<compile_context>
chip_gen: v7x
topology: tpu7x:2x2x1
jax: 0.10.0
libtpu: 0.0.40
codegen_flags: <defaults>
</compile_context>

<pallas_src>
import functools
import math

import jax
import jax.numpy as jnp
import numpy as np
from jax.experimental import pallas as pl
from jax.experimental.pallas import tpu as pltpu


def _self_attn_kernel(T, D, H, Bb,
                      x_ref, eo_ref, wqkv_ref, bqkv_ref, wo_ref, bo_ref,
                      o_ref):
    f32 = jnp.float32
    bf16 = jnp.bfloat16
    dh = D // H

    x = x_ref[...].astype(f32)                      # (Bb, T, D)
    eo = eo_ref[...].astype(f32)                    # (Bb, 2D) precomputed AdaLN proj
    scale = eo[:, None, :D]                         # (Bb, 1, D)
    shift = eo[:, None, D:]

    # ---- AdaLN: LayerNorm (no affine, eps=1e-6) then scale/shift ----------
    mu = jnp.mean(x, axis=-1, keepdims=True)
    var = jnp.mean(jnp.square(x - mu), axis=-1, keepdims=True)
    xn = (x - mu) * jax.lax.rsqrt(var + 1e-6)
    xn = xn * (1.0 + scale) + shift                 # (Bb, T, D)

    # ---- fused QKV projection on flattened rows (bf16 operands, f32 acc) --
    # 1/sqrt(dh) is pre-folded into the q columns of wqkv/bqkv in the wrapper.
    xn_flat = xn.reshape(Bb * T, D)
    qkv = jnp.dot(xn_flat.astype(bf16), wqkv_ref[...],
                  preferred_element_type=f32) + bqkv_ref[...]   # (Bb*T, 3D)

    # ---- slice + cast exactly once, head-batch into two einsums -----------
    # TODO(synk): key_padding_mask path not implemented (only None supported);
    #             attention-weight dropout omitted (eval-mode semantics).
    q = qkv[:, :D].astype(bf16)                     # (Bb*T, D)
    k = qkv[:, D:2 * D].astype(bf16)
    v = qkv[:, 2 * D:].astype(bf16)

    def to_heads(t):                                # (Bb*T, D) -> (Bb*H, T, dh)
        return t.reshape(Bb, T, H, dh).transpose(0, 2, 1, 3).reshape(Bb * H, T, dh)

    qh = to_heads(q)
    kh = to_heads(k)
    vh = to_heads(v)

    s = jnp.einsum('btd,bnd->btn', qh, kh,
                   preferred_element_type=f32)      # (Bb*H, T, T)

    # add_zero_attn=True appends one all-zero key/value per batch, which
    # contributes a logit of exactly 0 and a value of 0: fold it into the
    # softmax denominator analytically.
    m = jnp.maximum(jnp.max(s, axis=-1, keepdims=True), 0.0)
    p = jnp.exp(s - m)
    denom = jnp.sum(p, axis=-1, keepdims=True) + jnp.exp(-m)
    p = p * pl.reciprocal(denom)                    # exact; (Bb*H, T, 1) is tiny

    attn = jnp.einsum('btn,bnd->btd', p.astype(bf16), vh,
                      preferred_element_type=f32)   # (Bb*H, T, dh)
    attn = attn.reshape(Bb, H, T, dh).transpose(0, 2, 1, 3).reshape(Bb * T, D)

    # ---- output projection -------------------------------------------------
    y = jnp.dot(attn.astype(bf16), wo_ref[...],
                preferred_element_type=f32) + bo_ref[...]       # (Bb*T, D)

    o_ref[...] = y.reshape(Bb, T, D).astype(o_ref.dtype)


def _num_tensorcores_per_device():
    """v7x has 2 TensorCores per chip; v5e/v6e have 1."""
    try:
        kind = jax.devices()[0].device_kind.lower()
    except Exception:
        return 1
    return 2 if "v7" in kind else 1


def _pick_block_b(B, n_cores):
    """Largest divisor of B such that the grid has >= n_cores steps."""
    best = 1
    for cand in range(1, B + 1):
        if B % cand == 0 and (B // cand) >= max(n_cores, 1):
            best = cand
    return best


def vanilla_self_attention(x, emb, params, num_head, block_b=None):
    """x: (B,T,D), emb: (B,E) -> (B,T,D).  params from init_params()."""
    wada, bada, wqkv, bqkv, wo, bo = params
    B, T, D = x.shape
    H = num_head
    assert D % H == 0
    dh = D // H
    scaling = 1.0 / math.sqrt(dh)

    # AdaLN embedding projection for all batches as one well-shaped GEMM
    # (inside the kernel these would be B separate 1-row matmuls).
    silu = emb * jax.nn.sigmoid(emb)
    eo = (silu @ wada + bada).astype(jnp.float32)        # (B, 2D)

    # Fold the 1/sqrt(dh) query scaling into the q-columns of the fused
    # in-proj weight/bias (one-time constant preprocessing).
    wqkv_s = wqkv.at[:, :D].multiply(scaling)
    bqkv_s = bqkv.at[:D].multiply(scaling)

    # bf16 weights at the matmul boundary (f32 accumulation in-kernel).
    wqkv_bf = wqkv_s.astype(jnp.bfloat16)                # (D, 3D)
    wo_bf = wo.astype(jnp.bfloat16)                      # (D, D)
    bqkv2 = bqkv_s.reshape(1, 3 * D).astype(jnp.float32)
    bo2 = bo.reshape(1, D).astype(jnp.float32)

    # Generation-aware batch grouping: grid=(1,) on single-TC chips,
    # grid=(2,) on v7x so both TensorCores get a batch group.
    Bb = _pick_block_b(B, _num_tensorcores_per_device()) if block_b is None else block_b
    assert B % Bb == 0
    grid = (B // Bb,)

    kernel = functools.partial(_self_attn_kernel, T, D, H, Bb)

    out = pl.pallas_call(
        kernel,
        grid=grid,
        in_specs=[
            pl.BlockSpec((Bb, T, D), lambda g: (g, 0, 0)),    # x
            pl.BlockSpec((Bb, 2 * D), lambda g: (g, 0)),      # hoisted AdaLN emb projection
            pl.BlockSpec((D, 3 * D), lambda g: (0, 0)),       # fused in_proj_weight^T (q cols pre-scaled)
            pl.BlockSpec((1, 3 * D), lambda g: (0, 0)),       # fused in_proj_bias
            pl.BlockSpec((D, D), lambda g: (0, 0)),           # out_proj.weight^T
            pl.BlockSpec((1, D), lambda g: (0, 0)),           # out_proj.bias
        ],
        out_specs=pl.BlockSpec((Bb, T, D), lambda g: (g, 0, 0)),
        out_shape=jax.ShapeDtypeStruct((B, T, D), x.dtype),
        compiler_params=pltpu.CompilerParams(
            dimension_semantics=("parallel",)),
    )(x, eo, wqkv_bf, bqkv2, wo_bf, bo2)
    return out


def init_params(key, D, E):
    """Deterministic parameter init (shapes from the module's __init__)."""
    ks = jax.random.split(key, 6)
    s = 0.1
    wada = jax.random.normal(ks[0], (E, 2 * D), jnp.float32) * s   # AdaLN Linear weight^T
    bada = jax.random.normal(ks[1], (2 * D,), jnp.float32) * s
    wqkv = jax.random.normal(ks[2], (D, 3 * D), jnp.float32) * s   # in_proj_weight^T (q|k|v)
    bqkv = jax.random.normal(ks[3], (3 * D,), jnp.float32) * s
    wo = jax.random.normal(ks[4], (D, D), jnp.float32) * s         # out_proj.weight^T
    bo = jax.random.normal(ks[5], (D,), jnp.float32) * s
    return [wada, bada, wqkv, bqkv, wo, bo]


def reference(x, emb, params, H):
    """Pure-JAX (f32) reference mirroring the PyTorch forward (eval mode)."""
    wada, bada, wqkv, bqkv, wo, bo = params
    B, T, D = x.shape
    dh = D // H
    silu = emb * jax.nn.sigmoid(emb)
    eo = silu @ wada + bada
    scale, shift = eo[:, :D], eo[:, D:]
    mu = x.mean(-1, keepdims=True)
    var = ((x - mu) ** 2).mean(-1, keepdims=True)
    xn = (x - mu) / jnp.sqrt(var + 1e-6)
    xn = xn * (1.0 + scale[:, None]) + shift[:, None]
    qkv = xn @ wqkv + bqkv
    q, k, v = qkv[..., :D], qkv[..., D:2 * D], qkv[..., 2 * D:]
    # add_zero_attn=True
    k = jnp.concatenate([k, jnp.zeros((B, 1, D), k.dtype)], axis=1)
    v = jnp.concatenate([v, jnp.zeros((B, 1, D), v.dtype)], axis=1)
    qh = q.reshape(B, T, H, dh).transpose(0, 2, 1, 3) / math.sqrt(dh)
    kh = k.reshape(B, T + 1, H, dh).transpose(0, 2, 1, 3)
    vh = v.reshape(B, T + 1, H, dh).transpose(0, 2, 1, 3)
    s = jnp.einsum('bhtd,bhnd->bhtn', qh, kh)
    p = jax.nn.softmax(s, axis=-1)
    o = jnp.einsum('bhtn,bhnd->bhtd', p, vh)
    o = o.transpose(0, 2, 1, 3).reshape(B, T, D)
    return o @ wo + bo


if __name__ == "__main__":
    B, T, D = 16, 8, 32      # batch, seq, latent_dim
    E = 32                   # embed_dim
    H = 4                    # num_head

    key = jax.random.PRNGKey(0)
    kx, kemb, kp = jax.random.split(key, 3)
    x = jax.random.normal(kx, (B, T, D), jnp.float32)
    emb = jax.random.normal(kemb, (B, E), jnp.float32)
    params = init_params(kp, D, E)

    out = vanilla_self_attention(x, emb, params, H)
    out = jax.block_until_ready(out)

    ref = jax.block_until_ready(reference(x, emb, params, H))
    # bf16 matmul operands -> relaxed tolerance.
    np.testing.assert_allclose(np.asarray(out), np.asarray(ref),
                               rtol=3e-2, atol=3e-2)
    print("KERNEL_OK")
</pallas_src>

<mosaic_0001>
module attributes {stable_mosaic.version = 11 : i64} {
  func.func @_self_attn_kernel(%arg0: i32, %arg1: memref<16x8x32xf32, #tpu.memory_space<vmem>>, %arg2: memref<16x64xf32, #tpu.memory_space<vmem>>, %arg3: memref<32x96xbf16, #tpu.memory_space<vmem>>, %arg4: memref<1x96xf32, #tpu.memory_space<vmem>>, %arg5: memref<32x32xbf16, #tpu.memory_space<vmem>>, %arg6: memref<1x32xf32, #tpu.memory_space<vmem>>, %arg7: memref<16x8x32xf32, #tpu.memory_space<vmem>>) attributes {dimension_semantics = [#tpu.dimension_semantics<parallel>], iteration_bounds = array<i64: 1>, scalar_prefetch = 0 : i64, scratch_operands = 0 : i64, tpu.core_type = #tpu.core_type<tc>, window_params = [{transform_indices = @transform_0, window_bounds = array<i64: 16, 8, 32>}, {transform_indices = @transform_1, window_bounds = array<i64: 16, 64>}, {pipeline_mode = #tpu.pipeline_mode<synchronous>, transform_indices = @transform_2, window_bounds = array<i64: 32, 96>}, {pipeline_mode = #tpu.pipeline_mode<synchronous>, transform_indices = @transform_3, window_bounds = array<i64: 1, 96>}, {pipeline_mode = #tpu.pipeline_mode<synchronous>, transform_indices = @transform_4, window_bounds = array<i64: 32, 32>}, {pipeline_mode = #tpu.pipeline_mode<synchronous>, transform_indices = @transform_5, window_bounds = array<i64: 1, 32>}, {transform_indices = @transform_6, window_bounds = array<i64: 16, 8, 32>}]} {
    %c0 = arith.constant 0 : index
    %c0_0 = arith.constant 0 : index
    %c0_1 = arith.constant 0 : index
    %0 = vector.load %arg1[%c0, %c0_0, %c0_1] : memref<16x8x32xf32, #tpu.memory_space<vmem>>, vector<16x8x32xf32>
    %c0_2 = arith.constant 0 : index
    %c0_3 = arith.constant 0 : index
    %1 = vector.load %arg2[%c0_2, %c0_3] : memref<16x64xf32, #tpu.memory_space<vmem>>, vector<16x64xf32>
    %2 = vector.extract_strided_slice %1 {offsets = [0, 0], sizes = [16, 32], strides = [1, 1]} : vector<16x64xf32> to vector<16x32xf32>
    %3 = vector.shape_cast %2 : vector<16x32xf32> to vector<16x1x32xf32>
    %4 = vector.extract_strided_slice %1 {offsets = [0, 32], sizes = [16, 32], strides = [1, 1]} : vector<16x64xf32> to vector<16x32xf32>
    %5 = vector.shape_cast %4 : vector<16x32xf32> to vector<16x1x32xf32>
    %cst = arith.constant dense<0.000000e+00> : vector<16x8xf32>
    %6 = vector.multi_reduction <add>, %0, %cst [2] : vector<16x8x32xf32> to vector<16x8xf32>
    %7 = vector.shape_cast %6 : vector<16x8xf32> to vector<16x8x1xf32>
    %cst_4 = arith.constant 3.200000e+01 : f32
    %8 = vector.broadcast %cst_4 : f32 to vector<16x8x1xf32>
    %9 = arith.divf %7, %8 : vector<16x8x1xf32>
    %10 = vector.broadcast %9 : vector<16x8x1xf32> to vector<16x8x32xf32>
    %11 = arith.subf %0, %10 : vector<16x8x32xf32>
    %12 = arith.mulf %11, %11 : vector<16x8x32xf32>
    %cst_5 = arith.constant dense<0.000000e+00> : vector<16x8xf32>
    %13 = vector.multi_reduction <add>, %12, %cst_5 [2] : vector<16x8x32xf32> to vector<16x8xf32>
    %14 = vector.shape_cast %13 : vector<16x8xf32> to vector<16x8x1xf32>
    %cst_6 = arith.constant 3.200000e+01 : f32
    %15 = vector.broadcast %cst_6 : f32 to vector<16x8x1xf32>
    %16 = arith.divf %14, %15 : vector<16x8x1xf32>
    %17 = vector.broadcast %9 : vector<16x8x1xf32> to vector<16x8x32xf32>
    %18 = arith.subf %0, %17 : vector<16x8x32xf32>
    %cst_7 = arith.constant 9.99999997E-7 : f32
    %19 = vector.broadcast %cst_7 : f32 to vector<16x8x1xf32>
    %20 = arith.addf %16, %19 : vector<16x8x1xf32>
    %21 = math.rsqrt %20 : vector<16x8x1xf32>
    %22 = vector.broadcast %21 : vector<16x8x1xf32> to vector<16x8x32xf32>
    %23 = arith.mulf %18, %22 : vector<16x8x32xf32>
    %cst_8 = arith.constant 1.000000e+00 : f32
    %24 = vector.broadcast %cst_8 : f32 to vector<16x1x32xf32>
    %25 = arith.addf %24, %3 : vector<16x1x32xf32>
    %26 = vector.broadcast %25 : vector<16x1x32xf32> to vector<16x8x32xf32>
    %27 = arith.mulf %23, %26 : vector<16x8x32xf32>
    %28 = vector.broadcast %5 : vector<16x1x32xf32> to vector<16x8x32xf32>
    %29 = arith.addf %27, %28 : vector<16x8x32xf32>
    %30 = vector.shape_cast %29 : vector<16x8x32xf32> to vector<128x32xf32>
    %31 = arith.truncf %30 : vector<128x32xf32> to vector<128x32xbf16>
    %c0_9 = arith.constant 0 : index
    %c0_10 = arith.constant 0 : index
    %32 = vector.load %arg3[%c0_9, %c0_10] : memref<32x96xbf16, #tpu.memory_space<vmem>>, vector<32x96xbf16>
    %cst_11 = arith.constant dense<0.000000e+00> : vector<128x96xf32>
    %33 = tpu.matmul %31, %32, %cst_11 {dimension_numbers = #tpu.dot_dimension_numbers<[1], [0], [0], [1], [0, 0, 1, 1], [], []>} : vector<128x32xbf16>, vector<32x96xbf16>, vector<128x96xf32> -> vector<128x96xf32>
    %c0_12 = arith.constant 0 : index
    %c0_13 = arith.constant 0 : index
    %34 = vector.load %arg4[%c0_12, %c0_13] : memref<1x96xf32, #tpu.memory_space<vmem>>, vector<1x96xf32>
    %35 = vector.broadcast %34 : vector<1x96xf32> to vector<128x96xf32>
    %36 = arith.addf %33, %35 : vector<128x96xf32>
    %37 = vector.extract_strided_slice %36 {offsets = [0, 0], sizes = [128, 32], strides = [1, 1]} : vector<128x96xf32> to vector<128x32xf32>
    %38 = arith.truncf %37 : vector<128x32xf32> to vector<128x32xbf16>
    %39 = vector.extract_strided_slice %36 {offsets = [0, 32], sizes = [128, 32], strides = [1, 1]} : vector<128x96xf32> to vector<128x32xf32>
    %40 = arith.truncf %39 : vector<128x32xf32> to vector<128x32xbf16>
    %41 = vector.extract_strided_slice %36 {offsets = [0, 64], sizes = [128, 32], strides = [1, 1]} : vector<128x96xf32> to vector<128x32xf32>
    %42 = arith.truncf %41 : vector<128x32xf32> to vector<128x32xbf16>
    %43 = vector.shape_cast %38 : vector<128x32xbf16> to vector<16x8x4x8xbf16>
    %44 = tpu.transpose %43, [0, 2, 1, 3] : vector<16x8x4x8xbf16> -> vector<16x4x8x8xbf16>
    %45 = vector.shape_cast %44 : vector<16x4x8x8xbf16> to vector<64x8x8xbf16>
    %46 = vector.shape_cast %40 : vector<128x32xbf16> to vector<16x8x4x8xbf16>
    %47 = tpu.transpose %46, [0, 2, 1, 3] : vector<16x8x4x8xbf16> -> vector<16x4x8x8xbf16>
    %48 = vector.shape_cast %47 : vector<16x4x8x8xbf16> to vector<64x8x8xbf16>
    %49 = vector.shape_cast %42 : vector<128x32xbf16> to vector<16x8x4x8xbf16>
    %50 = tpu.transpose %49, [0, 2, 1, 3] : vector<16x8x4x8xbf16> -> vector<16x4x8x8xbf16>
    %51 = vector.shape_cast %50 : vector<16x4x8x8xbf16> to vector<64x8x8xbf16>
    "tpu.trace_start"() <{level = 10 : i32, message = "btd,bnd->btn"}> : () -> ()
    %cst_14 = arith.constant dense<0.000000e+00> : vector<64x8x8xf32>
    %52 = tpu.matmul %45, %48, %cst_14 {dimension_numbers = #tpu.dot_dimension_numbers<[2], [2], [1], [1], [0, 0, 0, 1, 1, 1], [0], [0]>} : vector<64x8x8xbf16>, vector<64x8x8xbf16>, vector<64x8x8xf32> -> vector<64x8x8xf32>
    "tpu.trace_stop"() : () -> ()
    %cst_15 = arith.constant dense<0xFF800000> : vector<64x8xf32>
    %53 = vector.multi_reduction <maximumf>, %52, %cst_15 [2] : vector<64x8x8xf32> to vector<64x8xf32>
    %54 = vector.shape_cast %53 : vector<64x8xf32> to vector<64x8x1xf32>
    %cst_16 = arith.constant 0.000000e+00 : f32
    %55 = vector.broadcast %cst_16 : f32 to vector<64x8x1xf32>
    %56 = arith.maximumf %54, %55 : vector<64x8x1xf32>
    %57 = vector.broadcast %56 : vector<64x8x1xf32> to vector<64x8x8xf32>
    %58 = arith.subf %52, %57 : vector<64x8x8xf32>
    %59 = math.exp %58 : vector<64x8x8xf32>
    %cst_17 = arith.constant dense<0.000000e+00> : vector<64x8xf32>
    %60 = vector.multi_reduction <add>, %59, %cst_17 [2] : vector<64x8x8xf32> to vector<64x8xf32>
    %61 = vector.shape_cast %60 : vector<64x8xf32> to vector<64x8x1xf32>
    %cst_18 = arith.constant 0.000000e+00 : f32
    %62 = vector.broadcast %cst_18 : f32 to vector<64x8x1xf32>
    %63 = arith.subf %62, %56 : vector<64x8x1xf32>
    %64 = math.exp %63 : vector<64x8x1xf32>
    %65 = arith.addf %61, %64 : vector<64x8x1xf32>
    %66 = tpu.reciprocal %65 : vector<64x8x1xf32> -> vector<64x8x1xf32>
    %67 = vector.broadcast %66 : vector<64x8x1xf32> to vector<64x8x8xf32>
    %68 = arith.mulf %59, %67 : vector<64x8x8xf32>
    %69 = arith.truncf %68 : vector<64x8x8xf32> to vector<64x8x8xbf16>
    "tpu.trace_start"() <{level = 10 : i32, message = "btn,bnd->btd"}> : () -> ()
    %cst_19 = arith.constant dense<0.000000e+00> : vector<64x8x8xf32>
    %70 = tpu.matmul %69, %51, %cst_19 {dimension_numbers = #tpu.dot_dimension_numbers<[2], [1], [1], [2], [0, 0, 0, 1, 1, 2], [0], [0]>} : vector<64x8x8xbf16>, vector<64x8x8xbf16>, vector<64x8x8xf32> -> vector<64x8x8xf32>
    "tpu.trace_stop"() : () -> ()
    %71 = vector.shape_cast %70 : vector<64x8x8xf32> to vector<16x4x8x8xf32>
    %72 = tpu.transpose %71, [0, 2, 1, 3] : vector<16x4x8x8xf32> -> vector<16x8x4x8xf32>
    %73 = vector.shape_cast %72 : vector<16x8x4x8xf32> to vector<128x32xf32>
    %74 = arith.truncf %73 : vector<128x32xf32> to vector<128x32xbf16>
    %c0_20 = arith.constant 0 : index
    %c0_21 = arith.constant 0 : index
    %75 = vector.load %arg5[%c0_20, %c0_21] : memref<32x32xbf16, #tpu.memory_space<vmem>>, vector<32x32xbf16>
    %cst_22 = arith.constant dense<0.000000e+00> : vector<128x32xf32>
    %76 = tpu.matmul %74, %75, %cst_22 {dimension_numbers = #tpu.dot_dimension_numbers<[1], [0], [0], [1], [0, 0, 1, 1], [], []>} : vector<128x32xbf16>, vector<32x32xbf16>, vector<128x32xf32> -> vector<128x32xf32>
    %c0_23 = arith.constant 0 : index
    %c0_24 = arith.constant 0 : index
    %77 = vector.load %arg6[%c0_23, %c0_24] : memref<1x32xf32, #tpu.memory_space<vmem>>, vector<1x32xf32>
    %78 = vector.broadcast %77 : vector<1x32xf32> to vector<128x32xf32>
    %79 = arith.addf %76, %78 : vector<128x32xf32>
    %80 = vector.shape_cast %79 : vector<128x32xf32> to vector<16x8x32xf32>
    %c0_25 = arith.constant 0 : index
    %c0_26 = arith.constant 0 : index
    %c0_27 = arith.constant 0 : index
    %81 = vector.load %arg7[%c0_25, %c0_26, %c0_27] : memref<16x8x32xf32, #tpu.memory_space<vmem>>, vector<16x8x32xf32>
    tpu.vector_store %arg7[%c0_25, %c0_26, %c0_27], %80 {strides = array<i32>} : memref<16x8x32xf32, #tpu.memory_space<vmem>>, vector<16x8x32xf32>,
    return
  }
  func.func @transform_0(%arg0: i32) -> (i32, i32, i32) {
    %c0_i32 = arith.constant 0 : i32
    %c0_i32_0 = arith.constant 0 : i32
    %c0_i32_1 = arith.constant 0 : i32
    return %arg0, %c0_i32, %c0_i32_0 : i32, i32, i32
  }
  func.func @transform_1(%arg0: i32) -> (i32, i32) {
    %c0_i32 = arith.constant 0 : i32
    %c0_i32_0 = arith.constant 0 : i32
    return %arg0, %c0_i32 : i32, i32
  }
  func.func @transform_2(%arg0: i32) -> (i32, i32) {
    %c0_i32 = arith.constant 0 : i32
    %c0_i32_0 = arith.constant 0 : i32
    %c0_i32_1 = arith.constant 0 : i32
    return %c0_i32, %c0_i32_0 : i32, i32
  }
  func.func @transform_3(%arg0: i32) -> (i32, i32) {
    %c0_i32 = arith.constant 0 : i32
    %c0_i32_0 = arith.constant 0 : i32
    %c0_i32_1 = arith.constant 0 : i32
    return %c0_i32, %c0_i32_0 : i32, i32
  }
  func.func @transform_4(%arg0: i32) -> (i32, i32) {
    %c0_i32 = arith.constant 0 : i32
    %c0_i32_0 = arith.constant 0 : i32
    %c0_i32_1 = arith.constant 0 : i32
    return %c0_i32, %c0_i32_0 : i32, i32
  }
  func.func @transform_5(%arg0: i32) -> (i32, i32) {
    %c0_i32 = arith.constant 0 : i32
    %c0_i32_0 = arith.constant 0 : i32
    %c0_i32_1 = arith.constant 0 : i32
    return %c0_i32, %c0_i32_0 : i32, i32
  }
  func.func @transform_6(%arg0: i32) -> (i32, i32, i32) {
    %c0_i32 = arith.constant 0 : i32
    %c0_i32_0 = arith.constant 0 : i32
    %c0_i32_1 = arith.constant 0 : i32
    return %arg0, %c0_i32, %c0_i32_0 : i32, i32, i32
  }
}

</mosaic_0001>

<bundles_post_ra>
// kernel: tpu_custom_call.1
= control target key start
LH: loop header
LB: loop body
LE: loop exit
PB: predicated region body
PF: predicated region fallthrough
CT: control target
= control target key end

     0   :  { %11 = vsyncpa [#allocation3], 0  ;;  %s25014_s0 = inlined_call_operand.hbm [shape: f32[16,8,32], index: 0, kind: input, shape index: {}]   ;;  %s25015_s1 = inlined_call_operand.hbm [shape: f32[16,64], index: 1, kind: input, shape index: {}]   ;;  %s25016_s2 = inlined_call_operand.hbm [shape: bf16[32,96], index: 2, kind: input, shape index: {}]   ;;  %s25017_s3 = inlined_call_operand.vmem [shape: f32[1,96], index: 3, kind: input, shape index: {}]   ;;  %s25018_s4 = inlined_call_operand.hbm [shape: bf16[32,32], index: 4, kind: input, shape index: {}]   ;;  %s25019_s5 = inlined_call_operand.vmem [shape: f32[1,32], index: 5, kind: input, shape index: {}]   ;;  %s25020_s6 = inlined_call_operand.hbm [shape: f32[16,8,32], index: 6, kind: output, shape index: {}]  }
   0x1   :  { %12 = vsyncpa [#allocation6], 0 }
   0x2   :  { %13 = vsyncpa [#allocation9], 0 }
   0x3   :  { %14 = vsyncpa [#allocation4], 0  ;;  %s19188_s21 = smov [#allocation5]   ;;  %s19189_s23 = smov [#allocation2]  }
   0x4   :  { %s32_s22 = sshll.u32 %s19188_s21, 4  ;;  %s20_s24 = sshll.u32 %s19189_s23, 4  ;;  %s33_s22 = int_to_ptr.vmem [resolvable:$true] %s32_s22  ;;  %s19244_s24 = int_to_ptr.vmem [resolvable:$true] %s20_s24 }
   0x5   :  { %s19070_s27 = scalar_lea.hbm %s25015_s1, 256 }
   0x6   :  { %p19071_p0 = scmp.ne.s32.totalorder %s25015_s1, %s19070_s27  ;;  %p19074_p1 = scmp.lt.u32.totalorder %s19070_s27, %s25015_s1 }
   0x8   :  { %p19076_p2 = pnand %p19074_p1, %p19071_p0 }
   0xa   :  { %19079 = shalt.err (!%p19076_p2)
}
   0xb   :  { %s19080_s8 = scalar_lea.vmem %s33_s22, 256  ;;  %p19085_p4 = scmp.lt.s32.totalorder %s33_s22, %s33_s22 }
   0xc   :  { %p19081_p3 = scmp.ne.s32.totalorder %s33_s22, %s19080_s8  ;;  %p19086_p5 = scmp.lt.s32.totalorder %s19080_s8, %s19080_s8 }
   0xe   :  { %p19087_p6 = por %p19086_p5, %p19085_p4 }
  0x10   :  { %p19088_p7 = pnand %p19087_p6, %p19081_p3 }
  0x12   :  { %19091 = shalt.err (!%p19088_p7)
}
  0x13   :  { %s19190_s9 = smov 128   ;;  %s19191_s10 = smov 8  }
  0x14   :  { %38 = dma.hbm_to_vmem [thread:$0]  %s25015_s1, 256, %s33_s22, [#allocation6], %s19190_s9, %s19190_s9, %s19191_s10  }
  0x15   :  { %s19092_s15 = scalar_lea.hbm %s25014_s0, 2048 }
  0x16   :  { %p19093_p8 = scmp.ne.s32.totalorder %s25014_s0, %s19092_s15  ;;  %p19096_p9 = scmp.lt.u32.totalorder %s19092_s15, %s25014_s0 }
  0x18   :  { %p19098_p10 = pnand %p19096_p9, %p19093_p8 }
  0x1a   :  { %19101 = shalt.err (!%p19098_p10)
}
  0x1b   :  { %s19102_s20 = scalar_lea.vmem %s19244_s24, 2048  ;;  %p19107_p12 = scmp.lt.s32.totalorder %s19244_s24, %s19244_s24 }
  0x1c   :  { %p19103_p11 = scmp.ne.s32.totalorder %s19244_s24, %s19102_s20  ;;  %p19108_p13 = scmp.lt.s32.totalorder %s19102_s20, %s19102_s20 }
  0x1e   :  { %p19109_p0 = por %p19108_p13, %p19107_p12 }
  0x20   :  { %p19110_p1 = pnand %p19109_p0, %p19103_p11 }
  0x22   :  { %19113 = shalt.err (!%p19110_p1)
}
  0x23   :  { %26 = dma.hbm_to_vmem [thread:$0]  %s25014_s0, 2048, %s19244_s24, [#allocation3], %s19190_s9, %s19190_s9, %s19191_s10  }
  0x24   :  { %s19192_s22 = smov [#allocation7]   ;;  %s19114_s27 = scalar_lea.hbm %s25016_s2, 256 }
  0x25   :  { %s44_s23 = sshll.u32 %s19192_s22, 4  ;;  %p19115_p2 = scmp.ne.s32.totalorder %s25016_s2, %s19114_s27  ;;  %s45_s23 = int_to_ptr.vmem [resolvable:$true] %s44_s23 }
  0x26   :  { %p19118_p3 = scmp.lt.u32.totalorder %s19114_s27, %s25016_s2 }
  0x28   :  { %p19120_p4 = pnand %p19118_p3, %p19115_p2 }
  0x2a   :  { %19123 = shalt.err (!%p19120_p4)
}
  0x2b   :  { %s19124_s8 = scalar_lea.vmem %s45_s23, 256  ;;  %p19129_p6 = scmp.lt.s32.totalorder %s45_s23, %s45_s23 }
  0x2c   :  { %p19125_p5 = scmp.ne.s32.totalorder %s45_s23, %s19124_s8  ;;  %p19130_p7 = scmp.lt.s32.totalorder %s19124_s8, %s19124_s8 }
  0x2e   :  { %p19131_p8 = por %p19130_p7, %p19129_p6 }
  0x30   :  { %p19132_p9 = pnand %p19131_p8, %p19125_p5 }
  0x32   :  { %19135 = shalt.err (!%p19132_p9)
}
  0x33   :  { %s19193_s0 = smov 64   ;;  %s19194_s24 = smov 4  }
  0x34   :  { %50 = dma.hbm_to_vmem [thread:$0]  %s25016_s2, 256, %s45_s23, [#allocation6], %s19193_s0, %s19193_s0, %s19194_s24  }
  0x35   :  { %s19195_s13 = smov [#allocation8]   ;;  %s19136_s17 = scalar_lea.hbm %s25018_s4, 256 }
  0x36   :  { %s58_s14 = sshll.u32 %s19195_s13, 4  ;;  %p19137_p10 = scmp.ne.s32.totalorder %s25018_s4, %s19136_s17  ;;  %s59_s14 = int_to_ptr.vmem [resolvable:$true] %s58_s14 }
  0x37   :  { %p19140_p11 = scmp.lt.u32.totalorder %s19136_s17, %s25018_s4 }
  0x39   :  { %p19142_p12 = pnand %p19140_p11, %p19137_p10 }
  0x3b   :  { %19145 = shalt.err (!%p19142_p12)
}
  0x3c   :  { %s19146_s21 = scalar_lea.vmem %s59_s14, 256  ;;  %p19151_p0 = scmp.lt.s32.totalorder %s59_s14, %s59_s14 }
  0x3d   :  { %p19147_p13 = scmp.ne.s32.totalorder %s59_s14, %s19146_s21  ;;  %p19152_p1 = scmp.lt.s32.totalorder %s19146_s21, %s19146_s21 }
  0x3f   :  { %p19153_p2 = por %p19152_p1, %p19151_p0 }
  0x41   :  { %p19154_p3 = pnand %p19153_p2, %p19147_p13 }
  0x43   :  { %19157 = shalt.err (!%p19154_p3)
}
  0x44   :  { %64 = dma.hbm_to_vmem [thread:$0]  %s25018_s4, 256, %s59_s14, [#allocation9], %s19193_s0, %s19193_s0, %s19194_s24  }
  0x45   :  { %19180 = dma.done.wait [#allocation3], 2048  }
  0x46   :  { %19181 = vsyncadd [#allocation3], 4294965248 }
  0x47   :  { %19182 = dma.done.wait [#allocation6], 512  }
  0x48   :  { %19183 = vsyncadd [#allocation6], 4294966784 }
  0x49   :  { %19184 = dma.done.wait [#allocation9], 256  }
  0x4a   :  { %19185 = vsyncadd [#allocation9], 4294967040  ;;  %vm214_vm0 = vcmask 261120   ;;  %v80_v0 = vld [vmem:[#allocation2] sm:$0xff]  ;;  %v82_v1 = vld [vmem:[#allocation2 + $0x10] sm:$0xff]  ;;  %v104_v18 = vlaneseq  ;;  %s19197_s4 = smov 96  }
  0x4b   :  { %v81_v2 = vld [vmem:[#allocation2 + $0x8] sm:$0xff]  ;;  %v215_v3 = vsel %vm214_vm0, %v80_v0, 0.0  ;;  %v221_v4 = vsel %vm214_vm0, %v82_v1, 0.0  ;;  %v83_v5 = vld [vmem:[#allocation2 + $0x18] sm:$0xff]  ;;  %v19312_v7 = vld [vmem:[#allocation2 + $0x20] sm:$0xff]  ;;  %s19198_s26 = smov 112  }
  0x4c   :  { %216 = vadd.xlane.f32.xlu0 %v215_v3  ;;  %222 = vadd.xlane.f32.xlu1 %v221_v4  ;;  %v218_v6 = vsel %vm214_vm0, %v81_v2, 0.0  ;;  %v224_v8 = vsel %vm214_vm0, %v83_v5, 0.0  ;;  %v19315_v9 = vld [vmem:[#allocation2 + $0x28] sm:$0xff]  ;;  %v227_v10 = vsel %vm214_vm0, %v19312_v7, 0.0  ;;  %v19321_v12 = vld [vmem:[#allocation2 + $0x30] sm:$0xff]  ;;  %v19325_v14 = vld [vmem:[#allocation2 + $0x38] sm:$0xff] }
  0x4d   :  { %v230_v11 = vsel %vm214_vm0, %v19315_v9, 0.0  ;;  %v233_v13 = vsel %vm214_vm0, %v19321_v12, 0.0  ;;  %v236_v15 = vsel %vm214_vm0, %v19325_v14, 0.0  ;;  %v19196_v21 = vmov 1966171168   ;;  %v96_v36 = vld [vmem:[#allocation5] sm:$0xff] }
  0x4e   :  { %v102_v22 = vunpack.c.l.s4 %v19196_v21  ;;  %v19333_v26 = vshrl.u32 %v104_v18, 7  ;;  %v19374_v51 = vld [vmem:[#allocation2 + $0x40] sm:$0xff]  ;;  %v19380_v55 = vld [vmem:[#allocation2 + $0x50] sm:$0xff]  ;;  %v19388_v61 = vld [vmem:[#allocation2 + $0x58] sm:$0xff]  ;;  %s19200_s27 = smov 104   ;;  %vm19202_vm1 = vmmov 0  }
  0x4f   :  { %v239_v52 = vsel %vm214_vm0, %v19374_v51, 0.0  ;;  %v245_v57 = vsel %vm214_vm0, %v19380_v55, 0.0  ;;  %v248_v62 = vsel %vm214_vm0, %v19388_v61, 0.0  ;;  %v19425_v21 = vld [vmem:[#allocation2 + $0x60] sm:$0xff]  ;;  %vm7558_vm2 = vcmask 64512   ;;  %s19206_s28 = smov 16  }
  0x50   :  { %219 = vadd.xlane.f32.xlu0 %v218_v6  ;;  %225 = vadd.xlane.f32.xlu1 %v224_v8  ;;  %v103_v30 = vunpack.c.0.s8 %v102_v22  ;;  %v19354_v41 = vsub.s32 0, %v19333_v26  ;;  %v100_v6 = vcombine.high %v96_v36, %v96_v36  ;;  %v251_v22 = vsel %vm214_vm0, %v19425_v21, 0.0  ;;  %s19207_s29 = smov 24  }
  0x51   :  { %vm11594_vm3 = vcmask 1043456   ;;  %vm16920_vm4 = vcmask 130048   ;;  %vm16937_vm5 = vcmask 195584  }
  0x52   :  { %v19346_v35 = vsub.s32 %v103_v30, %v19333_v26 }
  0x54   :  { %228 = vadd.xlane.f32.xlu0 %v227_v10  ;;  %231 = vadd.xlane.f32.xlu1 %v230_v11  ;;  %v107_v38 = vrot.slane %v96_v36, %v19346_v35  ;;  %v18649_v10 = vld [vmem:[#allocation7] sm:$0xff]  }
  0x55   :  { %17695 = vmatprep.subr.bf16.mxu0 %v18649_v10  ;;  %18503 = vmatprep.subr.bf16.mxu1 %v18649_v10 }
  0x56   :  { %v115_v39 = vcombine.high %v107_v38, %v107_v38  ;;  %v19357_v42 = vrot.slane %v107_v38, %v19346_v35  ;;  %17696 = vmatpush3.bf16.msra.mxu0 %v18649_v10  ;;  %18505 = vmatpush3.bf16.msra.mxu1 %v18649_v10 }
  0x58   :  { %234 = vadd.xlane.f32.xlu0 %v233_v13  ;;  %237 = vadd.xlane.f32.xlu1 %v236_v15  ;;  %v19351_v40 = vrot.slane %v115_v39, %v19346_v35  ;;  %v19363_v44 = vcombine.high %v19357_v42, %v19357_v42  ;;  %v555_v46 = vrot.slane %v19357_v42, %v19354_v41 }
  0x5a   :  { %v559_v43 = vrot.slane %v19351_v40, %v19354_v41  ;;  %v563_v45 = vrot.slane %v19363_v44, %v19354_v41  ;;  %v19403_v4 = vcombine.high %v19351_v40, %v19351_v40 }
  0xd9   :  { %v217_v16 = vpop.xlane.xlu0 %216  ;;  %v223_v17 = vpop.xlane.xlu1 %222 }
  0xda   :  { %v264_v19 = vmul.f32 0.03125, %v217_v16  ;;  %v266_v20 = vmul.f32 0.03125, %v223_v17  ;;  %v19418_v17 = vld [vmem:[#allocation2 + $0x48] sm:$0xff] }
  0xdb   :  { %v242_v18 = vsel %vm214_vm0, %v19418_v17, 0.0 }
  0xdc   :  { %v19329_v23 = vsub.f32 %v80_v0, %v264_v19  ;;  %v19331_v24 = vsub.f32 %v82_v1, %v266_v20 }
  0xdd   :  { %v220_v25 = vpop.xlane.xlu0 %219  ;;  %v226_v47 = vpop.xlane.xlu1 %225 }
  0xde   :  { %v265_v27 = vmul.f32 0.03125, %v220_v25  ;;  %v296_v28 = vmul.f32 %v19329_v23, %v19329_v23  ;;  %v298_v29 = vmul.f32 %v19331_v24, %v19331_v24  ;;  %v267_v48 = vmul.f32 0.03125, %v226_v47 }
  0xdf   :  { %v424_v47 = vadd.f32 1.0, %v19357_v42 }
  0xe0   :  { %v19339_v31 = vsub.f32 %v81_v2, %v265_v27  ;;  %v312_v32 = vsel %vm214_vm0, %v296_v28, 0.0  ;;  %v318_v33 = vsel %vm214_vm0, %v298_v29, 0.0  ;;  %v19372_v50 = vsub.f32 %v83_v5, %v267_v48  ;;  %v19436_v29 = vld [vmem:[#allocation2 + $0x78] sm:$0xff] }
  0xe1   :  { %313 = vadd.xlane.f32.xlu0 %v312_v32  ;;  %v229_v49 = vpop.xlane.xlu0 %228  ;;  %v567_v5 = vrot.slane %v19403_v4, %v19354_v41  ;;  %v232_v13 = vpop.xlane.xlu1 %231  ;;  %v260_v30 = vsel %vm214_vm0, %v19436_v29, 0.0  ;;  %v425_v48 = vadd.f32 1.0, %v19351_v40 }
  0xe2   :  { %v297_v34 = vmul.f32 %v19339_v31, %v19339_v31  ;;  %v299_v53 = vmul.f32 %v19372_v50, %v19372_v50  ;;  %v268_v54 = vmul.f32 0.03125, %v229_v49  ;;  %v269_v15 = vmul.f32 0.03125, %v232_v13 }
  0xe4   :  { %v315_v37 = vsel %vm214_vm0, %v297_v34, 0.0  ;;  %v321_v58 = vsel %vm214_vm0, %v299_v53, 0.0  ;;  %v19386_v59 = vsub.f32 %v19312_v7, %v268_v54  ;;  %v114_v7 = vrot.slane %v100_v6, %v19346_v35 }
  0xe5   :  { %319 = vadd.xlane.f32.xlu0 %v318_v33  ;;  %316 = vadd.xlane.f32.xlu1 %v315_v37  ;;  %v235_v56 = vpop.xlane.xlu0 %234  ;;  %v19416_v16 = vsub.f32 %v19315_v9, %v269_v15  ;;  %v19429_v9 = vld [vmem:[#allocation2 + $0x70] sm:$0xff]  ;;  %v238_v36 = vpop.xlane.xlu1 %237  ;;  %v459_v53 = vrot.slane %v424_v47, %v19354_v41 }
  0xe6   :  { %v270_v60 = vmul.f32 0.03125, %v235_v56  ;;  %v300_v0 = vmul.f32 %v19386_v59, %v19386_v59  ;;  %v19410_v8 = vrot.slane %v114_v7, %v19346_v35  ;;  %v116_v25 = vcombine.high %v114_v7, %v114_v7 }
  0xe7   :  { %v301_v19 = vmul.f32 %v19416_v16, %v19416_v16  ;;  %v257_v27 = vsel %vm214_vm0, %v19429_v9, 0.0  ;;  %v463_v56 = vrot.slane %v425_v48, %v19354_v41 }
  0xe8   :  { %v19393_v63 = vsub.f32 %v19321_v12, %v270_v60  ;;  %v324_v1 = vsel %vm214_vm0, %v300_v0, 0.0  ;;  %v571_v11 = vrot.slane %v19410_v8, %v19354_v41  ;;  %v18650_v12 = vld [vmem:[#allocation7 + $0x8] sm:$0xff]   ;;  %v19434_v28 = vrot.slane %v116_v25, %v19346_v35 }
  0xe9   :  { %17697 = vmatprep.subr.bf16.mxu0 %v18650_v12  ;;  %18504 = vmatprep.subr.bf16.mxu1 %v18650_v12  ;;  %v327_v20 = vsel %vm214_vm0, %v301_v19, 0.0  ;;  %v19444_v33 = vcombine.high %v19410_v8, %v19410_v8 }
  0xea   :  { %v302_v2 = vmul.f32 %v19393_v63, %v19393_v63  ;;  %17698 = vmatpush3.bf16.msra.mxu0 %v18650_v12  ;;  %18506 = vmatpush3.bf16.msra.mxu1 %v18650_v12  ;;  %v575_v32 = vrot.slane %v19434_v28, %v19354_v41 }
  0xeb   :  { %v579_v34 = vrot.slane %v19444_v33, %v19354_v41 }
  0xec   :  { %v330_v3 = vsel %vm214_vm0, %v302_v2, 0.0 }
  0xf6   :  { %618 = vrot.lane.b32.xlu1 %v559_v43, %s19197_s4 }
  0xfa   :  { %620 = vrot.lane.b32.xlu1 %v563_v45, %s19197_s4 }
  0xfb   :  { %616 = vrot.lane.b32.xlu0 %v555_v46, %s19197_s4 }
 0x11a   :  { %240 = vadd.xlane.f32.xlu0 %v239_v52 }
 0x11e   :  { %246 = vadd.xlane.f32.xlu0 %v245_v57  ;;  %322 = vadd.xlane.f32.xlu1 %v321_v58 }
 0x122   :  { %249 = vadd.xlane.f32.xlu0 %v248_v62  ;;  %v271_v62 = vmul.f32 0.03125, %v238_v36  ;;  %v426_v36 = vadd.f32 1.0, %v19363_v44 }
 0x124   :  { %v19457_v40 = vsub.f32 %v19325_v14, %v271_v62 }
 0x126   :  { %325 = vadd.xlane.f32.xlu0 %v324_v1 }
 0x12a   :  { %331 = vadd.xlane.f32.xlu0 %v330_v3 }
 0x12f   :  { %622 = vrot.lane.b32.xlu1 %v567_v5, %s19197_s4 }
 0x140   :  { %624 = vrot.lane.b32.xlu0 %v571_v11, %s19197_s4 }
 0x153   :  { %243 = vadd.xlane.f32.xlu1 %v242_v18 }
 0x157   :  { %328 = vadd.xlane.f32.xlu1 %v327_v20 }
 0x15f   :  { %252 = vadd.xlane.f32.xlu0 %v251_v22 }
 0x163   :  { %258 = vadd.xlane.f32.xlu0 %v257_v27 }
 0x167   :  { %261 = vadd.xlane.f32.xlu0 %v260_v30 }
 0x168   :  { %626 = vrot.lane.b32.xlu1 %v575_v32, %s19197_s4 }
 0x16c   :  { %628 = vrot.lane.b32.xlu1 %v579_v34, %s19197_s4 }
 0x16e   :  { %v314_v37 = vpop.xlane.xlu0 %313 }
 0x16f   :  { %v360_v38 = vmul.f32 0.03125, %v314_v37 }
 0x171   :  { %v376_v39 = vadd.f32 1e-06, %v360_v38  ;;  %v427_v38 = vadd.f32 1.0, %v19403_v4  ;;  %v19492_v4 = vld [vmem:[#allocation2 + $0x68] sm:$0xff] }
 0x172   :  { %v317_v43 = vpop.xlane.xlu1 %316  ;;  %v320_v54 = vpop.xlane.xlu0 %319 }
 0x173   :  { %18654 = vrsqrt.f32 %v376_v39  ;;  %v361_v45 = vmul.f32 0.03125, %v317_v43  ;;  %v362_v14 = vmul.f32 0.03125, %v320_v54  ;;  %v467_v39 = vrot.slane %v426_v36, %v19354_v41 }
 0x174   :  { %v471_v43 = vrot.slane %v427_v38, %v19354_v41 }
 0x175   :  { %v377_v46 = vadd.f32 1e-06, %v361_v45  ;;  %v378_v10 = vadd.f32 1e-06, %v362_v14 }
 0x176   :  { %v617_v0 = vpop.permute.xlu0 %616  ;;  %v619_v2 = vpop.permute.xlu1 %618 }
 0x177   :  { %18656 = vrsqrt.f32 %v377_v46  ;;  %v19487_v46 = vld [vmem:[#allocation5 + $0x8] sm:$0xff] }
 0x178   :  { %18658 = vrsqrt.f32 %v378_v10  ;;  %v156_v44 = vrot.slane %v19487_v46, %v19346_v35 }
 0x17a   :  { %v621_v11 = vpop.permute.xlu1 %620 }
 0x17d   :  { %v18655_v49 = vpop.eup %18654 }
 0x17e   :  { %v408_v52 = vmul.f32 %v18655_v49, %v19329_v23  ;;  %v303_v23 = vmul.f32 %v19457_v40, %v19457_v40 }
 0x180   :  { %v536_v60 = vmul.f32 %v459_v53, %v408_v52  ;;  %v333_v6 = vsel %vm214_vm0, %v303_v23, 0.0 }
 0x181   :  { %v18657_v57 = vpop.eup %18656 }
 0x182   :  { %v409_v58 = vmul.f32 %v18657_v57, %v19339_v31  ;;  %v664_v42 = vadd.f32 %v617_v0, %v536_v60  ;;  %v19465_v31 = vcombine.high %v19434_v28, %v19434_v28  ;;  %v18659_v37 = vpop.eup %18658  ;;  %v254_v57 = vsel %vm214_vm0, %v19492_v4, 0.0 }
 0x184   :  { %v537_v1 = vmul.f32 %v463_v56, %v409_v58  ;;  %v583_v7 = vrot.slane %v19465_v31, %v19354_v41 }
 0x186   :  { %v665_v3 = vadd.f32 %v619_v2, %v537_v1 }
 0x188   :  { %v680_v5 = vpack.c.bf16 %v665_v3, %v664_v42 }
 0x18a   :  { %17699 = vmatprep.mubr.msk.bf16.mxu0 %vm214_vm0, %v680_v5 }
 0x190   :  { %334 = vadd.xlane.f32.xlu1 %v333_v6 }
 0x1a1   :  { %630 = vrot.lane.b32.xlu1 %v583_v7, %s19197_s4 }
 0x1a7   :  { %v241_v12 = vpop.xlane.xlu0 %240 }
 0x1a8   :  { %v272_v13 = vmul.f32 0.03125, %v241_v12 }
 0x1aa   :  { %v19471_v15 = vsub.f32 %v19374_v51, %v272_v13 }
 0x1ab   :  { %v323_v18 = vpop.xlane.xlu1 %322  ;;  %v247_v19 = vpop.xlane.xlu0 %246 }
 0x1ac   :  { %v363_v20 = vmul.f32 0.03125, %v323_v18  ;;  %v274_v22 = vmul.f32 0.03125, %v247_v19  ;;  %v304_v25 = vmul.f32 %v19471_v15, %v19471_v15 }
 0x1ae   :  { %v379_v27 = vadd.f32 1e-06, %v363_v20  ;;  %v19476_v30 = vsub.f32 %v19380_v55, %v274_v22  ;;  %v336_v32 = vsel %vm214_vm0, %v304_v25, 0.0  ;;  %v410_v55 = vmul.f32 %v18659_v37, %v19331_v24 }
 0x1af   :  { %337 = vadd.xlane.f32.xlu0 %v336_v32  ;;  %v623_v52 = vpop.permute.xlu1 %622  ;;  %v19495_v24 = vrot.slane %v156_v44, %v19346_v35  ;;  %v250_v58 = vpop.xlane.xlu0 %249  ;;  %v429_v22 = vadd.f32 1.0, %v19434_v28  ;;  %v164_v37 = vcombine.high %v156_v44, %v156_v44 }
 0x1b0   :  { %18660 = vrsqrt.f32 %v379_v27  ;;  %v306_v34 = vmul.f32 %v19476_v30, %v19476_v30  ;;  %v538_v47 = vmul.f32 %v467_v39, %v410_v55  ;;  %v275_v0 = vmul.f32 0.03125, %v250_v58 }
 0x1b2   :  { %v342_v51 = vsel %vm214_vm0, %v306_v34, 0.0  ;;  %v666_v53 = vadd.f32 %v621_v11, %v538_v47  ;;  %v19504_v3 = vsub.f32 %v19388_v61, %v275_v0  ;;  %v19533_v47 = vrot.slane %v164_v37, %v19346_v35 }
 0x1b3   :  { %343 = vadd.xlane.f32.xlu0 %v342_v51  ;;  %v326_v60 = vpop.xlane.xlu0 %325 }
 0x1b4   :  { %v364_v62 = vmul.f32 0.03125, %v326_v60  ;;  %v307_v10 = vmul.f32 %v19504_v3, %v19504_v3  ;;  %v19554_v58 = vcombine.high %v19533_v47, %v19533_v47 }
 0x1b6   :  { %v380_v1 = vadd.f32 1e-06, %v364_v62  ;;  %v345_v61 = vsel %vm214_vm0, %v307_v10, 0.0  ;;  %v599_v60 = vrot.slane %v19554_v58, %v19354_v41  ;;  %v149_v62 = vcombine.high %v19487_v46, %v19487_v46 }
 0x1b7   :  { %v332_v23 = vpop.xlane.xlu0 %331  ;;  %v430_v46 = vadd.f32 1.0, %v19444_v33 }
 0x1b8   :  { %18662 = vrsqrt.f32 %v380_v1  ;;  %v163_v0 = vrot.slane %v149_v62, %v19346_v35 }
 0x1ba   :  { %v18661_v45 = vpop.eup %18660  ;;  %v19564_v1 = vrot.slane %v163_v0, %v19346_v35 }
 0x1bb   :  { %v411_v48 = vmul.f32 %v18661_v45, %v19372_v50  ;;  %v587_v50 = vrot.slane %v19495_v24, %v19354_v41  ;;  %v625_v13 = vpop.permute.xlu0 %624 }
 0x1bd   :  { %v539_v49 = vmul.f32 %v471_v43, %v411_v48 }
 0x1bf   :  { %v667_v54 = vadd.f32 %v623_v52, %v539_v49 }
 0x1c1   :  { %v681_v56 = vpack.c.bf16 %v667_v54, %v666_v53  ;;  %v591_v54 = vrot.slane %v19533_v47, %v19354_v41 }
 0x1c2   :  { %v18663_v19 = vpop.eup %18662 }
 0x1c3   :  { %17700 = vmatmul.mubr.msk.bf16.vlgmr.msra.gmra.mrb[0].mxu0 %vm214_vm0, %v681_v56  ;;  %v412_v27 = vmul.f32 %v18663_v19, %v19386_v59  ;;  %v19545_v56 = vcombine.high %v19495_v24, %v19495_v24 }
 0x1c5   :  { %255 = vadd.xlane.f32.xlu1 %v254_v57 }
 0x1c9   :  { %632 = vrot.lane.b32.xlu0 %v587_v50, %s19197_s4 }
 0x1e0   :  { %v244_v2 = vpop.xlane.xlu1 %243 }
 0x1e1   :  { %v273_v42 = vmul.f32 0.03125, %v244_v2  ;;  %v603_v2 = vrot.slane %v19564_v1, %v19354_v41 }
 0x1e3   :  { %v19507_v5 = vsub.f32 %v19418_v17, %v273_v42  ;;  %v428_v17 = vadd.f32 1.0, %v19410_v8  ;;  %v479_v8 = vrot.slane %v429_v22, %v19354_v41  ;;  %v366_v42 = vmul.f32 0.03125, %v332_v23 }
 0x1e4   :  { %v329_v6 = vpop.xlane.xlu1 %328 }
 0x1e5   :  { %v365_v7 = vmul.f32 0.03125, %v329_v6  ;;  %v305_v14 = vmul.f32 %v19507_v5, %v19507_v5  ;;  %v475_v32 = vrot.slane %v428_v17, %v19354_v41 }
 0x1e7   :  { %v381_v11 = vadd.f32 1e-06, %v365_v7  ;;  %v339_v12 = vsel %vm214_vm0, %v305_v14, 0.0  ;;  %v382_v7 = vadd.f32 1e-06, %v366_v42 }
 0x1e8   :  { %340 = vadd.xlane.f32.xlu1 %v339_v12  ;;  %v627_v49 = vpop.permute.xlu1 %626  ;;  %v431_v12 = vadd.f32 1.0, %v19465_v31 }
 0x1e9   :  { %18664 = vrsqrt.f32 %v381_v11 }
 0x1ea   :  { %18666 = vrsqrt.f32 %v382_v7  ;;  %v434_v7 = vadd.f32 1.0, %v19545_v56 }
 0x1ec   :  { %346 = vadd.xlane.f32.xlu1 %v345_v61  ;;  %v253_v18 = vpop.xlane.xlu0 %252  ;;  %v629_v6 = vpop.permute.xlu1 %628  ;;  %v483_v61 = vrot.slane %v430_v46, %v19354_v41 }
 0x1ed   :  { %v276_v20 = vmul.f32 0.03125, %v253_v18  ;;  %v487_v18 = vrot.slane %v431_v12, %v19354_v41 }
 0x1ef   :  { %v19518_v25 = vsub.f32 %v19425_v21, %v276_v20  ;;  %v540_v21 = vmul.f32 %v475_v32, %v412_v27 }
 0x1f0   :  { %v259_v34 = vpop.xlane.xlu0 %258 }
 0x1f1   :  { %v278_v51 = vmul.f32 0.03125, %v259_v34  ;;  %v308_v36 = vmul.f32 %v19518_v25, %v19518_v25  ;;  %v668_v52 = vadd.f32 %v625_v13, %v540_v21 }
 0x1f3   :  { %v18665_v38 = vpop.eup %18664  ;;  %v19526_v39 = vsub.f32 %v19429_v9, %v278_v51  ;;  %v348_v28 = vsel %vm214_vm0, %v308_v36, 0.0 }
 0x1f4   :  { %v413_v55 = vmul.f32 %v18665_v38, %v19416_v16  ;;  %349 = vadd.xlane.f32.xlu0 %v348_v28  ;;  %v262_v59 = vpop.xlane.xlu0 %261  ;;  %v18667_v13 = vpop.eup %18666  ;;  %v19589_v28 = vcombine.high %v19564_v1, %v19564_v1 }
 0x1f5   :  { %v279_v43 = vmul.f32 0.03125, %v262_v59  ;;  %v310_v45 = vmul.f32 %v19526_v39, %v19526_v39  ;;  %v414_v17 = vmul.f32 %v18667_v13, %v19393_v63 }
 0x1f6   :  { %v541_v48 = vmul.f32 %v479_v8, %v413_v55 }
 0x1f7   :  { %v19536_v44 = vsub.f32 %v19436_v29, %v279_v43  ;;  %v354_v9 = vsel %vm214_vm0, %v310_v45, 0.0  ;;  %v595_v29 = vrot.slane %v19545_v56, %v19354_v41  ;;  %v542_v22 = vmul.f32 %v483_v61, %v414_v17 }
 0x1f8   :  { %v669_v53 = vadd.f32 %v627_v49, %v541_v48  ;;  %355 = vadd.xlane.f32.xlu0 %v354_v9 }
 0x1f9   :  { %v311_v16 = vmul.f32 %v19536_v44, %v19536_v44  ;;  %v670_v32 = vadd.f32 %v629_v6, %v542_v22 }
 0x1fa   :  { %v682_v57 = vpack.c.bf16 %v669_v53, %v668_v52 }
 0x1fb   :  { %v357_v50 = vsel %vm214_vm0, %v311_v16, 0.0 }
 0x1fc   :  { %17703 = vmatprep.mubr.msk.bf16.mxu0 %vm214_vm0, %v682_v57  ;;  %358 = vadd.xlane.f32.xlu0 %v357_v50  ;;  %v432_v50 = vadd.f32 1.0, %v19495_v24 }
 0x1fd   :  { %634 = vrot.lane.b32.xlu1 %v591_v54, %s19197_s4 }
 0x201   :  { %636 = vrot.lane.b32.xlu1 %v595_v29, %s19197_s4 }
 0x205   :  { %638 = vrot.lane.b32.xlu1 %v599_v60, %s19197_s4  ;;  %v433_v60 = vadd.f32 1.0, %v19533_v47  ;;  %v499_v47 = vrot.slane %v434_v7, %v19354_v41  ;;  %v436_v7 = vadd.f32 1.0, %v19564_v1 }
 0x207   :  { %v495_v6 = vrot.slane %v433_v60, %v19354_v41 }
 0x212   :  { %640 = vrot.lane.b32.xlu0 %v603_v2, %s19197_s4  ;;  %v491_v2 = vrot.slane %v432_v50, %v19354_v41  ;;  %v438_v50 = vadd.f32 1.0, %v19589_v28 }
 0x21d   :  { %v335_v14 = vpop.xlane.xlu1 %334 }
 0x21e   :  { %v367_v10 = vmul.f32 0.03125, %v335_v14  ;;  %v435_v14 = vadd.f32 1.0, %v19554_v58 }
 0x220   :  { %v383_v11 = vadd.f32 1e-06, %v367_v10  ;;  %v503_v61 = vrot.slane %v435_v14, %v19354_v41 }
 0x221   :  { %v631_v20 = vpop.permute.xlu1 %630 }
 0x222   :  { %18668 = vrsqrt.f32 %v383_v11 }
 0x22c   :  { %v18669_v19 = vpop.eup %18668 }
 0x22d   :  { %v415_v23 = vmul.f32 %v18669_v19, %v19457_v40  ;;  %v165_v40 = vcombine.high %v163_v0, %v163_v0 }
 0x22f   :  { %v543_v27 = vmul.f32 %v487_v18, %v415_v23  ;;  %v19583_v8 = vrot.slane %v165_v40, %v19346_v35 }
 0x231   :  { %v671_v34 = vadd.f32 %v631_v20, %v543_v27  ;;  %v607_v38 = vrot.slane %v19583_v8, %v19354_v41  ;;  %v19596_v55 = vcombine.high %v19583_v8, %v19583_v8 }
 0x233   :  { %v683_v51 = vpack.c.bf16 %v671_v34, %v670_v32  ;;  %v615_v43 = vrot.slane %v19596_v55, %v19354_v41 }
 0x235   :  { %17704 = vmatmul.mubr.msk.bf16.gmra.mrb[4].mxu0 %vm214_vm0, %v683_v51 }
 0x23c   :  { %v338_v21 = vpop.xlane.xlu0 %337 }
 0x23d   :  { %v368_v59 = vmul.f32 0.03125, %v338_v21 }
 0x23f   :  { %v384_v45 = vadd.f32 1e-06, %v368_v59 }
 0x240   :  { %v344_v35 = vpop.xlane.xlu0 %343 }
 0x241   :  { %v370_v48 = vmul.f32 0.03125, %v344_v35  ;;  %18670 = vrsqrt.f32 %v384_v45 }
 0x243   :  { %v386_v49 = vadd.f32 1e-06, %v370_v48 }
 0x244   :  { %v633_v46 = vpop.permute.xlu0 %632 }
 0x245   :  { %18672 = vrsqrt.f32 %v386_v49 }
 0x24b   :  { %v18671_v29 = vpop.eup %18670 }
 0x24c   :  { %v416_v0 = vmul.f32 %v18671_v29, %v19471_v15  ;;  %v439_v29 = vadd.f32 1.0, %v19596_v55 }
 0x24e   :  { %v544_v11 = vmul.f32 %v491_v2, %v416_v0  ;;  %v515_v0 = vrot.slane %v438_v50, %v19354_v41 }
 0x24f   :  { %v18673_v42 = vpop.eup %18672 }
 0x250   :  { %v418_v15 = vmul.f32 %v18673_v42, %v19476_v30  ;;  %v672_v18 = vadd.f32 %v633_v46, %v544_v11  ;;  %v19619_v30 = vld [vmem:[%s25017_s3] ss:$0 sm:$0xff]  ;;  %s19199_s3 = smov 120   ;;  %v519_v42 = vrot.slane %v439_v29, %v19354_v41  ;;  %v437_v11 = vadd.f32 1.0, %v19583_v8 }
 0x251   :  { %v507_v46 = vrot.slane %v436_v7, %v19354_v41 }
 0x252   :  { %v256_v33 = vpop.xlane.xlu1 %255  ;;  %v546_v58 = vmul.f32 %v499_v47, %v418_v15 }
 0x253   :  { %v277_v31 = vmul.f32 0.03125, %v256_v33 }
 0x255   :  { %v19577_v36 = vsub.f32 %v19492_v4, %v277_v31  ;;  %v611_v4 = vrot.slane %v19589_v28, %v19354_v41 }
 0x257   :  { %v309_v63 = vmul.f32 %v19577_v36, %v19577_v36 }
 0x259   :  { %v351_v37 = vsel %vm214_vm0, %v309_v63, 0.0 }
 0x25a   :  { %352 = vadd.xlane.f32.xlu1 %v351_v37 }
 0x26b   :  { %642 = vrot.lane.b32.xlu1 %v607_v38, %s19197_s4 }
 0x26f   :  { %644 = vrot.lane.b32.xlu1 %v611_v4, %s19197_s4 }
 0x273   :  { %646 = vrot.lane.b32.xlu1 %v615_v43, %s19197_s4 }
 0x275   :  { %v341_v9 = vpop.xlane.xlu1 %340 }
 0x276   :  { %v369_v52 = vmul.f32 0.03125, %v341_v9 }
 0x278   :  { %v385_v53 = vadd.f32 1e-06, %v369_v52 }
 0x279   :  { %v347_v16 = vpop.xlane.xlu1 %346 }
 0x27a   :  { %18674 = vrsqrt.f32 %v385_v53  ;;  %v371_v54 = vmul.f32 0.03125, %v347_v16 }
 0x27c   :  { %v387_v57 = vadd.f32 1e-06, %v371_v54 }
 0x27d   :  { %v635_v62 = vpop.permute.xlu1 %634 }
 0x27e   :  { %18676 = vrsqrt.f32 %v387_v57 }
 0x281   :  { %v637_v12 = vpop.permute.xlu1 %636  ;;  %v350_v4 = vpop.xlane.xlu0 %349 }
 0x282   :  { %v674_v27 = vadd.f32 %v637_v12, %v546_v58  ;;  %v372_v9 = vmul.f32 0.03125, %v350_v4 }
 0x284   :  { %v18675_v10 = vpop.eup %18674  ;;  %v388_v52 = vadd.f32 1e-06, %v372_v9 }
 0x285   :  { %v417_v24 = vmul.f32 %v18675_v10, %v19507_v5  ;;  %v639_v23 = vpop.permute.xlu1 %638  ;;  %v356_v59 = vpop.xlane.xlu0 %355 }
 0x286   :  { %v374_v43 = vmul.f32 0.03125, %v356_v59 }
 0x287   :  { %v545_v13 = vmul.f32 %v495_v6, %v417_v24 }
 0x288   :  { %v18677_v17 = vpop.eup %18676  ;;  %v390_v48 = vadd.f32 1e-06, %v374_v43 }
 0x289   :  { %v673_v19 = vadd.f32 %v635_v62, %v545_v13  ;;  %v419_v56 = vmul.f32 %v18677_v17, %v19504_v3  ;;  %v359_v35 = vpop.xlane.xlu0 %358 }
 0x28a   :  { %v375_v45 = vmul.f32 0.03125, %v359_v35  ;;  %18678 = vrsqrt.f32 %v390_v48 }
 0x28b   :  { %v547_v20 = vmul.f32 %v503_v61, %v419_v56  ;;  %v684_v22 = vpack.c.bf16 %v673_v19, %v672_v18 }
 0x28c   :  { %v391_v49 = vadd.f32 1e-06, %v375_v45 }
 0x28d   :  { %v675_v5 = vadd.f32 %v639_v23, %v547_v20  ;;  %17707 = vmatprep.mubr.msk.bf16.mxu1 %vm214_vm0, %v684_v22  ;;  %v641_v17 = vpop.permute.xlu0 %640 }
 0x28e   :  { %18680 = vrsqrt.f32 %v391_v49 }
 0x28f   :  { %v685_v32 = vpack.c.bf16 %v675_v5, %v674_v27  ;;  %18682 = vrsqrt.f32 %v388_v52 }
 0x291   :  { %17708 = vmatmul.mubr.msk.bf16.vlgmr.msra.gmra.mrb[0].mxu1 %vm214_vm0, %v685_v32 }
 0x294   :  { %v18679_v54 = vpop.eup %18678 }
 0x295   :  { %v422_v2 = vmul.f32 %v18679_v54, %v19526_v39  ;;  %v511_v39 = vrot.slane %v437_v11, %v19354_v41 }
 0x296   :  { %v17701_v34 = vpop.f32.mrb[0].mxu0 }
 0x297   :  { %v769_v51 = vpop.f32.mrb[1].mxu0  ;;  %v778_v3 = vadd.f32 %v17701_v34, %v19619_v30  ;;  %v550_v28 = vmul.f32 %v515_v0, %v422_v2  ;;  %v19204_v2 = vmov 1934713408  }
 0x298   :  { %v17702_v33 = vpop.f32.mrb[2].mxu0  ;;  %v770_v37 = vadd.f32 %v19619_v30, %v769_v51  ;;  %v18681_v60 = vpop.eup %18680 }
 0x299   :  { %v781_v31 = vadd.f32 %v17702_v33, %v19619_v30  ;;  %v772_v63 = vpop.f32.mrb[3].mxu0  ;;  %v423_v6 = vmul.f32 %v18681_v60, %v19536_v44  ;;  %v18683_v10 = vpop.eup %18682 }
 0x29a   :  { %v773_v40 = vadd.f32 %v19619_v30, %v772_v63  ;;  %v420_v55 = vmul.f32 %v18683_v10, %v19518_v25 }
 0x29b   :  { %v19625_v38 = vpack.c.bf16 %v781_v31, %v778_v3  ;;  %v551_v24 = vmul.f32 %v519_v42, %v423_v6  ;;  %v1063_v42 = vunpack.c.l.s4 %v19204_v2 }
 0x29c   :  { %v19627_v21 = vpack.c.bf16 %v773_v40, %v770_v37  ;;  %v548_v44 = vmul.f32 %v507_v46, %v420_v55  ;;  %v25021_v37 = vmov 0.0  }
 0x29d   :  { %17715 = vmatprep.subr.bf16.mxu1 %v25021_v37  ;;  %17739 = vmatprep.subr.bf16.mxu0 %v25021_v37 }
 0x29e   :  { %864 = vrot.lane.b32.xlu1 %v19627_v21, %s19198_s26  ;;  %848 = vrot.lane.b32.xlu0 %v19627_v21, %s19199_s3  ;;  %v676_v19 = vadd.f32 %v641_v17, %v548_v44  ;;  %v900_v46 = vshrl.u32 %v19627_v21, 16 }
 0x29f   :  { %17741 = vmatprep.mubr.msk.bf16.mxu0 %vm19202_vm1, %v25021_v37 }
 0x2a2   :  { %850 = vrot.lane.b32.xlu1 %v19625_v38, %s19199_s3  ;;  %880 = vrot.lane.b32.xlu0 %v19627_v21, %s19200_s27 }
 0x2a6   :  { %882 = vrot.lane.b32.xlu1 %v19625_v38, %s19200_s27  ;;  %866 = vrot.lane.b32.xlu0 %v19625_v38, %s19198_s26 }
 0x2aa   :  { %3078 = vrot.lane.b32.xlu0 %v19627_v21, %s19197_s4 }
 0x2e7   :  { %v353_v53 = vpop.xlane.xlu1 %352 }
 0x2e8   :  { %v373_v16 = vmul.f32 0.03125, %v353_v53 }
 0x2ea   :  { %v389_v57 = vadd.f32 1e-06, %v373_v16 }
 0x2eb   :  { %v643_v62 = vpop.permute.xlu1 %642 }
 0x2ec   :  { %18684 = vrsqrt.f32 %v389_v57  ;;  %v19203_v57 = vmov 1983009808  }
 0x2ed   :  { %v1032_v50 = vunpack.c.l.s4 %v19203_v57 }
 0x2ef   :  { %v645_v14 = vpop.permute.xlu1 %644  ;;  %v1033_v0 = vunpack.c.0.s8 %v1032_v50 }
 0x2f0   :  { %v678_v13 = vadd.f32 %v645_v14, %v550_v28  ;;  %v25023_v14 = vmov 0  }
 0x2f1   :  { %v19738_v10 = vpack.i.b16 %v25023_v14, %v25023_v14 }
 0x2f3   :  { %v647_v12 = vpop.permute.xlu1 %646  ;;  %25286 = vst [vmem:[#allocation20_spill] sm:$0xff] %v19738_v10 }
 0x2f4   :  { %v679_v47 = vadd.f32 %v647_v12, %v551_v24 }
 0x2f6   :  { %v18685_v15 = vpop.eup %18684  ;;  %v687_v61 = vpack.c.bf16 %v679_v47, %v678_v13  ;;  %v19753_v13 = vsub.s32 %v1033_v0, %v19333_v26  ;;  %v1064_v47 = vunpack.c.0.s8 %v1063_v42 }
 0x2f7   :  { %v421_v1 = vmul.f32 %v18685_v15, %v19577_v36 }
 0x2f8   :  { %25288 = vst [vmem:[#allocation22_spill] sm:$0xff] %v19753_v13 }
 0x2f9   :  { %v549_v18 = vmul.f32 %v511_v39, %v421_v1 }
 0x2fb   :  { %v677_v8 = vadd.f32 %v643_v62, %v549_v18 }
 0x2fd   :  { %v686_v56 = vpack.c.bf16 %v677_v8, %v676_v19  ;;  %v19769_v8 = vsub.s32 %v1064_v47, %v19333_v26 }
 0x2ff   :  { %17711 = vmatprep.mubr.msk.bf16.mxu1 %vm214_vm0, %v686_v56  ;;  %25289 = vst [vmem:[#allocation23_spill] sm:$0xff] %v19769_v8 }
 0x300   :  { %17712 = vmatmul.mubr.msk.bf16.gmra.mrb[4].mxu1 %vm214_vm0, %v687_v61 }
 0x301   :  { %17717 = vmatprep.mubr.msk.bf16.mxu1 %vm19202_vm1, %v25021_v37 }
 0x308   :  { %v17705_v25 = vpop.f32.mrb[4].mxu0 }
 0x309   :  { %v785_v23 = vpop.f32.mrb[5].mxu0  ;;  %v794_v20 = vadd.f32 %v17705_v25, %v19619_v30 }
 0x30a   :  { %v17706_v58 = vpop.f32.mrb[6].mxu0  ;;  %v786_v27 = vadd.f32 %v19619_v30, %v785_v23 }
 0x30b   :  { %v797_v41 = vadd.f32 %v17706_v58, %v19619_v30  ;;  %v788_v22 = vpop.f32.mrb[7].mxu0 }
 0x30c   :  { %v789_v36 = vadd.f32 %v19619_v30, %v788_v22 }
 0x30d   :  { %v19661_v5 = vpack.c.bf16 %v797_v41, %v794_v20 }
 0x30e   :  { %v19663_v32 = vpack.c.bf16 %v789_v36, %v786_v27 }
 0x310   :  { %v19665_v34 = vpop.permute.xlu1 %864  ;;  %v19667_v51 = vpop.permute.xlu0 %848 }
 0x311   :  { %3110 = vrot.lane.b32.xlu0 %v19665_v34, %s19197_s4  ;;  %3094 = vrot.lane.b32.xlu1 %v19667_v51, %s19197_s4  ;;  %v898_v11 = vpack.i.b16 %v19667_v51, %v19627_v21  ;;  %v901_v28 = vshrl.u32 %v19667_v51, 16  ;;  %v908_v55 = vshrl.u32 %v19665_v34, 16 }
 0x313   :  { %v902_v61 = vpack.i.b16 %v901_v28, %v900_v46  ;;  %v1030_v44 = vcombine.high %v898_v11, %v19738_v10  ;;  %v1037_v56 = vrot.slane %v898_v11, %v19753_v13 }
 0x314   :  { %v19673_v33 = vpop.permute.xlu0 %880  ;;  %v19681_v3 = vpop.permute.xlu1 %850 }
 0x315   :  { %852 = vrot.lane.b32.xlu0 %v19663_v32, %s19199_s3  ;;  %3126 = vrot.lane.b32.xlu1 %v19673_v33, %s19197_s4  ;;  %25281 = vst [vmem:[#allocation15_spill] sm:$0xff] %v19681_v3  ;;  %v906_v62 = vpack.i.b16 %v19673_v33, %v19665_v34  ;;  %v909_v6 = vshrl.u32 %v19673_v33, 16  ;;  %v920_v1 = vpack.i.b16 %v19681_v3, %v19625_v38  ;;  %v923_v25 = vshrl.u32 %v19681_v3, 16 }
 0x316   :  { %v1044_v20 = vrot.slane %v1030_v44, %v19753_v13  ;;  %v1096_v41 = vcombine.high %v902_v61, %v19738_v10  ;;  %v1103_v26 = vrot.slane %v902_v61, %v19753_v13 }
 0x317   :  { %v1045_v12 = vcombine.high %v906_v62, %v19738_v10  ;;  %v910_v39 = vpack.i.b16 %v909_v6, %v908_v55  ;;  %v1052_v18 = vrot.slane %v906_v62, %v19753_v13  ;;  %v1162_v22 = vcombine.high %v920_v1, %v19738_v10 }
 0x318   :  { %v19689_v31 = vpop.permute.xlu1 %882  ;;  %v19691_v63 = vpop.permute.xlu0 %866  ;;  %v1110_v50 = vrot.slane %v1096_v41, %v19753_v13  ;;  %v19792_v62 = vrot.slane %v920_v1, %v19753_v13 }
 0x319   :  { %884 = vrot.lane.b32.xlu0 %v19663_v32, %s19200_s27  ;;  %868 = vrot.lane.b32.xlu1 %v19663_v32, %s19198_s26  ;;  %25282 = vst [vmem:[#allocation16_spill] sm:$0xff] %v19689_v31  ;;  %25283 = vst [vmem:[#allocation17_spill] sm:$0xff] %v19691_v63  ;;  %v1059_v19 = vrot.slane %v1045_v12, %v19753_v13  ;;  %v1118_v23 = vrot.slane %v910_v39, %v19753_v13  ;;  %v931_v28 = vshrl.u32 %v19689_v31, 16 }
 0x31a   :  { %v1111_v27 = vcombine.high %v910_v39, %v19738_v10  ;;  %v19795_v0 = vrot.slane %v1162_v22, %v19753_v13  ;;  %v930_v55 = vshrl.u32 %v19691_v63, 16  ;;  %v19812_v47 = vpack.i.b16 %v19689_v31, %v19691_v63 }
 0x31c   :  { %v19719_v53 = vpop.permute.xlu0 %3078  ;;  %v1125_v2 = vrot.slane %v1111_v27, %v19753_v13  ;;  %v19829_v27 = vpack.i.b16 %v931_v28, %v930_v55 }
 0x31d   :  { %3096 = vrot.lane.b32.xlu0 %v19681_v3, %s19197_s4  ;;  %3080 = vrot.lane.b32.xlu1 %v19625_v38, %s19197_s4 }
 0x31e   :  { %v1143_v41 = vcombine.high %v1110_v50, %v1125_v2 }
 0x321   :  { %3128 = vrot.lane.b32.xlu0 %v19689_v31, %s19197_s4  ;;  %3112 = vrot.lane.b32.xlu1 %v19691_v63, %s19197_s4 }
 0x325   :  { %870 = vrot.lane.b32.xlu0 %v19661_v5, %s19198_s26  ;;  %854 = vrot.lane.b32.xlu1 %v19661_v5, %s19199_s3 }
 0x329   :  { %3082 = vrot.lane.b32.xlu0 %v19663_v32, %s19197_s4  ;;  %886 = vrot.lane.b32.xlu1 %v19661_v5, %s19200_s27 }
 0x364   :  { %v17709_v40 = vpop.f32.mrb[0].mxu1 }
 0x365   :  { %v801_v4 = vpop.f32.mrb[1].mxu1  ;;  %v810_v35 = vadd.f32 %v17709_v40, %v19619_v30  ;;  %v922_v40 = vshrl.u32 %v19625_v38, 16 }
 0x366   :  { %v17710_v59 = vpop.f32.mrb[2].mxu1  ;;  %v802_v48 = vadd.f32 %v19619_v30, %v801_v4  ;;  %v1060_v4 = vcombine.low %v1037_v56, %v1052_v18 }
 0x367   :  { %v813_v43 = vadd.f32 %v17710_v59, %v19619_v30  ;;  %v804_v45 = vpop.f32.mrb[3].mxu1  ;;  %v1061_v59 = vcombine.high %v1037_v56, %v1052_v18  ;;  %v1142_v56 = vcombine.low %v1110_v50, %v1125_v2  ;;  %v19844_v50 = vrot.slane %v19812_v47, %v19753_v13 }
 0x368   :  { %v805_v49 = vadd.f32 %v19619_v30, %v804_v45  ;;  %v924_v45 = vpack.i.b16 %v923_v25, %v922_v40  ;;  %v1068_v6 = vrot.slane %v1060_v4, %v19769_v8 }
 0x369   :  { %v19715_v9 = vpack.c.bf16 %v813_v43, %v810_v35  ;;  %v1076_v35 = vcombine.low %v1044_v20, %v1059_v19  ;;  %v1077_v43 = vcombine.high %v1044_v20, %v1059_v19  ;;  %v1075_v11 = vrot.slane %v1061_v59, %v19769_v8 }
 0x36a   :  { %v19717_v52 = vpack.c.bf16 %v805_v49, %v802_v48  ;;  %v1126_v48 = vcombine.low %v1103_v26, %v1118_v23  ;;  %v1127_v49 = vcombine.high %v1103_v26, %v1118_v23  ;;  %v1228_v61 = vcombine.high %v924_v45, %v19738_v10 }
 0x36b   :  { %v1084_v46 = vrot.slane %v1076_v35, %v19769_v8  ;;  %v1091_v12 = vrot.slane %v1077_v43, %v19769_v8  ;;  %v19820_v19 = vrot.slane %v924_v45, %v19753_v13  ;;  %v2086_v22 = vcombine.low %v1068_v6, %v1075_v11 }
 0x36c   :  { %v1134_v44 = vrot.slane %v1126_v48, %v19769_v8  ;;  %v1141_v1 = vrot.slane %v1127_v49, %v19769_v8  ;;  %v3146_v26 = vshrl.u32 %v19719_v53, 16  ;;  %v17152_v40 = vcombine.high %v1068_v6, %v1075_v11 }
 0x36d   :  { %v2136_v4 = vcombine.low %v1084_v46, %v1091_v12  ;;  %v17154_v43 = vcombine.high %v1084_v46, %v1091_v12  ;;  %v1150_v48 = vrot.slane %v1142_v56, %v19769_v8  ;;  %v1177_v49 = vcombine.high %v19812_v47, %v19738_v10 }
 0x36e   :  { %v2111_v35 = vcombine.low %v1134_v44, %v1141_v1  ;;  %v17153_v6 = vcombine.high %v1134_v44, %v1141_v1  ;;  %v19857_v28 = vrot.slane %v17152_v40, %v19753_v13 }
 0x36f   :  { %v19860_v55 = vrot.slane %v2136_v4, %v19753_v13 }
 0x370   :  { %v19865_v47 = vrot.slane %v2111_v35, %v19753_v13 }
 0x383   :  { %v19721_v16 = vpop.permute.xlu1 %3094  ;;  %v19723_v54 = vpop.permute.xlu0 %3110 }
 0x384   :  { %v3147_v18 = vshrl.u32 %v19721_v16, 16  ;;  %v3154_v25 = vshrl.u32 %v19723_v54, 16  ;;  %v3144_v59 = vpack.i.b16 %v19721_v16, %v19719_v53  ;;  %v1157_v53 = vrot.slane %v1143_v41, %v19769_v8 }
 0x385   :  { %v19851_v16 = vrot.slane %v2086_v22, %v19753_v13 }
 0x386   :  { %v3148_v45 = vpack.i.b16 %v3147_v18, %v3146_v26  ;;  %v3277_v46 = vrot.slane %v3144_v59, %v19753_v13  ;;  %v2161_v41 = vcombine.low %v1150_v48, %v1157_v53  ;;  %v17155_v40 = vcombine.high %v1150_v48, %v1157_v53 }
 0x387   :  { %v19725_v29 = vpop.permute.xlu0 %852  ;;  %v19727_v60 = vpop.permute.xlu1 %3126 }
 0x388   :  { %25284 = vst [vmem:[#allocation18_spill] sm:$0xff] %v19725_v29  ;;  %3098 = vrot.lane.b32.xlu1 %v19725_v29, %s19197_s4  ;;  %v3155_v39 = vshrl.u32 %v19727_v60, 16  ;;  %v3152_v23 = vpack.i.b16 %v19727_v60, %v19723_v54  ;;  %v19837_v60 = vrot.slane %v1228_v61, %v19753_v13  ;;  %v3270_v61 = vcombine.high %v3144_v59, %v19738_v10 }
 0x389   :  { %v3336_v44 = vcombine.high %v3148_v45, %v19738_v10 }
 0x38a   :  { %v3156_v54 = vpack.i.b16 %v3155_v39, %v3154_v25  ;;  %v3292_v2 = vrot.slane %v3152_v23, %v19753_v13  ;;  %v3285_v11 = vcombine.high %v3152_v23, %v19738_v10  ;;  %v19868_v39 = vrot.slane %v17154_v43, %v19753_v13 }
 0x38b   :  { %v19734_v7 = vpop.permute.xlu0 %884  ;;  %v19743_v24 = vpop.permute.xlu1 %868  ;;  %v19875_v23 = vrot.slane %v17153_v6, %v19753_v13  ;;  %v2102_v43 = vcombine.low %v19851_v16, %v19857_v28  ;;  %v3284_v6 = vrot.slane %v3270_v61, %v19753_v13  ;;  %v19896_v16 = vrot.slane %v1177_v49, %v19753_v13 }
 0x38c   :  { %25285 = vst [vmem:[#allocation19_spill] sm:$0xff] %v19734_v7  ;;  %25287 = vst [vmem:[#allocation21_spill] sm:$0xff] %v19743_v24  ;;  %3130 = vrot.lane.b32.xlu1 %v19734_v7, %s19197_s4  ;;  %3114 = vrot.lane.b32.xlu0 %v19743_v24, %s19197_s4  ;;  %v3351_v12 = vcombine.high %v3156_v54, %v19738_v10  ;;  %v3300_v1 = vcombine.low %v3277_v46, %v3292_v2 }
 0x38d   :  { %v3301_v18 = vcombine.high %v3277_v46, %v3292_v2  ;;  %v3299_v22 = vrot.slane %v3285_v11, %v19753_v13  ;;  %v3358_v26 = vrot.slane %v3156_v54, %v19753_v13  ;;  %v3343_v54 = vrot.slane %v3148_v45, %v19753_v13 }
 0x38e   :  { %v3365_v4 = vrot.slane %v3351_v12, %v19753_v13  ;;  %v3350_v11 = vrot.slane %v3336_v44, %v19753_v13  ;;  %v3308_v48 = vrot.slane %v3300_v1, %v19769_v8  ;;  %v2127_v45 = vcombine.low %v19865_v47, %v19875_v23 }
 0x38f   :  { %v19755_v15 = vpop.permute.xlu0 %3096  ;;  %v19760_v17 = vpop.permute.xlu1 %3080  ;;  %v3315_v53 = vrot.slane %v3301_v18, %v19769_v8  ;;  %v3316_v12 = vcombine.low %v3284_v6, %v3299_v22  ;;  %v3317_v37 = vcombine.high %v3284_v6, %v3299_v22  ;;  %v3366_v14 = vcombine.low %v3343_v54, %v3358_v26 }
 0x390   :  { %872 = vrot.lane.b32.xlu1 %v19717_v52, %s19198_s26  ;;  %856 = vrot.lane.b32.xlu0 %v19717_v52, %s19199_s3  ;;  %v3162_v59 = vshrl.u32 %v19760_v17, 16  ;;  %v3163_v35 = vshrl.u32 %v19755_v15, 16  ;;  %v3367_v31 = vcombine.high %v3343_v54, %v3358_v26  ;;  %v3382_v28 = vcombine.low %v3350_v11, %v3365_v4 }
 0x391   :  { %v3383_v2 = vcombine.high %v3350_v11, %v3365_v4  ;;  %v19903_v44 = vrot.slane %v2161_v41, %v19753_v13  ;;  %v19906_v1 = vrot.slane %v17155_v40, %v19753_v13  ;;  %v1192_v18 = vcombine.low %v19792_v62, %v19844_v50 }
 0x392   :  { %v19898_v61 = vpack.i.b16 %v3163_v35, %v3162_v59  ;;  %v3324_v47 = vrot.slane %v3316_v12, %v19769_v8  ;;  %v3331_v23 = vrot.slane %v3317_v37, %v19769_v8  ;;  %v3374_v41 = vrot.slane %v3366_v14, %v19769_v8 }
 0x393   :  { %v19774_v58 = vpop.permute.xlu0 %3128  ;;  %v19780_v36 = vpop.permute.xlu1 %3112  ;;  %v3381_v26 = vrot.slane %v3367_v31, %v19769_v8  ;;  %v3390_v40 = vrot.slane %v3382_v28, %v19769_v8  ;;  %v3397_v4 = vrot.slane %v3383_v2, %v19769_v8  ;;  %v19924_v59 = vpack.i.b16 %v19755_v15, %v19760_v17 }
 0x394   :  { %3084 = vrot.lane.b32.xlu1 %v19661_v5, %s19197_s4  ;;  %888 = vrot.lane.b32.xlu0 %v19717_v52, %s19200_s27  ;;  %v3170_v56 = vshrl.u32 %v19780_v36, 16  ;;  %v3171_v25 = vshrl.u32 %v19774_v58, 16  ;;  %v19912_v49 = vpack.i.b16 %v19774_v58, %v19780_v36  ;;  %v3475_v58 = vrot.slane %v19898_v61, %v19753_v13 }
 0x395   :  { %v1193_v36 = vcombine.high %v19792_v62, %v19844_v50  ;;  %v19931_v37 = vrot.slane %v1192_v18, %v19769_v8  ;;  %v1243_v31 = vcombine.high %v19829_v27, %v19738_v10  ;;  %v1250_v14 = vrot.slane %v19829_v27, %v19753_v13 }
 0x396   :  { %v19893_v46 = vpack.i.b16 %v3171_v25, %v3170_v56  ;;  %v4326_v56 = vcombine.low %v3308_v48, %v3315_v53  ;;  %v17184_v25 = vcombine.high %v3308_v48, %v3315_v53  ;;  %v3424_v17 = vrot.slane %v19912_v49, %v19753_v13 }
 0x397   :  { %v19788_v57 = vpop.permute.xlu0 %870  ;;  %v19798_v42 = vpop.permute.xlu1 %854  ;;  %v4351_v6 = vcombine.low %v3374_v41, %v3381_v26  ;;  %v17185_v54 = vcombine.high %v3374_v41, %v3381_v26  ;;  %v4376_v62 = vcombine.low %v3324_v47, %v3331_v23  ;;  %v17186_v50 = vcombine.high %v3324_v47, %v3331_v23 }
 0x398   :  { %25290 = vst [vmem:[#allocation24_spill] sm:$0xff] %v19788_v57  ;;  %3116 = vrot.lane.b32.xlu1 %v19788_v57, %s19197_s4  ;;  %3100 = vrot.lane.b32.xlu0 %v19798_v42, %s19197_s4  ;;  %v3490_v22 = vrot.slane %v19893_v46, %v19753_v13  ;;  %v4333_v35 = vrot.slane %v4326_v56, %v19753_v13 }
 0x399   :  { %v4341_v15 = vrot.slane %v17184_v25, %v19753_v13  ;;  %v4401_v11 = vcombine.low %v3390_v40, %v3397_v4  ;;  %v17187_v48 = vcombine.high %v3390_v40, %v3397_v4  ;;  %v3409_v53 = vrot.slane %v19924_v59, %v19753_v13 }
 0x39a   :  { %v3498_v2 = vcombine.low %v3475_v58, %v3490_v22  ;;  %v3499_v12 = vcombine.high %v3475_v58, %v3490_v22  ;;  %v19944_v27 = vrot.slane %v1193_v36, %v19769_v8  ;;  %v1258_v18 = vcombine.low %v19820_v19, %v1250_v14 }
 0x39b   :  { %v19825_v20 = vpop.permute.xlu1 %886  ;;  %v19950_v56 = vrot.slane %v2102_v43, %v19769_v8  ;;  %v19953_v25 = vrot.slane %v1243_v31, %v19753_v13  ;;  %v3432_v47 = vcombine.low %v3409_v53, %v3424_v17  ;;  %v3433_v23 = vcombine.high %v3409_v53, %v3424_v17 }
 0x39c   :  { %25291 = vst [vmem:[#allocation25_spill] sm:$0xff] %v19825_v20  ;;  %858 = vrot.lane.b32.xlu1 %v19715_v9, %s19199_s3  ;;  %3132 = vrot.lane.b32.xlu0 %v19825_v20, %s19197_s4  ;;  %v3506_v41 = vrot.slane %v3498_v2, %v19769_v8  ;;  %v4342_v26 = vcombine.low %v4333_v35, %v4341_v15 }
 0x39d   :  { %v4358_v22 = vrot.slane %v4351_v6, %v19753_v13  ;;  %v4366_v40 = vrot.slane %v17185_v54, %v19753_v13  ;;  %v4383_v4 = vrot.slane %v4376_v62, %v19753_v13  ;;  %v3513_v58 = vrot.slane %v3499_v12, %v19769_v8 }
 0x39e   :  { %v4391_v36 = vrot.slane %v17186_v50, %v19753_v13  ;;  %v4408_v43 = vrot.slane %v4401_v11, %v19753_v13  ;;  %v4416_v31 = vrot.slane %v17187_v48, %v19753_v13  ;;  %v1259_v28 = vcombine.high %v19820_v19, %v1250_v14 }
 0x39f   :  { %v19965_v17 = vrot.slane %v1258_v18, %v19769_v8  ;;  %v4367_v35 = vcombine.low %v4358_v22, %v4366_v40  ;;  %v19968_v15 = vrot.slane %v2127_v45, %v19769_v8  ;;  %v3440_v2 = vrot.slane %v3432_v47, %v19769_v8 }
 0x3a0   :  { %890 = vrot.lane.b32.xlu1 %v19715_v9, %s19200_s27  ;;  %874 = vrot.lane.b32.xlu0 %v19715_v9, %s19198_s26  ;;  %v3447_v6 = vrot.slane %v3433_v23, %v19769_v8  ;;  %v4392_v54 = vcombine.low %v4383_v4, %v4391_v36  ;;  %v4417_v62 = vcombine.low %v4408_v43, %v4416_v31  ;;  %v25293_v31 = vmov 0.0  }
 0x3a1   :  { %v3483_v50 = vcombine.high %v19893_v46, %v19738_v10  ;;  %v19975_v11 = vrot.slane %v4342_v26, %v19769_v8  ;;  %v4374_v19 = vrot.slane %v4367_v35, %v19769_v8  ;;  %v4451_v14 = vcombine.low %v3506_v41, %v3513_v58 }
 0x3a2   :  { %v17189_v48 = vcombine.high %v3506_v41, %v3513_v58  ;;  %v19979_v45 = vrot.slane %v4392_v54, %v19769_v8  ;;  %v19982_v53 = vrot.slane %v4417_v62, %v19769_v8  ;;  %v1273_v12 = vrot.slane %v1259_v28, %v19769_v8 }
 0x3a3   :  { %v3468_v18 = vcombine.high %v19898_v61, %v19738_v10  ;;  %v5128_v46 = vpack.i.b16 %v4374_v19, %v19975_v11  ;;  %v2177_v47 = vcombine.low %v19903_v44, %v19906_v1  ;;  %v3417_v23 = vcombine.high %v19912_v49, %v19738_v10 }
 0x3a4   :  { %3086 = vrot.lane.b32.xlu0 %v19717_v52, %s19197_s4  ;;  %v4426_v41 = vcombine.low %v3440_v2, %v3447_v6  ;;  %v17188_v26 = vcombine.high %v3440_v2, %v3447_v6  ;;  %v5140_v22 = vpack.i.b16 %v19982_v53, %v19979_v45  ;;  %v3402_v40 = vcombine.high %v19924_v59, %v19738_v10 }
 0x3a5   :  { %v3497_v28 = vrot.slane %v3483_v50, %v19753_v13  ;;  %v7563_v61 = vsel %vm7558_vm2, %v5128_v46, 0  ;;  %v5130_v4 = vshrl.u32 %v4374_v19, 16  ;;  %v25292_v44 = vmov 0  }
 0x3a6   :  { %17716 = vmatpush3.bf16.xpose.msra.mxu1 %v7563_v61  ;;  %v7747_v58 = vsel %vm7558_vm2, %v5140_v22, 0  ;;  %v20001_v1 = vcombine.high %v19982_v53, %v25292_v44  ;;  %v4458_v49 = vrot.slane %v4451_v14, %v19753_v13  ;;  %v4466_v36 = vrot.slane %v17189_v48, %v19753_v13 }
 0x3a7   :  { %v2186_v43 = vcombine.low %v19931_v37, %v19944_v27  ;;  %v3482_v59 = vrot.slane %v3468_v18, %v19753_v13  ;;  %17740 = vmatpush3.bf16.xpose.msra.mxu0 %v7747_v58  ;;  %17721 = vmatprep.subr.bf16.mxu1 %v25293_v31  ;;  %v5129_v35 = vshrl.u32 %v19975_v11, 16  ;;  %v20011_v2 = vrot.slane %v2177_v47, %v19769_v8 }
 0x3a8   :  { %v3431_v6 = vrot.slane %v3417_v23, %v19753_v13  ;;  %v4433_v54 = vrot.slane %v4426_v41, %v19753_v13  ;;  %v4441_v62 = vrot.slane %v17188_v26, %v19753_v13  ;;  %17751 = vmatprep.subr.bf16.mxu0 %v25293_v31  ;;  %v20019_v50 = vcombine.high %v19979_v45, %v25292_v44 }
 0x3a9   :  { %v2211_v14 = vcombine.low %v19965_v17, %v1273_v12  ;;  %v3416_v48 = vrot.slane %v3402_v40, %v19753_v13  ;;  %v5131_v18 = vpack.i.b16 %v5130_v4, %v5129_v35  ;;  %v25294_v46 = vcombine.low %v19860_v55, %v19868_v39 }
 0x3aa   :  { %v3514_v23 = vcombine.low %v3482_v59, %v3497_v28  ;;  %v3515_v41 = vcombine.high %v3482_v59, %v3497_v28  ;;  %v5146_v26 = vpack.i.b16 %v20001_v1, %v20019_v50  ;;  %v4467_v22 = vcombine.low %v4458_v49, %v4466_v36 }
 0x3ab   :  { %v20027_v47 = vrot.slane %v25294_v46, %v19769_v8  ;;  %v1274_v61 = vcombine.low %v19837_v60, %v19953_v25  ;;  %v17156_v58 = vcombine.high %v19931_v37, %v19944_v27  ;;  %v17157_v40 = vcombine.high %v19965_v17, %v1273_v12 }
 0x3ac   :  { %v2888_v4 = vpack.i.b16 %v19968_v15, %v19950_v56  ;;  %v3448_v55 = vcombine.low %v3416_v48, %v3431_v6  ;;  %v3449_v39 = vcombine.high %v3416_v48, %v3431_v6  ;;  %v4442_v59 = vcombine.low %v4433_v54, %v4441_v62 }
 0x3ad   :  { %v2900_v28 = vpack.i.b16 %v20011_v2, %v20027_v47  ;;  %v1275_v49 = vcombine.high %v19837_v60, %v19953_v25  ;;  %v7609_v36 = vsel %vm7558_vm2, %v5131_v18, 0  ;;  %v4375_v37 = vcombine.high %v4374_v19, %v25292_v44 }
 0x3ae   :  { %17718 = vmatmul.mubr.msk.bf16.vlgmr.msra.gmra.mrb[8].mxu1 %vm7558_vm2, %v2888_v4  ;;  %v2218_v27 = vrot.slane %v2211_v14, %v19753_v13  ;;  %v3522_v17 = vrot.slane %v3514_v23, %v19769_v8  ;;  %v3529_v12 = vrot.slane %v3515_v41, %v19769_v8  ;;  %v7839_v35 = vsel %vm7558_vm2, %v5146_v26, 0 }
 0x3af   :  { %17722 = vmatpush3.bf16.xpose.msra.mxu1 %v7609_v36  ;;  %17742 = vmatmul.mubr.msk.bf16.vlgmr.msra.gmra.mrb[8].mxu0 %vm7558_vm2, %v2900_v28  ;;  %v20051_v6 = vrot.slane %v4467_v22, %v19769_v8  ;;  %v2890_v60 = vshrl.u32 %v19968_v15, 16  ;;  %v4350_v25 = vcombine.high %v19975_v11, %v25292_v44  ;;  %v20060_v19 = vcombine.high %v20011_v2, %v25292_v44 }
 0x3b0   :  { %17752 = vmatpush3.bf16.xpose.msra.mxu0 %v7839_v35  ;;  %17723 = vmatprep.mubr.msk.bf16.mxu1 %vm19202_vm1, %v25293_v31  ;;  %v2226_v54 = vrot.slane %v17157_v40, %v19753_v13  ;;  %v3456_v62 = vrot.slane %v3448_v55, %v19769_v8  ;;  %v3463_v14 = vrot.slane %v3449_v39, %v19769_v8  ;;  %v2889_v46 = vshrl.u32 %v19950_v56, 16 }
 0x3b1   :  { %17727 = vmatprep.subr.bf16.mxu1 %v25293_v31  ;;  %17753 = vmatprep.mubr.msk.bf16.mxu0 %vm19202_vm1, %v25293_v31  ;;  %v20069_v48 = vrot.slane %v4442_v59, %v19769_v8  ;;  %v2193_v11 = vrot.slane %v2186_v43, %v19753_v13  ;;  %v2201_v18 = vrot.slane %v17156_v58, %v19753_v13  ;;  %v5136_v63 = vshrl.u32 %v4375_v37, 16 }
 0x3b2   :  { %v5134_v23 = vpack.i.b16 %v4375_v37, %v4350_v25  ;;  %17763 = vmatprep.subr.bf16.mxu0 %v25293_v31  ;;  %v4501_v41 = vcombine.low %v3522_v17, %v3529_v12  ;;  %v17191_v26 = vcombine.high %v3522_v17, %v3529_v12  ;;  %v20077_v22 = vcombine.high %v20027_v47, %v25292_v44 }
 0x3b3   :  { %v5152_v40 = vpack.i.b16 %v20051_v6, %v20069_v48  ;;  %v1209_v4 = vcombine.high %v19795_v0, %v19896_v16  ;;  %v25295_v43 = vcombine.low %v19795_v0, %v19896_v16  ;;  %v2891_v55 = vpack.i.b16 %v2890_v60, %v2889_v46 }
 0x3b4   :  { %v2227_v39 = vcombine.low %v2218_v27, %v2226_v54  ;;  %v1282_v28 = vrot.slane %v1274_v61, %v19769_v8  ;;  %v4476_v59 = vcombine.low %v3456_v62, %v3463_v14  ;;  %v17190_v36 = vcombine.high %v3456_v62, %v3463_v14 }
 0x3b5   :  { %v20087_v58 = vrot.slane %v25295_v43, %v19769_v8  ;;  %v2906_v17 = vpack.i.b16 %v20060_v19, %v20077_v22  ;;  %v1289_v12 = vrot.slane %v1275_v49, %v19769_v8  ;;  %v7655_v35 = vsel %vm7558_vm2, %v5134_v23, 0 }
 0x3b6   :  { %17724 = vmatmul.mubr.msk.bf16.vlgmr.msra.gmra.mrb[12].mxu1 %vm7558_vm2, %v2891_v55  ;;  %v2202_v3 = vcombine.low %v2193_v11, %v2201_v18  ;;  %v7931_v0 = vsel %vm7558_vm2, %v5152_v40, 0  ;;  %v20099_v16 = vcombine.high %v20051_v6, %v25292_v44  ;;  %v4508_v61 = vrot.slane %v4501_v41, %v19753_v13 }
 0x3b7   :  { %17728 = vmatpush3.bf16.xpose.msra.mxu1 %v7655_v35  ;;  %17754 = vmatmul.mubr.msk.bf16.vlgmr.msra.gmra.mrb[12].mxu0 %vm7558_vm2, %v2906_v17  ;;  %v4516_v27 = vrot.slane %v17191_v26, %v19753_v13  ;;  %v1223_v49 = vrot.slane %v1209_v4, %v19769_v8  ;;  %v2135_v37 = vcombine.high %v19968_v15, %v25292_v44  ;;  %v5135_v60 = vshrl.u32 %v4350_v25, 16 }
 0x3b8   :  { %17764 = vmatpush3.bf16.xpose.msra.mxu0 %v7931_v0  ;;  %17729 = vmatprep.mubr.msk.bf16.mxu1 %vm19202_vm1, %v25293_v31  ;;  %v20109_v54 = vrot.slane %v2227_v39, %v19769_v8  ;;  %v20116_v62 = vcombine.high %v20069_v48, %v25292_v44  ;;  %v4483_v14 = vrot.slane %v4476_v59, %v19753_v13 }
 0x3b9   :  { %17733 = vmatprep.subr.bf16.mxu1 %v25293_v31  ;;  %17765 = vmatprep.mubr.msk.bf16.mxu0 %vm19202_vm1, %v25293_v31  ;;  %v4491_v11 = vrot.slane %v17190_v36, %v19753_v13  ;;  %v2261_v18 = vcombine.low %v1282_v28, %v1289_v12  ;;  %v2110_v15 = vcombine.high %v19950_v56, %v25292_v44  ;;  %v2896_v59 = vshrl.u32 %v2135_v37, 16 }
 0x3ba   :  { %v5137_v25 = vpack.i.b16 %v5136_v63, %v5135_v60  ;;  %17775 = vmatprep.subr.bf16.mxu0 %v25293_v31  ;;  %v20124_v46 = vrot.slane %v2202_v3, %v19769_v8  ;;  %v5158_v23 = vpack.i.b16 %v20099_v16, %v20116_v62  ;;  %v4517_v41 = vcombine.low %v4508_v61, %v4516_v27 }
 0x3bb   :  { %v17159_v26 = vcombine.high %v1282_v28, %v1289_v12  ;;  %v2894_v40 = vpack.i.b16 %v2135_v37, %v2110_v15  ;;  %v2236_v43 = vcombine.low %v20087_v58, %v1223_v49  ;;  %v17158_v55 = vcombine.high %v20087_v58, %v1223_v49 }
 0x3bc   :  { %v2912_v56 = vpack.i.b16 %v20109_v54, %v20124_v46  ;;  %v4492_v63 = vcombine.low %v4483_v14, %v4491_v11  ;;  %v7701_v3 = vsel %vm7558_vm2, %v5137_v25, 0  ;;  %v5142_v36 = vshrl.u32 %v19982_v53, 16 }
 0x3bd   :  { %v2268_v28 = vrot.slane %v2261_v18, %v19753_v13  ;;  %v8023_v58 = vsel %vm7558_vm2, %v5158_v23, 0  ;;  %v20139_v12 = vrot.slane %v4517_v41, %v19769_v8  ;;  %v5141_v53 = vshrl.u32 %v19979_v45, 16 }
 0x3be   :  { %17730 = vmatmul.mubr.msk.bf16.vlgmr.msra.gmra.mrb[16].mxu1 %vm7558_vm2, %v2894_v40  ;;  %v2276_v27 = vrot.slane %v17159_v26, %v19753_v13  ;;  %v20154_v60 = vcombine.high %v20109_v54, %v25292_v44  ;;  %v20157_v14 = vrot.slane %v4492_v63, %v19769_v8  ;;  %v2895_v45 = vshrl.u32 %v2110_v15, 16 }
 0x3bf   :  { %17734 = vmatpush3.bf16.xpose.msra.mxu1 %v7701_v3  ;;  %17766 = vmatmul.mubr.msk.bf16.vlgmr.msra.gmra.mrb[16].mxu0 %vm7558_vm2, %v2912_v56  ;;  %v5143_v18 = vpack.i.b16 %v5142_v36, %v5141_v53  ;;  %v2243_v41 = vrot.slane %v2236_v43, %v19753_v13  ;;  %v2251_v26 = vrot.slane %v17158_v55, %v19753_v13  ;;  %v5148_v63 = vshrl.u32 %v20001_v1, 16 }
 0x3c0   :  { %17776 = vmatpush3.bf16.xpose.msra.mxu0 %v8023_v58  ;;  %17735 = vmatprep.mubr.msk.bf16.mxu1 %vm19202_vm1, %v25293_v31  ;;  %v5164_v23 = vpack.i.b16 %v20139_v12, %v20157_v14  ;;  %v2897_v40 = vpack.i.b16 %v2896_v59, %v2895_v45  ;;  %v20181_v43 = vcombine.high %v20139_v12, %v25292_v44  ;;  %v2902_v55 = vshrl.u32 %v20011_v2, 16 }
 0x3c1   :  { %17745 = vmatprep.subr.bf16.mxu1 %v25293_v31  ;;  %17777 = vmatprep.mubr.msk.bf16.mxu0 %vm19202_vm1, %v25293_v31  ;;  %v7793_v56 = vsel %vm7558_vm2, %v5143_v18, 0  ;;  %v2252_v3 = vcombine.low %v2243_v41, %v2251_v26  ;;  %v5147_v59 = vshrl.u32 %v20019_v50, 16  ;;  %v20195_v36 = vcombine.high %v20157_v14, %v25292_v44 }
 0x3c2   :  { %17787 = vmatprep.subr.bf16.mxu0 %v25293_v31  ;;  %v2908_v53 = vshrl.u32 %v20060_v19, 16  ;;  %v5159_v41 = vshrl.u32 %v20116_v62, 16  ;;  %v2913_v26 = vshrl.u32 %v20124_v46, 16  ;;  %v5165_v62 = vshrl.u32 %v20157_v14, 16 }
 0x3c3   :  { %v20200_v2 = vrot.slane %v2252_v3, %v19769_v8  ;;  %v5170_v50 = vpack.i.b16 %v20181_v43, %v20195_v36 }
 0x3c5   :  { %v20226_v45 = vcombine.high %v20200_v2, %v25292_v44 }
 0x3c6   :  { %17736 = vmatmul.mubr.msk.bf16.vlgmr.msra.gmra.mrb[20].mxu1 %vm7558_vm2, %v2897_v40 }
 0x3c7   :  { %17746 = vmatpush3.bf16.xpose.msra.mxu1 %v7793_v56  ;;  %17747 = vmatprep.mubr.msk.bf16.mxu1 %vm19202_vm1, %v25293_v31 }
 0x3c8   :  { %17757 = vmatprep.subr.bf16.mxu1 %v25293_v31 }
 0x3d3   :  { %v17713_v4 = vpop.f32.mrb[4].mxu1 }
 0x3d4   :  { %v817_v39 = vpop.f32.mrb[5].mxu1  ;;  %v826_v35 = vadd.f32 %v17713_v4, %v19619_v30  ;;  %v2277_v4 = vcombine.low %v2268_v28, %v2276_v27  ;;  %v2901_v28 = vshrl.u32 %v20027_v47, 16  ;;  %v8207_v47 = vsel %vm7558_vm2, %v5170_v50, 0 }
 0x3d5   :  { %v17714_v17 = vpop.f32.mrb[6].mxu1  ;;  %v818_v49 = vadd.f32 %v19619_v30, %v817_v39  ;;  %v8115_v39 = vsel %vm7558_vm2, %v5164_v23, 0  ;;  %v5153_v27 = vshrl.u32 %v20069_v48, 16  ;;  %v5160_v23 = vshrl.u32 %v20099_v16, 16 }
 0x3d6   :  { %v829_v0 = vadd.f32 %v17714_v17, %v19619_v30  ;;  %v820_v61 = vpop.f32.mrb[7].mxu1  ;;  %v20191_v1 = vrot.slane %v2277_v4, %v19769_v8  ;;  %v5149_v17 = vpack.i.b16 %v5148_v63, %v5147_v59  ;;  %v2903_v58 = vpack.i.b16 %v2902_v55, %v2901_v28 }
 0x3d7   :  { %v821_v37 = vadd.f32 %v19619_v30, %v820_v61  ;;  %v20166_v30 = vcombine.high %v20124_v46, %v25292_v44  ;;  %v5154_v61 = vshrl.u32 %v20051_v6, 16  ;;  %v5161_v40 = vpack.i.b16 %v5160_v23, %v5159_v41 }
 0x3d8   :  { %v20159_v11 = vpack.c.bf16 %v829_v0, %v826_v35  ;;  %v2924_v35 = vpack.i.b16 %v20191_v1, %v20200_v2  ;;  %17748 = vmatmul.mubr.msk.bf16.vlgmr.msra.gmra.mrb[24].mxu1 %vm7558_vm2, %v2903_v58  ;;  %v7885_v0 = vsel %vm7558_vm2, %v5149_v17, 0  ;;  %v20220_v6 = vcombine.high %v20191_v1, %v25292_v44 }
 0x3d9   :  { %v20162_v25 = vpack.c.bf16 %v821_v37, %v818_v49  ;;  %v2918_v15 = vpack.i.b16 %v20154_v60, %v20166_v30  ;;  %17758 = vmatpush3.bf16.xpose.msra.mxu1 %v7885_v0  ;;  %17759 = vmatprep.mubr.msk.bf16.mxu1 %vm19202_vm1, %v25293_v31  ;;  %v2907_v49 = vshrl.u32 %v20077_v22, 16  ;;  %v5155_v37 = vpack.i.b16 %v5154_v61, %v5153_v27 }
 0x3da   :  { %25296 = vst [vmem:[#allocation26_spill] sm:$0xff] %v20159_v11  ;;  %17769 = vmatprep.subr.bf16.mxu1 %v25293_v31  ;;  %v2930_v48 = vpack.i.b16 %v20220_v6, %v20226_v45  ;;  %v2914_v22 = vshrl.u32 %v20109_v54, 16  ;;  %v8069_v16 = vsel %vm7558_vm2, %v5161_v40, 0  ;;  %v5166_v4 = vshrl.u32 %v20139_v12, 16 }
 0x3db   :  { %25297 = vst [vmem:[#allocation27_spill] sm:$0xff] %v20162_v25  ;;  %17778 = vmatmul.mubr.msk.bf16.vlgmr.msra.gmra.mrb[20].mxu0 %vm7558_vm2, %v2918_v15  ;;  %v2909_v19 = vpack.i.b16 %v2908_v53, %v2907_v49  ;;  %v7977_v18 = vsel %vm7558_vm2, %v5155_v37, 0  ;;  %v2920_v54 = vshrl.u32 %v20154_v60, 16  ;;  %v2919_v46 = vshrl.u32 %v20166_v30, 16 }
 0x3dc   :  { %17788 = vmatpush3.bf16.xpose.msra.mxu0 %v8115_v39  ;;  %17789 = vmatprep.mubr.msk.bf16.mxu0 %vm19202_vm1, %v25293_v31  ;;  %v2915_v15 = vpack.i.b16 %v2914_v22, %v2913_v26  ;;  %v5167_v56 = vpack.i.b16 %v5166_v4, %v5165_v62  ;;  %v20253_v39 = vpop.permute.xlu0 %3082  ;;  %v5172_v55 = vshrl.u32 %v20181_v43, 16  ;;  %v2926_v14 = vshrl.u32 %v20191_v1, 16 }
 0x3dd   :  { %17799 = vmatprep.subr.bf16.mxu0 %v25293_v31  ;;  %v2921_v3 = vpack.i.b16 %v2920_v54, %v2919_v46  ;;  %v5171_v30 = vshrl.u32 %v20195_v36, 16  ;;  %v2925_v28 = vshrl.u32 %v20200_v2, 16  ;;  %v2932_v2 = vshrl.u32 %v20220_v6, 16 }
 0x3de   :  { %v8161_v12 = vsel %vm7558_vm2, %v5167_v56, 0  ;;  %v946_v0 = vshrl.u32 %v19743_v24, 16  ;;  %v947_v61 = vshrl.u32 %v19734_v7, 16  ;;  %v939_v53 = vshrl.u32 %v19725_v29, 16 }
 0x3df   :  { %v5173_v17 = vpack.i.b16 %v5172_v55, %v5171_v30  ;;  %v2927_v43 = vpack.i.b16 %v2926_v14, %v2925_v28  ;;  %v944_v6 = vpack.i.b16 %v19734_v7, %v19743_v24 }
 0x3e0   :  { %17760 = vmatmul.mubr.msk.bf16.vlgmr.msra.gmra.mrb[28].mxu1 %vm7558_vm2, %v2909_v19  ;;  %v938_v19 = vshrl.u32 %v19663_v32, 16 }
 0x3e1   :  { %17770 = vmatpush3.bf16.xpose.msra.mxu1 %v7977_v18  ;;  %17771 = vmatprep.mubr.msk.bf16.mxu1 %vm19202_vm1, %v25293_v31  ;;  %v8253_v1 = vsel %vm7558_vm2, %v5173_v17, 0  ;;  %v1316_v22 = vrot.slane %v944_v6, %v19753_v13  ;;  %v1309_v26 = vcombine.high %v944_v6, %v19738_v10  ;;  %v3178_v6 = vshrl.u32 %v20253_v39, 16 }
 0x3e2   :  { %17781 = vmatprep.subr.bf16.mxu1 %v25293_v31  ;;  %v940_v18 = vpack.i.b16 %v939_v53, %v938_v19 }
 0x3e3   :  { %17790 = vmatmul.mubr.msk.bf16.vlgmr.msra.gmra.mrb[24].mxu0 %vm7558_vm2, %v2924_v35  ;;  %v1323_v28 = vrot.slane %v1309_v26, %v19753_v13 }
 0x3e4   :  { %17800 = vmatpush3.bf16.xpose.msra.mxu0 %v8207_v47  ;;  %17801 = vmatprep.mubr.msk.bf16.mxu0 %vm19202_vm1, %v25293_v31  ;;  %v2931_v47 = vshrl.u32 %v20226_v45, 16  ;;  %v936_v45 = vpack.i.b16 %v19725_v29, %v19663_v32  ;;  %v1360_v4 = vcombine.high %v940_v18, %v19738_v10  ;;  %v1367_v30 = vrot.slane %v940_v18, %v19753_v13 }
 0x3e5   :  { %17811 = vmatprep.subr.bf16.mxu0 %v25293_v31 }
 0x3e6   :  { %v2933_v49 = vpack.i.b16 %v2932_v2, %v2931_v47  ;;  %v1294_v40 = vcombine.high %v936_v45, %v19738_v10 }
 0x3e8   :  { %17772 = vmatmul.mubr.msk.bf16.vlgmr.msra.gmra.mrb[32].mxu1 %vm7558_vm2, %v2915_v15  ;;  %v1301_v15 = vrot.slane %v936_v45, %v19753_v13 }
 0x3e9   :  { %17782 = vmatpush3.bf16.xpose.msra.mxu1 %v8069_v16  ;;  %17783 = vmatprep.mubr.msk.bf16.mxu1 %vm19202_vm1, %v25293_v31 }
 0x3ea   :  { %17793 = vmatprep.subr.bf16.mxu1 %v25293_v31  ;;  %v1324_v56 = vcombine.low %v1301_v15, %v1316_v22 }
 0x3eb   :  { %17802 = vmatmul.mubr.msk.bf16.vlgmr.msra.gmra.mrb[28].mxu0 %vm7558_vm2, %v2930_v48  ;;  %v948_v48 = vpack.i.b16 %v947_v61, %v946_v0 }
 0x3ec   :  { %17813 = vmatprep.mubr.msk.bf16.mxu0 %vm19202_vm1, %v25293_v31  ;;  %v1332_v47 = vrot.slane %v1324_v56, %v19769_v8 }
 0x3ed   :  { %v1375_v16 = vcombine.high %v948_v48, %v19738_v10  ;;  %v1382_v54 = vrot.slane %v948_v48, %v19753_v13 }
 0x3ef   :  { %v1390_v2 = vcombine.low %v1367_v30, %v1382_v54  ;;  %v1391_v0 = vcombine.high %v1367_v30, %v1382_v54 }
 0x3f0   :  { %17784 = vmatmul.mubr.msk.bf16.vlgmr.msra.gmra.mrb[36].mxu1 %vm7558_vm2, %v2921_v3  ;;  %v1325_v3 = vcombine.high %v1301_v15, %v1316_v22 }
 0x3f1   :  { %17794 = vmatpush3.bf16.xpose.msra.mxu1 %v8161_v12  ;;  %17795 = vmatprep.mubr.msk.bf16.mxu1 %vm19202_vm1, %v25293_v31  ;;  %v20361_v26 = vrot.slane %v1390_v2, %v19769_v8 }
 0x3f2   :  { %17805 = vmatprep.subr.bf16.mxu1 %v25293_v31  ;;  %v1339_v53 = vrot.slane %v1325_v3, %v19769_v8  ;;  %v954_v3 = vshrl.u32 %v19661_v5, 16 }
 0x3f8   :  { %17796 = vmatmul.mubr.msk.bf16.vlgmr.msra.gmra.mrb[40].mxu1 %vm7558_vm2, %v2927_v43 }
 0x3f9   :  { %17806 = vmatpush3.bf16.xpose.msra.mxu1 %v8253_v1  ;;  %17807 = vmatprep.mubr.msk.bf16.mxu1 %vm19202_vm1, %v25293_v31  ;;  %v1374_v1 = vrot.slane %v1360_v4, %v19753_v13 }
 0x3fa   :  { %v20251_v63 = vpop.permute.xlu1 %3098  ;;  %17817 = vmatprep.subr.bf16.mxu1 %v25293_v31 }
 0x3fb   :  { %v20341_v17 = vpack.i.b16 %v20251_v63, %v20253_v39  ;;  %v3179_v43 = vshrl.u32 %v20251_v63, 16  ;;  %v20364_v39 = vrot.slane %v1391_v0, %v19769_v8 }
 0x3fd   :  { %v3541_v63 = vrot.slane %v20341_v17, %v19753_v13  ;;  %v3180_v22 = vpack.i.b16 %v3179_v43, %v3178_v6 }
 0x3fe   :  { %v20260_v60 = vpop.permute.xlu1 %3130  ;;  %v20265_v59 = vpop.permute.xlu0 %3114 }
 0x3ff   :  { %v20327_v62 = vpack.i.b16 %v20260_v60, %v20265_v59  ;;  %v3187_v12 = vshrl.u32 %v20260_v60, 16  ;;  %v3186_v55 = vshrl.u32 %v20265_v59, 16  ;;  %v1308_v60 = vrot.slane %v1294_v40, %v19753_v13 }
 0x400   :  { %17808 = vmatmul.mubr.msk.bf16.vlgmr.msra.gmra.mrb[44].mxu1 %vm7558_vm2, %v2933_v49  ;;  %v1389_v59 = vrot.slane %v1375_v16, %v19753_v13  ;;  %v2286_v16 = vcombine.low %v1332_v47, %v1339_v53 }
 0x401   :  { %17819 = vmatprep.mubr.msk.bf16.mxu1 %vm19202_vm1, %v25293_v31  ;;  %v3556_v61 = vrot.slane %v20327_v62, %v19753_v13  ;;  %v3188_v49 = vpack.i.b16 %v3187_v12, %v3186_v55  ;;  %v1340_v19 = vcombine.low %v1308_v60, %v1323_v28  ;;  %v1341_v45 = vcombine.high %v1308_v60, %v1323_v28 }
 0x402   :  { %v20268_v50 = vpop.permute.xlu1 %872  ;;  %v20270_v58 = vpop.permute.xlu0 %856  ;;  %v1406_v48 = vcombine.low %v1374_v1, %v1389_v59  ;;  %v1407_v18 = vcombine.high %v1374_v1, %v1389_v59  ;;  %v955_v12 = vshrl.u32 %v19798_v42, 16  ;;  %v17160_v28 = vcombine.high %v1332_v47, %v1339_v53 }
 0x403   :  { %3118 = vrot.lane.b32.xlu0 %v20268_v50, %s19197_s4  ;;  %3102 = vrot.lane.b32.xlu1 %v20270_v58, %s19197_s4  ;;  %v3564_v40 = vcombine.low %v3541_v63, %v3556_v61  ;;  %v3565_v15 = vcombine.high %v3541_v63, %v3556_v61  ;;  %v3622_v4 = vrot.slane %v3188_v49, %v19753_v13 }
 0x404   :  { %v20370_v54 = vrot.slane %v1340_v19, %v19769_v8  ;;  %v20373_v56 = vrot.slane %v1341_v45, %v19769_v8  ;;  %v20380_v55 = vrot.slane %v1406_v48, %v19769_v8  ;;  %v20383_v30 = vrot.slane %v1407_v18, %v19769_v8 }
 0x405   :  { %v3607_v60 = vrot.slane %v3180_v22, %v19753_v13  ;;  %v2311_v59 = vcombine.low %v20361_v26, %v20364_v39  ;;  %v3572_v43 = vrot.slane %v3564_v40, %v19769_v8  ;;  %v3579_v1 = vrot.slane %v3565_v15, %v19769_v8 }
 0x406   :  { %v20280_v36 = vpop.permute.xlu1 %3084  ;;  %v20283_v35 = vpop.permute.xlu0 %888  ;;  %v3615_v2 = vcombine.high %v3188_v49, %v19738_v10  ;;  %v20392_v0 = vrot.slane %v2286_v16, %v19753_v13  ;;  %v17161_v61 = vcombine.high %v20361_v26, %v20364_v39  ;;  %v952_v47 = vpack.i.b16 %v19798_v42, %v19661_v5 }
 0x407   :  { %860 = vrot.lane.b32.xlu0 %v20162_v25, %s19199_s3  ;;  %3134 = vrot.lane.b32.xlu1 %v20283_v35, %s19197_s4  ;;  %v3630_v6 = vcombine.low %v3607_v60, %v3622_v4  ;;  %v3631_v19 = vcombine.high %v3607_v60, %v3622_v4  ;;  %v956_v53 = vpack.i.b16 %v955_v12, %v954_v3  ;;  %v963_v45 = vshrl.u32 %v19825_v20, 16 }
 0x408   :  { %v3600_v63 = vcombine.high %v3180_v22, %v19738_v10  ;;  %v20401_v48 = vrot.slane %v17160_v28, %v19753_v13  ;;  %v960_v18 = vpack.i.b16 %v19825_v20, %v19788_v57  ;;  %v3549_v26 = vcombine.high %v20327_v62, %v19738_v10 }
 0x409   :  { %v962_v39 = vshrl.u32 %v19788_v57, 16  ;;  %v3629_v40 = vrot.slane %v3615_v2, %v19753_v13  ;;  %v4526_v15 = vcombine.low %v3572_v43, %v3579_v1  ;;  %v17192_v16 = vcombine.high %v3572_v43, %v3579_v1 }
 0x40a   :  { %v20294_v27 = vpop.permute.xlu1 %3116  ;;  %v20298_v37 = vpop.permute.xlu0 %3100  ;;  %v3534_v4 = vcombine.high %v20341_v17, %v19738_v10  ;;  %v3638_v3 = vrot.slane %v3630_v6, %v19769_v8  ;;  %v3645_v12 = vrot.slane %v3631_v19, %v19769_v8  ;;  %v1426_v28 = vcombine.high %v952_v47, %v19738_v10 }
 0x40b   :  { %892 = vrot.lane.b32.xlu0 %v20162_v25, %s19200_s27  ;;  %876 = vrot.lane.b32.xlu1 %v20162_v25, %s19198_s26  ;;  %v1492_v62 = vcombine.high %v956_v53, %v19738_v10  ;;  %v964_v60 = vpack.i.b16 %v963_v45, %v962_v39  ;;  %v3614_v49 = vrot.slane %v3600_v63, %v19753_v13  ;;  %v3195_v57 = vshrl.u32 %v20298_v37, 16 }
 0x40c   :  { %v1441_v2 = vcombine.high %v960_v18, %v19738_v10  ;;  %v3563_v17 = vrot.slane %v3549_v26, %v19753_v13  ;;  %v4533_v19 = vrot.slane %v4526_v15, %v19753_v13  ;;  %v1433_v45 = vrot.slane %v952_v47, %v19753_v13 }
 0x40d   :  { %v3646_v6 = vcombine.low %v3614_v49, %v3629_v40  ;;  %v3647_v22 = vcombine.high %v3614_v49, %v3629_v40  ;;  %v1448_v63 = vrot.slane %v960_v18, %v19753_v13  ;;  %v3548_v39 = vrot.slane %v3534_v4, %v19753_v13 }
 0x40e   :  { %v20308_v23 = vpop.permute.xlu1 %858  ;;  %v20313_v41 = vpop.permute.xlu0 %3132  ;;  %v4551_v43 = vcombine.low %v3638_v3, %v3645_v12  ;;  %v20432_v7 = vrot.slane %v1426_v28, %v19753_v13  ;;  %v20435_v1 = vrot.slane %v956_v53, %v19753_v13  ;;  %v20438_v26 = vrot.slane %v1492_v62, %v19753_v13 }
 0x40f   :  { %3104 = vrot.lane.b32.xlu0 %v20308_v23, %s19197_s4  ;;  %3088 = vrot.lane.b32.xlu1 %v19715_v9, %s19197_s4  ;;  %v1507_v49 = vcombine.high %v964_v60, %v19738_v10  ;;  %v20442_v40 = vrot.slane %v1441_v2, %v19753_v13  ;;  %v3580_v47 = vcombine.low %v3548_v39, %v3563_v17  ;;  %v3203_v28 = vshrl.u32 %v20313_v41, 16 }
 0x410   :  { %v3581_v15 = vcombine.high %v3548_v39, %v3563_v17  ;;  %v17193_v18 = vcombine.high %v3638_v3, %v3645_v12  ;;  %v3661_v4 = vrot.slane %v3647_v22, %v19769_v8  ;;  %v1456_v53 = vcombine.low %v1433_v45, %v1448_v63 }
 0x411   :  { %v1457_v29 = vcombine.high %v1433_v45, %v1448_v63  ;;  %v20448_v62 = vrot.slane %v964_v60, %v19753_v13  ;;  %v4558_v20 = vrot.slane %v4551_v43, %v19753_v13  ;;  %v3202_v2 = vshrl.u32 %v20294_v27, 16 }
 0x412   :  { %v20329_v46 = vpop.permute.xlu1 %890  ;;  %v20333_v14 = vpop.permute.xlu0 %874  ;;  %v2318_v3 = vrot.slane %v2311_v59, %v19753_v13  ;;  %v2326_v12 = vrot.slane %v17161_v61, %v19753_v13  ;;  %v20456_v22 = vrot.slane %v1507_v49, %v19753_v13  ;;  %v3595_v17 = vrot.slane %v3581_v15, %v19769_v8 }
 0x413   :  { %3136 = vrot.lane.b32.xlu0 %v20329_v46, %s19197_s4  ;;  %3120 = vrot.lane.b32.xlu1 %v20333_v14, %s19197_s4  ;;  %v4566_v60 = vrot.slane %v17193_v18, %v19753_v13  ;;  %v3194_v43 = vshrl.u32 %v20280_v36, 16  ;;  %v20466_v59 = vrot.slane %v1456_v53, %v19769_v8  ;;  %v20469_v61 = vrot.slane %v1457_v29, %v19769_v8 }
 0x414   :  { %v1522_v49 = vcombine.low %v20435_v1, %v20448_v62  ;;  %v20477_v15 = vpack.i.b16 %v20313_v41, %v20294_v27  ;;  %v2327_v18 = vcombine.low %v2318_v3, %v2326_v12  ;;  %v2302_v29 = vcombine.low %v20392_v0, %v20401_v48 }
 0x415   :  { %v4567_v39 = vcombine.low %v4558_v20, %v4566_v60  ;;  %v20484_v20 = vpack.i.b16 %v20298_v37, %v20280_v36 }
 0x416   :  { %v3688_v0 = vrot.slane %v20477_v15, %v19753_v13  ;;  %v2334_v36 = vrot.slane %v2327_v18, %v19769_v8 }
 0x417   :  { %878 = vrot.lane.b32.xlu0 %v20159_v11, %s19198_s26  ;;  %862 = vrot.lane.b32.xlu1 %v20159_v11, %s19199_s3  ;;  %v4574_v53 = vrot.slane %v4567_v39, %v19769_v8  ;;  %v2309_v39 = vrot.slane %v2302_v29, %v19769_v8 }
 0x419   :  { %v5178_v41 = vshrl.u32 %v4574_v53, 16 }
 0x41b   :  { %3090 = vrot.lane.b32.xlu0 %v20162_v25, %s19197_s4  ;;  %894 = vrot.lane.b32.xlu1 %v20159_v11, %s19200_s27  ;;  %v4541_v25 = vrot.slane %v17192_v16, %v19753_v13  ;;  %v3654_v16 = vrot.slane %v3646_v6, %v19769_v8 }
 0x41d   :  { %v4542_v24 = vcombine.low %v4533_v19, %v4541_v25  ;;  %v3588_v25 = vrot.slane %v3580_v47, %v19769_v8  ;;  %v4601_v6 = vcombine.low %v3654_v16, %v3661_v4  ;;  %v20462_v19 = vpack.i.b16 %v3203_v28, %v3202_v2 }
 0x41e   :  { %v17195_v63 = vcombine.high %v3654_v16, %v3661_v4  ;;  %v20473_v47 = vpack.i.b16 %v3195_v57, %v3194_v43  ;;  %v4575_v2 = vcombine.high %v4574_v53, %v25292_v44  ;;  %v3673_v43 = vrot.slane %v20484_v20, %v19753_v13 }
 0x41f   :  { %v4549_v45 = vrot.slane %v4542_v24, %v19769_v8  ;;  %v4576_v28 = vcombine.low %v3588_v25, %v3595_v17  ;;  %v17194_v24 = vcombine.high %v3588_v25, %v3595_v17  ;;  %v3754_v57 = vrot.slane %v20462_v19, %v19753_v13 }
 0x420   :  { %v4608_v4 = vrot.slane %v4601_v6, %v19753_v13  ;;  %v4616_v3 = vrot.slane %v17195_v63, %v19753_v13  ;;  %v3739_v12 = vrot.slane %v20473_v47, %v19753_v13  ;;  %v1523_v6 = vcombine.high %v20435_v1, %v20448_v62 }
 0x421   :  { %v5177_v16 = vshrl.u32 %v4549_v45, 16  ;;  %v5176_v27 = vpack.i.b16 %v4574_v53, %v4549_v45  ;;  %v4550_v37 = vcombine.high %v4549_v45, %v25292_v44  ;;  %v4583_v17 = vrot.slane %v4576_v28, %v19753_v13 }
 0x422   :  { %v4591_v60 = vrot.slane %v17194_v24, %v19753_v13  ;;  %v3762_v63 = vcombine.low %v3739_v12, %v3754_v57  ;;  %v3763_v18 = vcombine.high %v3739_v12, %v3754_v57  ;;  %v5184_v53 = vshrl.u32 %v4575_v2, 16 }
 0x423   :  { %v8299_v48 = vsel %vm7558_vm2, %v5176_v27, 0  ;;  %v5179_v25 = vpack.i.b16 %v5178_v41, %v5177_v16  ;;  %v4617_v16 = vcombine.low %v4608_v4, %v4616_v3  ;;  %v20510_v24 = vrot.slane %v1522_v49, %v19769_v8 }
 0x424   :  { %17812 = vmatpush3.bf16.xpose.msra.mxu0 %v8299_v48  ;;  %v3696_v1 = vcombine.low %v3673_v43, %v3688_v0  ;;  %v2938_v62 = vshrl.u32 %v2334_v36, 16  ;;  %v3697_v27 = vcombine.high %v3673_v43, %v3688_v0  ;;  %v5182_v41 = vpack.i.b16 %v4575_v2, %v4550_v37 }
 0x425   :  { %v8345_v45 = vsel %vm7558_vm2, %v5179_v25, 0  ;;  %17823 = vmatprep.subr.bf16.mxu0 %v25293_v31  ;;  %v5183_v29 = vshrl.u32 %v4550_v37, 16  ;;  %v4592_v57 = vcombine.low %v4583_v17, %v4591_v60  ;;  %v20514_v12 = vrot.slane %v1523_v6, %v19769_v8 }
 0x426   :  { %17818 = vmatpush3.bf16.xpose.msra.mxu1 %v8345_v45  ;;  %v2936_v48 = vpack.i.b16 %v2334_v36, %v2309_v39  ;;  %v2937_v4 = vshrl.u32 %v2309_v39, 16  ;;  %v2310_v3 = vcombine.high %v2309_v39, %v25292_v44  ;;  %v3770_v25 = vrot.slane %v3762_v63, %v19769_v8 }
 0x427   :  { %17829 = vmatprep.subr.bf16.mxu1 %v25293_v31  ;;  %v3777_v49 = vrot.slane %v3763_v18, %v19769_v8  ;;  %v5185_v28 = vpack.i.b16 %v5184_v53, %v5183_v29  ;;  %v4624_v45 = vrot.slane %v4617_v16, %v19769_v8  ;;  %v2335_v2 = vcombine.high %v2334_v36, %v25292_v44 }
 0x428   :  { %v2939_v0 = vpack.i.b16 %v2938_v62, %v2937_v4  ;;  %v25298_v37 = vcombine.low %v20380_v55, %v20383_v30  ;;  %v25299_v60 = vcombine.high %v20380_v55, %v20383_v30  ;;  %v3704_v43 = vrot.slane %v3696_v1, %v19769_v8 }
 0x429   :  { %v3711_v63 = vrot.slane %v3697_v27, %v19769_v8  ;;  %v8391_v39 = vsel %vm7558_vm2, %v5182_v41, 0  ;;  %v4599_v36 = vrot.slane %v4592_v57, %v19769_v8  ;;  %v3747_v18 = vcombine.high %v20462_v19, %v19738_v10 }
 0x42a   :  { %v2368_v17 = vrot.slane %v25298_v37, %v19753_v13  ;;  %v2376_v6 = vrot.slane %v25299_v60, %v19753_v13  ;;  %v2943_v53 = vshrl.u32 %v2310_v3, 16  ;;  %v25300_v55 = vcombine.low %v20370_v54, %v20373_v56 }
 0x42b   :  { %17814 = vmatmul.mubr.msk.bf16.vlgmr.msra.gmra.mrb[32].mxu0 %vm7558_vm2, %v2936_v48  ;;  %v25301_v16 = vcombine.high %v20370_v54, %v20373_v56  ;;  %v4651_v62 = vcombine.low %v3770_v25, %v3777_v49  ;;  %v17197_v27 = vcombine.high %v3770_v25, %v3777_v49  ;;  %v8437_v19 = vsel %vm7558_vm2, %v5185_v28, 0 }
 0x42c   :  { %17824 = vmatpush3.bf16.xpose.msra.mxu0 %v8391_v39  ;;  %17825 = vmatprep.mubr.msk.bf16.mxu0 %vm19202_vm1, %v25293_v31  ;;  %v2343_v30 = vrot.slane %v25300_v55, %v19753_v13  ;;  %v5190_v41 = vshrl.u32 %v4624_v45, 16  ;;  %v3732_v29 = vcombine.high %v20473_v47, %v19738_v10  ;;  %v3681_v57 = vcombine.high %v20477_v15, %v19738_v10 }
 0x42d   :  { %v2351_v1 = vrot.slane %v25301_v16, %v19753_v13  ;;  %17820 = vmatmul.mubr.msk.bf16.vlgmr.msra.gmra.mrb[48].mxu1 %vm7558_vm2, %v2939_v0  ;;  %17835 = vmatprep.subr.bf16.mxu0 %v25293_v31  ;;  %v2944_v54 = vshrl.u32 %v2335_v2, 16  ;;  %v2377_v56 = vcombine.low %v2368_v17, %v2376_v6  ;;  %v4626_v48 = vcombine.low %v3704_v43, %v3711_v63 }
 0x42e   :  { %17830 = vmatpush3.bf16.xpose.msra.mxu1 %v8437_v19  ;;  %17831 = vmatprep.mubr.msk.bf16.mxu1 %vm19202_vm1, %v25293_v31  ;;  %v17196_v4 = vcombine.high %v3704_v43, %v3711_v63  ;;  %v5188_v25 = vpack.i.b16 %v4624_v45, %v4599_v36  ;;  %v5189_v28 = vshrl.u32 %v4599_v36, 16  ;;  %v3666_v49 = vcombine.high %v20484_v20, %v19738_v10 }
 0x42f   :  { %17841 = vmatprep.subr.bf16.mxu1 %v25293_v31  ;;  %v3761_v47 = vrot.slane %v3747_v18, %v19753_v13  ;;  %v2942_v0 = vpack.i.b16 %v2335_v2, %v2310_v3  ;;  %v2352_v37 = vcombine.low %v2343_v30, %v2351_v1  ;;  %v4625_v60 = vcombine.high %v4624_v45, %v25292_v44 }
 0x430   :  { %v5191_v15 = vpack.i.b16 %v5190_v41, %v5189_v28  ;;  %v4658_v39 = vrot.slane %v4651_v62, %v19753_v13  ;;  %v4666_v17 = vrot.slane %v17197_v27, %v19753_v13  ;;  %v3746_v6 = vrot.slane %v3732_v29, %v19753_v13 }
 0x431   :  { %v3695_v43 = vrot.slane %v3681_v57, %v19753_v13  ;;  %v2945_v63 = vpack.i.b16 %v2944_v54, %v2943_v53  ;;  %v2384_v55 = vrot.slane %v2377_v56, %v19769_v8  ;;  %v4633_v20 = vrot.slane %v4626_v48, %v19753_v13 }
 0x432   :  { %v4641_v18 = vrot.slane %v17196_v4, %v19753_v13  ;;  %v8483_v3 = vsel %vm7558_vm2, %v5188_v25, 0  ;;  %v4600_v45 = vcombine.high %v4599_v36, %v25292_v44  ;;  %v3680_v2 = vrot.slane %v3666_v49, %v19753_v13 }
 0x433   :  { %17826 = vmatmul.mubr.msk.bf16.vlgmr.msra.gmra.mrb[36].mxu0 %vm7558_vm2, %v2942_v0  ;;  %v3778_v30 = vcombine.low %v3746_v6, %v3761_v47  ;;  %v2359_v53 = vrot.slane %v2352_v37, %v19769_v8  ;;  %v3779_v16 = vcombine.high %v3746_v6, %v3761_v47  ;;  %v8529_v1 = vsel %vm7558_vm2, %v5191_v15, 0 }
 0x434   :  { %17836 = vmatpush3.bf16.xpose.msra.mxu0 %v8483_v3  ;;  %17837 = vmatprep.mubr.msk.bf16.mxu0 %vm19202_vm1, %v25293_v31  ;;  %v5196_v62 = vshrl.u32 %v4625_v60, 16  ;;  %v4667_v27 = vcombine.low %v4658_v39, %v4666_v17  ;;  %v2411_v36 = vcombine.low %v20510_v24, %v20514_v12  ;;  %v17165_v19 = vcombine.high %v20510_v24, %v20514_v12 }
 0x435   :  { %17832 = vmatmul.mubr.msk.bf16.vlgmr.msra.gmra.mrb[52].mxu1 %vm7558_vm2, %v2945_v63  ;;  %17847 = vmatprep.subr.bf16.mxu0 %v25293_v31  ;;  %v3712_v41 = vcombine.low %v3680_v2, %v3695_v43  ;;  %v2950_v29 = vshrl.u32 %v2384_v55, 16  ;;  %v3713_v57 = vcombine.high %v3680_v2, %v3695_v43  ;;  %v5194_v54 = vpack.i.b16 %v4625_v60, %v4600_v45 }
 0x436   :  { %17842 = vmatpush3.bf16.xpose.msra.mxu1 %v8529_v1  ;;  %17843 = vmatprep.mubr.msk.bf16.mxu1 %vm19202_vm1, %v25293_v31  ;;  %v5195_v56 = vshrl.u32 %v4600_v45, 16  ;;  %v4642_v48 = vcombine.low %v4633_v20, %v4641_v18  ;;  %v2386_v4 = vcombine.low %v20466_v59, %v20469_v61  ;;  %v17164_v25 = vcombine.high %v20466_v59, %v20469_v61 }
 0x437   :  { %17853 = vmatprep.subr.bf16.mxu1 %v25293_v31  ;;  %v2948_v28 = vpack.i.b16 %v2384_v55, %v2359_v53  ;;  %v2949_v24 = vshrl.u32 %v2359_v53, 16  ;;  %v3786_v12 = vrot.slane %v3778_v30, %v19769_v8  ;;  %v3793_v49 = vrot.slane %v3779_v16, %v19769_v8 }
 0x438   :  { %v5197_v47 = vpack.i.b16 %v5196_v62, %v5195_v56  ;;  %v4674_v0 = vrot.slane %v4667_v27, %v19769_v8  ;;  %v2385_v15 = vcombine.high %v2384_v55, %v25292_v44  ;;  %v2418_v60 = vrot.slane %v2411_v36, %v19753_v13 }
 0x439   :  { %v2951_v37 = vpack.i.b16 %v2950_v29, %v2949_v24  ;;  %v2426_v39 = vrot.slane %v17165_v19, %v19753_v13  ;;  %v3720_v17 = vrot.slane %v3712_v41, %v19769_v8  ;;  %v3727_v59 = vrot.slane %v3713_v57, %v19769_v8 }
 0x43a   :  { %v8575_v61 = vsel %vm7558_vm2, %v5194_v54, 0  ;;  %v4649_v6 = vrot.slane %v4642_v48, %v19769_v8  ;;  %v2393_v43 = vrot.slane %v2386_v4, %v19753_v13  ;;  %v2401_v63 = vrot.slane %v17164_v25, %v19753_v13 }
 0x43b   :  { %17838 = vmatmul.mubr.msk.bf16.vlgmr.msra.gmra.mrb[40].mxu0 %vm7558_vm2, %v2948_v28  ;;  %v2360_v55 = vcombine.high %v2359_v53, %v25292_v44  ;;  %v4701_v20 = vcombine.low %v3786_v12, %v3793_v49  ;;  %v17199_v18 = vcombine.high %v3786_v12, %v3793_v49  ;;  %v8621_v3 = vsel %vm7558_vm2, %v5197_v47, 0 }
 0x43c   :  { %17848 = vmatpush3.bf16.xpose.msra.mxu0 %v8575_v61  ;;  %17849 = vmatprep.mubr.msk.bf16.mxu0 %vm19202_vm1, %v25293_v31  ;;  %v5202_v45 = vshrl.u32 %v4674_v0, 16  ;;  %v1538_v2 = vcombine.low %v20438_v26, %v20456_v22  ;;  %v1539_v30 = vcombine.high %v20438_v26, %v20456_v22  ;;  %v2956_v53 = vshrl.u32 %v2385_v15, 16 }
 0x43d   :  { %17844 = vmatmul.mubr.msk.bf16.vlgmr.msra.gmra.mrb[56].mxu1 %vm7558_vm2, %v2951_v37  ;;  %17859 = vmatprep.subr.bf16.mxu0 %v25293_v31  ;;  %v2427_v16 = vcombine.low %v2418_v60, %v2426_v39  ;;  %v4676_v1 = vcombine.low %v3720_v17, %v3727_v59  ;;  %v17198_v62 = vcombine.high %v3720_v17, %v3727_v59  ;;  %v5201_v36 = vshrl.u32 %v4649_v6, 16 }
 0x43e   :  { %17854 = vmatpush3.bf16.xpose.msra.mxu1 %v8621_v3  ;;  %17855 = vmatprep.mubr.msk.bf16.mxu1 %vm19202_vm1, %v25293_v31  ;;  %v5200_v27 = vpack.i.b16 %v4674_v0, %v4649_v6  ;;  %v1473_v19 = vcombine.high %v20432_v7, %v20442_v40  ;;  %v2954_v41 = vpack.i.b16 %v2385_v15, %v2360_v55  ;;  %v2955_v29 = vshrl.u32 %v2360_v55, 16 }
 0x43f   :  { %17865 = vmatprep.subr.bf16.mxu1 %v25293_v31  ;;  %v2402_v57 = vcombine.low %v2393_v43, %v2401_v63  ;;  %v5203_v54 = vpack.i.b16 %v5202_v45, %v5201_v36  ;;  %v4675_v26 = vcombine.high %v4674_v0, %v25292_v44  ;;  %v4708_v22 = vrot.slane %v4701_v20, %v19753_v13 }
 0x440   :  { %v4716_v56 = vrot.slane %v17199_v18, %v19753_v13  ;;  %v1546_v48 = vrot.slane %v1538_v2, %v19769_v8  ;;  %v1553_v4 = vrot.slane %v1539_v30, %v19769_v8  ;;  %v2957_v25 = vpack.i.b16 %v2956_v53, %v2955_v29 }
 0x441   :  { %v2434_v28 = vrot.slane %v2427_v16, %v19769_v8  ;;  %v8667_v24 = vsel %vm7558_vm2, %v5200_v27, 0  ;;  %v4650_v12 = vcombine.high %v4649_v6, %v25292_v44  ;;  %v4683_v49 = vrot.slane %v4676_v1, %v19753_v13 }
 0x442   :  { %v4691_v47 = vrot.slane %v17198_v62, %v19753_v13  ;;  %v25302_v0 = vcombine.low %v20432_v7, %v20442_v40  ;;  %v1487_v15 = vrot.slane %v1473_v19, %v19769_v8  ;;  %v2409_v60 = vrot.slane %v2402_v57, %v19769_v8 }
 0x443   :  { %17850 = vmatmul.mubr.msk.bf16.vlgmr.msra.gmra.mrb[44].mxu0 %vm7558_vm2, %v2954_v41  ;;  %v8713_v39 = vsel %vm7558_vm2, %v5203_v54, 0  ;;  %v5208_v17 = vshrl.u32 %v4675_v26, 16  ;;  %v4717_v59 = vcombine.low %v4708_v22, %v4716_v56  ;;  %v2461_v61 = vcombine.low %v1546_v48, %v1553_v4 }
 0x444   :  { %v1480_v37 = vrot.slane %v25302_v0, %v19769_v8  ;;  %17860 = vmatpush3.bf16.xpose.msra.mxu0 %v8667_v24  ;;  %17861 = vmatprep.mubr.msk.bf16.mxu0 %vm19202_vm1, %v25293_v31  ;;  %v2962_v7 = vshrl.u32 %v2434_v28, 16  ;;  %v17167_v40 = vcombine.high %v1546_v48, %v1553_v4  ;;  %v5206_v6 = vpack.i.b16 %v4675_v26, %v4650_v12 }
 0x445   :  { %17856 = vmatmul.mubr.msk.bf16.vlgmr.msra.gmra.mrb[60].mxu1 %vm7558_vm2, %v2957_v25  ;;  %17871 = vmatprep.subr.bf16.mxu0 %v25293_v31  ;;  %v5207_v43 = vshrl.u32 %v4650_v12, 16  ;;  %v4692_v63 = vcombine.low %v4683_v49, %v4691_v47  ;;  %v2961_v20 = vshrl.u32 %v2409_v60, 16  ;;  %v2960_v3 = vpack.i.b16 %v2434_v28, %v2409_v60 }
 0x446   :  { %17866 = vmatpush3.bf16.xpose.msra.mxu1 %v8713_v39  ;;  %17867 = vmatprep.mubr.msk.bf16.mxu1 %vm19202_vm1, %v25293_v31  ;;  %v2436_v55 = vcombine.low %v1480_v37, %v1487_v15  ;;  %v17166_v18 = vcombine.high %v1480_v37, %v1487_v15  ;;  %v4724_v2 = vrot.slane %v4717_v59, %v19769_v8  ;;  %v8759_v16 = vsel %vm7558_vm2, %v5206_v6, 0 }
 0x447   :  { %17877 = vmatprep.subr.bf16.mxu1 %v25293_v31  ;;  %v5209_v45 = vpack.i.b16 %v5208_v17, %v5207_v43  ;;  %v2963_v30 = vpack.i.b16 %v2962_v7, %v2961_v20  ;;  %v2435_v53 = vcombine.high %v2434_v28, %v25292_v44  ;;  %v4699_v1 = vrot.slane %v4692_v63, %v19769_v8 }
 0x448   :  { %v2468_v62 = vrot.slane %v2461_v61, %v19753_v13  ;;  %v2476_v27 = vrot.slane %v17167_v40, %v19753_v13  ;;  %v2410_v36 = vcombine.high %v2409_v60, %v25292_v44  ;;  %v5214_v41 = vshrl.u32 %v4724_v2, 16 }
 0x449   :  { %v8805_v19 = vsel %vm7558_vm2, %v5209_v45, 0  ;;  %v2443_v29 = vrot.slane %v2436_v55, %v19753_v13  ;;  %v2451_v57 = vrot.slane %v17166_v18, %v19753_v13  ;;  %v5212_v54 = vpack.i.b16 %v4724_v2, %v4699_v1  ;;  %v20684_v18 = vpop.permute.xlu0 %3086 }
 0x44a   :  { %v2968_v26 = vshrl.u32 %v2435_v53, 16  ;;  %v5213_v22 = vshrl.u32 %v4699_v1, 16  ;;  %v2477_v56 = vcombine.low %v2468_v62, %v2476_v27  ;;  %v2967_v48 = vshrl.u32 %v2410_v36, 16 }
 0x44b   :  { %17862 = vmatmul.mubr.msk.bf16.vlgmr.msra.gmra.mrb[48].mxu0 %vm7558_vm2, %v2960_v3  ;;  %v2966_v4 = vpack.i.b16 %v2435_v53, %v2410_v36  ;;  %v2452_v28 = vcombine.low %v2443_v29, %v2451_v57  ;;  %v4725_v24 = vcombine.high %v4724_v2, %v25292_v44  ;;  %v8851_v12 = vsel %vm7558_vm2, %v5212_v54, 0 }
 0x44c   :  { %17872 = vmatpush3.bf16.xpose.msra.mxu0 %v8759_v16  ;;  %17873 = vmatprep.mubr.msk.bf16.mxu0 %vm19202_vm1, %v25293_v31  ;;  %v5215_v25 = vpack.i.b16 %v5214_v41, %v5213_v22  ;;  %v2969_v49 = vpack.i.b16 %v2968_v26, %v2967_v48  ;;  %v2484_v47 = vrot.slane %v2477_v56, %v19769_v8  ;;  %v979_v41 = vshrl.u32 %v20283_v35, 16 }
 0x44d   :  { %17868 = vmatmul.mubr.msk.bf16.vlgmr.msra.gmra.mrb[64].mxu1 %vm7558_vm2, %v2963_v30  ;;  %17883 = vmatprep.subr.bf16.mxu0 %v25293_v31  ;;  %v4700_v0 = vcombine.high %v4699_v1, %v25292_v44  ;;  %v2459_v15 = vrot.slane %v2452_v28, %v19769_v8  ;;  %v5220_v60 = vshrl.u32 %v4725_v24, 16  ;;  %v976_v27 = vpack.i.b16 %v20283_v35, %v20268_v50 }
 0x44e   :  { %17878 = vmatpush3.bf16.xpose.msra.mxu1 %v8805_v19  ;;  %17879 = vmatprep.mubr.msk.bf16.mxu1 %vm19202_vm1, %v25293_v31  ;;  %v8897_v37 = vsel %vm7558_vm2, %v5215_v25, 0  ;;  %v2974_v17 = vshrl.u32 %v2484_v47, 16  ;;  %v2485_v63 = vcombine.high %v2484_v47, %v25292_v44  ;;  %v968_v19 = vpack.i.b16 %v20270_v58, %v19717_v52 }
 0x44f   :  { %17889 = vmatprep.subr.bf16.mxu1 %v25293_v31  ;;  %v5218_v39 = vpack.i.b16 %v4725_v24, %v4700_v0  ;;  %v5219_v59 = vshrl.u32 %v4700_v0, 16  ;;  %v2972_v61 = vpack.i.b16 %v2484_v47, %v2459_v15  ;;  %v2973_v7 = vshrl.u32 %v2459_v15, 16 }
 0x450   :  { %v2460_v20 = vcombine.high %v2459_v15, %v25292_v44  ;;  %v2980_v3 = vshrl.u32 %v2485_v63, 16  ;;  %v971_v57 = vshrl.u32 %v20270_v58, 16  ;;  %v978_v54 = vshrl.u32 %v20268_v50, 16 }
 0x451   :  { %v5221_v40 = vpack.i.b16 %v5220_v60, %v5219_v59  ;;  %v8943_v6 = vsel %vm7558_vm2, %v5218_v39, 0  ;;  %v2975_v43 = vpack.i.b16 %v2974_v17, %v2973_v7  ;;  %v1573_v26 = vcombine.high %v976_v27, %v19738_v10 }
 0x452   :  { %v2978_v45 = vpack.i.b16 %v2485_v63, %v2460_v20  ;;  %v2979_v2 = vshrl.u32 %v2460_v20, 16  ;;  %v1580_v22 = vrot.slane %v976_v27, %v19753_v13  ;;  %v970_v56 = vshrl.u32 %v19717_v52, 16 }
 0x453   :  { %17874 = vmatmul.mubr.msk.bf16.vlgmr.msra.gmra.mrb[52].mxu0 %vm7558_vm2, %v2966_v4  ;;  %v8989_v55 = vsel %vm7558_vm2, %v5221_v40, 0  ;;  %v1558_v4 = vcombine.high %v968_v19, %v19738_v10  ;;  %v1565_v25 = vrot.slane %v968_v19, %v19753_v13  ;;  %v980_v28 = vpack.i.b16 %v979_v41, %v978_v54 }
 0x454   :  { %17884 = vmatpush3.bf16.xpose.msra.mxu0 %v8851_v12  ;;  %17885 = vmatprep.mubr.msk.bf16.mxu0 %vm19202_vm1, %v25293_v31  ;;  %v2981_v30 = vpack.i.b16 %v2980_v3, %v2979_v2  ;;  %v972_v12 = vpack.i.b16 %v971_v57, %v970_v56  ;;  %v3210_v41 = vshrl.u32 %v20684_v18, 16 }
 0x455   :  { %17880 = vmatmul.mubr.msk.bf16.vlgmr.msra.gmra.mrb[68].mxu1 %vm7558_vm2, %v2969_v49  ;;  %17895 = vmatprep.subr.bf16.mxu0 %v25293_v31  ;;  %v1587_v49 = vrot.slane %v1573_v26, %v19753_v13  ;;  %v1588_v47 = vcombine.low %v1565_v25, %v1580_v22  ;;  %v1589_v0 = vcombine.high %v1565_v25, %v1580_v22  ;;  %v986_v25 = vshrl.u32 %v19715_v9, 16 }
 0x456   :  { %17890 = vmatpush3.bf16.xpose.msra.mxu1 %v8897_v37  ;;  %17891 = vmatprep.mubr.msk.bf16.mxu1 %vm19202_vm1, %v25293_v31  ;;  %v1572_v15 = vrot.slane %v1558_v4, %v19753_v13  ;;  %v1639_v60 = vcombine.high %v980_v28, %v19738_v10  ;;  %v1624_v17 = vcombine.high %v972_v12, %v19738_v10 }
 0x457   :  { %17901 = vmatprep.subr.bf16.mxu1 %v25293_v31  ;;  %v1646_v59 = vrot.slane %v980_v28, %v19753_v13  ;;  %v1596_v7 = vrot.slane %v1588_v47, %v19769_v8  ;;  %v1603_v40 = vrot.slane %v1589_v0, %v19769_v8  ;;  %v1631_v63 = vrot.slane %v972_v12, %v19753_v13 }
 0x458   :  { %v1653_v2 = vrot.slane %v1639_v60, %v19753_v13  ;;  %v984_v28 = vpack.i.b16 %v20308_v23, %v19715_v9  ;;  %v987_v12 = vshrl.u32 %v20308_v23, 16 }
 0x459   :  { %v1654_v19 = vcombine.low %v1631_v63, %v1646_v59  ;;  %v17168_v56 = vcombine.high %v1596_v7, %v1603_v40 }
 0x45b   :  { %17886 = vmatmul.mubr.msk.bf16.vlgmr.msra.gmra.mrb[56].mxu0 %vm7558_vm2, %v2972_v61  ;;  %v20776_v0 = vrot.slane %v1654_v19, %v19769_v8  ;;  %v994_v19 = vshrl.u32 %v20333_v14, 16 }
 0x45c   :  { %17896 = vmatpush3.bf16.xpose.msra.mxu0 %v8943_v6  ;;  %17897 = vmatprep.mubr.msk.bf16.mxu0 %vm19202_vm1, %v25293_v31  ;;  %v1604_v6 = vcombine.low %v1572_v15, %v1587_v49 }
 0x45d   :  { %17892 = vmatmul.mubr.msk.bf16.vlgmr.msra.gmra.mrb[72].mxu1 %vm7558_vm2, %v2975_v43  ;;  %17907 = vmatprep.subr.bf16.mxu0 %v25293_v31 }
 0x45e   :  { %17902 = vmatpush3.bf16.xpose.msra.mxu1 %v8989_v55  ;;  %17903 = vmatprep.mubr.msk.bf16.mxu1 %vm19202_vm1, %v25293_v31  ;;  %v1605_v55 = vcombine.high %v1572_v15, %v1587_v49  ;;  %v20752_v54 = vrot.slane %v1604_v6, %v19769_v8 }
 0x45f   :  { %17913 = vmatprep.subr.bf16.mxu1 %v25293_v31 }
 0x460   :  { %v20757_v22 = vrot.slane %v1605_v55, %v19769_v8 }
 0x463   :  { %17898 = vmatmul.mubr.msk.bf16.vlgmr.msra.gmra.mrb[60].mxu0 %vm7558_vm2, %v2978_v45 }
 0x464   :  { %17909 = vmatprep.mubr.msk.bf16.mxu0 %vm19202_vm1, %v25293_v31 }
 0x465   :  { %17904 = vmatmul.mubr.msk.bf16.vlgmr.msra.gmra.mrb[76].mxu1 %vm7558_vm2, %v2981_v30 }
 0x466   :  { %17915 = vmatprep.mubr.msk.bf16.mxu1 %vm19202_vm1, %v25293_v31 }
 0x475   :  { %v3119_v53 = vpop.permute.xlu0 %3118  ;;  %v3103_v16 = vpop.permute.xlu1 %3102 }
 0x476   :  { %v3211_v20 = vshrl.u32 %v3103_v16, 16  ;;  %v3218_v3 = vshrl.u32 %v3119_v53, 16  ;;  %v20739_v30 = vpack.i.b16 %v3103_v16, %v20684_v18  ;;  %v2486_v16 = vcombine.low %v1596_v7, %v1603_v40 }
 0x477   :  { %v20761_v18 = vpack.i.b16 %v20329_v46, %v20333_v14 }
 0x478   :  { %v20763_v4 = vpack.i.b16 %v3211_v20, %v3210_v41  ;;  %v3805_v49 = vrot.slane %v20739_v30, %v19753_v13  ;;  %v1697_v41 = vrot.slane %v984_v28, %v19753_v13 }
 0x479   :  { %v20693_v1 = vpop.permute.xlu0 %860  ;;  %v3135_v62 = vpop.permute.xlu1 %3134 }
 0x47a   :  { %25303 = vst [vmem:[#allocation28_spill] sm:$0xff] %v20693_v1  ;;  %3106 = vrot.lane.b32.xlu1 %v20693_v1, %s19197_s4  ;;  %v3219_v61 = vshrl.u32 %v3135_v62, 16  ;;  %v20732_v43 = vpack.i.b16 %v3135_v62, %v3119_v53  ;;  %v1655_v62 = vcombine.high %v1631_v63, %v1646_v59  ;;  %v1638_v53 = vrot.slane %v1624_v17, %v19753_v13 }
 0x47b   :  { %v1712_v63 = vrot.slane %v20761_v18, %v19753_v13  ;;  %v3871_v55 = vrot.slane %v20763_v4, %v19753_v13 }
 0x47c   :  { %v20746_v57 = vpack.i.b16 %v3219_v61, %v3218_v3  ;;  %v3820_v26 = vrot.slane %v20732_v43, %v19753_v13  ;;  %v20779_v15 = vrot.slane %v1655_v62, %v19769_v8  ;;  %v1670_v60 = vcombine.low %v1638_v53, %v1653_v2 }
 0x47d   :  { %v20699_v36 = vpop.permute.xlu0 %892  ;;  %v20704_v29 = vpop.permute.xlu1 %876  ;;  %v1671_v59 = vcombine.high %v1638_v53, %v1653_v2  ;;  %v20786_v61 = vrot.slane %v2486_v16, %v19753_v13  ;;  %v988_v3 = vpack.i.b16 %v987_v12, %v986_v25  ;;  %v995_v2 = vshrl.u32 %v20329_v46, 16 }
 0x47e   :  { %25304 = vst [vmem:[#allocation29_spill] sm:$0xff] %v20699_v36  ;;  %25305 = vst [vmem:[#allocation30_spill] sm:$0xff] %v20704_v29  ;;  %3122 = vrot.lane.b32.xlu0 %v20704_v29, %s19197_s4  ;;  %v3886_v17 = vrot.slane %v20746_v57, %v19753_v13  ;;  %v3828_v7 = vcombine.low %v3805_v49, %v3820_v26  ;;  %v3829_v40 = vcombine.high %v3805_v49, %v3820_v26 }
 0x47f   :  { %v20804_v62 = vrot.slane %v1670_v60, %v19769_v8  ;;  %v20810_v26 = vrot.slane %v1671_v59, %v19769_v8  ;;  %v17169_v12 = vcombine.high %v20776_v0, %v20779_v15  ;;  %v1720_v49 = vcombine.low %v1697_v41, %v1712_v63 }
 0x480   :  { %v3894_v53 = vcombine.low %v3871_v55, %v3886_v17  ;;  %v3895_v16 = vcombine.high %v3871_v55, %v3886_v17  ;;  %v3836_v25 = vrot.slane %v3828_v7, %v19769_v8  ;;  %v1721_v60 = vcombine.high %v1697_v41, %v1712_v63 }
 0x481   :  { %v20713_v48 = vpop.permute.xlu0 %3104  ;;  %v20717_v24 = vpop.permute.xlu1 %3088  ;;  %v3813_v17 = vcombine.high %v20732_v43, %v19738_v10  ;;  %v1756_v59 = vcombine.high %v988_v3, %v19738_v10  ;;  %v20822_v55 = vpack.i.b16 %v995_v2, %v994_v19  ;;  %v3879_v20 = vcombine.high %v20746_v57, %v19738_v10 }
 0x482   :  { %3092 = vrot.lane.b32.xlu0 %v20159_v11, %s19197_s4  ;;  %v3902_v43 = vrot.slane %v3894_v53, %v19769_v8  ;;  %v3864_v57 = vcombine.high %v20763_v4, %v19738_v10  ;;  %v20845_v63 = vrot.slane %v1720_v49, %v19769_v8  ;;  %v20848_v2 = vrot.slane %v1721_v60, %v19769_v8  ;;  %v20850_v19 = vpop.f32.mrb[8].mxu0 }
 0x483   :  { %25310 = vst [vmem:[#allocation35_spill] sm:$0xff] %v20850_v19  ;;  %v3827_v41 = vrot.slane %v3813_v17, %v19753_v13  ;;  %v20857_v53 = vrot.slane %v988_v3, %v19753_v13  ;;  %v17743_v49 = vpop.f32.mrb[9].mxu0  ;;  %v1771_v17 = vcombine.high %v20822_v55, %v19738_v10 }
 0x484   :  { %v1778_v49 = vrot.slane %v20822_v55, %v19753_v13 }
 0x485   :  { %v20722_v37 = vpop.permute.xlu0 %3136  ;;  %v20726_v39 = vpop.permute.xlu1 %3120 }
 0x489   :  { %v20735_v45 = vpop.permute.xlu0 %878  ;;  %v20741_v27 = vpop.permute.xlu1 %862 }
 0x48a   :  { %25306 = vst [vmem:[#allocation31_spill] sm:$0xff] %v20735_v45  ;;  %25307 = vst [vmem:[#allocation32_spill] sm:$0xff] %v20741_v27  ;;  %3124 = vrot.lane.b32.xlu0 %v20735_v45, %s19197_s4  ;;  %3108 = vrot.lane.b32.xlu1 %v20741_v27, %s19197_s4 }
 0x48d   :  { %v20771_v47 = vpop.permute.xlu1 %894 }
 0x48e   :  { %25308 = vst [vmem:[#allocation33_spill] sm:$0xff] %v20771_v47  ;;  %5318 = vrot.lane.b32.xlu0 %v19627_v21, %s19193_s0  ;;  %3140 = vrot.lane.b32.xlu1 %v20771_v47, %s19197_s4  ;;  %v20789_v21 = vrot.slane %v17168_v56, %v19753_v13  ;;  %v2511_v56 = vcombine.low %v20776_v0, %v20779_v15 }
 0x48f   :  { %v1705_v0 = vcombine.high %v20761_v18, %v19738_v10  ;;  %v3798_v15 = vcombine.high %v20739_v30, %v19738_v10  ;;  %v7786_v30 = vpop.f32.mrb[10].mxu0 }
 0x490   :  { %v17172_v30 = vcombine.high %v20845_v63, %v20848_v2 }
 0x491   :  { %v20866_v60 = vrot.slane %v1705_v0, %v19753_v13  ;;  %v17744_v0 = vpop.f32.mrb[11].mxu0 }
 0x492   :  { %5320 = vrot.lane.b32.xlu0 %v19625_v38, %s19193_s0  ;;  %5334 = vrot.lane.b32.xlu1 %v19667_v51, %s19193_s0  ;;  %v3843_v38 = vrot.slane %v3829_v40, %v19769_v8  ;;  %v1690_v51 = vcombine.high %v984_v28, %v19738_v10  ;;  %v3909_v28 = vrot.slane %v3895_v16, %v19769_v8  ;;  %v20900_v0 = vpop.f32.mrb[12].mxu0 }
 0x493   :  { %v20860_v16 = vrot.slane %v1756_v59, %v19753_v13  ;;  %v17755_v45 = vpop.f32.mrb[13].mxu0 }
 0x494   :  { %v4726_v40 = vcombine.low %v3836_v25, %v3843_v38  ;;  %v17200_v18 = vcombine.high %v3836_v25, %v3843_v38  ;;  %v20854_v4 = vrot.slane %v1690_v51, %v19753_v13  ;;  %v3893_v38 = vrot.slane %v3879_v20, %v19753_v13  ;;  %v25313_v45 = vld [vmem:[#allocation17_spill] sm:$0xff] }
 0x495   :  { %v3812_v51 = vrot.slane %v3798_v15, %v19753_v13  ;;  %v4751_v3 = vcombine.low %v3902_v43, %v3909_v28  ;;  %v3878_v20 = vrot.slane %v3864_v57, %v19753_v13  ;;  %v2586_v15 = vcombine.low %v20845_v63, %v20848_v2 }
 0x496   :  { %5322 = vrot.lane.b32.xlu0 %v19663_v32, %s19193_s0  ;;  %5350 = vrot.lane.b32.xlu1 %v19665_v34, %s19193_s0  ;;  %v20840_v32 = vpop.f32.mrb[8].mxu1  ;;  %v4733_v59 = vrot.slane %v4726_v40, %v19753_v13  ;;  %v2518_v57 = vrot.slane %v2511_v56, %v19753_v13  ;;  %v2526_v40 = vrot.slane %v17169_v12, %v19753_v13  ;;  %v3234_v63 = vshrl.u32 %v20726_v39, 16 }
 0x497   :  { %25309 = vst [vmem:[#allocation34_spill] sm:$0xff] %v20840_v32  ;;  %v17719_v34 = vpop.f32.mrb[9].mxu1  ;;  %v3844_v7 = vcombine.low %v3812_v51, %v3827_v41  ;;  %v3911_v6 = vcombine.high %v3878_v20, %v3893_v38  ;;  %v4758_v55 = vrot.slane %v4751_v3, %v19753_v13  ;;  %v3235_v56 = vshrl.u32 %v20722_v37, 16 }
 0x498   :  { %v7602_v25 = vpop.f32.mrb[10].mxu1 }
 0x499   :  { %v17720_v34 = vpop.f32.mrb[11].mxu1  ;;  %v17201_v25 = vcombine.high %v3902_v43, %v3909_v28  ;;  %v3226_v43 = vshrl.u32 %v20717_v24, 16  ;;  %v3227_v28 = vshrl.u32 %v20713_v48, 16  ;;  %v3852_v3 = vrot.slane %v3844_v7, %v19769_v8 }
 0x49a   :  { %5324 = vrot.lane.b32.xlu0 %v19661_v5, %s19193_s0  ;;  %5366 = vrot.lane.b32.xlu1 %v19673_v33, %s19193_s0  ;;  %v4741_v5 = vrot.slane %v17200_v18, %v19753_v13  ;;  %v3845_v34 = vcombine.high %v3812_v51, %v3827_v41  ;;  %v3910_v33 = vcombine.low %v3878_v20, %v3893_v38  ;;  %v25311_v18 = vld [vmem:[#allocation15_spill] sm:$0xff]  ;;  %v20891_v41 = vpop.f32.mrb[12].mxu1 }
 0x49b   :  { %v1786_v38 = vcombine.low %v20857_v53, %v1778_v49  ;;  %v1787_v51 = vcombine.high %v20857_v53, %v1778_v49  ;;  %v17725_v20 = vpop.f32.mrb[13].mxu1  ;;  %25312 = vst [vmem:[#allocation15_spill] sm:$0xff] %v20900_v0  ;;  %v3925_v27 = vrot.slane %v3911_v6, %v19769_v8  ;;  %v20911_v53 = vrot.slane %v1771_v17, %v19753_v13  ;;  %v7878_v6 = vpop.f32.mrb[14].mxu0 }
 0x49c   :  { %v4742_v2 = vcombine.low %v4733_v59, %v4741_v5  ;;  %v3859_v12 = vrot.slane %v3845_v34, %v19769_v8  ;;  %v7648_v47 = vpop.f32.mrb[14].mxu1  ;;  %v2502_v5 = vcombine.low %v20786_v61, %v20789_v21  ;;  %v20918_v34 = vpack.i.b16 %v3227_v28, %v3226_v43  ;;  %v17756_v61 = vpop.f32.mrb[15].mxu0 }
 0x49d   :  { %v17726_v49 = vpop.f32.mrb[15].mxu1  ;;  %v2527_v47 = vcombine.low %v2518_v57, %v2526_v40  ;;  %v20920_v21 = vpack.i.b16 %v3235_v56, %v3234_v63  ;;  %v20925_v17 = vrot.slane %v1786_v38, %v19769_v8  ;;  %v20932_v57 = vpack.i.b16 %v20722_v37, %v20726_v39  ;;  %v25314_v38 = vld [vmem:[#allocation16_spill] sm:$0xff] }
 0x49e   :  { %5326 = vrot.lane.b32.xlu0 %v19717_v52, %s19193_s0  ;;  %5336 = vrot.lane.b32.xlu1 %v25311_v18, %s19193_s0  ;;  %v4766_v52 = vrot.slane %v17201_v25, %v19753_v13  ;;  %v3918_v18 = vrot.slane %v3910_v33, %v19769_v8  ;;  %v20914_v25 = vrot.slane %v2586_v15, %v19753_v13 }
 0x49f   :  { %v20928_v15 = vrot.slane %v17172_v30, %v19753_v13  ;;  %v20935_v43 = vrot.slane %v1787_v51, %v19769_v8  ;;  %v17202_v28 = vcombine.high %v3852_v3, %v3859_v12  ;;  %v2509_v63 = vrot.slane %v2502_v5, %v19769_v8  ;;  %v20949_v51 = vpop.f32.mrb[16].mxu1 }
 0x4a0   :  { %v4767_v59 = vcombine.low %v4758_v55, %v4766_v52  ;;  %v4776_v55 = vcombine.low %v3852_v3, %v3859_v12  ;;  %v4801_v40 = vcombine.low %v3918_v18, %v3925_v27  ;;  %v17203_v56 = vcombine.high %v3918_v18, %v3925_v27  ;;  %25315 = vst [vmem:[#allocation17_spill] sm:$0xff] %v20949_v51  ;;  %v20953_v12 = vpop.f32.mrb[16].mxu0 }
 0x4a1   :  { %v2534_v30 = vrot.slane %v2527_v47, %v19769_v8  ;;  %v4003_v37 = vrot.slane %v20918_v34, %v19753_v13  ;;  %v4018_v39 = vrot.slane %v20920_v21, %v19753_v13  ;;  %25316 = vst [vmem:[#allocation16_spill] sm:$0xff] %v20953_v12  ;;  %v17767_v49 = vpop.f32.mrb[17].mxu0 }
 0x4a2   :  { %5328 = vrot.lane.b32.xlu0 %v19715_v9, %s19193_s0  ;;  %5352 = vrot.lane.b32.xlu1 %v25313_v45, %s19193_s0  ;;  %v4749_v9 = vrot.slane %v4742_v2, %v19769_v8  ;;  %v4774_v33 = vrot.slane %v4767_v59, %v19769_v8  ;;  %v20940_v2 = vpack.i.b16 %v20713_v48, %v20717_v24  ;;  %v17731_v24 = vpop.f32.mrb[17].mxu1  ;;  %v7970_v7 = vpop.f32.mrb[18].mxu0 }
 0x4a3   :  { %v3952_v48 = vrot.slane %v20932_v57, %v19753_v13  ;;  %v4783_v59 = vrot.slane %v4776_v55, %v19753_v13  ;;  %v7694_v5 = vpop.f32.mrb[18].mxu1  ;;  %v4791_v45 = vrot.slane %v17202_v28, %v19753_v13  ;;  %v4808_v61 = vrot.slane %v4801_v40, %v19753_v13  ;;  %v17768_v40 = vpop.f32.mrb[19].mxu0 }
 0x4a4   :  { %v5224_v52 = vpack.i.b16 %v4774_v33, %v4749_v9  ;;  %v5225_v3 = vshrl.u32 %v4749_v9, 16  ;;  %v5226_v27 = vshrl.u32 %v4774_v33, 16  ;;  %v4775_v18 = vcombine.high %v4774_v33, %v25292_v44  ;;  %v17732_v24 = vpop.f32.mrb[19].mxu1 }
 0x4a5   :  { %v4750_v47 = vcombine.high %v4749_v9, %v25292_v44  ;;  %v4816_v33 = vrot.slane %v17203_v56, %v19753_v13  ;;  %v25317_v55 = vcombine.low %v20752_v54, %v20757_v22  ;;  %v4026_v9 = vcombine.low %v4003_v37, %v4018_v39 }
 0x4a6   :  { %5368 = vrot.lane.b32.xlu1 %v25314_v38, %s19193_s0  ;;  %v9035_v20 = vsel %vm7558_vm2, %v5224_v52, 0  ;;  %v5227_v6 = vpack.i.b16 %v5226_v27, %v5225_v3  ;;  %v3937_v38 = vrot.slane %v20940_v2, %v19753_v13  ;;  %v4027_v28 = vcombine.high %v4003_v37, %v4018_v39 }
 0x4a7   :  { %17908 = vmatpush3.bf16.xpose.msra.mxu0 %v9035_v20  ;;  %v20969_v52 = vrot.slane %v25317_v55, %v19753_v13  ;;  %v5232_v27 = vshrl.u32 %v4775_v18, 16  ;;  %v5230_v7 = vpack.i.b16 %v4775_v18, %v4750_v47  ;;  %v2986_v20 = vshrl.u32 %v2534_v30, 16 }
 0x4a8   :  { %17919 = vmatprep.subr.bf16.mxu0 %v25293_v31  ;;  %v9081_v3 = vsel %vm7558_vm2, %v5227_v6, 0  ;;  %v4817_v5 = vcombine.low %v4808_v61, %v4816_v33  ;;  %v25318_v56 = vcombine.high %v20752_v54, %v20757_v22  ;;  %v3960_v24 = vcombine.low %v3937_v38, %v3952_v48 }
 0x4a9   :  { %17914 = vmatpush3.bf16.xpose.msra.mxu1 %v9081_v3  ;;  %v3961_v55 = vcombine.high %v3937_v38, %v3952_v48  ;;  %v4792_v37 = vcombine.low %v4783_v59, %v4791_v45  ;;  %v2984_v39 = vpack.i.b16 %v2534_v30, %v2509_v63  ;;  %v2985_v40 = vshrl.u32 %v2509_v63, 16  ;;  %v20993_v59 = vpop.f32.mrb[20].mxu1 }
 0x4aa   :  { %5340 = vrot.lane.b32.xlu1 %v19798_v42, %s19193_s0  ;;  %v20978_v49 = vrot.slane %v25318_v56, %v19753_v13  ;;  %17925 = vmatprep.subr.bf16.mxu1 %v25293_v31  ;;  %v5231_v42 = vshrl.u32 %v4750_v47, 16  ;;  %v25319_v18 = vcombine.low %v20804_v62, %v20810_v26  ;;  %v25320_v61 = vcombine.high %v20804_v62, %v20810_v26  ;;  %v17737_v38 = vpop.f32.mrb[21].mxu1 }
 0x4ab   :  { %v4034_v22 = vrot.slane %v4026_v9, %v19769_v8  ;;  %v4041_v48 = vrot.slane %v4027_v28, %v19769_v8  ;;  %25321 = vst [vmem:[#allocation36_spill] sm:$0xff] %v20993_v59  ;;  %v4824_v45 = vrot.slane %v4817_v5, %v19769_v8  ;;  %v9127_v62 = vsel %vm7558_vm2, %v5230_v7, 0 }
 0x4ac   :  { %v2568_v6 = vrot.slane %v25319_v18, %v19753_v13  ;;  %v2576_v54 = vrot.slane %v25320_v61, %v19753_v13  ;;  %v5233_v47 = vpack.i.b16 %v5232_v27, %v5231_v42  ;;  %v2987_v26 = vpack.i.b16 %v2986_v20, %v2985_v40  ;;  %v7740_v18 = vpop.f32.mrb[22].mxu1 }
 0x4ad   :  { %v2510_v3 = vcombine.high %v2509_v63, %v25292_v44  ;;  %v2535_v56 = vcombine.high %v2534_v30, %v25292_v44  ;;  %v3968_v9 = vrot.slane %v3960_v24, %v19769_v8  ;;  %v3975_v28 = vrot.slane %v3961_v55, %v19769_v8  ;;  %v17738_v20 = vpop.f32.mrb[23].mxu1  ;;  %v25323_v24 = vld [vmem:[#allocation24_spill] sm:$0xff] }
 0x4ae   :  { %3138 = vrot.lane.b32.xlu1 %v20699_v36, %s19197_s4  ;;  %v20996_v33 = vpop.f32.mrb[20].mxu0  ;;  %17910 = vmatmul.mubr.msk.bf16.vlgmr.msra.gmra.mrb[64].mxu0 %vm7558_vm2, %v2984_v39  ;;  %v4799_v5 = vrot.slane %v4792_v37, %v19769_v8  ;;  %v4011_v7 = vcombine.high %v20920_v21, %v19738_v10  ;;  %v2552_v63 = vcombine.low %v20969_v52, %v20978_v49  ;;  %v9173_v37 = vsel %vm7558_vm2, %v5233_v47, 0  ;;  %v21029_v18 = vpop.f32.mrb[24].mxu1 }
 0x4af   :  { %25322 = vst [vmem:[#allocation37_spill] sm:$0xff] %v20996_v33  ;;  %v17779_v27 = vpop.f32.mrb[21].mxu0  ;;  %17920 = vmatpush3.bf16.xpose.msra.mxu0 %v9127_v62  ;;  %17921 = vmatprep.mubr.msk.bf16.mxu0 %vm19202_vm1, %v25293_v31  ;;  %v2577_v30 = vcombine.low %v2568_v6, %v2576_v54  ;;  %v4851_v55 = vcombine.low %v4034_v22, %v4041_v48  ;;  %v5238_v61 = vshrl.u32 %v4824_v45, 16  ;;  %v2992_v49 = vshrl.u32 %v2535_v56, 16 }
 0x4b0   :  { %v8062_v42 = vpop.f32.mrb[22].mxu0  ;;  %17931 = vmatprep.subr.bf16.mxu0 %v25293_v31  ;;  %v17205_v39 = vcombine.high %v4034_v22, %v4041_v48  ;;  %17916 = vmatmul.mubr.msk.bf16.vlgmr.msra.gmra.mrb[80].mxu1 %vm7558_vm2, %v2987_v26  ;;  %v3996_v21 = vcombine.high %v20918_v34, %v19738_v10  ;;  %v3945_v38 = vcombine.high %v20932_v57, %v19738_v10  ;;  %v2991_v22 = vshrl.u32 %v2510_v3, 16  ;;  %v25324_v26 = vld [vmem:[#allocation25_spill] sm:$0xff] }
 0x4b1   :  { %v17780_v40 = vpop.f32.mrb[23].mxu0  ;;  %17926 = vmatpush3.bf16.xpose.msra.mxu1 %v9173_v37  ;;  %17927 = vmatprep.mubr.msk.bf16.mxu1 %vm19202_vm1, %v25293_v31  ;;  %v5236_v52 = vpack.i.b16 %v4824_v45, %v4799_v5  ;;  %v4826_v6 = vcombine.low %v3968_v9, %v3975_v28  ;;  %v17204_v54 = vcombine.high %v3968_v9, %v3975_v28  ;;  %v5237_v48 = vshrl.u32 %v4799_v5, 16 }
 0x4b2   :  { %5356 = vrot.lane.b32.xlu1 %v25323_v24, %s19193_s0  ;;  %17937 = vmatprep.subr.bf16.mxu1 %v25293_v31  ;;  %v3930_v47 = vcombine.high %v20940_v2, %v19738_v10  ;;  %v4025_v34 = vrot.slane %v4011_v7, %v19753_v13  ;;  %v2990_v62 = vpack.i.b16 %v2535_v56, %v2510_v3  ;;  %v17749_v7 = vpop.f32.mrb[25].mxu1 }
 0x4b3   :  { %v2584_v57 = vrot.slane %v2577_v30, %v19769_v8  ;;  %25325 = vst [vmem:[#allocation24_spill] sm:$0xff] %v21029_v18  ;;  %v5239_v27 = vpack.i.b16 %v5238_v61, %v5237_v48  ;;  %v4825_v9 = vcombine.high %v4824_v45, %v25292_v44  ;;  %v4858_v28 = vrot.slane %v4851_v55, %v19753_v13  ;;  %v7832_v40 = vpop.f32.mrb[26].mxu1 }
 0x4b4   :  { %v4866_v20 = vrot.slane %v17205_v39, %v19753_v13  ;;  %v4010_v42 = vrot.slane %v3996_v21, %v19753_v13  ;;  %v3959_v2 = vrot.slane %v3945_v38, %v19753_v13  ;;  %v9219_v56 = vsel %vm7558_vm2, %v5236_v52, 0  ;;  %v17750_v21 = vpop.f32.mrb[27].mxu1 }
 0x4b5   :  { %v2993_v30 = vpack.i.b16 %v2992_v49, %v2991_v22  ;;  %v4833_v24 = vrot.slane %v4826_v6, %v19753_v13  ;;  %v4841_v45 = vrot.slane %v17204_v54, %v19753_v13  ;;  %v4800_v39 = vcombine.high %v4799_v5, %v25292_v44 }
 0x4b6   :  { %5372 = vrot.lane.b32.xlu1 %v25324_v26, %s19193_s0  ;;  %v21036_v3 = vpop.f32.mrb[24].mxu0  ;;  %17922 = vmatmul.mubr.msk.bf16.vlgmr.msra.gmra.mrb[68].mxu0 %vm7558_vm2, %v2990_v62  ;;  %v3944_v37 = vrot.slane %v3930_v47, %v19753_v13  ;;  %v4042_v61 = vcombine.low %v4010_v42, %v4025_v34  ;;  %v2559_v52 = vrot.slane %v2552_v63, %v19769_v8  ;;  %v9265_v54 = vsel %vm7558_vm2, %v5239_v27, 0 }
 0x4b7   :  { %25326 = vst [vmem:[#allocation25_spill] sm:$0xff] %v21036_v3  ;;  %v17791_v55 = vpop.f32.mrb[25].mxu0  ;;  %17932 = vmatpush3.bf16.xpose.msra.mxu0 %v9219_v56  ;;  %17933 = vmatprep.mubr.msk.bf16.mxu0 %vm19202_vm1, %v25293_v31  ;;  %v4043_v49 = vcombine.high %v4010_v42, %v4025_v34  ;;  %v5244_v22 = vshrl.u32 %v4825_v9, 16  ;;  %v4867_v5 = vcombine.low %v4858_v28, %v4866_v20  ;;  %v5243_v26 = vshrl.u32 %v4800_v39, 16 }
 0x4b8   :  { %v8154_v38 = vpop.f32.mrb[26].mxu0  ;;  %17943 = vmatprep.subr.bf16.mxu0 %v25293_v31  ;;  %17928 = vmatmul.mubr.msk.bf16.vlgmr.msra.gmra.mrb[84].mxu1 %vm7558_vm2, %v2993_v30  ;;  %v2611_v48 = vcombine.low %v20925_v17, %v20935_v43  ;;  %v17173_v47 = vcombine.high %v20925_v17, %v20935_v43  ;;  %v5242_v63 = vpack.i.b16 %v4825_v9, %v4800_v39  ;;  %v2997_v42 = vshrl.u32 %v2559_v52, 16  ;;  %v21064_v43 = vpop.f32.mrb[28].mxu1 }
 0x4b9   :  { %v17792_v6 = vpop.f32.mrb[27].mxu0  ;;  %17938 = vmatpush3.bf16.xpose.msra.mxu1 %v9265_v54  ;;  %17939 = vmatprep.mubr.msk.bf16.mxu1 %vm19202_vm1, %v25293_v31  ;;  %v3976_v34 = vcombine.low %v3944_v37, %v3959_v2  ;;  %v3977_v62 = vcombine.high %v3944_v37, %v3959_v2  ;;  %v4842_v27 = vcombine.low %v4833_v24, %v4841_v45  ;;  %v10503_v56 = vsel %vm7558_vm2, %v20840_v32, -inf  ;;  %v17761_v30 = vpop.f32.mrb[29].mxu1 }
 0x4ba   :  { %5342 = vrot.lane.b32.xlu1 %v20270_v58, %s19193_s0  ;;  %v2998_v58 = vshrl.u32 %v2584_v57, 16  ;;  %17949 = vmatprep.subr.bf16.mxu1 %v25293_v31  ;;  %v4050_v28 = vrot.slane %v4042_v61, %v19769_v8  ;;  %v2996_v20 = vpack.i.b16 %v2584_v57, %v2559_v52  ;;  %v2585_v7 = vcombine.high %v2584_v57, %v25292_v44  ;;  %v7924_v37 = vpop.f32.mrb[30].mxu1 }
 0x4bb   :  { %v4057_v17 = vrot.slane %v4043_v49, %v19769_v8  ;;  %25327 = vst [vmem:[#allocation38_spill] sm:$0xff] %v21064_v43  ;;  %v5245_v9 = vpack.i.b16 %v5244_v22, %v5243_v26  ;;  %v4874_v2 = vrot.slane %v4867_v5, %v19769_v8  ;;  %v9311_v57 = vsel %vm7558_vm2, %v5242_v63, 0  ;;  %v17762_v6 = vpop.f32.mrb[31].mxu1 }
 0x4bc   :  { %v2999_v45 = vpack.i.b16 %v2998_v58, %v2997_v42  ;;  %v2626_v40 = vrot.slane %v17173_v47, %v19753_v13  ;;  %v3984_v55 = vrot.slane %v3976_v34, %v19769_v8  ;;  %v3991_v39 = vrot.slane %v3977_v62, %v19769_v8 }
 0x4bd   :  { %v4849_v21 = vrot.slane %v4842_v27, %v19769_v8  ;;  %v1802_v38 = vcombine.low %v20860_v16, %v20911_v53  ;;  %v1803_v49 = vcombine.high %v20860_v16, %v20911_v53  ;;  %v2560_v22 = vcombine.high %v2559_v52, %v25292_v44 }
 0x4be   :  { %5358 = vrot.lane.b32.xlu1 %v20268_v50, %s19193_s0  ;;  %v21069_v24 = vpop.f32.mrb[28].mxu0  ;;  %17934 = vmatmul.mubr.msk.bf16.vlgmr.msra.gmra.mrb[72].mxu0 %vm7558_vm2, %v2996_v20  ;;  %v2618_v50 = vrot.slane %v2611_v48, %v19753_v13  ;;  %v4901_v5 = vcombine.low %v4050_v28, %v4057_v17  ;;  %v17207_v48 = vcombine.high %v4050_v28, %v4057_v17  ;;  %v9357_v63 = vsel %vm7558_vm2, %v5245_v9, 0  ;;  %v21102_v9 = vpop.f32.mrb[32].mxu1 }
 0x4bf   :  { %25328 = vst [vmem:[#allocation39_spill] sm:$0xff] %v21069_v24  ;;  %v17803_v61 = vpop.f32.mrb[29].mxu0  ;;  %17944 = vmatpush3.bf16.xpose.msra.mxu0 %v9311_v57  ;;  %17945 = vmatprep.mubr.msk.bf16.mxu0 %vm19202_vm1, %v25293_v31  ;;  %v5250_v58 = vshrl.u32 %v4874_v2, 16  ;;  %v5248_v16 = vpack.i.b16 %v4874_v2, %v4849_v21  ;;  %v3004_v53 = vshrl.u32 %v2585_v7, 16  ;;  %v10515_v34 = vsel %vm7558_vm2, %v20850_v19, -inf  ;;  %25329 = vst [vmem:[#allocation40_spill] sm:$0xff] %v21102_v9 }
 0x4c0   :  { %v8246_v54 = vpop.f32.mrb[30].mxu0  ;;  %17955 = vmatprep.subr.bf16.mxu0 %v25293_v31  ;;  %17940 = vmatmul.mubr.msk.bf16.vlgmr.msra.gmra.mrb[88].mxu1 %vm7558_vm2, %v2999_v45  ;;  %v2627_v52 = vcombine.low %v2618_v50, %v2626_v40  ;;  %v4876_v62 = vcombine.low %v3984_v55, %v3991_v39  ;;  %v17206_v26 = vcombine.high %v3984_v55, %v3991_v39  ;;  %v5249_v27 = vshrl.u32 %v4849_v21, 16  ;;  %v17773_v40 = vpop.f32.mrb[33].mxu1 }
 0x4c1   :  { %10504 = vmax.xlane.f32.xlu0 %v10503_v56  ;;  %v17804_v47 = vpop.f32.mrb[31].mxu0  ;;  %17950 = vmatpush3.bf16.xpose.msra.mxu1 %v9357_v63  ;;  %v1810_v28 = vrot.slane %v1802_v38, %v19769_v8  ;;  %v3002_v20 = vpack.i.b16 %v2585_v7, %v2560_v22  ;;  %v3003_v42 = vshrl.u32 %v2560_v22, 16  ;;  %v2602_v17 = vcombine.low %v20914_v25, %v20928_v15 }
 0x4c2   :  { %5374 = vrot.lane.b32.xlu1 %v20283_v35, %s19193_s0  ;;  %17951 = vmatprep.mubr.msk.bf16.mxu1 %vm19202_vm1, %v25293_v31  ;;  %v1737_v35 = vcombine.high %v20854_v4, %v20866_v60  ;;  %v5251_v56 = vpack.i.b16 %v5250_v58, %v5249_v27  ;;  %v4875_v30 = vcombine.high %v4874_v2, %v25292_v44  ;;  %v9403_v7 = vsel %vm7558_vm2, %v5248_v16, 0 }
 0x4c3   :  { %17961 = vmatprep.subr.bf16.mxu1 %v25293_v31  ;;  %v4908_v57 = vrot.slane %v4901_v5, %v19753_v13  ;;  %v4916_v45 = vrot.slane %v17207_v48, %v19753_v13  ;;  %v1817_v50 = vrot.slane %v1803_v49, %v19769_v8  ;;  %v3005_v25 = vpack.i.b16 %v3004_v53, %v3003_v42 }
 0x4c4   :  { %v2634_v15 = vrot.slane %v2627_v52, %v19769_v8  ;;  %v4850_v2 = vcombine.high %v4849_v21, %v25292_v44  ;;  %v4883_v55 = vrot.slane %v4876_v62, %v19753_v13  ;;  %v4891_v39 = vrot.slane %v17206_v26, %v19753_v13 }
 0x4c5   :  { %10516 = vmax.xlane.f32.xlu0 %v10515_v34  ;;  %v10521_v37 = vsel %vm7558_vm2, %v20900_v0, -inf  ;;  %v25330_v61 = vcombine.low %v20854_v4, %v20866_v60  ;;  %v1751_v49 = vrot.slane %v1737_v35, %v19769_v8  ;;  %v9449_v21 = vsel %vm7558_vm2, %v5251_v56, 0 }
 0x4c6   :  { %5344 = vrot.lane.b32.xlu1 %v20308_v23, %s19193_s0  ;;  %17946 = vmatmul.mubr.msk.bf16.vlgmr.msra.gmra.mrb[76].mxu0 %vm7558_vm2, %v3002_v20  ;;  %v8016_v23 = vpop.f32.mrb[34].mxu1  ;;  %v2609_v54 = vrot.slane %v2602_v17, %v19769_v8  ;;  %v5256_v22 = vshrl.u32 %v4875_v30, 16  ;;  %v4917_v5 = vcombine.low %v4908_v57, %v4916_v45  ;;  %v2661_v48 = vcombine.low %v1810_v28, %v1817_v50 }
 0x4c7   :  { %17956 = vmatpush3.bf16.xpose.msra.mxu0 %v9403_v7  ;;  %17957 = vmatprep.mubr.msk.bf16.mxu0 %vm19202_vm1, %v25293_v31  ;;  %v1744_v38 = vrot.slane %v25330_v61, %v19769_v8  ;;  %v17774_v6 = vpop.f32.mrb[35].mxu1  ;;  %v17175_v4 = vcombine.high %v1810_v28, %v1817_v50  ;;  %v5254_v60 = vpack.i.b16 %v4875_v30, %v4850_v2  ;;  %v3010_v47 = vshrl.u32 %v2634_v15, 16  ;;  %v25332_v23 = vld [vmem:[#allocation18_spill] sm:$0xff] }
 0x4c8   :  { %17967 = vmatprep.subr.bf16.mxu0 %v25293_v31  ;;  %17952 = vmatmul.mubr.msk.bf16.vlgmr.msra.gmra.mrb[92].mxu1 %vm7558_vm2, %v3005_v25  ;;  %v5255_v63 = vshrl.u32 %v4850_v2, 16  ;;  %v4892_v58 = vcombine.low %v4883_v55, %v4891_v39  ;;  %v10509_v16 = vsel %vm7558_vm2, %v20949_v51, -inf  ;;  %v3008_v52 = vpack.i.b16 %v2634_v15, %v2609_v54 }
 0x4c9   :  { %10522 = vmax.xlane.f32.xlu0 %v10521_v37  ;;  %17962 = vmatpush3.bf16.xpose.msra.mxu1 %v9449_v21  ;;  %v2636_v53 = vcombine.low %v1744_v38, %v1751_v49  ;;  %v17174_v34 = vcombine.high %v1744_v38, %v1751_v49  ;;  %v3009_v35 = vshrl.u32 %v2609_v54, 16  ;;  %v4924_v26 = vrot.slane %v4917_v5, %v19769_v8  ;;  %v25334_v5 = vld [vmem:[#allocation21_spill] sm:$0xff] }
 0x4ca   :  { %5360 = vrot.lane.b32.xlu1 %v20333_v14, %s19193_s0  ;;  %17963 = vmatprep.mubr.msk.bf16.mxu1 %vm19202_vm1, %v25293_v31  ;;  %v21134_v14 = vpop.f32.mrb[36].mxu1  ;;  %v5257_v62 = vpack.i.b16 %v5256_v22, %v5255_v63  ;;  %v9495_v28 = vsel %vm7558_vm2, %v5254_v60, 0  ;;  %v2668_v20 = vrot.slane %v2661_v48, %v19753_v13  ;;  %v2676_v42 = vrot.slane %v17175_v4, %v19753_v13 }
 0x4cb   :  { %17973 = vmatprep.subr.bf16.mxu1 %v25293_v31  ;;  %25331 = vst [vmem:[#allocation41_spill] sm:$0xff] %v21134_v14  ;;  %v17785_v27 = vpop.f32.mrb[37].mxu1  ;;  %v3011_v56 = vpack.i.b16 %v3010_v47, %v3009_v35  ;;  %v2635_v30 = vcombine.high %v2634_v15, %v25292_v44  ;;  %v4899_v57 = vrot.slane %v4892_v58, %v19769_v8  ;;  %v5262_v25 = vshrl.u32 %v4924_v26, 16 }
 0x4cc   :  { %v8108_v17 = vpop.f32.mrb[38].mxu1  ;;  %v2643_v50 = vrot.slane %v2636_v53, %v19753_v13  ;;  %v9541_v40 = vsel %vm7558_vm2, %v5257_v62, 0  ;;  %v2610_v7 = vcombine.high %v2609_v54, %v25292_v44  ;;  %v2651_v15 = vrot.slane %v17174_v34, %v19753_v13  ;;  %v25335_v62 = vld [vmem:[#allocation19_spill] sm:$0xff] }
 0x4cd   :  { %10510 = vmax.xlane.f32.xlu0 %v10509_v16  ;;  %v17786_v45 = vpop.f32.mrb[39].mxu1  ;;  %v5260_v2 = vpack.i.b16 %v4924_v26, %v4899_v57  ;;  %v3016_v55 = vshrl.u32 %v2635_v30, 16  ;;  %v5261_v39 = vshrl.u32 %v4899_v57, 16  ;;  %v2677_v37 = vcombine.low %v2668_v20, %v2676_v42 }
 0x4ce   :  { %5376 = vrot.lane.b32.xlu1 %v20329_v46, %s19193_s0  ;;  %17958 = vmatmul.mubr.msk.bf16.vlgmr.msra.gmra.mrb[80].mxu0 %vm7558_vm2, %v3008_v52  ;;  %v10527_v46 = vsel %vm7558_vm2, %v20953_v12, -inf  ;;  %v10512_v61 = vsel %vm7558_vm2, %v20993_v59, -inf  ;;  %v3014_v38 = vpack.i.b16 %v2635_v30, %v2610_v7  ;;  %v21162_v49 = vpop.f32.mrb[40].mxu1  ;;  %v3015_v6 = vshrl.u32 %v2610_v7, 16 }
 0x4cf   :  { %17968 = vmatpush3.bf16.xpose.msra.mxu0 %v9495_v28  ;;  %17969 = vmatprep.mubr.msk.bf16.mxu0 %vm19202_vm1, %v25293_v31  ;;  %25333 = vst [vmem:[#allocation18_spill] sm:$0xff] %v21162_v49  ;;  %v5263_v21 = vpack.i.b16 %v5262_v25, %v5261_v39  ;;  %v2652_v54 = vcombine.low %v2643_v50, %v2651_v15  ;;  %v17797_v48 = vpop.f32.mrb[41].mxu1  ;;  %v9587_v4 = vsel %vm7558_vm2, %v5260_v2, 0  ;;  %v10533_v16 = vsel %vm7558_vm2, %v20996_v33, -inf }
 0x4d0   :  { %17979 = vmatprep.subr.bf16.mxu0 %v25293_v31  ;;  %17964 = vmatmul.mubr.msk.bf16.vlgmr.msra.gmra.mrb[96].mxu1 %vm7558_vm2, %v3011_v56  ;;  %v4925_v22 = vcombine.high %v4924_v26, %v25292_v44  ;;  %v8200_v60 = vpop.f32.mrb[42].mxu1  ;;  %v3017_v47 = vpack.i.b16 %v3016_v55, %v3015_v6  ;;  %v2684_v63 = vrot.slane %v2677_v37, %v19769_v8  ;;  %v10539_v20 = vsel %vm7558_vm2, %v21036_v3, -inf }
 0x4d1   :  { %10528 = vmax.xlane.f32.xlu0 %v10527_v46  ;;  %17974 = vmatpush3.bf16.xpose.msra.mxu1 %v9541_v40  ;;  %v4900_v58 = vcombine.high %v4899_v57, %v25292_v44  ;;  %v17798_v53 = vpop.f32.mrb[43].mxu1  ;;  %v9633_v52 = vsel %vm7558_vm2, %v5263_v21, 0  ;;  %v2659_v34 = vrot.slane %v2652_v54, %v19769_v8  ;;  %v10545_v7 = vsel %vm7558_vm2, %v21069_v24, -inf }
 0x4d2   :  { %5338 = vrot.lane.b32.xlu1 %v25332_v23, %s19193_s0  ;;  %17975 = vmatprep.mubr.msk.bf16.mxu1 %vm19202_vm1, %v25293_v31  ;;  %v5268_v35 = vshrl.u32 %v4925_v22, 16  ;;  %v3022_v27 = vshrl.u32 %v2684_v63, 16  ;;  %v2685_v40 = vcombine.high %v2684_v63, %v25292_v44  ;;  %v10506_v54 = vsel %vm7558_vm2, %v20891_v41, -inf }
 0x4d3   :  { %17985 = vmatprep.subr.bf16.mxu1 %v25293_v31  ;;  %v5266_v26 = vpack.i.b16 %v4925_v22, %v4900_v58  ;;  %v5267_v28 = vshrl.u32 %v4900_v58, 16  ;;  %v3020_v42 = vpack.i.b16 %v2684_v63, %v2659_v34  ;;  %v21186_v17 = vpop.f32.mrb[44].mxu1  ;;  %v3021_v56 = vshrl.u32 %v2659_v34, 16 }
 0x4d4   :  { %25336 = vst [vmem:[#allocation21_spill] sm:$0xff] %v21186_v17  ;;  %v17809_v57 = vpop.f32.mrb[45].mxu1  ;;  %v2660_v23 = vcombine.high %v2659_v34, %v25292_v44  ;;  %v3028_v2 = vshrl.u32 %v2685_v40, 16  ;;  %v10518_v48 = vsel %vm7558_vm2, %v21029_v18, -inf  ;;  %v10530_v53 = vsel %vm7558_vm2, %v21102_v9, -inf }
 0x4d5   :  { %10513 = vmax.xlane.f32.xlu0 %v10512_v61  ;;  %v5269_v30 = vpack.i.b16 %v5268_v35, %v5267_v28  ;;  %v9679_v46 = vsel %vm7558_vm2, %v5266_v26, 0  ;;  %v8292_v45 = vpop.f32.mrb[46].mxu1  ;;  %v3023_v50 = vpack.i.b16 %v3022_v27, %v3021_v56  ;;  %v21208_v61 = vpop.permute.xlu0 %3090  ;;  %v10536_v26 = vsel %vm7558_vm2, %v21134_v14, -inf }
 0x4d6   :  { %5354 = vrot.lane.b32.xlu1 %v25334_v5, %s19193_s0  ;;  %17970 = vmatmul.mubr.msk.bf16.vlgmr.msra.gmra.mrb[84].mxu0 %vm7558_vm2, %v3014_v38  ;;  %v17810_v25 = vpop.f32.mrb[47].mxu1  ;;  %v3026_v55 = vpack.i.b16 %v2685_v40, %v2660_v23  ;;  %v3027_v39 = vshrl.u32 %v2660_v23, 16 }
 0x4d7   :  { %17980 = vmatpush3.bf16.xpose.msra.mxu0 %v9587_v4  ;;  %17981 = vmatprep.mubr.msk.bf16.mxu0 %vm19202_vm1, %v25293_v31  ;;  %v9725_v15 = vsel %vm7558_vm2, %v5269_v30, 0 }
 0x4d8   :  { %17991 = vmatprep.subr.bf16.mxu0 %v25293_v31  ;;  %17976 = vmatmul.mubr.msk.bf16.vlgmr.msra.gmra.mrb[100].mxu1 %vm7558_vm2, %v3017_v47  ;;  %v3029_v37 = vpack.i.b16 %v3028_v2, %v3027_v39  ;;  %v10524_v47 = vsel %vm7558_vm2, %v21064_v43, -inf  ;;  %v10542_v2 = vsel %vm7558_vm2, %v21162_v49, -inf }
 0x4d9   :  { %10534 = vmax.xlane.f32.xlu0 %v10533_v16  ;;  %17986 = vmatpush3.bf16.xpose.msra.mxu1 %v9633_v52 }
 0x4da   :  { %5370 = vrot.lane.b32.xlu1 %v25335_v62, %s19193_s0  ;;  %17987 = vmatprep.mubr.msk.bf16.mxu1 %vm19202_vm1, %v25293_v31 }
 0x4db   :  { %17997 = vmatprep.subr.bf16.mxu1 %v25293_v31 }
 0x4dd   :  { %10540 = vmax.xlane.f32.xlu0 %v10539_v20 }
 0x4de   :  { %17982 = vmatmul.mubr.msk.bf16.vlgmr.msra.gmra.mrb[88].mxu0 %vm7558_vm2, %v3020_v42 }
 0x4df   :  { %17992 = vmatpush3.bf16.xpose.msra.mxu0 %v9679_v46  ;;  %17993 = vmatprep.mubr.msk.bf16.mxu0 %vm19202_vm1, %v25293_v31 }
 0x4e0   :  { %18003 = vmatprep.subr.bf16.mxu0 %v25293_v31  ;;  %17988 = vmatmul.mubr.msk.bf16.vlgmr.msra.gmra.mrb[104].mxu1 %vm7558_vm2, %v3023_v50 }
 0x4e1   :  { %10546 = vmax.xlane.f32.xlu0 %v10545_v7  ;;  %17998 = vmatpush3.bf16.xpose.msra.mxu1 %v9725_v15 }
 0x4e2   :  { %17999 = vmatprep.mubr.msk.bf16.mxu1 %vm19202_vm1, %v25293_v31  ;;  %18009 = vmatprep.subr.bf16.mxu1 %v25293_v31 }
 0x4e6   :  { %17994 = vmatmul.mubr.msk.bf16.vlgmr.msra.gmra.mrb[92].mxu0 %vm7558_vm2, %v3026_v55 }
 0x4e7   :  { %18005 = vmatprep.mubr.msk.bf16.mxu0 %vm19202_vm1, %v25293_v31 }
 0x4e8   :  { %18000 = vmatmul.mubr.msk.bf16.vlgmr.msra.gmra.mrb[108].mxu1 %vm7558_vm2, %v3029_v37 }
 0x4e9   :  { %18011 = vmatprep.mubr.msk.bf16.mxu1 %vm19202_vm1, %v25293_v31 }
 0x4ec   :  { %v21210_v38 = vpop.permute.xlu1 %3106 }
 0x4f0   :  { %v21212_v6 = vpop.permute.xlu0 %3122 }
 0x4f4   :  { %v21218_v22 = vpop.permute.xlu0 %3092 }
 0x4fc   :  { %v21214_v21 = vpop.permute.xlu1 %3108  ;;  %v21224_v4 = vpop.permute.xlu0 %3124 }
 0x4fe   :  { %10507 = vmax.xlane.f32.xlu1 %v10506_v54  ;;  %v21236_v27 = vpop.f32.mrb[32].mxu0 }
 0x4ff   :  { %25337 = vst [vmem:[#allocation19_spill] sm:$0xff] %v21236_v27  ;;  %v17815_v30 = vpop.f32.mrb[33].mxu0  ;;  %v10551_v57 = vsel %vm7558_vm2, %v21236_v27, -inf }
 0x500   :  { %v21220_v5 = vpop.permute.xlu1 %3140  ;;  %v5319_v58 = vpop.permute.xlu0 %5318  ;;  %10552 = vmax.xlane.f32.xlu0 %v10551_v57 }
 0x501   :  { %v5386_v34 = vshrl.u32 %v5319_v58, 16  ;;  %v8338_v45 = vpop.f32.mrb[34].mxu0  ;;  %v21244_v50 = vpop.f32.mrb[48].mxu1 }
 0x502   :  { %10519 = vmax.xlane.f32.xlu1 %v10518_v48  ;;  %25338 = vst [vmem:[#allocation42_spill] sm:$0xff] %v21244_v50  ;;  %v17816_v25 = vpop.f32.mrb[35].mxu0  ;;  %v17821_v15 = vpop.f32.mrb[49].mxu1 }
 0x503   :  { %v8384_v55 = vpop.f32.mrb[50].mxu1 }
 0x504   :  { %v5335_v60 = vpop.permute.xlu1 %5334  ;;  %v17822_v48 = vpop.f32.mrb[51].mxu1 }
 0x505   :  { %v5387_v16 = vshrl.u32 %v5335_v60, 16  ;;  %v21230_v52 = vpack.i.b16 %v5335_v60, %v5319_v58 }
 0x506   :  { %10525 = vmax.xlane.f32.xlu1 %v10524_v47 }
 0x507   :  { %v21232_v62 = vpack.i.b16 %v5387_v16, %v5386_v34  ;;  %v5510_v28 = vcombine.high %v21230_v52, %v19738_v10  ;;  %v5321_v16 = vpop.permute.xlu0 %5320  ;;  %v10548_v34 = vsel %vm7558_vm2, %v21186_v17, -inf }
 0x508   :  { %v5351_v63 = vpop.permute.xlu1 %5350  ;;  %v21274_v15 = vpop.f32.mrb[52].mxu1 }
 0x509   :  { %v5394_v20 = vshrl.u32 %v5351_v63, 16  ;;  %v5576_v23 = vcombine.high %v21232_v62, %v19738_v10  ;;  %v5524_v39 = vrot.slane %v5510_v28, %v19753_v13  ;;  %25340 = vst [vmem:[#allocation44_spill] sm:$0xff] %v21274_v15 }
 0x50a   :  { %10531 = vmax.xlane.f32.xlu1 %v10530_v53 }
 0x50b   :  { %v5590_v58 = vrot.slane %v5576_v23, %v19753_v13  ;;  %v5402_v23 = vshrl.u32 %v5321_v16, 16 }
 0x50c   :  { %v5367_v35 = vpop.permute.xlu1 %5366 }
 0x50d   :  { %v21240_v42 = vpack.i.b16 %v5367_v35, %v5351_v63  ;;  %v5395_v56 = vshrl.u32 %v5367_v35, 16  ;;  %v21262_v35 = vpop.f32.mrb[36].mxu0 }
 0x50e   :  { %10537 = vmax.xlane.f32.xlu1 %v10536_v26  ;;  %25339 = vst [vmem:[#allocation43_spill] sm:$0xff] %v21262_v35  ;;  %v10557_v30 = vsel %vm7558_vm2, %v21262_v35, -inf }
 0x50f   :  { %v21246_v40 = vpack.i.b16 %v5395_v56, %v5394_v20  ;;  %v5525_v7 = vcombine.high %v21240_v42, %v19738_v10  ;;  %v17827_v56 = vpop.f32.mrb[37].mxu0  ;;  %10558 = vmax.xlane.f32.xlu0 %v10557_v30 }
 0x510   :  { %v5337_v46 = vpop.permute.xlu1 %5336  ;;  %v8430_v25 = vpop.f32.mrb[38].mxu0 }
 0x511   :  { %v5539_v37 = vrot.slane %v5525_v7, %v19753_v13  ;;  %v5591_v54 = vcombine.high %v21246_v40, %v19738_v10  ;;  %v5403_v20 = vshrl.u32 %v5337_v46, 16  ;;  %v21272_v45 = vpack.i.b16 %v5337_v46, %v5321_v16 }
 0x512   :  { %10543 = vmax.xlane.f32.xlu1 %v10542_v2  ;;  %v10554_v46 = vsel %vm7558_vm2, %v21244_v50, -inf }
 0x513   :  { %v5556_v47 = vcombine.low %v5524_v39, %v5539_v37  ;;  %v5557_v63 = vcombine.high %v5524_v39, %v5539_v37  ;;  %v5605_v53 = vrot.slane %v5591_v54, %v19753_v13  ;;  %v17828_v39 = vpop.f32.mrb[39].mxu0  ;;  %v17833_v37 = vpop.f32.mrb[53].mxu1  ;;  %v21288_v16 = vpack.i.b16 %v5403_v20, %v5402_v23 }
 0x514   :  { %v5353_v60 = vpop.permute.xlu1 %5352  ;;  %v10560_v23 = vsel %vm7558_vm2, %v21274_v15, -inf }
 0x515   :  { %v21265_v26 = vrot.slane %v5556_v47, %v19769_v8  ;;  %v21268_v28 = vrot.slane %v5557_v63, %v19769_v8  ;;  %v5622_v57 = vcombine.low %v5590_v58, %v5605_v53  ;;  %v5623_v2 = vcombine.high %v5590_v58, %v5605_v53  ;;  %v8476_v47 = vpop.f32.mrb[54].mxu1 }
 0x516   :  { %10549 = vmax.xlane.f32.xlu1 %v10548_v34  ;;  %v17834_v58 = vpop.f32.mrb[55].mxu1  ;;  %v5642_v53 = vcombine.high %v21272_v45, %v19738_v10  ;;  %v5410_v34 = vshrl.u32 %v5353_v60, 16 }
 0x517   :  { %v21279_v54 = vrot.slane %v5622_v57, %v19769_v8  ;;  %v21286_v63 = vrot.slane %v5623_v2, %v19769_v8  ;;  %v21304_v2 = vpop.f32.mrb[40].mxu0 }
 0x518   :  { %v5369_v7 = vpop.permute.xlu1 %5368  ;;  %25341 = vst [vmem:[#allocation45_spill] sm:$0xff] %v21304_v2  ;;  %v10563_v37 = vsel %vm7558_vm2, %v21304_v2, -inf }
 0x519   :  { %v21292_v56 = vpack.i.b16 %v5369_v7, %v5353_v60  ;;  %v5411_v30 = vshrl.u32 %v5369_v7, 16  ;;  %v5708_v60 = vcombine.high %v21288_v16, %v19738_v10  ;;  %v17839_v7 = vpop.f32.mrb[41].mxu0  ;;  %10564 = vmax.xlane.f32.xlu0 %v10563_v37 }
 0x51a   :  { %10555 = vmax.xlane.f32.xlu1 %v10554_v46  ;;  %v5656_v46 = vrot.slane %v5642_v53, %v19753_v13 }
 0x51b   :  { %v21298_v39 = vpack.i.b16 %v5411_v30, %v5410_v34  ;;  %v5657_v20 = vcombine.high %v21292_v56, %v19738_v10  ;;  %v8522_v34 = vpop.f32.mrb[42].mxu0  ;;  %v21314_v30 = vpop.f32.mrb[56].mxu1  ;;  %v5722_v15 = vrot.slane %v5708_v60, %v19753_v13 }
 0x51c   :  { %v21312_v58 = vpop.permute.xlu1 %5340  ;;  %25343 = vst [vmem:[#allocation47_spill] sm:$0xff] %v21314_v30  ;;  %v17840_v57 = vpop.f32.mrb[43].mxu0 }
 0x51d   :  { %v5671_v47 = vrot.slane %v5657_v20, %v19753_v13  ;;  %25342 = vst [vmem:[#allocation46_spill] sm:$0xff] %v21312_v58  ;;  %v5723_v25 = vcombine.high %v21298_v39, %v19738_v10  ;;  %v17845_v48 = vpop.f32.mrb[57].mxu1  ;;  %v1008_v20 = vpack.i.b16 %v20699_v36, %v20704_v29 }
 0x51e   :  { %10561 = vmax.xlane.f32.xlu1 %v10560_v23  ;;  %v8568_v55 = vpop.f32.mrb[58].mxu1  ;;  %v25344_v48 = vld [vmem:[#allocation27_spill] sm:$0xff] }
 0x51f   :  { %v5688_v23 = vcombine.low %v5656_v46, %v5671_v47  ;;  %v5689_v7 = vcombine.high %v5656_v46, %v5671_v47  ;;  %v5737_v53 = vrot.slane %v5723_v25, %v19753_v13  ;;  %v17846_v58 = vpop.f32.mrb[59].mxu1  ;;  %v1000_v46 = vpack.i.b16 %v20693_v1, %v25344_v48 }
 0x520   :  { %v1003_v55 = vshrl.u32 %v20693_v1, 16  ;;  %v3139_v47 = vpop.permute.xlu1 %3138  ;;  %v1010_v58 = vshrl.u32 %v20704_v29, 16  ;;  %v1002_v1 = vshrl.u32 %v25344_v48, 16  ;;  %v1837_v25 = vcombine.high %v1008_v20, %v19738_v10 }
 0x521   :  { %v21323_v34 = vrot.slane %v5688_v23, %v19769_v8  ;;  %v21326_v37 = vrot.slane %v5689_v7, %v19769_v8  ;;  %v5754_v2 = vcombine.low %v5722_v15, %v5737_v53  ;;  %v5755_v57 = vcombine.high %v5722_v15, %v5737_v53  ;;  %v21337_v7 = vpop.f32.mrb[44].mxu0 }
 0x522   :  { %v1011_v23 = vshrl.u32 %v20699_v36, 16  ;;  %25345 = vst [vmem:[#allocation48_spill] sm:$0xff] %v21337_v7  ;;  %v1844_v35 = vrot.slane %v1008_v20, %v19753_v13  ;;  %v17851_v60 = vpop.f32.mrb[45].mxu0  ;;  %v10569_v29 = vsel %vm7558_vm2, %v21337_v7, -inf  ;;  %v21350_v36 = vpop.f32.mrb[60].mxu1  ;;  %v3251_v50 = vshrl.u32 %v3139_v47, 16 }
 0x523   :  { %v21340_v15 = vrot.slane %v5754_v2, %v19769_v8  ;;  %v21343_v53 = vrot.slane %v5755_v57, %v19769_v8  ;;  %v8614_v14 = vpop.f32.mrb[46].mxu0  ;;  %25347 = vst [vmem:[#allocation50_spill] sm:$0xff] %v21350_v36  ;;  %10570 = vmax.xlane.f32.xlu0 %v10569_v29  ;;  %v10566_v48 = vsel %vm7558_vm2, %v21314_v30, -inf  ;;  %v1829_v20 = vrot.slane %v1000_v46, %v19753_v13  ;;  %v17857_v27 = vpop.f32.mrb[61].mxu1 }
 0x524   :  { %v3243_v60 = vshrl.u32 %v21210_v38, 16  ;;  %v3250_v7 = vshrl.u32 %v21212_v6, 16  ;;  %v17852_v14 = vpop.f32.mrb[47].mxu0  ;;  %10567 = vmax.xlane.f32.xlu1 %v10566_v48  ;;  %v1004_v29 = vpack.i.b16 %v1003_v55, %v1002_v1  ;;  %v1822_v17 = vcombine.high %v1000_v46, %v19738_v10  ;;  %v8660_v24 = vpop.f32.mrb[62].mxu1 }
 0x525   :  { %25346 = vst [vmem:[#allocation49_spill] sm:$0xff] %v21343_v53  ;;  %v1012_v2 = vpack.i.b16 %v1011_v23, %v1010_v58  ;;  %v21363_v57 = vpack.i.b16 %v3139_v47, %v21212_v6  ;;  %v1852_v49 = vcombine.low %v1829_v20, %v1844_v35  ;;  %v3242_v30 = vshrl.u32 %v21208_v61, 16  ;;  %v17858_v3 = vpop.f32.mrb[63].mxu1 }
 0x526   :  { %v21366_v33 = vpack.i.b16 %v3251_v50, %v3250_v7  ;;  %v1851_v59 = vrot.slane %v1837_v25, %v19753_v13  ;;  %v1853_v12 = vcombine.high %v1829_v20, %v1844_v35  ;;  %v21371_v27 = vpack.i.b16 %v21210_v38, %v21208_v61  ;;  %v21380_v50 = vpop.f32.mrb[48].mxu0  ;;  %v21395_v7 = vpop.f32.mrb[64].mxu1 }
 0x527   :  { %v10572_v1 = vsel %vm7558_vm2, %v21350_v36, -inf  ;;  %v21375_v24 = vpack.i.b16 %v3243_v60, %v3242_v30  ;;  %v1836_v6 = vrot.slane %v1822_v17, %v19753_v13  ;;  %v1888_v48 = vcombine.high %v1004_v29, %v19738_v10  ;;  %25348 = vst [vmem:[#allocation51_spill] sm:$0xff] %v21380_v50  ;;  %v17863_v46 = vpop.f32.mrb[49].mxu0  ;;  %25349 = vst [vmem:[#allocation52_spill] sm:$0xff] %v21395_v7  ;;  %v17869_v14 = vpop.f32.mrb[65].mxu1  ;;  %v25351_v36 = vld [vmem:[#allocation33_spill] sm:$0xff] }
 0x528   :  { %10573 = vmax.xlane.f32.xlu1 %v10572_v1  ;;  %v1903_v3 = vcombine.high %v1012_v2, %v19738_v10  ;;  %v4084_v35 = vrot.slane %v21363_v57, %v19753_v13  ;;  %v21385_v61 = vrot.slane %v1852_v49, %v19769_v8  ;;  %v1910_v38 = vrot.slane %v1012_v2, %v19753_v13  ;;  %v8706_v23 = vpop.f32.mrb[50].mxu0  ;;  %v8752_v1 = vpop.f32.mrb[66].mxu1 }
 0x529   :  { %v10575_v30 = vsel %vm7558_vm2, %v21380_v50, -inf  ;;  %v4150_v17 = vrot.slane %v21366_v33, %v19753_v13  ;;  %v1867_v55 = vrot.slane %v1853_v12, %v19769_v8  ;;  %v1868_v25 = vcombine.low %v1836_v6, %v1851_v59  ;;  %v17864_v60 = vpop.f32.mrb[51].mxu0  ;;  %v25350_v50 = vld [vmem:[#allocation31_spill] sm:$0xff]  ;;  %v17870_v9 = vpop.f32.mrb[67].mxu1 }
 0x52a   :  { %v1869_v47 = vcombine.high %v1836_v6, %v1851_v59  ;;  %v4069_v58 = vrot.slane %v21371_v27, %v19753_v13  ;;  %10576 = vmax.xlane.f32.xlu0 %v10575_v30  ;;  %v1895_v49 = vrot.slane %v1004_v29, %v19753_v13  ;;  %v1018_v2 = vshrl.u32 %v20159_v11, 16 }
 0x52b   :  { %v4135_v20 = vrot.slane %v21375_v24, %v19753_v13  ;;  %v1902_v12 = vrot.slane %v1888_v48, %v19753_v13  ;;  %v1917_v59 = vrot.slane %v1903_v3, %v19753_v13  ;;  %v1024_v30 = vpack.i.b16 %v25351_v36, %v25350_v50 }
 0x52c   :  { %v4092_v6 = vcombine.low %v4069_v58, %v4084_v35  ;;  %v4093_v46 = vcombine.high %v4069_v58, %v4084_v35  ;;  %v1918_v23 = vcombine.low %v1895_v49, %v1910_v38  ;;  %v21406_v0 = vrot.slane %v1868_v25, %v19769_v8  ;;  %v25352_v35 = vld [vmem:[#allocation32_spill] sm:$0xff] }
 0x52d   :  { %v4158_v29 = vcombine.low %v4135_v20, %v4150_v17  ;;  %v4159_v51 = vcombine.high %v4135_v20, %v4150_v17  ;;  %v21409_v60 = vrot.slane %v1869_v47, %v19769_v8  ;;  %v1919_v14 = vcombine.high %v1895_v49, %v1910_v38  ;;  %v21418_v20 = vpop.f32.mrb[52].mxu0 }
 0x52e   :  { %v2686_v48 = vcombine.low %v21385_v61, %v1867_v55  ;;  %v17176_v3 = vcombine.high %v21385_v61, %v1867_v55  ;;  %v1016_v58 = vpack.i.b16 %v25352_v35, %v20159_v11  ;;  %v1019_v1 = vshrl.u32 %v25352_v35, 16  ;;  %25353 = vst [vmem:[#allocation53_spill] sm:$0xff] %v21418_v20  ;;  %v17875_v55 = vpop.f32.mrb[53].mxu0 }
 0x52f   :  { %v1027_v9 = vshrl.u32 %v25351_v36, 16  ;;  %v1026_v17 = vshrl.u32 %v25350_v50, 16  ;;  %v4100_v25 = vrot.slane %v4092_v6, %v19769_v8  ;;  %v4107_v47 = vrot.slane %v4093_v46, %v19769_v8  ;;  %v8798_v43 = vpop.f32.mrb[54].mxu0 }
 0x530   :  { %v10578_v38 = vsel %vm7558_vm2, %v21395_v7, -inf  ;;  %v1969_v61 = vcombine.high %v1024_v30, %v19738_v10  ;;  %v10581_v49 = vsel %vm7558_vm2, %v21418_v20, -inf  ;;  %v4166_v11 = vrot.slane %v4158_v29, %v19769_v8  ;;  %v21433_v7 = vpop.f32.mrb[68].mxu1 }
 0x531   :  { %v4173_v36 = vrot.slane %v4159_v51, %v19769_v8  ;;  %10579 = vmax.xlane.f32.xlu1 %v10578_v38  ;;  %v21430_v50 = vrot.slane %v1918_v23, %v19769_v8  ;;  %v1934_v6 = vcombine.low %v1902_v12, %v1917_v59  ;;  %v1935_v35 = vcombine.high %v1902_v12, %v1917_v59  ;;  %v17876_v38 = vpop.f32.mrb[55].mxu0  ;;  %v17881_v23 = vpop.f32.mrb[69].mxu1 }
 0x532   :  { %v1976_v46 = vrot.slane %v1024_v30, %v19753_v13  ;;  %25354 = vst [vmem:[#allocation54_spill] sm:$0xff] %v21433_v7  ;;  %10582 = vmax.xlane.f32.xlu0 %v10581_v49  ;;  %v21436_v55 = vrot.slane %v1919_v14, %v19769_v8  ;;  %v21439_v20 = vrot.slane %v2686_v48, %v19753_v13  ;;  %v8844_v59 = vpop.f32.mrb[70].mxu1  ;;  %v10584_v48 = vsel %vm7558_vm2, %v21433_v7, -inf }
 0x533   :  { %v1954_v51 = vcombine.high %v1016_v58, %v19738_v10  ;;  %v1028_v29 = vpack.i.b16 %v1027_v9, %v1026_v17  ;;  %v1020_v19 = vpack.i.b16 %v1019_v1, %v1018_v2  ;;  %v1961_v12 = vrot.slane %v1016_v58, %v19753_v13  ;;  %v17882_v49 = vpop.f32.mrb[71].mxu1 }
 0x534   :  { %v4926_v30 = vcombine.low %v4100_v25, %v4107_v47  ;;  %v17208_v43 = vcombine.high %v4100_v25, %v4107_v47  ;;  %v21444_v18 = vrot.slane %v17176_v3, %v19753_v13  ;;  %v1983_v14 = vrot.slane %v1969_v61, %v19753_v13 }
 0x535   :  { %v4951_v32 = vcombine.low %v4166_v11, %v4173_v36  ;;  %v21450_v9 = vrot.slane %v1934_v6, %v19769_v8  ;;  %v21453_v2 = vrot.slane %v1935_v35, %v19769_v8  ;;  %v1984_v1 = vcombine.low %v1961_v12, %v1976_v46  ;;  %10585 = vmax.xlane.f32.xlu1 %v10584_v48  ;;  %v21461_v6 = vpop.f32.mrb[56].mxu0 }
 0x536   :  { %v1968_v3 = vrot.slane %v1954_v51, %v19753_v13  ;;  %v1985_v17 = vcombine.high %v1961_v12, %v1976_v46  ;;  %v2042_v25 = vrot.slane %v1028_v29, %v19753_v13  ;;  %v17209_v47 = vcombine.high %v4166_v11, %v4173_v36  ;;  %25355 = vst [vmem:[#allocation55_spill] sm:$0xff] %v21461_v6  ;;  %v17887_v58 = vpop.f32.mrb[57].mxu0 }
 0x537   :  { %v2027_v61 = vrot.slane %v1020_v19, %v19753_v13  ;;  %v2035_v38 = vcombine.high %v1028_v29, %v19738_v10  ;;  %v4933_v35 = vrot.slane %v4926_v30, %v19753_v13  ;;  %v4941_v23 = vrot.slane %v17208_v43, %v19753_v13  ;;  %v8890_v30 = vpop.f32.mrb[58].mxu0  ;;  %v21474_v43 = vpop.f32.mrb[72].mxu1 }
 0x538   :  { %v2000_v59 = vcombine.low %v1968_v3, %v1983_v14  ;;  %v2001_v49 = vcombine.high %v1968_v3, %v1983_v14  ;;  %v10587_v51 = vsel %vm7558_vm2, %v21461_v6, -inf  ;;  %v4958_v46 = vrot.slane %v4951_v32, %v19753_v13  ;;  %25356 = vst [vmem:[#allocation56_spill] sm:$0xff] %v21474_v43  ;;  %v17888_v58 = vpop.f32.mrb[59].mxu0  ;;  %v17893_v3 = vpop.f32.mrb[73].mxu1 }
 0x539   :  { %v2711_v11 = vcombine.low %v21430_v50, %v21436_v55  ;;  %v17177_v36 = vcombine.high %v21430_v50, %v21436_v55  ;;  %v2020_v29 = vcombine.high %v1020_v19, %v19738_v10  ;;  %v1992_v12 = vrot.slane %v1984_v1, %v19769_v8  ;;  %10588 = vmax.xlane.f32.xlu0 %v10587_v51  ;;  %v8936_v1 = vpop.f32.mrb[74].mxu1 }
 0x53a   :  { %v1999_v14 = vrot.slane %v1985_v17, %v19769_v8  ;;  %v2050_v48 = vcombine.low %v2027_v61, %v2042_v25  ;;  %v10590_v32 = vsel %vm7558_vm2, %v21474_v43, -inf  ;;  %v4966_v7 = vrot.slane %v17209_v47, %v19753_v13  ;;  %v17894_v58 = vpop.f32.mrb[75].mxu1 }
 0x53b   :  { %v21485_v55 = vrot.slane %v2035_v38, %v19753_v13  ;;  %10591 = vmax.xlane.f32.xlu1 %v10590_v32  ;;  %v4942_v17 = vcombine.low %v4933_v35, %v4941_v23  ;;  %v21490_v30 = vrot.slane %v2000_v59, %v19769_v8  ;;  %v21493_v47 = vrot.slane %v2001_v49, %v19769_v8  ;;  %v21526_v58 = vpop.f32.mrb[76].mxu1 }
 0x53c   :  { %v4967_v3 = vcombine.low %v4958_v46, %v4966_v7  ;;  %v21496_v50 = vrot.slane %v2020_v29, %v19753_v13  ;;  %v2051_v19 = vcombine.high %v2027_v61, %v2042_v25  ;;  %v2718_v38 = vrot.slane %v2711_v11, %v19753_v13  ;;  %v21510_v61 = vpop.f32.mrb[60].mxu0  ;;  %25358 = vst [vmem:[#allocation58_spill] sm:$0xff] %v21526_v58 }
 0x53d   :  { %v2726_v32 = vrot.slane %v17177_v36, %v19753_v13  ;;  %v21501_v35 = vrot.slane %v2050_v48, %v19769_v8  ;;  %v2786_v23 = vcombine.low %v1992_v12, %v1999_v14  ;;  %v17180_v1 = vcombine.high %v1992_v12, %v1999_v14  ;;  %25357 = vst [vmem:[#allocation57_spill] sm:$0xff] %v21510_v61  ;;  %v17899_v29 = vpop.f32.mrb[61].mxu0 }
 0x53e   :  { %v4974_v59 = vrot.slane %v4967_v3, %v19769_v8  ;;  %v4077_v25 = vcombine.high %v21363_v57, %v19738_v10  ;;  %v4949_v46 = vrot.slane %v4942_v17, %v19769_v8  ;;  %v4143_v36 = vcombine.high %v21366_v33, %v19738_v10  ;;  %v8982_v17 = vpop.f32.mrb[62].mxu0 }
 0x53f   :  { %v10593_v12 = vsel %vm7558_vm2, %v21510_v61, -inf  ;;  %v2702_v14 = vcombine.low %v21439_v20, %v21444_v18  ;;  %v21522_v48 = vrot.slane %v2051_v19, %v19769_v8  ;;  %v4062_v57 = vcombine.high %v21371_v27, %v19738_v10  ;;  %v17900_v20 = vpop.f32.mrb[63].mxu0  ;;  %v17905_v19 = vpop.f32.mrb[77].mxu1 }
 0x540   :  { %10594 = vmax.xlane.f32.xlu0 %v10593_v12  ;;  %v5272_v3 = vpack.i.b16 %v4974_v59, %v4949_v46  ;;  %v2727_v11 = vcombine.low %v2718_v38, %v2726_v32  ;;  %v21529_v33 = vrot.slane %v2786_v23, %v19753_v13  ;;  %v21532_v29 = vrot.slane %v17180_v1, %v19753_v13  ;;  %v9028_v51 = vpop.f32.mrb[78].mxu1  ;;  %v21548_v1 = vpop.permute.xlu1 %5356 }
 0x541   :  { %v4128_v18 = vcombine.high %v21375_v24, %v19738_v10  ;;  %v10596_v27 = vsel %vm7558_vm2, %v21526_v58, -inf  ;;  %v3267_v17 = vshrl.u32 %v21220_v5, 16  ;;  %v4091_v12 = vrot.slane %v4077_v25, %v19753_v13  ;;  %25360 = vst [vmem:[#allocation59_spill] sm:$0xff] %v21548_v1  ;;  %v17906_v20 = vpop.f32.mrb[79].mxu1 }
 0x542   :  { %10597 = vmax.xlane.f32.xlu1 %v10596_v27  ;;  %v9771_v38 = vsel %vm7558_vm2, %v5272_v3, 0  ;;  %v25359_v32 = vcombine.low %v21406_v0, %v21409_v60  ;;  %v4157_v24 = vrot.slane %v4143_v36, %v19753_v13  ;;  %v5273_v19 = vshrl.u32 %v4949_v46, 16 }
 0x543   :  { %18004 = vmatpush3.bf16.xpose.msra.mxu0 %v9771_v38  ;;  %v5274_v7 = vshrl.u32 %v4974_v59, 16  ;;  %v2709_v25 = vrot.slane %v2702_v14, %v19769_v8  ;;  %v4076_v51 = vrot.slane %v4062_v57, %v19753_v13  ;;  %v3259_v3 = vshrl.u32 %v21214_v21, 16 }
 0x544   :  { %v21545_v23 = vrot.slane %v25359_v32, %v19753_v13  ;;  %v3266_v27 = vshrl.u32 %v21224_v4, 16  ;;  %v2734_v49 = vrot.slane %v2727_v11, %v19769_v8  ;;  %18015 = vmatprep.subr.bf16.mxu0 %v25293_v31  ;;  %v4142_v36 = vrot.slane %v4128_v18, %v19753_v13 }
 0x545   :  { %v5275_v32 = vpack.i.b16 %v5274_v7, %v5273_v19  ;;  %v4950_v20 = vcombine.high %v4949_v46, %v25292_v44  ;;  %v4975_v38 = vcombine.high %v4974_v59, %v25292_v44  ;;  %v3258_v1 = vshrl.u32 %v21218_v22, 16 }
 0x546   :  { %v21560_v14 = vpack.i.b16 %v3267_v17, %v3266_v27  ;;  %v4108_v57 = vcombine.low %v4076_v51, %v4091_v12  ;;  %v4109_v61 = vcombine.high %v4076_v51, %v4091_v12  ;;  %v4174_v6 = vcombine.low %v4142_v36, %v4157_v24  ;;  %v21573_v17 = vpop.permute.xlu1 %5372 }
 0x547   :  { %v4175_v58 = vcombine.high %v4142_v36, %v4157_v24  ;;  %v9817_v43 = vsel %vm7558_vm2, %v5275_v32, 0  ;;  %v5278_v11 = vpack.i.b16 %v4975_v38, %v4950_v20  ;;  %v21563_v53 = vpack.i.b16 %v3259_v3, %v3258_v1  ;;  %25361 = vst [vmem:[#allocation60_spill] sm:$0xff] %v21573_v17 }
 0x548   :  { %v21567_v7 = vpack.i.b16 %v21220_v5, %v21224_v4  ;;  %18010 = vmatpush3.bf16.xpose.msra.mxu1 %v9817_v43  ;;  %v3032_v46 = vpack.i.b16 %v2734_v49, %v2709_v25  ;;  %v5280_v59 = vshrl.u32 %v4975_v38, 16  ;;  %v21571_v18 = vpack.i.b16 %v21214_v21, %v21218_v22 }
 0x549   :  { %v3034_v12 = vshrl.u32 %v2734_v49, 16  ;;  %18021 = vmatprep.subr.bf16.mxu1 %v25293_v31  ;;  %v5279_v24 = vshrl.u32 %v4950_v20, 16  ;;  %v25362_v1 = vcombine.high %v21406_v0, %v21409_v60  ;;  %v4282_v5 = vrot.slane %v21560_v14, %v19753_v13 }
 0x54a   :  { %v4116_v4 = vrot.slane %v4108_v57, %v19769_v8  ;;  %v4123_v43 = vrot.slane %v4109_v61, %v19769_v8  ;;  %18006 = vmatmul.mubr.msk.bf16.vlgmr.msra.gmra.mrb[96].mxu0 %vm7558_vm2, %v3032_v46  ;;  %v9863_v21 = vsel %vm7558_vm2, %v5278_v11, 0  ;;  %v4182_v22 = vrot.slane %v4174_v6, %v19769_v8 }
 0x54b   :  { %v2751_v19 = vrot.slane %v25362_v1, %v19753_v13  ;;  %v4189_v51 = vrot.slane %v4175_v58, %v19769_v8  ;;  %18016 = vmatpush3.bf16.xpose.msra.mxu0 %v9863_v21  ;;  %v3033_v3 = vshrl.u32 %v2709_v25, 16  ;;  %v5281_v27 = vpack.i.b16 %v5280_v59, %v5279_v24  ;;  %18017 = vmatprep.mubr.msk.bf16.mxu0 %vm19202_vm1, %v25293_v31  ;;  %v21607_v1 = vpop.permute.xlu1 %5342 }
 0x54c   :  { %v4267_v0 = vrot.slane %v21563_v53, %v19753_v13  ;;  %v4216_v60 = vrot.slane %v21567_v7, %v19753_v13  ;;  %v2735_v61 = vcombine.high %v2734_v49, %v25292_v44  ;;  %18027 = vmatprep.subr.bf16.mxu0 %v25293_v31  ;;  %v17182_v6 = vcombine.high %v21490_v30, %v21493_v47 }
 0x54d   :  { %v4201_v58 = vrot.slane %v21571_v18, %v19753_v13  ;;  %v3035_v36 = vpack.i.b16 %v3034_v12, %v3033_v3  ;;  %v2710_v32 = vcombine.high %v2709_v25, %v25292_v44  ;;  %v4976_v57 = vcombine.low %v4116_v4, %v4123_v43  ;;  %25364 = vst [vmem:[#allocation61_spill] sm:$0xff] %v21607_v1  ;;  %v25440_v1 = vld [vmem:[#allocation36_spill] sm:$0xff] }
 0x54e   :  { %v4290_v20 = vcombine.low %v4267_v0, %v4282_v5  ;;  %v4291_v38 = vcombine.high %v4267_v0, %v4282_v5  ;;  %v17210_v11 = vcombine.high %v4116_v4, %v4123_v43  ;;  %v25363_v46 = vcombine.low %v21496_v50, %v21485_v55 }
 0x54f   :  { %v5001_v59 = vcombine.low %v4182_v22, %v4189_v51  ;;  %v17211_v24 = vcombine.high %v4182_v22, %v4189_v51  ;;  %18012 = vmatmul.mubr.msk.bf16.vlgmr.msra.gmra.mrb[112].mxu1 %vm7558_vm2, %v3035_v36  ;;  %v9909_v12 = vsel %vm7558_vm2, %v5281_v27, 0  ;;  %v4224_v21 = vcombine.low %v4201_v58, %v4216_v60 }
 0x550   :  { %v21605_v49 = vrot.slane %v25363_v46, %v19769_v8  ;;  %v4225_v25 = vcombine.high %v4201_v58, %v4216_v60  ;;  %18022 = vmatpush3.bf16.xpose.msra.mxu1 %v9909_v12  ;;  %v3038_v5 = vpack.i.b16 %v2735_v61, %v2710_v32  ;;  %v2752_v4 = vcombine.low %v21545_v23, %v2751_v19 }
 0x551   :  { %v25365_v43 = vcombine.high %v21496_v50, %v21485_v55  ;;  %18023 = vmatprep.mubr.msk.bf16.mxu1 %vm19202_vm1, %v25293_v31  ;;  %v3040_v22 = vshrl.u32 %v2735_v61, 16  ;;  %v25366_v51 = vcombine.low %v21450_v9, %v21453_v2  ;;  %v25367_v0 = vcombine.high %v21450_v9, %v21453_v2  ;;  %18033 = vmatprep.subr.bf16.mxu1 %v25293_v31 }
 0x552   :  { %v4298_v19 = vrot.slane %v4290_v20, %v19769_v8  ;;  %v4305_v50 = vrot.slane %v4291_v38, %v19769_v8  ;;  %18018 = vmatmul.mubr.msk.bf16.vlgmr.msra.gmra.mrb[100].mxu0 %vm7558_vm2, %v3038_v5  ;;  %v4983_v55 = vrot.slane %v4976_v57, %v19753_v13  ;;  %v4991_v60 = vrot.slane %v17210_v11, %v19753_v13 }
 0x553   :  { %v21616_v3 = vrot.slane %v25365_v43, %v19769_v8  ;;  %v2768_v27 = vrot.slane %v25366_v51, %v19753_v13  ;;  %v2776_v23 = vrot.slane %v25367_v0, %v19753_v13  ;;  %v2811_v61 = vcombine.low %v21501_v35, %v21522_v48  ;;  %18029 = vmatprep.mubr.msk.bf16.mxu0 %vm19202_vm1, %v25293_v31 }
 0x554   :  { %v5008_v58 = vrot.slane %v5001_v59, %v19753_v13  ;;  %v5016_v36 = vrot.slane %v17211_v24, %v19753_v13  ;;  %v3039_v46 = vshrl.u32 %v2710_v32, 16  ;;  %v4232_v9 = vrot.slane %v4224_v21, %v19769_v8  ;;  %v21649_v32 = vpop.permute.xlu1 %5358 }
 0x555   :  { %v4239_v2 = vrot.slane %v4225_v25, %v19769_v8  ;;  %v4992_v20 = vcombine.low %v4983_v55, %v4991_v60  ;;  %v21643_v38 = vrot.slane %v2752_v4, %v19769_v8  ;;  %v17181_v57 = vcombine.high %v21501_v35, %v21522_v48  ;;  %25368 = vst [vmem:[#allocation62_spill] sm:$0xff] %v21649_v32 }
 0x556   :  { %v2861_v11 = vcombine.low %v21605_v49, %v21616_v3  ;;  %v5017_v59 = vcombine.low %v5008_v58, %v5016_v36  ;;  %v3041_v24 = vpack.i.b16 %v3040_v22, %v3039_v46  ;;  %v5051_v12 = vcombine.low %v4298_v19, %v4305_v50 }
 0x557   :  { %v17213_v5 = vcombine.high %v4298_v19, %v4305_v50  ;;  %v4999_v21 = vrot.slane %v4992_v20, %v19769_v8  ;;  %v2777_v43 = vcombine.low %v2768_v27, %v2776_v23  ;;  %v17183_v25 = vcombine.high %v21605_v49, %v21616_v3 }
 0x558   :  { %v4209_v4 = vcombine.high %v21567_v7, %v19738_v10  ;;  %v5024_v35 = vrot.slane %v5017_v59, %v19769_v8  ;;  %18024 = vmatmul.mubr.msk.bf16.vlgmr.msra.gmra.mrb[116].mxu1 %vm7558_vm2, %v3041_v24  ;;  %v2802_v48 = vcombine.low %v21529_v33, %v21532_v29  ;;  %v4275_v22 = vcombine.high %v21560_v14, %v19738_v10  ;;  %v21673_v58 = vpop.permute.xlu1 %5374 }
 0x559   :  { %v5026_v51 = vcombine.low %v4232_v9, %v4239_v2  ;;  %v17212_v0 = vcombine.high %v4232_v9, %v4239_v2  ;;  %18035 = vmatprep.mubr.msk.bf16.mxu1 %vm19202_vm1, %v25293_v31  ;;  %v3045_v27 = vshrl.u32 %v21643_v38, 16  ;;  %v4194_v7 = vcombine.high %v21571_v18, %v19738_v10  ;;  %25369 = vst [vmem:[#allocation63_spill] sm:$0xff] %v21673_v58 }
 0x55a   :  { %v5284_v23 = vpack.i.b16 %v5024_v35, %v4999_v21  ;;  %v5285_v19 = vshrl.u32 %v4999_v21, 16  ;;  %v5286_v50 = vshrl.u32 %v5024_v35, 16  ;;  %v4260_v55 = vcombine.high %v21563_v53, %v19738_v10 }
 0x55b   :  { %v2784_v33 = vrot.slane %v2777_v43, %v19769_v8  ;;  %v5058_v29 = vrot.slane %v5051_v12, %v19753_v13  ;;  %v5066_v14 = vrot.slane %v17213_v5, %v19753_v13  ;;  %v4223_v60 = vrot.slane %v4209_v4, %v19753_v13 }
 0x55c   :  { %v9955_v36 = vsel %vm7558_vm2, %v5284_v23, 0  ;;  %v5287_v46 = vpack.i.b16 %v5286_v50, %v5285_v19  ;;  %v21678_v18 = vcombine.high %v21643_v38, %v25292_v44  ;;  %v4289_v9 = vrot.slane %v4275_v22, %v19753_v13 }
 0x55d   :  { %v5033_v53 = vrot.slane %v5026_v51, %v19753_v13  ;;  %v5041_v2 = vrot.slane %v17212_v0, %v19753_v13  ;;  %18028 = vmatpush3.bf16.xpose.msra.mxu0 %v9955_v36  ;;  %v21684_v20 = vrot.slane %v2802_v48, %v19769_v8  ;;  %v4208_v59 = vrot.slane %v4194_v7, %v19753_v13 }
 0x55e   :  { %v10001_v24 = vsel %vm7558_vm2, %v5287_v46, 0  ;;  %18039 = vmatprep.subr.bf16.mxu0 %v25293_v31  ;;  %v2818_v12 = vrot.slane %v2811_v61, %v19753_v13  ;;  %v2826_v5 = vrot.slane %v17181_v57, %v19753_v13  ;;  %v4274_v43 = vrot.slane %v4260_v55, %v19753_v13 }
 0x55f   :  { %18034 = vmatpush3.bf16.xpose.msra.mxu1 %v10001_v24  ;;  %v3044_v4 = vpack.i.b16 %v2784_v33, %v21643_v38  ;;  %v5067_v22 = vcombine.low %v5058_v29, %v5066_v14  ;;  %v25370_v48 = vcombine.low %v21490_v30, %v21493_v47  ;;  %v4240_v0 = vcombine.low %v4208_v59, %v4223_v60  ;;  %v21705_v14 = vpop.permute.xlu1 %5344 }
 0x560   :  { %v4241_v7 = vcombine.high %v4208_v59, %v4223_v60  ;;  %v5000_v23 = vcombine.high %v4999_v21, %v25292_v44  ;;  %v3046_v19 = vshrl.u32 %v2784_v33, 16  ;;  %18045 = vmatprep.subr.bf16.mxu1 %v25293_v31  ;;  %v4306_v61 = vcombine.low %v4274_v43, %v4289_v9  ;;  %25371 = vst [vmem:[#allocation64_spill] sm:$0xff] %v21705_v14 }
 0x561   :  { %v21697_v51 = vrot.slane %v25370_v48, %v19753_v13  ;;  %v5025_v57 = vcombine.high %v5024_v35, %v25292_v44  ;;  %v2785_v50 = vcombine.high %v2784_v33, %v25292_v44  ;;  %v5042_v38 = vcombine.low %v5033_v53, %v5041_v2 }
 0x562   :  { %v4307_v55 = vcombine.high %v4274_v43, %v4289_v9  ;;  %v5532_v29 = vrot.slane %v21240_v42, %v19753_v13  ;;  %v2827_v36 = vcombine.low %v2818_v12, %v2826_v5  ;;  %v21709_v60 = vcombine.high %v21684_v20, %v25292_v44 }
 0x563   :  { %v5290_v21 = vpack.i.b16 %v5025_v57, %v5000_v23  ;;  %v5291_v46 = vshrl.u32 %v5000_v23, 16  ;;  %v5292_v59 = vshrl.u32 %v5025_v57, 16  ;;  %v5074_v24 = vrot.slane %v5067_v22, %v19769_v8 }
 0x564   :  { %v4248_v35 = vrot.slane %v4240_v0, %v19769_v8  ;;  %v4255_v33 = vrot.slane %v4241_v7, %v19769_v8  ;;  %v5517_v9 = vrot.slane %v21230_v52, %v19753_v13  ;;  %18030 = vmatmul.mubr.msk.bf16.vlgmr.msra.gmra.mrb[104].mxu0 %vm7558_vm2, %v3044_v4  ;;  %v3047_v42 = vpack.i.b16 %v3046_v19, %v3045_v27  ;;  %v21743_v19 = vpop.permute.xlu1 %5360 }
 0x565   :  { %v4314_v53 = vrot.slane %v4306_v61, %v19769_v8  ;;  %v10047_v2 = vsel %vm7558_vm2, %v5290_v21, 0  ;;  %v5293_v12 = vpack.i.b16 %v5292_v59, %v5291_v46  ;;  %18041 = vmatprep.mubr.msk.bf16.mxu0 %vm19202_vm1, %v25293_v31  ;;  %v5049_v5 = vrot.slane %v5042_v38, %v19769_v8  ;;  %25372 = vst [vmem:[#allocation65_spill] sm:$0xff] %v21743_v19 }
 0x566   :  { %v4321_v43 = vrot.slane %v4307_v55, %v19769_v8  ;;  %v5540_v22 = vcombine.low %v5517_v9, %v5532_v29  ;;  %v5541_v48 = vcombine.high %v5517_v9, %v5532_v29  ;;  %18040 = vmatpush3.bf16.xpose.msra.mxu0 %v10047_v2  ;;  %18036 = vmatmul.mubr.msk.bf16.vlgmr.msra.gmra.mrb[120].mxu1 %vm7558_vm2, %v3047_v42  ;;  %v3051_v52 = vshrl.u32 %v21678_v18, 16 }
 0x567   :  { %v10093_v27 = vsel %vm7558_vm2, %v5293_v12, 0  ;;  %18051 = vmatprep.subr.bf16.mxu0 %v25293_v31  ;;  %18047 = vmatprep.mubr.msk.bf16.mxu1 %vm19202_vm1, %v25293_v31  ;;  %v5298_v4 = vshrl.u32 %v5074_v24, 16  ;;  %v21733_v0 = vrot.slane %v17182_v6, %v19753_v13  ;;  %v21739_v7 = vrot.slane %v2861_v11, %v19753_v13 }
 0x568   :  { %v5598_v23 = vrot.slane %v21246_v40, %v19753_v13  ;;  %18046 = vmatpush3.bf16.xpose.msra.mxu1 %v10093_v27  ;;  %v3050_v61 = vpack.i.b16 %v2785_v50, %v21678_v18  ;;  %v3052_v57 = vshrl.u32 %v2785_v50, 16  ;;  %v21747_v38 = vrot.slane %v2827_v36, %v19769_v8  ;;  %v21766_v12 = vpop.permute.xlu1 %5376 }
 0x569   :  { %v5076_v30 = vcombine.low %v4248_v35, %v4255_v33  ;;  %v17214_v47 = vcombine.high %v4248_v35, %v4255_v33  ;;  %v5296_v6 = vpack.i.b16 %v5074_v24, %v5049_v5  ;;  %18057 = vmatprep.subr.bf16.mxu1 %v25293_v31  ;;  %v5297_v55 = vshrl.u32 %v5049_v5, 16  ;;  %25373 = vst [vmem:[#allocation66_spill] sm:$0xff] %v21766_v12 }
 0x56a   :  { %v5101_v11 = vcombine.low %v4314_v53, %v4321_v43  ;;  %v5583_v29 = vrot.slane %v21232_v62, %v19753_v13  ;;  %v5548_v40 = vrot.slane %v5540_v22, %v19769_v8  ;;  %v5555_v21 = vrot.slane %v5541_v48, %v19769_v8 }
 0x56b   :  { %v17215_v46 = vcombine.high %v4314_v53, %v4321_v43  ;;  %v5299_v18 = vpack.i.b16 %v5298_v4, %v5297_v55  ;;  %v5075_v50 = vcombine.high %v5074_v24, %v25292_v44  ;;  %v2852_v36 = vcombine.low %v21697_v51, %v21733_v0 }
 0x56c   :  { %v5606_v59 = vcombine.low %v5583_v29, %v5598_v23  ;;  %v5607_v35 = vcombine.high %v5583_v29, %v5598_v23  ;;  %v3053_v33 = vpack.i.b16 %v3052_v57, %v3051_v52  ;;  %v2876_v9 = vrot.slane %v17183_v25, %v19753_v13  ;;  %v21799_v29 = vpop.permute.xlu1 %5338 }
 0x56d   :  { %18042 = vmatmul.mubr.msk.bf16.vlgmr.msra.gmra.mrb[108].mxu0 %vm7558_vm2, %v3050_v61  ;;  %v10139_v62 = vsel %vm7558_vm2, %v5296_v6, 0  ;;  %v5050_v42 = vcombine.high %v5049_v5, %v25292_v44  ;;  %v5083_v53 = vrot.slane %v5076_v30, %v19753_v13  ;;  %v5091_v24 = vrot.slane %v17214_v47, %v19753_v13  ;;  %25375 = vst [vmem:[#allocation68_spill] sm:$0xff] %v21799_v29 }
 0x56e   :  { %v6566_v2 = vcombine.low %v5548_v40, %v5555_v21  ;;  %v17216_v51 = vcombine.high %v5548_v40, %v5555_v21  ;;  %18052 = vmatpush3.bf16.xpose.msra.mxu0 %v10139_v62  ;;  %18053 = vmatprep.mubr.msk.bf16.mxu0 %vm19202_vm1, %v25293_v31  ;;  %v3057_v49 = vshrl.u32 %v21684_v20, 16  ;;  %v5108_v3 = vrot.slane %v5101_v11, %v19753_v13 }
 0x56f   :  { %18048 = vmatmul.mubr.msk.bf16.vlgmr.msra.gmra.mrb[124].mxu1 %vm7558_vm2, %v3053_v33  ;;  %v10185_v25 = vsel %vm7558_vm2, %v5299_v18, 0  ;;  %18063 = vmatprep.subr.bf16.mxu0 %v25293_v31  ;;  %v5304_v5 = vshrl.u32 %v5075_v50, 16  ;;  %v5092_v43 = vcombine.low %v5083_v53, %v5091_v24  ;;  %v5116_v22 = vrot.slane %v17215_v46, %v19753_v13 }
 0x570   :  { %18058 = vmatpush3.bf16.xpose.msra.mxu1 %v10185_v25  ;;  %v3056_v48 = vpack.i.b16 %v21747_v38, %v21684_v20  ;;  %18059 = vmatprep.mubr.msk.bf16.mxu1 %vm19202_vm1, %v25293_v31  ;;  %v3058_v52 = vshrl.u32 %v21747_v38, 16  ;;  %v21783_v27 = vcombine.high %v21747_v38, %v25292_v44  ;;  %v2877_v4 = vcombine.low %v21739_v7, %v2876_v9  ;;  %v21793_v38 = vpop.permute.xlu0 %5322 }
 0x571   :  { %v5664_v0 = vrot.slane %v21292_v56, %v19753_v13  ;;  %v5302_v23 = vpack.i.b16 %v5075_v50, %v5050_v42  ;;  %18069 = vmatprep.subr.bf16.mxu1 %v25293_v31  ;;  %v5303_v61 = vshrl.u32 %v5050_v42, 16  ;;  %v5117_v57 = vcombine.low %v5108_v3, %v5116_v22  ;;  %25374 = vst [vmem:[#allocation67_spill] sm:$0xff] %v21793_v38  ;;  %v25442_v38 = vld [vmem:[#allocation37_spill] sm:$0xff] }
 0x572   :  { %v5614_v20 = vrot.slane %v5606_v59, %v19769_v8  ;;  %v5621_v30 = vrot.slane %v5607_v35, %v19769_v8  ;;  %v6573_v47 = vrot.slane %v6566_v2, %v19753_v13  ;;  %v6581_v6 = vrot.slane %v17216_v51, %v19753_v13 }
 0x573   :  { %v5649_v7 = vrot.slane %v21272_v45, %v19753_v13  ;;  %v5305_v55 = vpack.i.b16 %v5304_v5, %v5303_v61  ;;  %v5099_v56 = vrot.slane %v5092_v43, %v19769_v8  ;;  %v5124_v11 = vrot.slane %v5117_v57, %v19769_v8  ;;  %v21837_v43 = vpop.permute.xlu1 %5354 }
 0x574   :  { %v3059_v40 = vpack.i.b16 %v3058_v52, %v3057_v49  ;;  %v3062_v21 = vpack.i.b16 %v21783_v27, %v21709_v60  ;;  %v21804_v46 = vrot.slane %v2852_v36, %v19769_v8  ;;  %v10231_v45 = vsel %vm7558_vm2, %v5302_v23, 0  ;;  %v21828_v3 = vpop.permute.xlu0 %5324  ;;  %25377 = vst [vmem:[#allocation70_spill] sm:$0xff] %v21837_v43 }
 0x575   :  { %v5672_v18 = vcombine.low %v5649_v7, %v5664_v0  ;;  %v5673_v50 = vcombine.high %v5649_v7, %v5664_v0  ;;  %18054 = vmatmul.mubr.msk.bf16.vlgmr.msra.gmra.mrb[112].mxu0 %vm7558_vm2, %v3056_v48  ;;  %v5310_v59 = vshrl.u32 %v5124_v11, 16  ;;  %v6591_v35 = vcombine.low %v5614_v20, %v5621_v30  ;;  %25376 = vst [vmem:[#allocation69_spill] sm:$0xff] %v21828_v3 }
 0x576   :  { %v17217_v33 = vcombine.high %v5614_v20, %v5621_v30  ;;  %18064 = vmatpush3.bf16.xpose.msra.mxu0 %v10231_v45  ;;  %18065 = vmatprep.mubr.msk.bf16.mxu0 %vm19202_vm1, %v25293_v31  ;;  %v6582_v9 = vcombine.low %v6573_v47, %v6581_v6  ;;  %v10277_v62 = vsel %vm7558_vm2, %v5305_v55, 0  ;;  %v3064_v36 = vshrl.u32 %v21783_v27, 16 }
 0x577   :  { %18060 = vmatmul.mubr.msk.bf16.vlgmr.msra.gmra.mrb[128].mxu1 %vm7558_vm2, %v3059_v40  ;;  %18075 = vmatprep.subr.bf16.mxu0 %v25293_v31  ;;  %v5309_v42 = vshrl.u32 %v5099_v56, 16  ;;  %v21815_v53 = vrot.slane %v2877_v4, %v19769_v8  ;;  %v5715_v24 = vrot.slane %v21288_v16, %v19753_v13  ;;  %v5730_v2 = vrot.slane %v21298_v39, %v19753_v13 }
 0x578   :  { %18070 = vmatpush3.bf16.xpose.msra.mxu1 %v10277_v62  ;;  %18071 = vmatprep.mubr.msk.bf16.mxu1 %vm19202_vm1, %v25293_v31  ;;  %v3063_v51 = vshrl.u32 %v21709_v60, 16  ;;  %v21826_v49 = vcombine.high %v21804_v46, %v25292_v44  ;;  %v21831_v25 = vrot.slane %v5672_v18, %v19769_v8  ;;  %v21834_v16 = vrot.slane %v5673_v50, %v19769_v8 }
 0x579   :  { %v5308_v5 = vpack.i.b16 %v5124_v11, %v5099_v56  ;;  %18081 = vmatprep.subr.bf16.mxu1 %v25293_v31  ;;  %v5311_v39 = vpack.i.b16 %v5310_v59, %v5309_v42  ;;  %v21840_v60 = vcombine.high %v5124_v11, %v25292_v44  ;;  %v21843_v22 = vrot.slane %v6582_v9, %v19769_v8  ;;  %v21880_v9 = vpop.permute.xlu0 %5326 }
 0x57a   :  { %v6598_v48 = vrot.slane %v6591_v35, %v19753_v13  ;;  %v6606_v52 = vrot.slane %v17217_v33, %v19753_v13  ;;  %v3065_v27 = vpack.i.b16 %v3064_v36, %v3063_v51  ;;  %v3068_v0 = vpack.i.b16 %v21815_v53, %v21804_v46  ;;  %25379 = vst [vmem:[#allocation71_spill] sm:$0xff] %v21880_v9 }
 0x57b   :  { %v3070_v23 = vshrl.u32 %v21815_v53, 16  ;;  %v21854_v61 = vcombine.high %v21815_v53, %v25292_v44  ;;  %v5738_v57 = vcombine.low %v5715_v24, %v5730_v2  ;;  %v5739_v20 = vcombine.high %v5715_v24, %v5730_v2 }
 0x57c   :  { %v6607_v6 = vcombine.low %v6598_v48, %v6606_v52  ;;  %v6666_v7 = vcombine.low %v21831_v25, %v21834_v16  ;;  %v10323_v55 = vsel %vm7558_vm2, %v5308_v5, 0  ;;  %v10369_v11 = vsel %vm7558_vm2, %v5311_v39, 0 }
 0x57d   :  { %18066 = vmatmul.mubr.msk.bf16.vlgmr.msra.gmra.mrb[116].mxu0 %vm7558_vm2, %v3062_v21  ;;  %v5100_v18 = vcombine.high %v5099_v56, %v25292_v44  ;;  %v5316_v59 = vshrl.u32 %v21840_v60, 16  ;;  %v21874_v21 = vcombine.high %v21843_v22, %v25292_v44  ;;  %v25378_v56 = vcombine.low %v21265_v26, %v21268_v28 }
 0x57e   :  { %18076 = vmatpush3.bf16.xpose.msra.mxu0 %v10323_v55  ;;  %18077 = vmatprep.mubr.msk.bf16.mxu0 %vm19202_vm1, %v25293_v31  ;;  %v21870_v35 = vrot.slane %v6607_v6, %v19769_v8  ;;  %v25380_v42 = vcombine.high %v21265_v26, %v21268_v28  ;;  %v25381_v2 = vcombine.low %v21279_v54, %v21286_v63  ;;  %v3069_v26 = vshrl.u32 %v21804_v46, 16 }
 0x57f   :  { %v6623_v33 = vrot.slane %v25378_v56, %v19753_v13  ;;  %18072 = vmatmul.mubr.msk.bf16.vlgmr.msra.gmra.mrb[132].mxu1 %vm7558_vm2, %v3065_v27  ;;  %18087 = vmatprep.subr.bf16.mxu0 %v25293_v31  ;;  %v25382_v5 = vcombine.high %v21279_v54, %v21286_v63  ;;  %v5746_v48 = vrot.slane %v5738_v57, %v19769_v8  ;;  %v21900_v27 = vpop.permute.xlu1 %5370  ;;  %v5315_v63 = vshrl.u32 %v5100_v18, 16 }
 0x580   :  { %v6631_v24 = vrot.slane %v25380_v42, %v19753_v13  ;;  %v6648_v51 = vrot.slane %v25381_v2, %v19753_v13  ;;  %v5753_v52 = vrot.slane %v5739_v20, %v19769_v8  ;;  %25383 = vst [vmem:[#allocation72_spill] sm:$0xff] %v21900_v27  ;;  %18082 = vmatpush3.bf16.xpose.msra.mxu1 %v10369_v11  ;;  %v7375_v11 = vshrl.u32 %v21874_v21, 16 }
 0x581   :  { %v21847_v4 = vpop.f32.mrb[64].mxu0  ;;  %v6656_v39 = vrot.slane %v25382_v5, %v19753_v13  ;;  %v21905_v28 = vcombine.high %v21870_v35, %v25292_v44  ;;  %18083 = vmatprep.mubr.msk.bf16.mxu1 %vm19202_vm1, %v25293_v31  ;;  %v5314_v54 = vpack.i.b16 %v21840_v60, %v5100_v18  ;;  %18093 = vmatprep.subr.bf16.mxu1 %v25293_v31 }
 0x582   :  { %v17911_v30 = vpop.f32.mrb[65].mxu0  ;;  %v10599_v47 = vsel %vm7558_vm2, %v21847_v4, -inf  ;;  %v6632_v57 = vcombine.low %v6623_v33, %v6631_v24  ;;  %v17220_v6 = vcombine.high %v21831_v25, %v21834_v16  ;;  %v5317_v56 = vpack.i.b16 %v5316_v59, %v5315_v63 }
 0x583   :  { %v9074_v40 = vpop.f32.mrb[66].mxu0  ;;  %10600 = vmax.xlane.f32.xlu0 %v10599_v47  ;;  %v21864_v50 = vpop.f32.mrb[80].mxu1  ;;  %v6657_v20 = vcombine.low %v6648_v51, %v6656_v39  ;;  %v6691_v33 = vcombine.low %v5746_v48, %v5753_v52  ;;  %v21934_v59 = vrot.slane %v6666_v7, %v19753_v13  ;;  %v10415_v2 = vsel %vm7558_vm2, %v5314_v54, 0 }
 0x584   :  { %v17912_v45 = vpop.f32.mrb[67].mxu0  ;;  %v17917_v62 = vpop.f32.mrb[81].mxu1  ;;  %v10602_v36 = vsel %vm7558_vm2, %v21864_v50, -inf  ;;  %v7376_v40 = vshrl.u32 %v21905_v28, 16  ;;  %v21920_v60 = vrot.slane %v6632_v57, %v19769_v8  ;;  %v3075_v57 = vshrl.u32 %v21826_v49, 16 }
 0x585   :  { %v9120_v30 = vpop.f32.mrb[82].mxu1  ;;  %10603 = vmax.xlane.f32.xlu1 %v10602_v36  ;;  %v3071_v45 = vpack.i.b16 %v3070_v23, %v3069_v26  ;;  %v21923_v18 = vrot.slane %v6657_v20, %v19769_v8  ;;  %v17221_v36 = vcombine.high %v5746_v48, %v5753_v52  ;;  %v21931_v23 = vpop.permute.xlu0 %5328  ;;  %18078 = vmatmul.mubr.msk.bf16.vlgmr.msra.gmra.mrb[120].mxu0 %vm7558_vm2, %v3068_v0  ;;  %v10461_v0 = vsel %vm7558_vm2, %v5317_v56, 0 }
 0x586   :  { %v17918_v47 = vpop.f32.mrb[83].mxu1  ;;  %v21929_v24 = vpack.i.b16 %v7376_v40, %v7375_v11  ;;  %25384 = vst [vmem:[#allocation73_spill] sm:$0xff] %v21931_v23  ;;  %v21945_v48 = vrot.slane %v17220_v6, %v19753_v13  ;;  %18088 = vmatpush3.bf16.xpose.msra.mxu0 %v10415_v2  ;;  %18089 = vmatprep.mubr.msk.bf16.mxu0 %vm19202_vm1, %v25293_v31  ;;  %v7369_v56 = vshrl.u32 %v21843_v22, 16 }
 0x587   :  { %v21953_v46 = vcombine.high %v21920_v60, %v25292_v44  ;;  %v21957_v53 = vcombine.high %v21923_v18, %v25292_v44  ;;  %18084 = vmatmul.mubr.msk.bf16.vlgmr.msra.gmra.mrb[136].mxu1 %vm7558_vm2, %v3071_v45  ;;  %18099 = vmatprep.subr.bf16.mxu0 %v25293_v31  ;;  %v7370_v47 = vshrl.u32 %v21870_v35, 16  ;;  %v6698_v6 = vrot.slane %v6691_v33, %v19753_v13 }
 0x588   :  { %18094 = vmatpush3.bf16.xpose.msra.mxu1 %v10461_v0  ;;  %v6706_v11 = vrot.slane %v17221_v36, %v19753_v13  ;;  %18095 = vmatprep.mubr.msk.bf16.mxu1 %vm19202_vm1, %v25293_v31  ;;  %v7368_v45 = vpack.i.b16 %v21870_v35, %v21843_v22  ;;  %v7382_v33 = vshrl.u32 %v21923_v18, 16  ;;  %v25386_v36 = vcombine.low %v21323_v34, %v21326_v37 }
 0x589   :  { %v21917_v62 = vpop.f32.mrb[68].mxu0  ;;  %18105 = vmatprep.subr.bf16.mxu1 %v25293_v31  ;;  %v25387_v35 = vcombine.high %v21323_v34, %v21326_v37  ;;  %v7371_v22 = vpack.i.b16 %v7370_v47, %v7369_v56  ;;  %v25391_v56 = vld [vmem:[#allocation49_spill] sm:$0xff] }
 0x58a   :  { %v17923_v25 = vpop.f32.mrb[69].mxu0  ;;  %v10605_v16 = vsel %vm7558_vm2, %v21917_v62, -inf  ;;  %v6723_v2 = vrot.slane %v25386_v36, %v19753_v13  ;;  %v11596_v34 = vsel %vm11594_vm3, %v7368_v45, 0 }
 0x58b   :  { %v21927_v42 = vpop.xlane.xlu1 %10507  ;;  %v9166_v51 = vpop.f32.mrb[70].mxu0  ;;  %10606 = vmax.xlane.f32.xlu0 %v10605_v16  ;;  %v11642_v45 = vsel %vm11594_vm3, %v7371_v22, 0 }
 0x58c   :  { %v25086_v5 = vmax.f32 %v21927_v42, 0.0  ;;  %v21947_v7 = vpop.f32.mrb[84].mxu1  ;;  %v17924_v52 = vpop.f32.mrb[71].mxu0  ;;  %v6731_v51 = vrot.slane %v25387_v35, %v19753_v13 }
 0x58d   :  { %25385 = vst [vmem:[#allocation74_spill] sm:$0xff] %v21947_v7  ;;  %v17929_v30 = vpop.f32.mrb[85].mxu1  ;;  %v10608_v26 = vsel %vm7558_vm2, %v21947_v7, -inf  ;;  %v21980_v16 = vpop.xlane.xlu0 %10504  ;;  %v3074_v52 = vpack.i.b16 %v21854_v61, %v21826_v49 }
 0x58e   :  { %v10760_v54 = vsub.f32 %v20891_v41, %v25086_v5  ;;  %v9212_v63 = vpop.f32.mrb[86].mxu1  ;;  %10609 = vmax.xlane.f32.xlu1 %v10608_v26  ;;  %v3076_v41 = vshrl.u32 %v21854_v61, 16  ;;  %v7381_v30 = vshrl.u32 %v21920_v60, 16 }
 0x58f   :  { %v17930_v40 = vpop.f32.mrb[87].mxu1  ;;  %v6682_v63 = vcombine.low %v21934_v59, %v21945_v48  ;;  %18090 = vmatmul.mubr.msk.bf16.vlgmr.msra.gmra.mrb[124].mxu0 %vm7558_vm2, %v3074_v52  ;;  %v22002_v61 = vpop.xlane.xlu1 %10519  ;;  %v6732_v48 = vcombine.low %v6723_v2, %v6731_v51 }
 0x590   :  { %v10825_v25 = vmul.f32 1.442695, %v10760_v54  ;;  %v6707_v40 = vcombine.low %v6698_v6, %v6706_v11  ;;  %v3077_v37 = vpack.i.b16 %v3076_v41, %v3075_v57  ;;  %25389 = vst [vmem:[#allocation76_spill] sm:$0xff] %v22002_v61  ;;  %v22004_v47 = vpack.i.b16 %v7382_v33, %v7381_v30  ;;  %18100 = vmatpush3.bf16.msra.mxu0 %v11596_v34 }
 0x591   :  { %v21993_v0 = vpop.f32.mrb[72].mxu0  ;;  %18101 = vmatprep.mubr.msk.bf16.mxu0 %vm19202_vm1, %v25293_v31  ;;  %v25394_v57 = vcombine.high %v21340_v15, %v25391_v56  ;;  %v25085_v11 = vmax.f32 %v21980_v16, 0.0  ;;  %18111 = vmatprep.subr.bf16.mxu0 %v25293_v31  ;;  %v22024_v52 = vpop.xlane.xlu0 %10516  ;;  %v25084_v22 = vmax.f32 %v22002_v61, 0.0  ;;  %v7387_v34 = vshrl.u32 %v21953_v46, 16 }
 0x592   :  { %25388 = vst [vmem:[#allocation75_spill] sm:$0xff] %v21993_v0  ;;  %18686 = vpow2.f32 %v10825_v25  ;;  %v17935_v26 = vpop.f32.mrb[73].mxu0  ;;  %v10611_v54 = vsel %vm7558_vm2, %v21993_v0, -inf  ;;  %25390 = vst [vmem:[#allocation77_spill] sm:$0xff] %v22004_v47  ;;  %v25392_v25 = vcombine.low %v21340_v15, %v25391_v56  ;;  %18096 = vmatmul.mubr.msk.bf16.vlgmr.msra.gmra.mrb[140].mxu1 %vm7558_vm2, %v3077_v37  ;;  %v22027_v15 = vrot.slane %v6682_v63, %v19769_v8 }
 0x593   :  { %v9258_v49 = vpop.f32.mrb[74].mxu0  ;;  %10612 = vmax.xlane.f32.xlu0 %v10611_v54  ;;  %v22010_v35 = vpop.f32.mrb[88].mxu1  ;;  %v6756_v6 = vrot.slane %v25394_v57, %v19753_v13  ;;  %18106 = vmatpush3.bf16.msra.mxu1 %v11642_v45  ;;  %v22030_v51 = vrot.slane %v6707_v40, %v19769_v8  ;;  %v22037_v54 = vrot.slane %v6732_v48, %v19769_v8  ;;  %v7388_v63 = vshrl.u32 %v21957_v53, 16  ;;  %v25396_v40 = vld [vmem:[#allocation34_spill] sm:$0xff] }
 0x594   :  { %v6748_v36 = vrot.slane %v25392_v25, %v19753_v13  ;;  %25393 = vst [vmem:[#allocation49_spill] sm:$0xff] %v22010_v35  ;;  %v17936_v59 = vpop.f32.mrb[75].mxu0  ;;  %v17941_v41 = vpop.f32.mrb[89].mxu1  ;;  %v10614_v33 = vsel %vm7558_vm2, %v22010_v35, -inf  ;;  %18107 = vmatprep.mubr.msk.bf16.mxu1 %vm19202_vm1, %v25293_v31  ;;  %18117 = vmatprep.subr.bf16.mxu1 %v25293_v31  ;;  %v10759_v37 = vsub.f32 %v25396_v40, %v25085_v11  ;;  %v25089_v49 = vmax.f32 %v22024_v52, 0.0 }
 0x595   :  { %v9304_v2 = vpop.f32.mrb[90].mxu1  ;;  %10615 = vmax.xlane.f32.xlu1 %v10614_v33  ;;  %25395 = vst [vmem:[#allocation78_spill] sm:$0xff] %v22037_v54  ;;  %v22052_v48 = vpack.i.b16 %v7388_v63, %v7387_v34  ;;  %v7393_v57 = vshrl.u32 %v22027_v15, 16  ;;  %v25400_v33 = vld [vmem:[#allocation24_spill] sm:$0xff]  ;;  %v22065_v40 = vpop.xlane.xlu1 %10525  ;;  %v22071_v63 = vcombine.high %v22037_v54, %v25292_v44 }
 0x596   :  { %v17942_v30 = vpop.f32.mrb[91].mxu1  ;;  %v6757_v26 = vcombine.low %v6748_v36, %v6756_v6  ;;  %v7394_v6 = vshrl.u32 %v22030_v51, 16  ;;  %v10764_v2 = vsub.f32 %v25400_v33, %v25084_v22  ;;  %25402 = vst [vmem:[#allocation81_spill] sm:$0xff] %v22065_v40  ;;  %v25406_v33 = vld [vmem:[#allocation35_spill] sm:$0xff]  ;;  %v22082_v39 = vpop.xlane.xlu0 %10522  ;;  %v25092_v19 = vmax.f32 %v22065_v40, 0.0 }
 0x597   :  { %25399 = vst [vmem:[#allocation80_spill] sm:$0xff] %v22052_v48  ;;  %25403 = vst [vmem:[#allocation82_spill] sm:$0xff] %v22071_v63  ;;  %v10763_v30 = vsub.f32 %v25406_v33, %v25089_v49  ;;  %v25411_v33 = vld [vmem:[#allocation38_spill] sm:$0xff] }
 0x598   :  { %v22048_v25 = vrot.slane %v6757_v26, %v19769_v8  ;;  %v10833_v12 = vmul.f32 1.442695, %v10764_v2 }
 0x599   :  { %v22045_v56 = vpop.f32.mrb[76].mxu0 }
 0x59a   :  { %25397 = vst [vmem:[#allocation34_spill] sm:$0xff] %v22045_v56  ;;  %25398 = vst [vmem:[#allocation79_spill] sm:$0xff] %v22048_v25  ;;  %v17947_v59 = vpop.f32.mrb[77].mxu0  ;;  %v10617_v36 = vsel %vm7558_vm2, %v22045_v56, -inf }
 0x59b   :  { %v9350_v41 = vpop.f32.mrb[78].mxu0  ;;  %10618 = vmax.xlane.f32.xlu0 %v10617_v36  ;;  %v22063_v26 = vpop.f32.mrb[92].mxu1  ;;  %v22075_v59 = vcombine.high %v22048_v25, %v25292_v44  ;;  %v22077_v36 = vpack.i.b16 %v7394_v6, %v7393_v57  ;;  %v10831_v57 = vmul.f32 1.442695, %v10763_v30  ;;  %v25094_v6 = vmax.f32 %v22082_v39, 0.0 }
 0x59c   :  { %v22056_v45 = vpop.eup %18686  ;;  %25401 = vst [vmem:[#allocation24_spill] sm:$0xff] %v22063_v26  ;;  %v10823_v41 = vmul.f32 1.442695, %v10759_v37  ;;  %v17948_v22 = vpop.f32.mrb[79].mxu0  ;;  %v10620_v37 = vsel %vm7558_vm2, %v22063_v26, -inf  ;;  %v25443_v26 = vmax.f32 %v21927_v42, 0.0 }
 0x59d   :  { %v10954_v34 = vsel %vm7558_vm2, %v22056_v45, 0.0  ;;  %25404 = vst [vmem:[#allocation83_spill] sm:$0xff] %v22075_v59  ;;  %25405 = vst [vmem:[#allocation84_spill] sm:$0xff] %v22077_v36  ;;  %v17953_v20 = vpop.f32.mrb[93].mxu1  ;;  %v22102_v30 = vpop.xlane.xlu0 %10510 }
 0x59e   :  { %10955 = vadd.xlane.f32.xlu1 %v10954_v34  ;;  %v9396_v55 = vpop.f32.mrb[94].mxu1  ;;  %18688 = vpow2.f32 %v10823_v41  ;;  %v22100_v34 = vcombine.high %v22027_v15, %v25292_v44  ;;  %v11144_v10 = vsub.f32 0.0, %v25443_v26  ;;  %v25448_v26 = vld [vmem:[#allocation18_spill] sm:$0xff] }
 0x59f   :  { %v17954_v5 = vpop.f32.mrb[95].mxu1  ;;  %18690 = vpow2.f32 %v10833_v12 }
 0x5a0   :  { %v22096_v5 = vcombine.high %v22030_v51, %v25292_v44  ;;  %25409 = vst [vmem:[#allocation86_spill] sm:$0xff] %v22100_v34  ;;  %18692 = vpow2.f32 %v10831_v57  ;;  %v22114_v44 = vpop.xlane.xlu1 %10531  ;;  %v7399_v48 = vshrl.u32 %v22100_v34, 16  ;;  %v25097_v57 = vmax.f32 %v22102_v30, 0.0 }
 0x5a1   :  { %v22090_v22 = vpop.f32.mrb[80].mxu0  ;;  %25413 = vst [vmem:[#allocation38_spill] sm:$0xff] %v22114_v44 }
 0x5a2   :  { %25407 = vst [vmem:[#allocation35_spill] sm:$0xff] %v22090_v22  ;;  %10621 = vmax.xlane.f32.xlu1 %v10620_v37  ;;  %v17959_v20 = vpop.f32.mrb[81].mxu0  ;;  %v10623_v55 = vsel %vm7558_vm2, %v22090_v22, -inf  ;;  %25408 = vst [vmem:[#allocation85_spill] sm:$0xff] %v22096_v5  ;;  %v10766_v37 = vsub.f32 %v25411_v33, %v25092_v19  ;;  %v7400_v12 = vshrl.u32 %v22096_v5, 16 }
 0x5a3   :  { %v9442_v2 = vpop.f32.mrb[82].mxu0  ;;  %10624 = vmax.xlane.f32.xlu0 %v10623_v55  ;;  %v22104_v41 = vpop.f32.mrb[96].mxu1  ;;  %v25412_v20 = vld [vmem:[#allocation15_spill] sm:$0xff] }
 0x5a4   :  { %25410 = vst [vmem:[#allocation87_spill] sm:$0xff] %v22104_v41  ;;  %v10765_v11 = vsub.f32 %v25412_v20, %v25094_v6  ;;  %v17960_v2 = vpop.f32.mrb[83].mxu0  ;;  %v17965_v55 = vpop.f32.mrb[97].mxu1  ;;  %v10626_v49 = vsel %vm7558_vm2, %v22104_v41, -inf  ;;  %v10837_v33 = vmul.f32 1.442695, %v10766_v37 }
 0x5a5   :  { %v9488_v14 = vpop.f32.mrb[98].mxu1  ;;  %v22122_v2 = vpack.i.b16 %v7400_v12, %v7399_v48  ;;  %v22124_v55 = vpop.xlane.xlu0 %10528  ;;  %v25416_v37 = vld [vmem:[#allocation17_spill] sm:$0xff] }
 0x5a6   :  { %10627 = vmax.xlane.f32.xlu1 %v10626_v49  ;;  %v17966_v36 = vpop.f32.mrb[99].mxu1  ;;  %v10835_v19 = vmul.f32 1.442695, %v10765_v11  ;;  %v10761_v11 = vsub.f32 %v25416_v37, %v25097_v57  ;;  %18694 = vpow2.f32 %v10837_v33  ;;  %v25100_v48 = vmax.f32 %v22124_v55, 0.0 }
 0x5a7   :  { %25415 = vst [vmem:[#allocation88_spill] sm:$0xff] %v22122_v2  ;;  %v25419_v2 = vld [vmem:[#allocation40_spill] sm:$0xff] }
 0x5a8   :  { %v22128_v6 = vpop.eup %18688  ;;  %18696 = vpow2.f32 %v10835_v19 }
 0x5a9   :  { %v22119_v23 = vpop.f32.mrb[84].mxu0  ;;  %v10951_v33 = vsel %vm7558_vm2, %v22128_v6, 0.0 }
 0x5aa   :  { %25414 = vst [vmem:[#allocation15_spill] sm:$0xff] %v22119_v23  ;;  %v17971_v14 = vpop.f32.mrb[85].mxu0  ;;  %v10629_v49 = vsel %vm7558_vm2, %v22119_v23, -inf }
 0x5ab   :  { %v9534_v36 = vpop.f32.mrb[86].mxu0  ;;  %10630 = vmax.xlane.f32.xlu0 %v10629_v49  ;;  %v22133_v47 = vpop.f32.mrb[100].mxu1  ;;  %v25418_v14 = vmax.f32 %v22114_v44, 0.0 }
 0x5ac   :  { %25417 = vst [vmem:[#allocation17_spill] sm:$0xff] %v22133_v47  ;;  %v17972_v12 = vpop.f32.mrb[87].mxu0  ;;  %v17977_v20 = vpop.f32.mrb[101].mxu1  ;;  %v10632_v36 = vsel %vm7558_vm2, %v22133_v47, -inf }
 0x5ad   :  { %v10768_v23 = vsub.f32 %v25419_v2, %v25418_v14  ;;  %v22141_v49 = vpop.eup %18690  ;;  %v9580_v27 = vpop.f32.mrb[102].mxu1  ;;  %10633 = vmax.xlane.f32.xlu1 %v10632_v36  ;;  %v10827_v12 = vmul.f32 1.442695, %v10761_v11  ;;  %v25421_v20 = vld [vmem:[#allocation16_spill] sm:$0xff]  ;;  %v7405_v36 = vshrl.u32 %v22037_v54, 16 }
 0x5ae   :  { %25420 = vst [vmem:[#allocation40_spill] sm:$0xff] %v22141_v49  ;;  %v22145_v37 = vpop.eup %18692  ;;  %v17978_v19 = vpop.f32.mrb[103].mxu1  ;;  %v10767_v57 = vsub.f32 %v25421_v20, %v25100_v48  ;;  %v10966_v43 = vsel %vm7558_vm2, %v22141_v49, 0.0 }
 0x5af   :  { %10952 = vadd.xlane.f32.xlu0 %v10951_v33  ;;  %v10841_v2 = vmul.f32 1.442695, %v10768_v23  ;;  %v10963_v29 = vsel %vm7558_vm2, %v22145_v37, 0.0  ;;  %v7406_v33 = vshrl.u32 %v22048_v25, 16  ;;  %18698 = vpow2.f32 %v10827_v12 }
 0x5b0   :  { %v10839_v20 = vmul.f32 1.442695, %v10767_v57  ;;  %v22164_v44 = vpop.eup %18694  ;;  %v7412_v12 = vshrl.u32 %v22075_v59, 16 }
 0x5b1   :  { %v22150_v14 = vpop.f32.mrb[88].mxu0  ;;  %10967 = vadd.xlane.f32.xlu1 %v10966_v43  ;;  %v22160_v23 = vpack.i.b16 %v7406_v33, %v7405_v36  ;;  %18700 = vpow2.f32 %v10841_v2  ;;  %25425 = vst [vmem:[#allocation91_spill] sm:$0xff] %v22164_v44  ;;  %v10972_v2 = vsel %vm7558_vm2, %v22164_v44, 0.0 }
 0x5b2   :  { %25422 = vst [vmem:[#allocation16_spill] sm:$0xff] %v22150_v14  ;;  %v17983_v27 = vpop.f32.mrb[89].mxu0  ;;  %v10635_v54 = vsel %vm7558_vm2, %v22150_v14, -inf  ;;  %v22170_v36 = vpop.eup %18696  ;;  %18702 = vpow2.f32 %v10839_v20 }
 0x5b3   :  { %v9626_v11 = vpop.f32.mrb[90].mxu0  ;;  %10964 = vadd.xlane.f32.xlu0 %v10963_v29  ;;  %v22158_v19 = vpop.f32.mrb[104].mxu1  ;;  %25424 = vst [vmem:[#allocation90_spill] sm:$0xff] %v22160_v23  ;;  %v7411_v29 = vshrl.u32 %v22071_v63, 16 }
 0x5b4   :  { %25423 = vst [vmem:[#allocation89_spill] sm:$0xff] %v22158_v19  ;;  %v17984_v48 = vpop.f32.mrb[91].mxu0  ;;  %v17989_v49 = vpop.f32.mrb[105].mxu1  ;;  %v10638_v27 = vsel %vm7558_vm2, %v22158_v19, -inf  ;;  %v10969_v11 = vsel %vm7558_vm2, %v22170_v36, 0.0 }
 0x5b5   :  { %v9672_v43 = vpop.f32.mrb[106].mxu1  ;;  %10639 = vmax.xlane.f32.xlu1 %v10638_v27  ;;  %v22172_v48 = vpack.i.b16 %v7412_v12, %v7411_v29 }
 0x5b6   :  { %v17990_v57 = vpop.f32.mrb[107].mxu1 }
 0x5b7   :  { %10636 = vmax.xlane.f32.xlu0 %v10635_v54  ;;  %25426 = vst [vmem:[#allocation92_spill] sm:$0xff] %v22172_v48 }
 0x5b9   :  { %v22174_v49 = vpop.f32.mrb[92].mxu0  ;;  %10973 = vadd.xlane.f32.xlu1 %v10972_v2  ;;  %v22182_v54 = vpop.eup %18698 }
 0x5ba   :  { %25427 = vst [vmem:[#allocation93_spill] sm:$0xff] %v22174_v49  ;;  %v17995_v33 = vpop.f32.mrb[93].mxu0  ;;  %v10641_v20 = vsel %vm7558_vm2, %v22174_v49, -inf  ;;  %v10957_v2 = vsel %vm7558_vm2, %v22182_v54, 0.0 }
 0x5bb   :  { %v9718_v27 = vpop.f32.mrb[94].mxu0  ;;  %10970 = vadd.xlane.f32.xlu0 %v10969_v11  ;;  %v22180_v43 = vpop.f32.mrb[108].mxu1 }
 0x5bc   :  { %25428 = vst [vmem:[#allocation94_spill] sm:$0xff] %v22180_v43  ;;  %v17996_v23 = vpop.f32.mrb[95].mxu0  ;;  %v18001_v57 = vpop.f32.mrb[109].mxu1  ;;  %v10644_v12 = vsel %vm7558_vm2, %v22180_v43, -inf }
 0x5bd   :  { %v9764_v29 = vpop.f32.mrb[110].mxu1  ;;  %v22188_v33 = vpop.eup %18700  ;;  %10645 = vmax.xlane.f32.xlu1 %v10644_v12 }
 0x5be   :  { %25429 = vst [vmem:[#allocation95_spill] sm:$0xff] %v22188_v33  ;;  %v18002_v48 = vpop.f32.mrb[111].mxu1  ;;  %v10978_v23 = vsel %vm7558_vm2, %v22188_v33, 0.0  ;;  %v22194_v11 = vpop.eup %18702 }
 0x5bf   :  { %10642 = vmax.xlane.f32.xlu0 %v10641_v20  ;;  %v10975_v27 = vsel %vm7558_vm2, %v22194_v11, 0.0  ;;  %v22198_v57 = vpop.xlane.xlu1 %10537  ;;  %v22204_v20 = vpop.xlane.xlu0 %10513 }
 0x5c0   :  { %25432 = vst [vmem:[#allocation98_spill] sm:$0xff] %v22204_v20  ;;  %v25131_v32 = vmax.f32 %v22204_v20, 0.0 }
 0x5c1   :  { %10979 = vadd.xlane.f32.xlu1 %v10978_v23 }
 0x5c2   :  { %v10762_v9 = vsub.f32 %v25440_v1, %v25131_v32  ;;  %v11209_v32 = vmul.f32 1.442695, %v11144_v10 }
 0x5c3   :  { %10958 = vadd.xlane.f32.xlu0 %v10957_v2  ;;  %v22200_v29 = vpop.xlane.xlu1 %10543  ;;  %v22208_v63 = vpop.xlane.xlu0 %10534 }
 0x5c4   :  { %25430 = vst [vmem:[#allocation96_spill] sm:$0xff] %v22200_v29  ;;  %25434 = vst [vmem:[#allocation100_spill] sm:$0xff] %v22208_v63  ;;  %v25134_v43 = vmax.f32 %v22208_v63, 0.0  ;;  %v10829_v8 = vmul.f32 1.442695, %v10762_v9  ;;  %v25140_v20 = vmax.f32 %v22200_v29, 0.0 }
 0x5c5   :  { %v25447_v9 = vld [vmem:[#allocation25_spill] sm:$0xff] }
 0x5c6   :  { %v10769_v41 = vsub.f32 %v25442_v38, %v25134_v43  ;;  %18704 = vpow2.f32 %v10829_v8 }
 0x5c7   :  { %10976 = vadd.xlane.f32.xlu0 %v10975_v27  ;;  %v22202_v48 = vpop.xlane.xlu1 %10549  ;;  %v22212_v2 = vpop.xlane.xlu0 %10540 }
 0x5c8   :  { %25431 = vst [vmem:[#allocation97_spill] sm:$0xff] %v22202_v48  ;;  %25435 = vst [vmem:[#allocation101_spill] sm:$0xff] %v22212_v2  ;;  %v10843_v13 = vmul.f32 1.442695, %v10769_v41  ;;  %v25139_v1 = vmax.f32 %v22212_v2, 0.0  ;;  %v10772_v41 = vsub.f32 %v25448_v26, %v25140_v20 }
 0x5ca   :  { %18706 = vpow2.f32 %v10843_v13  ;;  %v10771_v42 = vsub.f32 %v25447_v9, %v25139_v1  ;;  %v10849_v7 = vmul.f32 1.442695, %v10772_v41 }
 0x5cb   :  { %v22206_v12 = vpop.xlane.xlu1 %10555  ;;  %v22216_v59 = vpop.xlane.xlu0 %10546  ;;  %18708 = vpow2.f32 %v11209_v32 }
 0x5cc   :  { %25433 = vst [vmem:[#allocation99_spill] sm:$0xff] %v22206_v12  ;;  %v10847_v10 = vmul.f32 1.442695, %v10771_v42 }
 0x5ce   :  { %18710 = vpow2.f32 %v10847_v10 }
 0x5cf   :  { %v22210_v33 = vpop.xlane.xlu1 %10561  ;;  %v22220_v44 = vpop.xlane.xlu0 %10552  ;;  %18712 = vpow2.f32 %v10849_v7 }
 0x5d0   :  { %25437 = vst [vmem:[#allocation103_spill] sm:$0xff] %v22220_v44  ;;  %v22272_v2 = vpop.eup %18704 }
 0x5d1   :  { %25452 = vst [vmem:[#allocation109_spill] sm:$0xff] %v22272_v2 }
 0x5d3   :  { %v22214_v23 = vpop.xlane.xlu1 %10567  ;;  %v22222_v19 = vpop.xlane.xlu0 %10558 }
 0x5d4   :  { %25436 = vst [vmem:[#allocation102_spill] sm:$0xff] %v22214_v23  ;;  %v22278_v20 = vpop.eup %18706 }
 0x5d5   :  { %25455 = vst [vmem:[#allocation112_spill] sm:$0xff] %v22278_v20  ;;  %v18709_v29 = vpop.eup %18708 }
 0x5d7   :  { %v22218_v27 = vpop.xlane.xlu1 %10573  ;;  %v22226_v49 = vpop.xlane.xlu0 %10564 }
 0x5db   :  { %v22224_v25 = vpop.xlane.xlu1 %10579  ;;  %v22230_v58 = vpop.xlane.xlu0 %10570 }
 0x5dc   :  { %25438 = vst [vmem:[#allocation104_spill] sm:$0xff] %v22224_v25 }
 0x5df   :  { %v22228_v14 = vpop.xlane.xlu1 %10585  ;;  %v22234_v40 = vpop.xlane.xlu0 %10576 }
 0x5e0   :  { %25439 = vst [vmem:[#allocation105_spill] sm:$0xff] %v22228_v14 }
 0x5e3   :  { %v22239_v47 = vpop.xlane.xlu1 %10591  ;;  %v22244_v61 = vpop.xlane.xlu0 %10582 }
 0x5e4   :  { %25441 = vst [vmem:[#allocation36_spill] sm:$0xff] %v22239_v47 }
 0x5e7   :  { %v22248_v35 = vpop.xlane.xlu1 %10597  ;;  %v22250_v3 = vpop.xlane.xlu0 %10588 }
 0x5e8   :  { %25444 = vst [vmem:[#allocation37_spill] sm:$0xff] %v22248_v35 }
 0x5eb   :  { %v22256_v38 = vpop.xlane.xlu0 %10594 }
 0x5ec   :  { %25446 = vst [vmem:[#allocation107_spill] sm:$0xff] %v22256_v38 }
 0x610   :  { %v22266_v43 = vpop.xlane.xlu0 %10600 }
 0x611   :  { %25450 = vst [vmem:[#allocation18_spill] sm:$0xff] %v22266_v43 }
 0x612   :  { %v22254_v63 = vpop.xlane.xlu1 %10603 }
 0x613   :  { %25445 = vst [vmem:[#allocation106_spill] sm:$0xff] %v22254_v63 }
 0x618   :  { %v22276_v1 = vpop.xlane.xlu0 %10606 }
 0x619   :  { %25454 = vst [vmem:[#allocation111_spill] sm:$0xff] %v22276_v1 }
 0x61b   :  { %v22264_v8 = vpop.xlane.xlu1 %10609 }
 0x61c   :  { %25449 = vst [vmem:[#allocation25_spill] sm:$0xff] %v22264_v8 }
 0x61d   :  { %v22268_v17 = vpop.f32.mrb[96].mxu0 }
 0x61e   :  { %25451 = vst [vmem:[#allocation108_spill] sm:$0xff] %v22268_v17  ;;  %v18007_v13 = vpop.f32.mrb[97].mxu0  ;;  %v10647_v22 = vsel %vm7558_vm2, %v22268_v17, -inf  ;;  %v25457_v17 = vmax.f32 %v21980_v16, 0.0  ;;  %v25461_v16 = vld [vmem:[#allocation39_spill] sm:$0xff] }
 0x61f   :  { %v9810_v32 = vpop.f32.mrb[98].mxu0  ;;  %10648 = vmax.xlane.f32.xlu0 %v10647_v22  ;;  %v10960_v13 = vsel %vm7558_vm2, %v22272_v2, 0.0  ;;  %v25460_v2 = vmax.f32 %v22216_v59, 0.0 }
 0x620   :  { %v18008_v26 = vpop.f32.mrb[99].mxu0  ;;  %v22290_v8 = vpop.xlane.xlu0 %10612 }
 0x621   :  { %v25151_v26 = vmax.f32 %v22202_v48, 0.0  ;;  %25458 = vst [vmem:[#allocation114_spill] sm:$0xff] %v22290_v8 }
 0x622   :  { %v22274_v9 = vpop.xlane.xlu1 %10615  ;;  %v22281_v41 = vpop.f32.mrb[112].mxu1 }
 0x623   :  { %25453 = vst [vmem:[#allocation110_spill] sm:$0xff] %v22274_v9  ;;  %25456 = vst [vmem:[#allocation113_spill] sm:$0xff] %v22281_v41  ;;  %v11143_v9 = vsub.f32 0.0, %v25457_v17  ;;  %v18013_v32 = vpop.f32.mrb[113].mxu1  ;;  %v10650_v22 = vsel %vm7558_vm2, %v22281_v41, -inf  ;;  %10961 = vadd.xlane.f32.xlu0 %v10960_v13  ;;  %v10773_v17 = vsub.f32 %v25461_v16, %v25460_v2  ;;  %v10981_v41 = vsel %vm7558_vm2, %v22278_v20, 0.0  ;;  %v22308_v16 = vpop.eup %18710 }
 0x624   :  { %10651 = vmax.xlane.f32.xlu1 %v10650_v22  ;;  %v9856_v7 = vpop.f32.mrb[114].mxu1  ;;  %v25462_v22 = vld [vmem:[#allocation21_spill] sm:$0xff] }
 0x625   :  { %v18014_v56 = vpop.f32.mrb[115].mxu1  ;;  %v22292_v0 = vpop.f32.mrb[100].mxu0  ;;  %v11207_v13 = vmul.f32 1.442695, %v11143_v9  ;;  %v10774_v7 = vsub.f32 %v25462_v22, %v25151_v26  ;;  %25464 = vst [vmem:[#allocation21_spill] sm:$0xff] %v22308_v16  ;;  %v25156_v9 = vmax.f32 %v22220_v44, 0.0 }
 0x626   :  { %25459 = vst [vmem:[#allocation115_spill] sm:$0xff] %v22292_v0  ;;  %v18019_v32 = vpop.f32.mrb[101].mxu0  ;;  %v10653_v2 = vsel %vm7558_vm2, %v22292_v0, -inf  ;;  %v25158_v22 = vmax.f32 %v22206_v12, 0.0  ;;  %v25159_v0 = vmax.f32 %v22198_v57, 0.0 }
 0x627   :  { %v9902_v5 = vpop.f32.mrb[102].mxu0  ;;  %10982 = vadd.xlane.f32.xlu0 %v10981_v41  ;;  %v22313_v41 = vpop.eup %18712  ;;  %v10853_v32 = vmul.f32 1.442695, %v10774_v7 }
 0x628   :  { %v22302_v56 = vpop.xlane.xlu0 %10618  ;;  %25465 = vst [vmem:[#allocation116_spill] sm:$0xff] %v22313_v41 }
 0x629   :  { %25463 = vst [vmem:[#allocation39_spill] sm:$0xff] %v22302_v56 }
 0x62b   :  { %v10956_v10 = vpop.xlane.xlu1 %10955  ;;  %v22304_v34 = vpop.f32.mrb[116].mxu1  ;;  %10654 = vmax.xlane.f32.xlu0 %v10653_v2  ;;  %v10990_v2 = vsel %vm7558_vm2, %v22313_v41, 0.0 }
 0x62c   :  { %v11336_v42 = vadd.f32 %v18709_v29, %v10956_v10  ;;  %v18020_v29 = vpop.f32.mrb[103].mxu0  ;;  %v10851_v10 = vmul.f32 1.442695, %v10773_v17  ;;  %v18025_v5 = vpop.f32.mrb[117].mxu1 }
 0x62d   :  { %v9948_v17 = vpop.f32.mrb[118].mxu1  ;;  %v25467_v5 = vld [vmem:[#allocation19_spill] sm:$0xff] }
 0x62e   :  { %18714 = vrcp.f32 %v11336_v42  ;;  %v10656_v42 = vsel %vm7558_vm2, %v22304_v34, -inf  ;;  %v18026_v26 = vpop.f32.mrb[119].mxu1  ;;  %v10775_v48 = vsub.f32 %v25467_v5, %v25156_v9 }
 0x62f   :  { %18716 = vpow2.f32 %v11207_v13  ;;  %10657 = vmax.xlane.f32.xlu1 %v10656_v42  ;;  %v10987_v13 = vsel %vm7558_vm2, %v22308_v16, 0.0  ;;  %v25468_v42 = vld [vmem:[#allocation42_spill] sm:$0xff] }
 0x630   :  { %v22316_v29 = vpop.xlane.xlu0 %10624  ;;  %18718 = vpow2.f32 %v10851_v10  ;;  %10988 = vadd.xlane.f32.xlu0 %v10987_v13  ;;  %v10776_v17 = vsub.f32 %v25468_v42, %v25158_v22  ;;  %v10855_v16 = vmul.f32 1.442695, %v10775_v48  ;;  %v25470_v48 = vld [vmem:[#allocation41_spill] sm:$0xff] }
 0x631   :  { %25466 = vst [vmem:[#allocation117_spill] sm:$0xff] %v22316_v29  ;;  %18720 = vpow2.f32 %v10853_v32  ;;  %v11734_v32 = vsel %vm11594_vm3, %v21929_v24, 0 }
 0x632   :  { %v10857_v9 = vmul.f32 1.442695, %v10776_v17  ;;  %18722 = vpow2.f32 %v10855_v16  ;;  %v25473_v16 = vmax.f32 %v22102_v30, 0.0 }
 0x633   :  { %10991 = vadd.xlane.f32.xlu1 %v10990_v2 }
 0x634   :  { %18724 = vpow2.f32 %v10857_v9 }
 0x637   :  { %v22335_v13 = vpop.f32.mrb[104].mxu0 }
 0x638   :  { %v18715_v7 = vpop.eup %18714  ;;  %v22328_v26 = vpop.xlane.xlu0 %10630 }
 0x639   :  { %25469 = vst [vmem:[#allocation19_spill] sm:$0xff] %v22328_v26  ;;  %v11464_v10 = vmul.f32 %v18715_v7, %v22056_v45  ;;  %v18717_v5 = vpop.eup %18716  ;;  %v25162_v45 = vmax.f32 %v22222_v19, 0.0  ;;  %v10770_v7 = vsub.f32 %v25470_v48, %v25159_v0  ;;  %v18031_v42 = vpop.f32.mrb[105].mxu0 }
 0x63a   :  { %v22346_v24 = vpop.eup %18718  ;;  %v22348_v17 = vpop.f32.mrb[120].mxu1 }
 0x63b   :  { %v11528_v44 = vpack.c.bf16 %v11464_v10, %v11464_v10  ;;  %25471 = vst [vmem:[#allocation42_spill] sm:$0xff] %v22346_v24  ;;  %25472 = vst [vmem:[#allocation41_spill] sm:$0xff] %v22348_v17  ;;  %v11145_v10 = vsub.f32 0.0, %v25473_v16  ;;  %v10662_v48 = vsel %vm7558_vm2, %v22348_v17, -inf  ;;  %v22354_v42 = vpop.eup %18720  ;;  %v10845_v41 = vmul.f32 1.442695, %v10770_v7 }
 0x63c   :  { %v10953_v20 = vpop.xlane.xlu0 %10952  ;;  %25474 = vst [vmem:[#allocation118_spill] sm:$0xff] %v22354_v42  ;;  %10663 = vmax.xlane.f32.xlu1 %v10662_v48  ;;  %v10993_v9 = vsel %vm7558_vm2, %v22346_v24, 0.0  ;;  %v25476_v16 = vmax.f32 %v22024_v52, 0.0  ;;  %v25167_v48 = vmax.f32 %v22214_v23, 0.0  ;;  %v25480_v24 = vmax.f32 %v22226_v49, 0.0 }
 0x63d   :  { %18108 = vmatmul.mubr.msk.bf16.vlgmr.msra.gmra.mrb[144].mxu1 %vm7558_vm2, %v11528_v44  ;;  %v11335_v2 = vadd.f32 %v18717_v5, %v10953_v20  ;;  %v10659_v44 = vsel %vm7558_vm2, %v22335_v13, -inf  ;;  %v9994_v20 = vpop.f32.mrb[106].mxu0 }
 0x63e   :  { %18118 = vmatpush3.bf16.msra.mxu1 %v11734_v32  ;;  %18119 = vmatprep.mubr.msk.bf16.mxu1 %vm19202_vm1, %v25293_v31  ;;  %v18032_v5 = vpop.f32.mrb[107].mxu0  ;;  %v18037_v32 = vpop.f32.mrb[121].mxu1  ;;  %v25475_v20 = vld [vmem:[#allocation43_spill] sm:$0xff] }
 0x63f   :  { %18129 = vmatprep.subr.bf16.mxu1 %v25293_v31  ;;  %10660 = vmax.xlane.f32.xlu0 %v10659_v44  ;;  %v10040_v22 = vpop.f32.mrb[122].mxu1  ;;  %18726 = vrcp.f32 %v11335_v2  ;;  %v10777_v44 = vsub.f32 %v25475_v20, %v25162_v45  ;;  %v11147_v5 = vsub.f32 0.0, %v25476_v16  ;;  %v11211_v32 = vmul.f32 1.442695, %v11145_v10  ;;  %v25477_v16 = vld [vmem:[#allocation47_spill] sm:$0xff] }
 0x640   :  { %v22356_v0 = vpop.xlane.xlu0 %10964  ;;  %v18038_v30 = vpop.f32.mrb[123].mxu1  ;;  %v10996_v22 = vsel %vm7558_vm2, %v22354_v42, 0.0  ;;  %18728 = vpow2.f32 %v10845_v41 }
 0x641   :  { %10997 = vadd.xlane.f32.xlu1 %v10996_v22  ;;  %v10859_v12 = vmul.f32 1.442695, %v10777_v44  ;;  %v22371_v20 = vpop.f32.mrb[108].mxu0  ;;  %v11215_v10 = vmul.f32 1.442695, %v11147_v5  ;;  %18730 = vpow2.f32 %v11211_v32  ;;  %v10780_v22 = vsub.f32 %v25477_v16, %v25167_v48  ;;  %v25481_v5 = vld [vmem:[#allocation45_spill] sm:$0xff] }
 0x642   :  { %v18043_v30 = vpop.f32.mrb[109].mxu0  ;;  %v10665_v52 = vsel %vm7558_vm2, %v22371_v20, -inf  ;;  %v22380_v42 = vpop.f32.mrb[124].mxu1  ;;  %v10779_v32 = vsub.f32 %v25481_v5, %v25480_v24  ;;  %v25482_v16 = vmax.f32 %v22082_v39, 0.0 }
 0x643   :  { %10994 = vadd.xlane.f32.xlu0 %v10993_v9  ;;  %v22375_v9 = vpop.eup %18722  ;;  %v10086_v45 = vpop.f32.mrb[110].mxu0  ;;  %25478 = vst [vmem:[#allocation43_spill] sm:$0xff] %v22380_v42  ;;  %v10668_v30 = vsel %vm7558_vm2, %v22380_v42, -inf  ;;  %18732 = vpow2.f32 %v10859_v12  ;;  %v10865_v48 = vmul.f32 1.442695, %v10780_v22  ;;  %v25170_v12 = vmax.f32 %v22218_v27, 0.0 }
 0x644   :  { %v22368_v2 = vpop.xlane.xlu0 %10636  ;;  %v18044_v44 = vpop.f32.mrb[111].mxu0  ;;  %18734 = vpow2.f32 %v11215_v10  ;;  %v10863_v24 = vmul.f32 1.442695, %v10779_v32 }
 0x645   :  { %v18049_v41 = vpop.f32.mrb[125].mxu1  ;;  %v22384_v7 = vpop.eup %18724  ;;  %10669 = vmax.xlane.f32.xlu1 %v10668_v30  ;;  %18736 = vpow2.f32 %v10865_v48 }
 0x646   :  { %25479 = vst [vmem:[#allocation47_spill] sm:$0xff] %v22384_v7  ;;  %v10132_v23 = vpop.f32.mrb[126].mxu1  ;;  %v10999_v41 = vsel %vm7558_vm2, %v22375_v9, 0.0  ;;  %18738 = vpow2.f32 %v10863_v24 }
 0x647   :  { %10666 = vmax.xlane.f32.xlu0 %v10665_v52  ;;  %v11149_v52 = vsub.f32 0.0, %v25482_v16  ;;  %v18050_v44 = vpop.f32.mrb[127].mxu1  ;;  %v11002_v23 = vsel %vm7558_vm2, %v22384_v7, 0.0 }
 0x648   :  { %v22389_v17 = vpop.xlane.xlu0 %10970  ;;  %v22400_v39 = vpop.f32.mrb[112].mxu0 }
 0x649   :  { %v18727_v45 = vpop.eup %18726  ;;  %11003 = vadd.xlane.f32.xlu1 %v11002_v23  ;;  %v18055_v44 = vpop.f32.mrb[113].mxu0  ;;  %v10671_v10 = vsel %vm7558_vm2, %v22400_v39, -inf }
 0x64a   :  { %v11463_v42 = vmul.f32 %v18727_v45, %v22128_v6  ;;  %v22406_v22 = vpop.eup %18728  ;;  %v25483_v6 = vld [vmem:[#allocation50_spill] sm:$0xff]  ;;  %v10178_v45 = vpop.f32.mrb[114].mxu0 }
 0x64b   :  { %11000 = vadd.xlane.f32.xlu0 %v10999_v41  ;;  %v11219_v41 = vmul.f32 1.442695, %v11149_v52  ;;  %v10782_v32 = vsub.f32 %v25483_v6, %v25170_v12  ;;  %v22411_v30 = vpop.f32.mrb[128].mxu1  ;;  %v18056_v44 = vpop.f32.mrb[115].mxu0  ;;  %v25487_v6 = vld [vmem:[#allocation48_spill] sm:$0xff] }
 0x64c   :  { %v22402_v5 = vpop.xlane.xlu0 %10642  ;;  %v11527_v16 = vpack.c.bf16 %v11463_v42, %v11463_v42  ;;  %25484 = vst [vmem:[#allocation45_spill] sm:$0xff] %v22411_v30  ;;  %v25485_v42 = vpack.i.b16 %v21905_v28, %v21874_v21  ;;  %v18061_v7 = vpop.f32.mrb[129].mxu1  ;;  %v10674_v48 = vsel %vm7558_vm2, %v22411_v30, -inf  ;;  %v25488_v44 = vmax.f32 %v22124_v55, 0.0  ;;  %v25490_v55 = vld [vmem:[#allocation52_spill] sm:$0xff] }
 0x64d   :  { %v18731_v52 = vpop.eup %18730  ;;  %10675 = vmax.xlane.f32.xlu1 %v10674_v48  ;;  %v10224_v45 = vpop.f32.mrb[130].mxu1  ;;  %18740 = vpow2.f32 %v11219_v41  ;;  %v10869_v12 = vmul.f32 1.442695, %v10782_v32  ;;  %v25172_v30 = vmax.f32 %v22224_v25, 0.0 }
 0x64e   :  { %18102 = vmatmul.mubr.msk.bf16.vlgmr.msra.gmra.mrb[128].mxu0 %vm7558_vm2, %v11527_v16  ;;  %v11688_v23 = vsel %vm11594_vm3, %v25485_v42, 0  ;;  %v18062_v28 = vpop.f32.mrb[131].mxu1  ;;  %v10984_v42 = vsel %vm7558_vm2, %v22406_v22, 0.0  ;;  %v11151_v24 = vsub.f32 0.0, %v25488_v44 }
 0x64f   :  { %10672 = vmax.xlane.f32.xlu0 %v10671_v10  ;;  %18112 = vmatpush3.bf16.msra.mxu0 %v11688_v23  ;;  %v25486_v10 = vmax.f32 %v22230_v58, 0.0  ;;  %v22428_v23 = vpop.eup %18732  ;;  %v10784_v32 = vsub.f32 %v25490_v55, %v25172_v30 }
 0x650   :  { %18113 = vmatprep.mubr.msk.bf16.mxu0 %vm19202_vm1, %v25293_v31  ;;  %v10959_v21 = vpop.xlane.xlu0 %10958  ;;  %18123 = vmatprep.subr.bf16.mxu0 %v25293_v31  ;;  %v18735_v48 = vpop.eup %18734  ;;  %v11005_v41 = vsel %vm7558_vm2, %v22428_v23, 0.0  ;;  %v11223_v28 = vmul.f32 1.442695, %v11151_v24  ;;  %v25494_v24 = vld [vmem:[#allocation51_spill] sm:$0xff] }
 0x651   :  { %v10781_v16 = vsub.f32 %v25487_v6, %v25486_v10  ;;  %v11337_v7 = vadd.f32 %v18731_v52, %v10959_v21  ;;  %v22434_v45 = vpop.f32.mrb[116].mxu0  ;;  %v11339_v52 = vadd.f32 %v18735_v48, %v22356_v0 }
 0x652   :  { %25489 = vst [vmem:[#allocation50_spill] sm:$0xff] %v22434_v45  ;;  %v18067_v21 = vpop.f32.mrb[117].mxu0  ;;  %v22443_v44 = vpop.f32.mrb[132].mxu1 }
 0x653   :  { %10985 = vadd.xlane.f32.xlu0 %v10984_v42  ;;  %v10867_v10 = vmul.f32 1.442695, %v10781_v16  ;;  %18742 = vrcp.f32 %v11337_v7  ;;  %v25175_v42 = vmax.f32 %v22239_v47, 0.0  ;;  %v10270_v16 = vpop.f32.mrb[118].mxu0  ;;  %25491 = vst [vmem:[#allocation48_spill] sm:$0xff] %v22443_v44  ;;  %v18073_v7 = vpop.f32.mrb[133].mxu1 }
 0x654   :  { %18744 = vpow2.f32 %v10869_v12  ;;  %v18068_v0 = vpop.f32.mrb[119].mxu0  ;;  %v10680_v48 = vsel %vm7558_vm2, %v22443_v44, -inf  ;;  %v22448_v21 = vpop.eup %18736  ;;  %v25493_v12 = vmax.f32 %v22234_v40, 0.0  ;;  %v25496_v7 = vld [vmem:[#allocation56_spill] sm:$0xff] }
 0x655   :  { %25492 = vst [vmem:[#allocation52_spill] sm:$0xff] %v22448_v21  ;;  %18746 = vpow2.f32 %v10867_v10  ;;  %10681 = vmax.xlane.f32.xlu1 %v10680_v48  ;;  %v10316_v30 = vpop.f32.mrb[134].mxu1  ;;  %v22455_v6 = vpop.eup %18738  ;;  %v10873_v0 = vmul.f32 1.442695, %v10784_v32  ;;  %v10788_v44 = vsub.f32 %v25496_v7, %v25175_v42  ;;  %v25179_v10 = vmax.f32 %v22248_v35, 0.0  ;;  %v25498_v48 = vld [vmem:[#allocation44_spill] sm:$0xff] }
 0x656   :  { %v10783_v55 = vsub.f32 %v25494_v24, %v25493_v12  ;;  %18748 = vrcp.f32 %v11339_v52  ;;  %v18074_v16 = vpop.f32.mrb[135].mxu1  ;;  %25495 = vst [vmem:[#allocation51_spill] sm:$0xff] %v22455_v6  ;;  %v25497_v12 = vmax.f32 %v22210_v33, 0.0  ;;  %v11014_v52 = vsel %vm7558_vm2, %v22448_v21, 0.0 }
 0x657   :  { %11006 = vadd.xlane.f32.xlu0 %v11005_v41  ;;  %v10677_v41 = vsel %vm7558_vm2, %v22434_v45, -inf  ;;  %18750 = vpow2.f32 %v11223_v28  ;;  %v18741_v24 = vpop.eup %18740  ;;  %v10881_v42 = vmul.f32 1.442695, %v10788_v44  ;;  %v25503_v44 = vmax.f32 %v22244_v61, 0.0 }
 0x658   :  { %v10778_v30 = vsub.f32 %v25498_v48, %v25497_v12  ;;  %v10871_v16 = vmul.f32 1.442695, %v10783_v55  ;;  %v22467_v28 = vpop.f32.mrb[120].mxu0  ;;  %v11341_v32 = vadd.f32 %v18741_v24, %v22389_v17  ;;  %18752 = vpow2.f32 %v10873_v0  ;;  %v25500_v12 = vld [vmem:[#allocation58_spill] sm:$0xff]  ;;  %v25504_v0 = vld [vmem:[#allocation53_spill] sm:$0xff] }
 0x659   :  { %11015 = vadd.xlane.f32.xlu1 %v11014_v52  ;;  %25499 = vst [vmem:[#allocation56_spill] sm:$0xff] %v22467_v28  ;;  %v18079_v7 = vpop.f32.mrb[121].mxu0  ;;  %v10790_v48 = vsub.f32 %v25500_v12, %v25179_v10  ;;  %v10785_v12 = vsub.f32 %v25504_v0, %v25503_v44  ;;  %v25189_v10 = vmax.f32 %v22250_v3, 0.0  ;;  %v10977_v44 = vpop.xlane.xlu0 %10976 }
 0x65a   :  { %v10362_v55 = vpop.f32.mrb[122].mxu0  ;;  %v22476_v47 = vpop.f32.mrb[136].mxu1  ;;  %v10861_v45 = vmul.f32 1.442695, %v10778_v30  ;;  %18754 = vpow2.f32 %v10871_v16  ;;  %v25506_v16 = vmax.f32 %v22254_v63, 0.0 }
 0x65b   :  { %10678 = vmax.xlane.f32.xlu0 %v10677_v41  ;;  %v11011_v41 = vsel %vm7558_vm2, %v22455_v6, 0.0  ;;  %25501 = vst [vmem:[#allocation44_spill] sm:$0xff] %v22476_v47  ;;  %v18080_v25 = vpop.f32.mrb[123].mxu0  ;;  %v18085_v17 = vpop.f32.mrb[137].mxu1  ;;  %v10686_v24 = vsel %vm7558_vm2, %v22476_v47, -inf  ;;  %18756 = vrcp.f32 %v11341_v32  ;;  %v25507_v32 = vpack.i.b16 %v21923_v18, %v21920_v60 }
 0x65c   :  { %v10408_v55 = vpop.f32.mrb[138].mxu1  ;;  %v10683_v25 = vsel %vm7558_vm2, %v22467_v28, -inf  ;;  %18758 = vpow2.f32 %v10881_v42  ;;  %v10885_v21 = vmul.f32 1.442695, %v10790_v48  ;;  %v10792_v35 = vsub.f32 %v21864_v50, %v25506_v16  ;;  %v25508_v42 = vld [vmem:[#allocation55_spill] sm:$0xff] }
 0x65d   :  { %v18743_v52 = vpop.eup %18742  ;;  %10687 = vmax.xlane.f32.xlu1 %v10686_v24  ;;  %v18086_v30 = vpop.f32.mrb[139].mxu1  ;;  %18760 = vpow2.f32 %v10861_v45  ;;  %v10787_v48 = vsub.f32 %v25508_v42, %v25189_v10  ;;  %v25188_v50 = vmax.f32 %v22256_v38, 0.0  ;;  %v25187_v42 = vmax.f32 %v22266_v43, 0.0  ;;  %v25590_v43 = vld [vmem:[#allocation72_spill] sm:$0xff]  ;;  %v25594_v38 = vld [vmem:[#allocation113_spill] sm:$0xff] }
 0x65e   :  { %v22480_v7 = vpop.eup %18744  ;;  %v10875_v30 = vmul.f32 1.442695, %v10785_v12  ;;  %18762 = vpow2.f32 %v10885_v21  ;;  %v10889_v18 = vmul.f32 1.442695, %v10792_v35  ;;  %v25512_v35 = vld [vmem:[#allocation57_spill] sm:$0xff] }
 0x65f   :  { %11012 = vadd.xlane.f32.xlu0 %v11011_v41  ;;  %25502 = vst [vmem:[#allocation58_spill] sm:$0xff] %v22480_v7  ;;  %v11465_v41 = vmul.f32 %v18743_v52, %v22182_v54  ;;  %v22489_v17 = vpop.eup %18746  ;;  %v11020_v54 = vsel %vm7558_vm2, %v22480_v7, 0.0  ;;  %v11780_v52 = vsel %vm11594_vm3, %v25507_v32, 0  ;;  %v10789_v21 = vsub.f32 %v25512_v35, %v25188_v50  ;;  %v25558_v7 = vld [vmem:[#allocation76_spill] sm:$0xff] }
 0x660   :  { %25505 = vst [vmem:[#allocation53_spill] sm:$0xff] %v22489_v17  ;;  %v18749_v24 = vpop.eup %18748  ;;  %v11017_v60 = vsel %vm7558_vm2, %v22489_v17, 0.0  ;;  %18764 = vpow2.f32 %v10875_v30  ;;  %v25185_v35 = vmax.f32 %v22228_v14, 0.0  ;;  %v25559_v28 = vmax.f32 %v25558_v7, 0.0  ;;  %v25563_v7 = vld [vmem:[#allocation67_spill] sm:$0xff]  ;;  %v25587_v14 = vld [vmem:[#allocation68_spill] sm:$0xff] }
 0x661   :  { %v11529_v0 = vpack.c.bf16 %v11465_v41, %v11465_v41  ;;  %v18751_v55 = vpop.eup %18750  ;;  %11021 = vadd.xlane.f32.xlu1 %v11020_v54  ;;  %v11467_v54 = vmul.f32 %v18749_v24, %v22145_v37 }
 0x662   :  { %v22504_v41 = vpop.f32.mrb[124].mxu0 }
 0x663   :  { %10684 = vmax.xlane.f32.xlu0 %v10683_v25  ;;  %25509 = vst [vmem:[#allocation55_spill] sm:$0xff] %v22504_v41  ;;  %18114 = vmatmul.mubr.msk.bf16.vlgmr.msra.gmra.mrb[132].mxu0 %vm7558_vm2, %v11529_v0  ;;  %v11343_v25 = vadd.f32 %v18751_v55, %v10977_v44  ;;  %v18091_v16 = vpop.f32.mrb[125].mxu0  ;;  %v10879_v55 = vmul.f32 1.442695, %v10787_v48  ;;  %v10689_v37 = vsel %vm7558_vm2, %v22504_v41, -inf }
 0x664   :  { %18124 = vmatpush3.bf16.msra.mxu0 %v11780_v52  ;;  %18125 = vmatprep.mubr.msk.bf16.mxu0 %vm19202_vm1, %v25293_v31  ;;  %v10454_v45 = vpop.f32.mrb[126].mxu0  ;;  %v22517_v52 = vpop.eup %18752 }
 0x665   :  { %v22511_v12 = vpop.f32.mrb[140].mxu1  ;;  %18135 = vmatprep.subr.bf16.mxu0 %v25293_v31  ;;  %v18092_v0 = vpop.f32.mrb[127].mxu0  ;;  %25511 = vst [vmem:[#allocation120_spill] sm:$0xff] %v22517_v52  ;;  %18766 = vrcp.f32 %v11343_v25  ;;  %v11531_v45 = vpack.c.bf16 %v11467_v54, %v11467_v54  ;;  %v11026_v48 = vsel %vm7558_vm2, %v22517_v52, 0.0  ;;  %v10883_v25 = vmul.f32 1.442695, %v10789_v21 }
 0x666   :  { %25510 = vst [vmem:[#allocation119_spill] sm:$0xff] %v22511_v12  ;;  %v18097_v44 = vpop.f32.mrb[141].mxu1  ;;  %v10692_v32 = vsel %vm7558_vm2, %v22511_v12, -inf  ;;  %v22525_v24 = vpop.eup %18754  ;;  %18768 = vpow2.f32 %v10889_v18  ;;  %v25514_v0 = vpack.i.b16 %v21957_v53, %v21953_v46  ;;  %v10791_v18 = vsub.f32 %v21847_v4, %v25187_v42  ;;  %v25551_v52 = vld [vmem:[#allocation20_spill] sm:$0xff] }
 0x667   :  { %11018 = vadd.xlane.f32.xlu0 %v11017_v60  ;;  %10693 = vmax.xlane.f32.xlu1 %v10692_v32  ;;  %v10500_v16 = vpop.f32.mrb[142].mxu1  ;;  %25513 = vst [vmem:[#allocation57_spill] sm:$0xff] %v22525_v24  ;;  %v18757_v30 = vpop.eup %18756  ;;  %18770 = vpow2.f32 %v10879_v55  ;;  %v11023_v54 = vsel %vm7558_vm2, %v22525_v24, 0.0  ;;  %v7392_v55 = vpack.i.b16 %v22030_v51, %v22027_v15 }
 0x668   :  { %v18098_v60 = vpop.f32.mrb[143].mxu1  ;;  %v11872_v44 = vsel %vm11594_vm3, %v25514_v0, 0  ;;  %v22533_v32 = vpop.eup %18758  ;;  %v11469_v53 = vmul.f32 %v18757_v30, %v22170_v36  ;;  %18772 = vpow2.f32 %v10883_v25  ;;  %v25518_v16 = vld [vmem:[#allocation54_spill] sm:$0xff] }
 0x669   :  { %25515 = vst [vmem:[#allocation121_spill] sm:$0xff] %v22533_v32  ;;  %v22544_v46 = vpop.eup %18760  ;;  %v11038_v4 = vsel %vm7558_vm2, %v22533_v32, 0.0  ;;  %v10786_v60 = vsub.f32 %v25518_v16, %v25185_v35  ;;  %v11964_v51 = vsel %vm11594_vm3, %v7392_v55, 0  ;;  %v25522_v16 = vld [vmem:[#allocation86_spill] sm:$0xff] }
 0x66a   :  { %25516 = vst [vmem:[#allocation122_spill] sm:$0xff] %v22544_v46  ;;  %v22552_v21 = vpop.eup %18762  ;;  %v11008_v36 = vsel %vm7558_vm2, %v22544_v46, 0.0 }
 0x66b   :  { %10690 = vmax.xlane.f32.xlu0 %v10689_v37  ;;  %11027 = vadd.xlane.f32.xlu1 %v11026_v48  ;;  %25517 = vst [vmem:[#allocation123_spill] sm:$0xff] %v22552_v21  ;;  %v10887_v37 = vmul.f32 1.442695, %v10791_v18  ;;  %v22560_v30 = vpop.eup %18764  ;;  %v11533_v48 = vpack.c.bf16 %v11469_v53, %v11469_v53  ;;  %v11044_v15 = vsel %vm7558_vm2, %v22552_v21, 0.0  ;;  %v10877_v25 = vmul.f32 1.442695, %v10786_v60 }
 0x66c   :  { %18126 = vmatmul.mubr.msk.bf16.vlgmr.msra.gmra.mrb[136].mxu0 %vm7558_vm2, %v11531_v45  ;;  %v25181_v45 = vmax.f32 %v22276_v1, 0.0  ;;  %25519 = vst [vmem:[#allocation54_spill] sm:$0xff] %v22560_v30  ;;  %v11029_v53 = vsel %vm7558_vm2, %v22560_v30, 0.0  ;;  %v25523_v60 = vld [vmem:[#allocation85_spill] sm:$0xff]  ;;  %v25546_v21 = vld [vmem:[#allocation110_spill] sm:$0xff] }
 0x66d   :  { %18136 = vmatpush3.bf16.msra.mxu0 %v11872_v44  ;;  %18137 = vmatprep.mubr.msk.bf16.mxu0 %vm19202_vm1, %v25293_v31  ;;  %18774 = vpow2.f32 %v10887_v37  ;;  %v7398_v37 = vpack.i.b16 %v25523_v60, %v25522_v16  ;;  %v25184_v60 = vmax.f32 %v22316_v29, 0.0 }
 0x66e   :  { %18147 = vmatprep.subr.bf16.mxu0 %v25293_v31  ;;  %v10793_v18 = vsub.f32 %v21917_v62, %v25181_v45  ;;  %18776 = vpow2.f32 %v10877_v25  ;;  %v25526_v25 = vld [vmem:[#allocation34_spill] sm:$0xff] }
 0x66f   :  { %11024 = vadd.xlane.f32.xlu0 %v11023_v54  ;;  %11039 = vadd.xlane.f32.xlu1 %v11038_v4  ;;  %v18767_v0 = vpop.eup %18766  ;;  %v25183_v54 = vmax.f32 %v22290_v8, 0.0  ;;  %v25557_v8 = vld [vmem:[#allocation23_spill] sm:$0xff] }
 0x670   :  { %v22565_v44 = vpop.eup %18768  ;;  %v11471_v55 = vmul.f32 %v18767_v0, %v22194_v11  ;;  %v12056_v0 = vsel %vm11594_vm3, %v7398_v37, 0  ;;  %v25528_v37 = vld [vmem:[#allocation25_spill] sm:$0xff] }
 0x671   :  { %25520 = vst [vmem:[#allocation124_spill] sm:$0xff] %v22565_v44  ;;  %v22576_v4 = vpop.eup %18770  ;;  %v11050_v62 = vsel %vm7558_vm2, %v22565_v44, 0.0  ;;  %v25545_v44 = vld [vmem:[#allocation59_spill] sm:$0xff] }
 0x672   :  { %25521 = vst [vmem:[#allocation125_spill] sm:$0xff] %v22576_v4  ;;  %v22590_v45 = vpop.eup %18772  ;;  %v11535_v11 = vpack.c.bf16 %v11471_v55, %v11471_v55 }
 0x673   :  { %11009 = vadd.xlane.f32.xlu0 %v11008_v36  ;;  %11045 = vadd.xlane.f32.xlu1 %v11044_v15  ;;  %v10891_v36 = vmul.f32 1.442695, %v10793_v18  ;;  %25525 = vst [vmem:[#allocation86_spill] sm:$0xff] %v22590_v45 }
 0x674   :  { %18138 = vmatmul.mubr.msk.bf16.vlgmr.msra.gmra.mrb[140].mxu0 %vm7558_vm2, %v11533_v48  ;;  %v25524_v48 = vld [vmem:[#allocation75_spill] sm:$0xff] }
 0x675   :  { %18148 = vmatpush3.bf16.msra.mxu0 %v11964_v51  ;;  %18149 = vmatprep.mubr.msk.bf16.mxu0 %vm19202_vm1, %v25293_v31  ;;  %v10795_v15 = vsub.f32 %v25524_v48, %v25183_v54  ;;  %v25182_v51 = vmax.f32 %v22302_v56, 0.0  ;;  %18778 = vpow2.f32 %v10891_v36  ;;  %v25186_v36 = vmax.f32 %v25528_v37, 0.0  ;;  %v22616_v54 = vpop.xlane.xlu1 %10621  ;;  %v25550_v37 = vld [vmem:[#allocation49_spill] sm:$0xff] }
 0x676   :  { %18159 = vmatprep.subr.bf16.mxu0 %v25293_v31  ;;  %25532 = vst [vmem:[#allocation34_spill] sm:$0xff] %v22616_v54 }
 0x677   :  { %11030 = vadd.xlane.f32.xlu0 %v11029_v53  ;;  %11051 = vadd.xlane.f32.xlu1 %v11050_v62  ;;  %v11035_v53 = vsel %vm7558_vm2, %v22576_v4, 0.0  ;;  %v10895_v16 = vmul.f32 1.442695, %v10795_v15  ;;  %v10797_v18 = vsub.f32 %v25526_v25, %v25182_v51  ;;  %v11041_v62 = vsel %vm7558_vm2, %v22590_v45, 0.0  ;;  %v22602_v55 = vpop.eup %18774  ;;  %v25529_v15 = vld [vmem:[#allocation35_spill] sm:$0xff]  ;;  %v25531_v25 = vld [vmem:[#allocation74_spill] sm:$0xff] }
 0x678   :  { %25527 = vst [vmem:[#allocation85_spill] sm:$0xff] %v22602_v55 }
 0x679   :  { %18780 = vpow2.f32 %v10895_v16  ;;  %v10899_v48 = vmul.f32 1.442695, %v10797_v18 }
 0x67b   :  { %11036 = vadd.xlane.f32.xlu0 %v11035_v53  ;;  %v10799_v53 = vsub.f32 %v25529_v15, %v25184_v60  ;;  %18782 = vpow2.f32 %v10899_v48  ;;  %v25534_v60 = vld [vmem:[#allocation28_spill] sm:$0xff]  ;;  %v22628_v48 = vpop.xlane.xlu1 %10627 }
 0x67c   :  { %18150 = vmatmul.mubr.msk.bf16.vlgmr.msra.gmra.mrb[144].mxu0 %vm7558_vm2, %v11535_v11  ;;  %v11047_v11 = vsel %vm7558_vm2, %v22602_v55, 0.0  ;;  %25536 = vst [vmem:[#allocation28_spill] sm:$0xff] %v22628_v48 }
 0x67d   :  { %18160 = vmatpush3.bf16.msra.mxu0 %v12056_v0  ;;  %18161 = vmatprep.mubr.msk.bf16.mxu0 %vm19202_vm1, %v25293_v31  ;;  %v22611_v0 = vpop.eup %18776  ;;  %v10903_v51 = vmul.f32 1.442695, %v10799_v53  ;;  %v25537_v53 = vld [vmem:[#allocation30_spill] sm:$0xff] }
 0x67e   :  { %18171 = vmatprep.subr.bf16.mxu0 %v25293_v31  ;;  %25530 = vst [vmem:[#allocation75_spill] sm:$0xff] %v22611_v0  ;;  %v11032_v16 = vsel %vm7558_vm2, %v22611_v0, 0.0 }
 0x67f   :  { %11042 = vadd.xlane.f32.xlu0 %v11041_v62  ;;  %v10794_v62 = vsub.f32 %v25531_v25, %v25186_v36  ;;  %v22620_v18 = vpop.eup %18778  ;;  %18784 = vpow2.f32 %v10903_v51  ;;  %v22636_v51 = vpop.xlane.xlu1 %10633 }
 0x680   :  { %25533 = vst [vmem:[#allocation35_spill] sm:$0xff] %v22620_v18  ;;  %25539 = vst [vmem:[#allocation126_spill] sm:$0xff] %v22636_v51 }
 0x681   :  { %v10893_v15 = vmul.f32 1.442695, %v10794_v62 }
 0x683   :  { %11048 = vadd.xlane.f32.xlu0 %v11047_v11  ;;  %v11053_v11 = vsel %vm7558_vm2, %v22620_v18, 0.0  ;;  %v22626_v35 = vpop.eup %18780  ;;  %18786 = vpow2.f32 %v10893_v15 }
 0x684   :  { %25535 = vst [vmem:[#allocation74_spill] sm:$0xff] %v22626_v35  ;;  %v11059_v25 = vsel %vm7558_vm2, %v22626_v35, 0.0  ;;  %v25547_v35 = vld [vmem:[#allocation69_spill] sm:$0xff] }
 0x685   :  { %v22634_v62 = vpop.eup %18782  ;;  %v5434_v32 = vshrl.u32 %v25547_v35, 16 }
 0x686   :  { %25538 = vst [vmem:[#allocation30_spill] sm:$0xff] %v22634_v62 }
 0x687   :  { %11033 = vadd.xlane.f32.xlu0 %v11032_v16  ;;  %v11065_v16 = vsel %vm7558_vm2, %v22634_v62, 0.0 }
 0x688   :  { %5346 = vrot.lane.b32.xlu1 %v25534_v60, %s19193_s0  ;;  %v25540_v60 = vld [vmem:[#allocation29_spill] sm:$0xff] }
 0x689   :  { %v22642_v36 = vpop.eup %18784 }
 0x68a   :  { %25541 = vst [vmem:[#allocation29_spill] sm:$0xff] %v22642_v36  ;;  %v11071_v15 = vsel %vm7558_vm2, %v22642_v36, 0.0  ;;  %v25207_v36 = vmax.f32 %v25546_v21, 0.0 }
 0x68b   :  { %11054 = vadd.xlane.f32.xlu0 %v11053_v11 }
 0x68c   :  { %5362 = vrot.lane.b32.xlu1 %v25537_v53, %s19193_s0  ;;  %v22648_v53 = vpop.xlane.xlu1 %10967 }
 0x68d   :  { %v22646_v11 = vpop.eup %18786 }
 0x68e   :  { %25542 = vst [vmem:[#allocation127_spill] sm:$0xff] %v22646_v11  ;;  %v11056_v50 = vsel %vm7558_vm2, %v22646_v11, 0.0  ;;  %v25549_v11 = vld [vmem:[#allocation22_spill] sm:$0xff] }
 0x68f   :  { %11060 = vadd.xlane.f32.xlu0 %v11059_v25  ;;  %v25543_v25 = vld [vmem:[#allocation60_spill] sm:$0xff] }
 0x690   :  { %5378 = vrot.lane.b32.xlu1 %v25540_v60, %s19193_s0  ;;  %v5443_v42 = vshrl.u32 %v25543_v25, 16  ;;  %v25544_v60 = vld [vmem:[#allocation46_spill] sm:$0xff]  ;;  %v5440_v62 = vpack.i.b16 %v25543_v25, %v25545_v44  ;;  %v22661_v18 = vpop.xlane.xlu1 %10639  ;;  %v10796_v25 = vsub.f32 %v25550_v37, %v25207_v36  ;;  %v25554_v37 = vld [vmem:[#allocation24_spill] sm:$0xff] }
 0x691   :  { %v5435_v10 = vshrl.u32 %v25544_v60, 16  ;;  %25548 = vst [vmem:[#allocation60_spill] sm:$0xff] %v22661_v18 }
 0x692   :  { %v5928_v55 = vrot.slane %v5440_v62, %v25549_v11  ;;  %v5921_v29 = vcombine.high %v5440_v62, %v25551_v52  ;;  %v10897_v21 = vmul.f32 1.442695, %v10796_v25 }
 0x693   :  { %11066 = vadd.xlane.f32.xlu0 %v11065_v16  ;;  %v5442_v16 = vshrl.u32 %v25545_v44, 16  ;;  %v5436_v0 = vpack.i.b16 %v5435_v10, %v5434_v32  ;;  %v25552_v10 = vld [vmem:[#allocation98_spill] sm:$0xff] }
 0x694   :  { %v25553_v32 = vmax.f32 %v25552_v10, 0.0  ;;  %v22675_v63 = vpop.xlane.xlu1 %10973  ;;  %v5935_v62 = vrot.slane %v5921_v29, %v25549_v11  ;;  %v11148_v29 = vsub.f32 0.0, %v25559_v28  ;;  %18788 = vpow2.f32 %v10897_v21 }
 0x695   :  { %v5444_v12 = vpack.i.b16 %v5443_v42, %v5442_v16  ;;  %v5979_v4 = vrot.slane %v5436_v0, %v25549_v11 }
 0x696   :  { %v11146_v16 = vsub.f32 0.0, %v25553_v32  ;;  %v25555_v32 = vld [vmem:[#allocation100_spill] sm:$0xff] }
 0x697   :  { %11072 = vadd.xlane.f32.xlu0 %v11071_v15  ;;  %v5432_v15 = vpack.i.b16 %v25544_v60, %v25547_v35  ;;  %v5987_v35 = vcombine.high %v5444_v12, %v25551_v52  ;;  %v5972_v60 = vcombine.high %v5436_v0, %v25551_v52  ;;  %v5994_v56 = vrot.slane %v5444_v12, %v25549_v11 }
 0x698   :  { %v25556_v47 = vmax.f32 %v25555_v32, 0.0  ;;  %v25560_v12 = vmax.f32 %v22628_v48, 0.0  ;;  %v25220_v0 = vmax.f32 %v22636_v51, 0.0 }
 0x699   :  { %v5913_v44 = vrot.slane %v5432_v15, %v25549_v11  ;;  %v5906_v45 = vcombine.high %v5432_v15, %v25551_v52  ;;  %v6001_v10 = vrot.slane %v5987_v35, %v25549_v11  ;;  %v6002_v30 = vcombine.low %v5979_v4, %v5994_v56 }
 0x69a   :  { %v11153_v25 = vsub.f32 0.0, %v25556_v47 }
 0x69b   :  { %11057 = vadd.xlane.f32.xlu0 %v11056_v50  ;;  %v25215_v50 = vmax.f32 %v22616_v54, 0.0  ;;  %v5936_v42 = vcombine.low %v5913_v44, %v5928_v55  ;;  %v5937_v15 = vcombine.high %v5913_v44, %v5928_v55  ;;  %v5920_v41 = vrot.slane %v5906_v45, %v25549_v11  ;;  %v25561_v45 = vld [vmem:[#allocation87_spill] sm:$0xff] }
 0x69c   :  { %v5986_v54 = vrot.slane %v5972_v60, %v25549_v11  ;;  %v10800_v44 = vsub.f32 %v25561_v45, %v25560_v12  ;;  %v22697_v60 = vpop.xlane.xlu1 %10645  ;;  %v11227_v1 = vmul.f32 1.442695, %v11153_v25  ;;  %v25564_v12 = vld [vmem:[#allocation17_spill] sm:$0xff]  ;;  %v25569_v25 = vld [vmem:[#allocation71_spill] sm:$0xff] }
 0x69d   :  { %v10798_v36 = vsub.f32 %v25554_v37, %v25215_v50  ;;  %v5944_v37 = vrot.slane %v5936_v42, %v25557_v8  ;;  %v11213_v50 = vmul.f32 1.442695, %v11146_v16  ;;  %v5951_v35 = vrot.slane %v5937_v15, %v25557_v8  ;;  %25562 = vst [vmem:[#allocation46_spill] sm:$0xff] %v22697_v60 }
 0x69e   :  { %v5952_v32 = vcombine.low %v5920_v41, %v5935_v62  ;;  %v5953_v47 = vcombine.high %v5920_v41, %v5935_v62  ;;  %v6003_v42 = vcombine.high %v5979_v4, %v5994_v56  ;;  %v6018_v16 = vcombine.low %v5986_v54, %v6001_v10 }
 0x69f   :  { %v10901_v55 = vmul.f32 1.442695, %v10798_v36  ;;  %v6019_v21 = vcombine.high %v5986_v54, %v6001_v10  ;;  %18790 = vpow2.f32 %v11213_v50  ;;  %v11217_v36 = vmul.f32 1.442695, %v11148_v29  ;;  %v25570_v29 = vld [vmem:[#allocation61_spill] sm:$0xff] }
 0x6a0   :  { %v10905_v48 = vmul.f32 1.442695, %v10800_v44  ;;  %v10802_v45 = vsub.f32 %v25564_v12, %v25220_v0  ;;  %v25221_v15 = vmax.f32 %v22697_v60, 0.0  ;;  %v22705_v41 = vrot.slane %v5952_v32, %v25557_v8  ;;  %v25571_v32 = vld [vmem:[#allocation81_spill] sm:$0xff]  ;;  %v22760_v60 = vpop.xlane.xlu1 %10979 }
 0x6a1   :  { %18792 = vpow2.f32 %v10901_v55  ;;  %v22708_v56 = vrot.slane %v5953_v47, %v25557_v8  ;;  %v22711_v4 = vrot.slane %v6002_v30, %v25557_v8  ;;  %v6866_v54 = vcombine.low %v5944_v37, %v5951_v35 }
 0x6a2   :  { %25565 = vst [vmem:[#allocation59_spill] sm:$0xff] %v22705_v41  ;;  %v22714_v50 = vrot.slane %v6003_v42, %v25557_v8  ;;  %v22717_v62 = vrot.slane %v6018_v16, %v25557_v8  ;;  %v17228_v10 = vcombine.high %v5944_v37, %v5951_v35  ;;  %18794 = vpow2.f32 %v11227_v1  ;;  %v25574_v16 = vld [vmem:[#allocation94_spill] sm:$0xff] }
 0x6a3   :  { %25566 = vst [vmem:[#allocation69_spill] sm:$0xff] %v22708_v56  ;;  %v5448_v55 = vpack.i.b16 %v25570_v29, %v25569_v25  ;;  %v5451_v44 = vshrl.u32 %v25570_v29, 16  ;;  %18796 = vpow2.f32 %v11217_v36  ;;  %v25572_v47 = vmax.f32 %v25571_v32, 0.0  ;;  %v25578_v29 = vld [vmem:[#allocation62_spill] sm:$0xff] }
 0x6a4   :  { %25567 = vst [vmem:[#allocation22_spill] sm:$0xff] %v22714_v50  ;;  %25568 = vst [vmem:[#allocation49_spill] sm:$0xff] %v22717_v62  ;;  %v22725_v30 = vrot.slane %v6019_v21, %v25557_v8  ;;  %18798 = vpow2.f32 %v10905_v48  ;;  %v10909_v42 = vmul.f32 1.442695, %v10802_v45  ;;  %v10806_v0 = vsub.f32 %v25574_v16, %v25221_v15  ;;  %v25576_v21 = vld [vmem:[#allocation27_spill] sm:$0xff]  ;;  %v22740_v48 = vpop.eup %18788  ;;  %v25589_v62 = vld [vmem:[#allocation70_spill] sm:$0xff] }
 0x6a5   :  { %v11150_v12 = vsub.f32 0.0, %v25572_v47  ;;  %v5450_v1 = vshrl.u32 %v25569_v25, 16  ;;  %v22732_v37 = vrot.slane %v6866_v54, %v25549_v11  ;;  %25577 = vst [vmem:[#allocation24_spill] sm:$0xff] %v22740_v48  ;;  %v25579_v54 = vld [vmem:[#allocation63_spill] sm:$0xff]  ;;  %v25580_v47 = vld [vmem:[#allocation101_spill] sm:$0xff]  ;;  %v22755_v36 = vrot.slane %v17228_v10, %v25549_v11 }
 0x6a6   :  { %25573 = vst [vmem:[#allocation20_spill] sm:$0xff] %v22725_v30  ;;  %v22748_v32 = vpack.i.b16 %v25579_v54, %v25578_v29  ;;  %v25581_v16 = vmax.f32 %v25580_v47, 0.0  ;;  %v6038_v28 = vcombine.high %v5448_v55, %v25551_v52  ;;  %18800 = vpow2.f32 %v10909_v42 }
 0x6a7   :  { %25575 = vst [vmem:[#allocation98_spill] sm:$0xff] %v22732_v37  ;;  %25582 = vst [vmem:[#allocation100_spill] sm:$0xff] %v22755_v36  ;;  %v11221_v45 = vmul.f32 1.442695, %v11150_v12  ;;  %v10917_v47 = vmul.f32 1.442695, %v10806_v0  ;;  %v22767_v46 = vrot.slane %v5448_v55, %v25549_v11  ;;  %v5416_v30 = vpack.i.b16 %v25587_v14, %v25563_v7 }
 0x6a8   :  { %v11155_v15 = vsub.f32 0.0, %v25581_v16  ;;  %v5458_v10 = vshrl.u32 %v25578_v29, 16  ;;  %v11062_v12 = vsel %vm7558_vm2, %v22740_v48, 0.0  ;;  %v22779_v42 = vrot.slane %v22748_v32, %v25549_v11 }
 0x6a9   :  { %v18791_v16 = vpop.eup %18790  ;;  %v22783_v29 = vrot.slane %v6038_v28, %v25549_v11  ;;  %18802 = vpow2.f32 %v11221_v45  ;;  %v5419_v45 = vshrl.u32 %v25587_v14, 16 }
 0x6aa   :  { %v11231_v0 = vmul.f32 1.442695, %v11155_v15  ;;  %v25585_v15 = vld [vmem:[#allocation38_spill] sm:$0xff]  ;;  %18804 = vpow2.f32 %v10917_v47  ;;  %v25592_v47 = vld [vmem:[#allocation15_spill] sm:$0xff] }
 0x6ab   :  { %v25586_v41 = vmax.f32 %v25585_v15, 0.0  ;;  %v5424_v15 = vpack.i.b16 %v25590_v43, %v25589_v62 }
 0x6ac   :  { %v22752_v35 = vpop.xlane.xlu0 %10648  ;;  %18806 = vpow2.f32 %v11231_v0  ;;  %v5426_v0 = vshrl.u32 %v25589_v62, 16 }
 0x6ad   :  { %v11152_v55 = vsub.f32 0.0, %v25586_v41  ;;  %v25591_v41 = vmax.f32 %v22328_v26, 0.0 }
 0x6af   :  { %v11225_v50 = vmul.f32 1.442695, %v11152_v55  ;;  %v25601_v55 = vmax.f32 %v22216_v59, 0.0 }
 0x6b0   :  { %v10962_v51 = vpop.xlane.xlu0 %10961 }
 0x6b1   :  { %5330 = vrot.lane.b32.xlu0 %v25576_v21, %s19193_s0  ;;  %v22757_v21 = vpack.i.b16 %v5451_v44, %v5450_v1  ;;  %v5459_v44 = vshrl.u32 %v25579_v54, 16  ;;  %v22773_v1 = vpop.eup %18792  ;;  %v22787_v48 = vpop.xlane.xlu1 %10651  ;;  %v11338_v24 = vadd.f32 %v18791_v16, %v10962_v51  ;;  %v5427_v54 = vshrl.u32 %v25590_v43, 16 }
 0x6b2   :  { %25583 = vst [vmem:[#allocation23_spill] sm:$0xff] %v22773_v1  ;;  %25584 = vst [vmem:[#allocation76_spill] sm:$0xff] %v22787_v48  ;;  %v18795_v25 = vpop.eup %18794  ;;  %v11068_v51 = vsel %vm7558_vm2, %v22773_v1, 0.0  ;;  %v25593_v17 = vmax.f32 %v22787_v48, 0.0  ;;  %v25246_v48 = vmax.f32 %v22402_v5, 0.0 }
 0x6b3   :  { %v22791_v56 = vrot.slane %v22757_v21, %v25549_v11  ;;  %v18797_v28 = vpop.eup %18796  ;;  %18808 = vrcp.f32 %v11338_v24  ;;  %v22814_v6 = vpack.i.b16 %v5459_v44, %v5458_v10  ;;  %v22835_v10 = vpack.i.b16 %v5427_v54, %v5426_v0 }
 0x6b4   :  { %11063 = vadd.xlane.f32.xlu1 %v11062_v12  ;;  %v22802_v16 = vpop.eup %18798  ;;  %v10801_v12 = vsub.f32 %v25592_v47, %v25591_v41  ;;  %v10808_v14 = vsub.f32 %v25594_v38, %v25593_v17  ;;  %v10983_v37 = vpop.xlane.xlu0 %10982  ;;  %v11340_v1 = vadd.f32 %v18797_v28, %v22648_v53  ;;  %v25595_v41 = vmax.f32 %v22368_v2, 0.0 }
 0x6b5   :  { %25588 = vst [vmem:[#allocation87_spill] sm:$0xff] %v22802_v16  ;;  %v11345_v36 = vadd.f32 %v18795_v25, %v10983_v37  ;;  %v11074_v38 = vsel %vm7558_vm2, %v22802_v16, 0.0  ;;  %v22823_v43 = vpop.eup %18800  ;;  %v25598_v17 = vshrl.u32 %v25563_v7, 16  ;;  %v5774_v53 = vcombine.high %v5416_v30, %v25551_v52 }
 0x6b6   :  { %v10921_v26 = vmul.f32 1.442695, %v10808_v14  ;;  %25597 = vst [vmem:[#allocation67_spill] sm:$0xff] %v22823_v43  ;;  %v10907_v62 = vmul.f32 1.442695, %v10801_v12  ;;  %v22833_v25 = vrot.slane %v5416_v30, %v25549_v11  ;;  %v5796_v7 = vrot.slane %v5424_v15, %v25549_v11  ;;  %v18803_v12 = vpop.eup %18802  ;;  %v25602_v30 = vld [vmem:[#allocation93_spill] sm:$0xff] }
 0x6b7   :  { %18810 = vrcp.f32 %v11345_v36  ;;  %v22827_v24 = vpack.i.b16 %v5419_v45, %v25598_v17  ;;  %v5789_v36 = vcombine.high %v5424_v15, %v25551_v52  ;;  %v11157_v28 = vsub.f32 0.0, %v25601_v55  ;;  %v22850_v0 = vpop.eup %18804 }
 0x6b8   :  { %11069 = vadd.xlane.f32.xlu1 %v11068_v51  ;;  %v25596_v51 = vld [vmem:[#allocation16_spill] sm:$0xff]  ;;  %18812 = vpow2.f32 %v10921_v26  ;;  %v22830_v37 = vpop.xlane.xlu0 %10654  ;;  %v10805_v54 = vsub.f32 %v25602_v30, %v25246_v48  ;;  %v25249_v14 = vmax.f32 %v22752_v35, 0.0  ;;  %25603 = vst [vmem:[#allocation61_spill] sm:$0xff] %v22850_v0  ;;  %v22853_v15 = vrot.slane %v5774_v53, %v25549_v11  ;;  %v18807_v53 = vpop.eup %18806 }
 0x6b9   :  { %v10803_v47 = vsub.f32 %v25596_v51, %v25595_v41  ;;  %25599 = vst [vmem:[#allocation17_spill] sm:$0xff] %v22830_v37  ;;  %18814 = vrcp.f32 %v11340_v1  ;;  %v11080_v1 = vsel %vm7558_vm2, %v22823_v43, 0.0  ;;  %v5840_v59 = vcombine.high %v22827_v24, %v25551_v52  ;;  %v25605_v43 = vld [vmem:[#allocation109_spill] sm:$0xff] }
 0x6ba   :  { %18816 = vpow2.f32 %v11225_v50  ;;  %v5847_v41 = vrot.slane %v22827_v24, %v25549_v11  ;;  %v22863_v51 = vrot.slane %v5789_v36, %v25549_v11  ;;  %v5805_v55 = vcombine.high %v22833_v25, %v5796_v7  ;;  %v25604_v24 = vld [vmem:[#allocation108_spill] sm:$0xff] }
 0x6bb   :  { %v10911_v45 = vmul.f32 1.442695, %v10803_v47  ;;  %18818 = vpow2.f32 %v10907_v62  ;;  %v5862_v47 = vrot.slane %v22835_v10, %v25549_v11  ;;  %v5804_v62 = vcombine.low %v22833_v25, %v5796_v7 }
 0x6bc   :  { %11075 = vadd.xlane.f32.xlu1 %v11074_v38  ;;  %v22838_v44 = vpop.xlane.xlu1 %10657  ;;  %v11342_v38 = vadd.f32 %v18803_v12, %v22675_v63  ;;  %v11235_v30 = vmul.f32 1.442695, %v11157_v28  ;;  %v10807_v36 = vsub.f32 %v25604_v24, %v25249_v14  ;;  %v11092_v48 = vsel %vm7558_vm2, %v22850_v0, 0.0  ;;  %v25607_v24 = vld [vmem:[#allocation77_spill] sm:$0xff] }
 0x6bd   :  { %25600 = vst [vmem:[#allocation71_spill] sm:$0xff] %v22838_v44  ;;  %v25245_v26 = vmax.f32 %v22838_v44, 0.0  ;;  %v10989_v17 = vpop.xlane.xlu0 %10988  ;;  %18820 = vpow2.f32 %v10911_v45  ;;  %v5855_v7 = vcombine.high %v22835_v10, %v25551_v52  ;;  %v5870_v28 = vcombine.low %v5847_v41, %v5862_v47 }
 0x6be   :  { %v11347_v12 = vadd.f32 %v18807_v53, %v10989_v17  ;;  %v5871_v45 = vcombine.high %v5847_v41, %v5862_v47  ;;  %v25609_v17 = vld [vmem:[#allocation103_spill] sm:$0xff]  ;;  %v10919_v47 = vmul.f32 1.442695, %v10807_v36 }
 0x6bf   :  { %v10810_v50 = vsub.f32 %v22304_v34, %v25245_v26  ;;  %v18809_v34 = vpop.eup %18808  ;;  %v10915_v26 = vmul.f32 1.442695, %v10805_v54  ;;  %v25610_v53 = vmax.f32 %v25609_v17, 0.0  ;;  %v22898_v17 = vrot.slane %v5805_v55, %v25557_v8 }
 0x6c0   :  { %11081 = vadd.xlane.f32.xlu1 %v11080_v1  ;;  %v11466_v44 = vmul.f32 %v18809_v34, %v25605_v43  ;;  %v25250_v34 = vmax.f32 %v22661_v18, 0.0 }
 0x6c1   :  { %v10925_v1 = vmul.f32 1.442695, %v10810_v50  ;;  %v18811_v25 = vpop.eup %18810  ;;  %v11159_v43 = vsub.f32 0.0, %v25610_v53 }
 0x6c2   :  { %v22879_v54 = vpop.eup %18812  ;;  %v11530_v50 = vpack.c.bf16 %v11466_v44, %v11466_v44  ;;  %v25612_v44 = vld [vmem:[#allocation115_spill] sm:$0xff] }
 0x6c3   :  { %18822 = vpow2.f32 %v10925_v1  ;;  %25606 = vst [vmem:[#allocation81_spill] sm:$0xff] %v22879_v54  ;;  %v11826_v1 = vsel %vm11594_vm3, %v25607_v24, 0  ;;  %v18815_v63 = vpop.eup %18814  ;;  %v11098_v10 = vsel %vm7558_vm2, %v22879_v54, 0.0  ;;  %v25613_v24 = vld [vmem:[#allocation73_spill] sm:$0xff] }
 0x6c4   :  { %11093 = vadd.xlane.f32.xlu1 %v11092_v48  ;;  %18824 = vrcp.f32 %v11342_v38  ;;  %v25608_v48 = vld [vmem:[#allocation112_spill] sm:$0xff]  ;;  %v18817_v41 = vpop.eup %18816  ;;  %v25611_v38 = vmax.f32 %v22830_v37, 0.0  ;;  %18120 = vmatmul.mubr.msk.bf16.vlgmr.msra.gmra.mrb[148].mxu1 %vm7558_vm2, %v11530_v50  ;;  %v5885_v50 = vrot.slane %v5871_v45, %v25557_v8  ;;  %v25711_v37 = vld [vmem:[#allocation122_spill] sm:$0xff] }
 0x6c5   :  { %18826 = vpow2.f32 %v11235_v30  ;;  %v11473_v14 = vmul.f32 %v18811_v25, %v25608_v48  ;;  %v11344_v53 = vadd.f32 %v18817_v41, %v22760_v60  ;;  %18130 = vmatpush3.bf16.msra.mxu1 %v11826_v1  ;;  %18131 = vmatprep.mubr.msk.bf16.mxu1 %vm19202_vm1, %v25293_v31  ;;  %v25619_v60 = vld [vmem:[#allocation40_spill] sm:$0xff]  ;;  %v25620_v41 = vcombine.high %v22748_v32, %v25551_v52  ;;  %v22951_v32 = vpop.xlane.xlu1 %10991 }
 0x6c6   :  { %18828 = vpow2.f32 %v10915_v26  ;;  %v10809_v30 = vsub.f32 %v25612_v44, %v25611_v38  ;;  %v22895_v26 = vrot.slane %v5804_v62, %v25557_v8  ;;  %v25616_v62 = vld [vmem:[#allocation79_spill] sm:$0xff]  ;;  %18141 = vmatprep.subr.bf16.mxu1 %v25293_v31  ;;  %v11468_v1 = vmul.f32 %v18815_v63, %v25619_v60  ;;  %v25621_v63 = vld [vmem:[#allocation89_spill] sm:$0xff] }
 0x6c7   :  { %18830 = vrcp.f32 %v11347_v12  ;;  %v11537_v25 = vpack.c.bf16 %v11473_v14, %v11473_v14  ;;  %v22905_v12 = vpop.eup %18818  ;;  %v5878_v14 = vrot.slane %v5870_v28, %v25557_v8  ;;  %v22920_v44 = vrot.slane %v25620_v41, %v25549_v11 }
 0x6c8   :  { %11099 = vadd.xlane.f32.xlu1 %v11098_v10  ;;  %25615 = vst [vmem:[#allocation27_spill] sm:$0xff] %v22905_v12  ;;  %v25617_v10 = vld [vmem:[#allocation78_spill] sm:$0xff]  ;;  %v22923_v28 = vrot.slane %v5840_v59, %v25549_v11  ;;  %18832 = vpow2.f32 %v10919_v47  ;;  %v22934_v59 = vpop.eup %18820  ;;  %v6766_v47 = vcombine.low %v22895_v26, %v22898_v17  ;;  %v11532_v48 = vpack.c.bf16 %v11468_v1, %v11468_v1 }
 0x6c9   :  { %18162 = vmatmul.mubr.msk.bf16.vlgmr.msra.gmra.mrb[148].mxu0 %vm7558_vm2, %v11537_v25  ;;  %v25618_v55 = vpack.i.b16 %v25616_v62, %v25617_v10  ;;  %v11239_v25 = vmul.f32 1.442695, %v11159_v43  ;;  %v10804_v62 = vsub.f32 %v25621_v63, %v25250_v34  ;;  %v10923_v10 = vmul.f32 1.442695, %v10809_v30  ;;  %25622 = vst [vmem:[#allocation62_spill] sm:$0xff] %v22934_v59 }
 0x6ca   :  { %18173 = vmatprep.mubr.msk.bf16.mxu0 %vm19202_vm1, %v25293_v31  ;;  %v22939_v43 = vrot.slane %v5855_v7, %v25549_v11  ;;  %18834 = vrcp.f32 %v11344_v53  ;;  %v6791_v30 = vcombine.low %v5878_v14, %v5885_v50  ;;  %v25624_v63 = vmax.f32 %v22198_v57, 0.0 }
 0x6cb   :  { %v12148_v38 = vsel %vm11594_vm3, %v25618_v55, 0  ;;  %v17225_v45 = vcombine.high %v5878_v14, %v5885_v50  ;;  %18836 = vpow2.f32 %v11239_v25  ;;  %v25625_v7 = vmax.f32 %v22222_v19, 0.0  ;;  %v25627_v14 = vld [vmem:[#allocation80_spill] sm:$0xff] }
 0x6cc   :  { %v22901_v36 = vpop.xlane.xlu0 %10660  ;;  %18172 = vmatpush3.bf16.msra.mxu0 %v12148_v38  ;;  %v11077_v38 = vsel %vm7558_vm2, %v22905_v12, 0.0  ;;  %v11154_v34 = vsub.f32 0.0, %v25624_v63  ;;  %v10913_v12 = vmul.f32 1.442695, %v10804_v62  ;;  %18838 = vpow2.f32 %v10923_v10  ;;  %18132 = vmatmul.mubr.msk.bf16.vlgmr.msra.gmra.mrb[152].mxu1 %vm7558_vm2, %v11532_v48 }
 0x6cd   :  { %25614 = vst [vmem:[#allocation94_spill] sm:$0xff] %v22901_v36  ;;  %18183 = vmatprep.subr.bf16.mxu0 %v25293_v31  ;;  %v22943_v41 = vpop.eup %18822  ;;  %v11161_v53 = vsub.f32 0.0, %v25625_v7  ;;  %v25626_v16 = vmax.f32 %v22901_v36, 0.0  ;;  %v11918_v50 = vsel %vm11594_vm3, %v25627_v14, 0  ;;  %v5886_v1 = vcombine.low %v22923_v28, %v22939_v43  ;;  %18143 = vmatprep.mubr.msk.bf16.mxu1 %vm19202_vm1, %v25293_v31  ;;  %v25632_v7 = vld [vmem:[#allocation91_spill] sm:$0xff]  ;;  %v25633_v14 = vld [vmem:[#allocation21_spill] sm:$0xff] }
 0x6ce   :  { %25623 = vst [vmem:[#allocation63_spill] sm:$0xff] %v22943_v41  ;;  %v18825_v55 = vpop.eup %18824  ;;  %v11104_v54 = vsel %vm7558_vm2, %v22943_v41, 0.0  ;;  %v17224_v25 = vcombine.high %v22895_v26, %v22898_v17  ;;  %v11083_v10 = vsel %vm7558_vm2, %v22934_v59, 0.0  ;;  %18142 = vmatpush3.bf16.msra.mxu1 %v11918_v50  ;;  %v6806_v41 = vrot.slane %v17225_v45, %v25549_v11  ;;  %v22985_v59 = vpop.xlane.xlu1 %10663 }
 0x6cf   :  { %v18827_v0 = vpop.eup %18826  ;;  %v10811_v57 = vsub.f32 %v22335_v13, %v25626_v16  ;;  %11105 = vadd.xlane.f32.xlu1 %v11104_v54  ;;  %v11229_v16 = vmul.f32 1.442695, %v11154_v34  ;;  %v25629_v54 = vld [vmem:[#allocation96_spill] sm:$0xff]  ;;  %18153 = vmatprep.subr.bf16.mxu1 %v25293_v31  ;;  %v11470_v26 = vmul.f32 %v18825_v55, %v25632_v7  ;;  %v11243_v17 = vmul.f32 1.442695, %v11161_v53  ;;  %25634 = vst [vmem:[#allocation68_spill] sm:$0xff] %v22985_v59 }
 0x6d0   :  { %v10995_v60 = vpop.xlane.xlu0 %10994  ;;  %11078 = vadd.xlane.f32.xlu0 %v11077_v38  ;;  %v22961_v19 = vpop.eup %18828  ;;  %v25630_v48 = vmax.f32 %v25629_v54, 0.0  ;;  %v5887_v34 = vcombine.high %v22923_v28, %v22939_v43  ;;  %18840 = vpow2.f32 %v10913_v12  ;;  %v25639_v7 = vld [vmem:[#allocation84_spill] sm:$0xff] }
 0x6d1   :  { %25628 = vst [vmem:[#allocation101_spill] sm:$0xff] %v22961_v19  ;;  %v11349_v62 = vadd.f32 %v18827_v0, %v10995_v60  ;;  %v18831_v13 = vpop.eup %18830  ;;  %v6798_v0 = vrot.slane %v6791_v30, %v25549_v11  ;;  %v10927_v54 = vmul.f32 1.442695, %v10811_v57  ;;  %v11089_v30 = vsel %vm7558_vm2, %v22961_v19, 0.0  ;;  %v25636_v57 = vld [vmem:[#allocation83_spill] sm:$0xff] }
 0x6d2   :  { %v11156_v38 = vsub.f32 0.0, %v25630_v48  ;;  %v11475_v50 = vmul.f32 %v18831_v13, %v25633_v14  ;;  %v6781_v48 = vrot.slane %v17224_v25, %v25549_v11  ;;  %v22992_v45 = vpop.eup %18832  ;;  %v25637_v25 = vld [vmem:[#allocation82_spill] sm:$0xff] }
 0x6d3   :  { %18842 = vrcp.f32 %v11349_v62  ;;  %25635 = vst [vmem:[#allocation70_spill] sm:$0xff] %v22992_v45  ;;  %v25638_v62 = vpack.i.b16 %v25636_v57, %v25637_v25  ;;  %v6807_v14 = vcombine.low %v6798_v0, %v6806_v41  ;;  %v25647_v25 = vld [vmem:[#allocation41_spill] sm:$0xff] }
 0x6d4   :  { %11084 = vadd.xlane.f32.xlu0 %v11083_v10  ;;  %v22973_v63 = vpop.xlane.xlu0 %10666  ;;  %v6773_v10 = vrot.slane %v6766_v47, %v25549_v11  ;;  %18844 = vpow2.f32 %v11229_v16  ;;  %v11233_v28 = vmul.f32 1.442695, %v11156_v38  ;;  %v11539_v12 = vpack.c.bf16 %v11475_v50, %v11475_v50  ;;  %v18835_v53 = vpop.eup %18834 }
 0x6d5   :  { %25631 = vst [vmem:[#allocation38_spill] sm:$0xff] %v22973_v63  ;;  %v25257_v60 = vmax.f32 %v22973_v63, 0.0  ;;  %v11534_v47 = vpack.c.bf16 %v11470_v26, %v11470_v26  ;;  %18846 = vpow2.f32 %v11243_v17  ;;  %v12240_v13 = vsel %vm11594_vm3, %v25638_v62, 0  ;;  %v18837_v26 = vpop.eup %18836 }
 0x6d6   :  { %v25260_v16 = vmax.f32 %v22985_v59, 0.0  ;;  %18848 = vpow2.f32 %v10927_v54  ;;  %18174 = vmatmul.mubr.msk.bf16.vlgmr.msra.gmra.mrb[152].mxu0 %vm7558_vm2, %v11539_v12  ;;  %v23006_v17 = vrot.slane %v5886_v1, %v25557_v8  ;;  %v23009_v50 = vrot.slane %v5887_v34, %v25557_v8  ;;  %v23013_v0 = vpop.eup %18838 }
 0x6d7   :  { %v10813_v55 = vsub.f32 %v22371_v20, %v25257_v60  ;;  %v12010_v20 = vsel %vm11594_vm3, %v25639_v7, 0  ;;  %v25640_v60 = vmax.f32 %v22226_v49, 0.0  ;;  %18144 = vmatmul.mubr.msk.bf16.vlgmr.msra.gmra.mrb[156].mxu1 %vm7558_vm2, %v11534_v47  ;;  %18184 = vmatpush3.bf16.msra.mxu0 %v12240_v13  ;;  %v11095_v49 = vsel %vm7558_vm2, %v22992_v45, 0.0  ;;  %25641 = vst [vmem:[#allocation72_spill] sm:$0xff] %v23013_v0 }
 0x6d8   :  { %11090 = vadd.xlane.f32.xlu0 %v11089_v30  ;;  %v11001_v43 = vpop.xlane.xlu0 %11000  ;;  %18154 = vmatpush3.bf16.msra.mxu1 %v12010_v20  ;;  %v6782_v41 = vcombine.low %v6773_v10, %v6781_v48  ;;  %18850 = vpow2.f32 %v11233_v28  ;;  %v25644_v30 = vld [vmem:[#allocation95_spill] sm:$0xff]  ;;  %v6068_v34 = vcombine.low %v22767_v46, %v22779_v42  ;;  %v6069_v10 = vcombine.high %v22767_v46, %v22779_v42  ;;  %v23049_v20 = vpop.xlane.xlu1 %10997 }
 0x6d9   :  { %v11163_v19 = vsub.f32 0.0, %v25640_v60  ;;  %v10931_v38 = vmul.f32 1.442695, %v10813_v55  ;;  %v25642_v60 = vld [vmem:[#allocation97_spill] sm:$0xff]  ;;  %v11472_v12 = vmul.f32 %v18835_v53, %v25644_v30  ;;  %v11351_v47 = vadd.f32 %v18837_v26, %v11001_v43  ;;  %18185 = vmatprep.mubr.msk.bf16.mxu0 %vm19202_vm1, %v25293_v31  ;;  %18195 = vmatprep.subr.bf16.mxu0 %v25293_v31 }
 0x6da   :  { %v25643_v54 = vmax.f32 %v25642_v60, 0.0  ;;  %v23029_v28 = vrot.slane %v6807_v14, %v25557_v8  ;;  %18155 = vmatprep.mubr.msk.bf16.mxu1 %vm19202_vm1, %v25293_v31  ;;  %v25646_v43 = vcombine.low %v22853_v15, %v22863_v51  ;;  %v10812_v62 = vsub.f32 %v25647_v25, %v25260_v16  ;;  %18165 = vmatprep.subr.bf16.mxu1 %v25293_v31 }
 0x6db   :  { %v11247_v57 = vmul.f32 1.442695, %v11163_v19  ;;  %18852 = vpow2.f32 %v10931_v38  ;;  %v25648_v13 = vcombine.high %v22853_v15, %v22863_v51  ;;  %v11101_v19 = vsel %vm7558_vm2, %v23013_v0, 0.0  ;;  %v23059_v38 = vpop.eup %18840 }
 0x6dc   :  { %v11158_v55 = vsub.f32 0.0, %v25643_v54  ;;  %11096 = vadd.xlane.f32.xlu0 %v11095_v49  ;;  %v23018_v1 = vpop.xlane.xlu0 %10672  ;;  %v23037_v53 = vrot.slane %v25646_v43, %v25557_v8  ;;  %v23057_v26 = vrot.slane %v6782_v41, %v25557_v8  ;;  %25649 = vst [vmem:[#allocation113_spill] sm:$0xff] %v23059_v38  ;;  %v6841_v49 = vcombine.low %v23006_v17, %v23009_v50  ;;  %v25650_v41 = vld [vmem:[#allocation88_spill] sm:$0xff] }
 0x6dd   :  { %25645 = vst [vmem:[#allocation15_spill] sm:$0xff] %v23018_v1  ;;  %v25259_v48 = vmax.f32 %v23018_v1, 0.0  ;;  %v23047_v7 = vrot.slane %v25648_v13, %v25557_v8  ;;  %18854 = vrcp.f32 %v11351_v47  ;;  %v11536_v60 = vpack.c.bf16 %v11472_v12, %v11472_v12  ;;  %v18843_v54 = vpop.eup %18842 }
 0x6de   :  { %v11237_v15 = vmul.f32 1.442695, %v11158_v55  ;;  %v7416_v43 = vpack.i.b16 %v23029_v28, %v23057_v26  ;;  %v12102_v25 = vsel %vm11594_vm3, %v25650_v41, 0  ;;  %v18845_v13 = vpop.eup %18844  ;;  %18856 = vpow2.f32 %v11247_v57  ;;  %v25653_v41 = vld [vmem:[#allocation32_spill] sm:$0xff]  ;;  %v25655_v57 = vld [vmem:[#allocation99_spill] sm:$0xff] }
 0x6df   :  { %v10815_v14 = vsub.f32 %v22400_v39, %v25259_v48  ;;  %v17227_v39 = vcombine.high %v23006_v17, %v23009_v50  ;;  %v25651_v48 = vmax.f32 %v22230_v58, 0.0  ;;  %v10929_v47 = vmul.f32 1.442695, %v10812_v62  ;;  %18156 = vmatmul.mubr.msk.bf16.vlgmr.msra.gmra.mrb[160].mxu1 %vm7558_vm2, %v11536_v60  ;;  %v18847_v12 = vpop.eup %18846 }
 0x6e0   :  { %11102 = vadd.xlane.f32.xlu0 %v11101_v19  ;;  %v10986_v51 = vpop.xlane.xlu0 %10985  ;;  %v25652_v19 = vld [vmem:[#allocation42_spill] sm:$0xff]  ;;  %v6816_v17 = vcombine.low %v23037_v53, %v23047_v7  ;;  %5348 = vrot.lane.b32.xlu1 %v25653_v41, %s19193_s0  ;;  %v23079_v58 = vpop.eup %18848  ;;  %v25656_v62 = vmax.f32 %v25655_v57, 0.0 }
 0x6e1   :  { %v10935_v30 = vmul.f32 1.442695, %v10815_v14  ;;  %v11165_v55 = vsub.f32 0.0, %v25651_v48  ;;  %v11477_v16 = vmul.f32 %v18843_v54, %v25652_v19  ;;  %v11346_v50 = vadd.f32 %v18845_v13, %v10986_v51  ;;  %18166 = vmatpush3.bf16.msra.mxu1 %v12102_v25  ;;  %25654 = vst [vmem:[#allocation16_spill] sm:$0xff] %v23079_v58  ;;  %18167 = vmatprep.mubr.msk.bf16.mxu1 %vm19202_vm1, %v25293_v31 }
 0x6e2   :  { %v11086_v14 = vsel %vm7558_vm2, %v23059_v38, 0.0  ;;  %v17226_v48 = vcombine.high %v23037_v53, %v23047_v7  ;;  %v11160_v60 = vsub.f32 0.0, %v25656_v62  ;;  %v25657_v51 = vcombine.high %v22757_v21, %v25551_v52  ;;  %v23095_v53 = vpop.xlane.xlu1 %10669  ;;  %18177 = vmatprep.subr.bf16.mxu1 %v25293_v31 }
 0x6e3   :  { %18858 = vpow2.f32 %v10935_v30  ;;  %v11541_v54 = vpack.c.bf16 %v11477_v16, %v11477_v16  ;;  %v6084_v13 = vcombine.low %v22783_v29, %v22920_v44  ;;  %25658 = vst [vmem:[#allocation93_spill] sm:$0xff] %v23095_v53  ;;  %v12332_v7 = vsel %vm11594_vm3, %v7416_v43, 0  ;;  %v18851_v16 = vpop.eup %18850 }
 0x6e4   :  { %18860 = vpow2.f32 %v11237_v15  ;;  %11087 = vadd.xlane.f32.xlu0 %v11086_v14  ;;  %v11007_v30 = vpop.xlane.xlu0 %11006  ;;  %v23091_v25 = vrot.slane %v25657_v51, %v25549_v11  ;;  %v11251_v19 = vmul.f32 1.442695, %v11165_v55  ;;  %v6848_v14 = vrot.slane %v6841_v49, %v25549_v11 }
 0x6e5   :  { %v11353_v15 = vadd.f32 %v18847_v12, %v11007_v30  ;;  %18862 = vpow2.f32 %v10929_v47  ;;  %18186 = vmatmul.mubr.msk.bf16.vlgmr.msra.gmra.mrb[156].mxu0 %vm7558_vm2, %v11541_v54  ;;  %v6856_v21 = vrot.slane %v17227_v39, %v25549_v11  ;;  %v11348_v41 = vadd.f32 %v18851_v16, %v22951_v32  ;;  %v23111_v47 = vpop.eup %18852  ;;  %v25661_v54 = vld [vmem:[#allocation31_spill] sm:$0xff] }
 0x6e6   :  { %18864 = vrcp.f32 %v11346_v50  ;;  %18196 = vmatpush3.bf16.msra.mxu0 %v12332_v7  ;;  %v11107_v57 = vsel %vm7558_vm2, %v23079_v58, 0.0  ;;  %18197 = vmatprep.mubr.msk.bf16.mxu0 %vm19202_vm1, %v25293_v31  ;;  %v25659_v43 = vmov 0   ;;  %25660 = vst [vmem:[#allocation108_spill] sm:$0xff] %v23111_v47  ;;  %v11241_v12 = vmul.f32 1.442695, %v11160_v60  ;;  %v23140_v42 = vpop.xlane.xlu1 %11003 }
 0x6e7   :  { %v23109_v55 = vcombine.high %v23029_v28, %v25659_v43  ;;  %18866 = vrcp.f32 %v11353_v15  ;;  %18207 = vmatprep.subr.bf16.mxu0 %v25293_v31  ;;  %v6823_v32 = vrot.slane %v6816_v17, %v25549_v11  ;;  %v6831_v39 = vrot.slane %v17226_v48, %v25549_v11  ;;  %5364 = vrot.lane.b32.xlu1 %v25661_v54, %s19193_s0  ;;  %v18855_v48 = vpop.eup %18854 }
 0x6e8   :  { %11108 = vadd.xlane.f32.xlu0 %v11107_v57  ;;  %v23113_v49 = vpop.xlane.xlu0 %10678  ;;  %v6076_v50 = vrot.slane %v6068_v34, %v25557_v8  ;;  %v6083_v62 = vrot.slane %v6069_v10, %v25557_v8  ;;  %v6085_v60 = vcombine.high %v22783_v29, %v22920_v44  ;;  %v23132_v17 = vcombine.high %v23057_v26, %v25659_v43  ;;  %v18857_v51 = vpop.eup %18856 }
 0x6e9   :  { %v6119_v30 = vcombine.high %v22814_v6, %v25551_v52  ;;  %v23138_v34 = vrot.slane %v22814_v6, %v25549_v11  ;;  %18868 = vpow2.f32 %v11251_v19  ;;  %v6857_v46 = vcombine.low %v6848_v14, %v6856_v21 }
 0x6ea   :  { %18870 = vrcp.f32 %v11348_v41  ;;  %v11479_v29 = vmul.f32 %v18855_v48, %v22375_v9  ;;  %v7422_v44 = vpack.i.b16 %v23109_v55, %v23132_v17  ;;  %v11113_v10 = vsel %vm7558_vm2, %v23111_v47, 0.0 }
 0x6eb   :  { %v23148_v7 = vrot.slane %v6084_v13, %v25557_v8  ;;  %v25662_v6 = vmax.f32 %v22234_v40, 0.0  ;;  %18872 = vpow2.f32 %v11241_v12  ;;  %v6832_v19 = vcombine.low %v6823_v32, %v6831_v39  ;;  %v25665_v39 = vld [vmem:[#allocation64_spill] sm:$0xff] }
 0x6ec   :  { %11114 = vadd.xlane.f32.xlu0 %v11113_v10  ;;  %v11013_v16 = vpop.xlane.xlu0 %11012  ;;  %v23155_v9 = vrot.slane %v6085_v60, %v25557_v8  ;;  %v6966_v21 = vcombine.low %v6076_v50, %v6083_v62  ;;  %v17232_v41 = vcombine.high %v6076_v50, %v6083_v62  ;;  %v11543_v57 = vpack.c.bf16 %v11479_v29, %v11479_v29 }
 0x6ed   :  { %v11167_v15 = vsub.f32 0.0, %v25662_v6  ;;  %v23152_v14 = vpop.eup %18858  ;;  %v25664_v48 = vmax.f32 %v22210_v33, 0.0  ;;  %v11355_v47 = vadd.f32 %v18857_v51, %v11013_v16  ;;  %v23162_v12 = vrot.slane %v6857_v46, %v25557_v8 }
 0x6ee   :  { %25663 = vst [vmem:[#allocation109_spill] sm:$0xff] %v23152_v14  ;;  %v18861_v54 = vpop.eup %18860  ;;  %v11119_v40 = vsel %vm7558_vm2, %v23152_v14, 0.0  ;;  %v23165_v32 = vrot.slane %v6119_v30, %v25549_v11  ;;  %v23169_v60 = vpack.i.b16 %v25665_v39, %v25613_v24  ;;  %18198 = vmatmul.mubr.msk.bf16.vlgmr.msra.gmra.mrb[160].mxu0 %vm7558_vm2, %v11543_v57  ;;  %v12424_v33 = vsel %vm11594_vm3, %v7422_v44, 0 }
 0x6ef   :  { %v11162_v13 = vsub.f32 0.0, %v25664_v48  ;;  %v11350_v50 = vadd.f32 %v18861_v54, %v23049_v20  ;;  %v23174_v62 = vpop.eup %18862  ;;  %v6134_v29 = vcombine.low %v22791_v56, %v23138_v34  ;;  %v6135_v46 = vcombine.high %v22791_v56, %v23138_v34  ;;  %18208 = vmatpush3.bf16.msra.mxu0 %v12424_v33  ;;  %18209 = vmatprep.mubr.msk.bf16.mxu0 %vm19202_vm1, %v25293_v31 }
 0x6f0   :  { %25666 = vst [vmem:[#allocation77_spill] sm:$0xff] %v23174_v62  ;;  %v11255_v30 = vmul.f32 1.442695, %v11167_v15  ;;  %11120 = vadd.xlane.f32.xlu0 %v11119_v40  ;;  %v23180_v10 = vpop.xlane.xlu0 %10684  ;;  %v23183_v51 = vrot.slane %v6832_v19, %v25557_v8  ;;  %v18865_v20 = vpop.eup %18864  ;;  %v23186_v6 = vrot.slane %v6966_v21, %v25549_v11  ;;  %v23189_v44 = vrot.slane %v17232_v41, %v25549_v11 }
 0x6f1   :  { %v25667_v56 = vmax.f32 %v22244_v61, 0.0  ;;  %v23195_v15 = vpop.xlane.xlu1 %10675  ;;  %18219 = vmatprep.subr.bf16.mxu0 %v25293_v31  ;;  %v18867_v19 = vpop.eup %18866  ;;  %v11245_v57 = vmul.f32 1.442695, %v11162_v13  ;;  %v11474_v21 = vmul.f32 %v18865_v20, %v22406_v22  ;;  %18874 = vrcp.f32 %v11355_v47  ;;  %v25669_v13 = vld [vmem:[#allocation102_spill] sm:$0xff] }
 0x6f2   :  { %25668 = vst [vmem:[#allocation112_spill] sm:$0xff] %v23195_v15  ;;  %v7428_v41 = vpack.i.b16 %v23162_v12, %v23183_v51  ;;  %18876 = vrcp.f32 %v11350_v50  ;;  %v11481_v61 = vmul.f32 %v18867_v19, %v22428_v23  ;;  %v11110_v48 = vsel %vm7558_vm2, %v23174_v62, 0.0 }
 0x6f3   :  { %v11169_v34 = vsub.f32 0.0, %v25667_v56  ;;  %v18869_v40 = vpop.eup %18868  ;;  %18878 = vpow2.f32 %v11255_v30  ;;  %v25670_v56 = vmax.f32 %v25669_v13, 0.0  ;;  %v11538_v47 = vpack.c.bf16 %v11474_v21, %v11474_v21  ;;  %v25671_v21 = vld [vmem:[#allocation90_spill] sm:$0xff] }
 0x6f4   :  { %11111 = vadd.xlane.f32.xlu0 %v11110_v48  ;;  %v11019_v20 = vpop.xlane.xlu0 %11018  ;;  %v18871_v16 = vpop.eup %18870  ;;  %v23212_v50 = vrot.slane %v6134_v29, %v25557_v8  ;;  %v23215_v23 = vrot.slane %v6135_v46, %v25557_v8  ;;  %v11545_v14 = vpack.c.bf16 %v11481_v61, %v11481_v61  ;;  %18880 = vpow2.f32 %v11245_v57 }
 0x6f5   :  { %v11164_v22 = vsub.f32 0.0, %v25670_v56  ;;  %v11259_v19 = vmul.f32 1.442695, %v11169_v34  ;;  %v23217_v54 = vpop.xlane.xlu1 %10681  ;;  %v18873_v62 = vpop.eup %18872  ;;  %18168 = vmatmul.mubr.msk.bf16.vlgmr.msra.gmra.mrb[164].mxu1 %vm7558_vm2, %v11538_v47  ;;  %v12194_v48 = vsel %vm11594_vm3, %v25671_v21, 0  ;;  %v11357_v13 = vadd.f32 %v18869_v40, %v11019_v20  ;;  %v25673_v56 = vld [vmem:[#allocation43_spill] sm:$0xff]  ;;  %v25676_v21 = vld [vmem:[#allocation116_spill] sm:$0xff] }
 0x6f6   :  { %v6150_v29 = vcombine.low %v23091_v25, %v23165_v32  ;;  %v25672_v46 = vmax.f32 %v23095_v53, 0.0  ;;  %v11352_v33 = vadd.f32 %v18873_v62, %v23140_v42  ;;  %18178 = vmatpush3.bf16.msra.mxu1 %v12194_v48  ;;  %18210 = vmatmul.mubr.msk.bf16.vlgmr.msra.gmra.mrb[164].mxu0 %vm7558_vm2, %v11545_v14  ;;  %v12516_v57 = vsel %vm11594_vm3, %v7428_v41, 0  ;;  %v25681_v48 = vld [vmem:[#allocation45_spill] sm:$0xff] }
 0x6f7   :  { %v25674_v61 = vmax.f32 %v22250_v3, 0.0  ;;  %v11249_v30 = vmul.f32 1.442695, %v11164_v22  ;;  %v25675_v40 = vmax.f32 %v22218_v27, 0.0  ;;  %v11476_v58 = vmul.f32 %v18871_v16, %v25676_v21  ;;  %18220 = vmatpush3.bf16.msra.mxu0 %v12516_v57  ;;  %18179 = vmatprep.mubr.msk.bf16.mxu1 %vm19202_vm1, %v25293_v31  ;;  %v25677_v27 = vld [vmem:[#allocation22_spill] sm:$0xff] }
 0x6f8   :  { %v10814_v34 = vsub.f32 %v25673_v56, %v25672_v46  ;;  %v23236_v0 = vpop.xlane.xlu0 %10690  ;;  %18882 = vpow2.f32 %v11259_v19  ;;  %18189 = vmatprep.subr.bf16.mxu1 %v25293_v31  ;;  %18221 = vmatprep.mubr.msk.bf16.mxu0 %vm19202_vm1, %v25293_v31  ;;  %v23245_v3 = vcombine.high %v23162_v12, %v25659_v43  ;;  %v25678_v42 = vcombine.low %v22711_v4, %v25677_v27 }
 0x6f9   :  { %v11171_v47 = vsub.f32 0.0, %v25674_v61  ;;  %v11166_v20 = vsub.f32 0.0, %v25675_v40  ;;  %v25679_v62 = vcombine.high %v22711_v4, %v25677_v27  ;;  %v6151_v41 = vcombine.high %v23091_v25, %v23165_v32  ;;  %18231 = vmatprep.subr.bf16.mxu0 %v25293_v31  ;;  %v23265_v61 = vpop.xlane.xlu1 %11015  ;;  %v25683_v32 = vld [vmem:[#allocation92_spill] sm:$0xff] }
 0x6fa   :  { %v6898_v14 = vrot.slane %v25678_v42, %v25549_v11  ;;  %v5467_v22 = vshrl.u32 %v25665_v39, 16  ;;  %v25680_v19 = vmax.f32 %v23195_v15, 0.0  ;;  %18884 = vrcp.f32 %v11357_v13  ;;  %v25688_v15 = vld [vmem:[#allocation118_spill] sm:$0xff] }
 0x6fb   :  { %v6906_v16 = vrot.slane %v25679_v62, %v25549_v11  ;;  %v23263_v56 = vrot.slane %v6150_v29, %v25557_v8  ;;  %v10933_v57 = vmul.f32 1.442695, %v10814_v34  ;;  %18886 = vrcp.f32 %v11352_v33  ;;  %v18875_v25 = vpop.eup %18874  ;;  %v25682_v29 = vld [vmem:[#allocation51_spill] sm:$0xff] }
 0x6fc   :  { %v10816_v46 = vsub.f32 %v25681_v48, %v25680_v19  ;;  %v23269_v4 = vcombine.high %v23183_v51, %v25659_v43  ;;  %v11263_v39 = vmul.f32 1.442695, %v11171_v47  ;;  %18888 = vpow2.f32 %v11249_v30  ;;  %v11025_v40 = vpop.xlane.xlu0 %11024  ;;  %v18877_v21 = vpop.eup %18876 }
 0x6fd   :  { %v11540_v13 = vpack.c.bf16 %v11476_v58, %v11476_v58  ;;  %v11253_v27 = vmul.f32 1.442695, %v11166_v20  ;;  %v11483_v42 = vmul.f32 %v18875_v25, %v25682_v29  ;;  %v6907_v34 = vcombine.low %v6898_v14, %v6906_v16  ;;  %v18879_v62 = vpop.eup %18878  ;;  %v25684_v14 = vld [vmem:[#allocation100_spill] sm:$0xff]  ;;  %v25685_v16 = vld [vmem:[#allocation98_spill] sm:$0xff] }
 0x6fe   :  { %v7434_v33 = vpack.i.b16 %v23245_v3, %v23269_v4  ;;  %v23277_v19 = vrot.slane %v6151_v41, %v25557_v8  ;;  %v10937_v48 = vmul.f32 1.442695, %v10816_v46  ;;  %v12286_v30 = vsel %vm11594_vm3, %v25683_v32, 0  ;;  %v18881_v41 = vpop.eup %18880  ;;  %v25686_v46 = vld [vmem:[#allocation107_spill] sm:$0xff] }
 0x6ff   :  { %18180 = vmatmul.mubr.msk.bf16.vlgmr.msra.gmra.mrb[168].mxu1 %vm7558_vm2, %v11540_v13  ;;  %v7418_v58 = vshrl.u32 %v23029_v28, 16  ;;  %18890 = vpow2.f32 %v10933_v57  ;;  %v11359_v47 = vadd.f32 %v18879_v62, %v11025_v40  ;;  %v11547_v20 = vpack.c.bf16 %v11483_v42, %v11483_v42  ;;  %v23292_v57 = vpop.xlane.xlu1 %10687  ;;  %v25697_v62 = vld [vmem:[#allocation47_spill] sm:$0xff] }
 0x700   :  { %18190 = vmatpush3.bf16.msra.mxu1 %v12286_v30  ;;  %18191 = vmatprep.mubr.msk.bf16.mxu1 %vm19202_vm1, %v25293_v31  ;;  %v6882_v25 = vcombine.low %v25685_v16, %v25684_v14  ;;  %18892 = vpow2.f32 %v11263_v39  ;;  %v25687_v29 = vmax.f32 %v25686_v46, 0.0  ;;  %v11478_v53 = vmul.f32 %v18877_v21, %v25688_v15  ;;  %v11010_v32 = vpop.xlane.xlu0 %11009 }
 0x701   :  { %18201 = vmatprep.subr.bf16.mxu1 %v25293_v31  ;;  %v7417_v28 = vshrl.u32 %v23057_v26, 16  ;;  %18894 = vpow2.f32 %v11253_v27  ;;  %18222 = vmatmul.mubr.msk.bf16.vlgmr.msra.gmra.mrb[168].mxu0 %vm7558_vm2, %v11547_v20  ;;  %v12608_v40 = vsel %vm11594_vm3, %v7434_v33, 0  ;;  %v11354_v42 = vadd.f32 %v18881_v41, %v11010_v32  ;;  %v25691_v20 = vld [vmem:[#allocation104_spill] sm:$0xff]  ;;  %v25693_v32 = vld [vmem:[#allocation53_spill] sm:$0xff] }
 0x702   :  { %v11173_v13 = vsub.f32 0.0, %v25687_v29  ;;  %v23297_v39 = vrot.slane %v6907_v34, %v25557_v8  ;;  %v25689_v15 = vshrl.u32 %v25613_v24, 16  ;;  %18896 = vpow2.f32 %v10937_v48  ;;  %18232 = vmatpush3.bf16.msra.mxu0 %v12608_v40  ;;  %18233 = vmatprep.mubr.msk.bf16.mxu0 %vm19202_vm1, %v25293_v31  ;;  %v18883_v27 = vpop.eup %18882  ;;  %v25690_v34 = vld [vmem:[#allocation65_spill] sm:$0xff] }
 0x703   :  { %v7419_v26 = vpack.i.b16 %v7418_v58, %v7417_v28  ;;  %v23309_v33 = vrot.slane %v23169_v60, %v25549_v11  ;;  %18898 = vrcp.f32 %v11359_v47  ;;  %18243 = vmatprep.subr.bf16.mxu0 %v25293_v31  ;;  %v23314_v24 = vrot.slane %v6882_v25, %v25557_v8 }
 0x704   :  { %v23303_v21 = vpack.i.b16 %v5467_v22, %v25689_v15  ;;  %v18885_v22 = vpop.eup %18884  ;;  %v11267_v48 = vmul.f32 1.442695, %v11173_v13  ;;  %v25692_v58 = vmax.f32 %v25691_v20, 0.0  ;;  %18900 = vrcp.f32 %v11354_v42  ;;  %v11031_v41 = vpop.xlane.xlu0 %11030  ;;  %v25694_v15 = vld [vmem:[#allocation66_spill] sm:$0xff] }
 0x705   :  { %v11542_v16 = vpack.c.bf16 %v11478_v53, %v11478_v53  ;;  %v18887_v46 = vpop.eup %18886  ;;  %v11485_v28 = vmul.f32 %v18885_v22, %v25693_v32  ;;  %v11361_v47 = vadd.f32 %v18883_v27, %v11031_v41  ;;  %v7440_v40 = vpack.i.b16 %v23297_v39, %v23314_v24  ;;  %v11022_v27 = vpop.xlane.xlu1 %11021  ;;  %v25695_v13 = vld [vmem:[#allocation18_spill] sm:$0xff] }
 0x706   :  { %v11168_v14 = vsub.f32 0.0, %v25692_v58  ;;  %v18889_v25 = vpop.eup %18888  ;;  %v23327_v20 = vpack.i.b16 %v25694_v15, %v25690_v34  ;;  %v12378_v53 = vsel %vm11594_vm3, %v7419_v26, 0  ;;  %v7424_v42 = vshrl.u32 %v23109_v55, 16 }
 0x707   :  { %18192 = vmatmul.mubr.msk.bf16.vlgmr.msra.gmra.mrb[172].mxu1 %vm7558_vm2, %v11542_v16  ;;  %v11356_v22 = vadd.f32 %v18889_v25, %v23265_v61  ;;  %18902 = vrcp.f32 %v11361_v47  ;;  %v11549_v58 = vpack.c.bf16 %v11485_v28, %v11485_v28  ;;  %v7423_v41 = vshrl.u32 %v23132_v17, 16  ;;  %v25699_v17 = vld [vmem:[#allocation49_spill] sm:$0xff] }
 0x708   :  { %18202 = vmatpush3.bf16.msra.mxu1 %v12378_v53  ;;  %18203 = vmatprep.mubr.msk.bf16.mxu1 %vm19202_vm1, %v25293_v31  ;;  %18904 = vpow2.f32 %v11267_v48  ;;  %v11257_v32 = vmul.f32 1.442695, %v11168_v14  ;;  %v25696_v29 = vmax.f32 %v25695_v13, 0.0  ;;  %v11480_v26 = vmul.f32 %v18887_v46, %v25697_v62  ;;  %v11037_v30 = vpop.xlane.xlu0 %11036  ;;  %v25700_v48 = vld [vmem:[#allocation20_spill] sm:$0xff]  ;;  %v25703_v13 = vld [vmem:[#allocation105_spill] sm:$0xff] }
 0x709   :  { %18213 = vmatprep.subr.bf16.mxu1 %v25293_v31  ;;  %v23340_v55 = vpop.eup %18890  ;;  %18234 = vmatmul.mubr.msk.bf16.vlgmr.msra.gmra.mrb[172].mxu0 %vm7558_vm2, %v11549_v58  ;;  %v12700_v61 = vsel %vm11594_vm3, %v7440_v40, 0  ;;  %v23346_v28 = vcombine.high %v23297_v39, %v25659_v43  ;;  %v25701_v14 = vcombine.low %v25699_v17, %v25700_v48  ;;  %v25702_v62 = vcombine.high %v25699_v17, %v25700_v48  ;;  %v25705_v58 = vld [vmem:[#allocation26_spill] sm:$0xff]  ;;  %v25706_v17 = vld [vmem:[#allocation59_spill] sm:$0xff]  ;;  %v25707_v48 = vld [vmem:[#allocation69_spill] sm:$0xff] }
 0x70a   :  { %v11175_v16 = vsub.f32 0.0, %v25696_v29  ;;  %25698 = vst [vmem:[#allocation103_spill] sm:$0xff] %v23340_v55  ;;  %v18893_v47 = vpop.eup %18892  ;;  %v25704_v53 = vmax.f32 %v25703_v13, 0.0  ;;  %18244 = vmatpush3.bf16.msra.mxu0 %v12700_v61  ;;  %5332 = vrot.lane.b32.xlu0 %v25705_v58, %s19193_s0  ;;  %v7425_v1 = vpack.i.b16 %v7424_v42, %v7423_v41  ;;  %v23363_v45 = vcombine.high %v23314_v24, %v25659_v43  ;;  %v23380_v58 = vpop.xlane.xlu1 %10693 }
 0x70b   :  { %v6948_v29 = vrot.slane %v25701_v14, %v25549_v11  ;;  %v6956_v46 = vrot.slane %v25702_v62, %v25549_v11  ;;  %v18895_v14 = vpop.eup %18894  ;;  %18906 = vrcp.f32 %v11356_v22  ;;  %v11363_v38 = vadd.f32 %v18893_v47, %v11037_v30  ;;  %18245 = vmatprep.mubr.msk.bf16.mxu0 %vm19202_vm1, %v25293_v31  ;;  %18255 = vmatprep.subr.bf16.mxu0 %v25293_v31 }
 0x70c   :  { %v11170_v40 = vsub.f32 0.0, %v25704_v53  ;;  %v25708_v61 = vcombine.low %v25706_v17, %v25707_v48  ;;  %v25709_v42 = vcombine.high %v25706_v17, %v25707_v48  ;;  %v23376_v13 = vpop.eup %18896  ;;  %18908 = vpow2.f32 %v11257_v32  ;;  %v11043_v63 = vpop.xlane.xlu0 %11042 }
 0x70d   :  { %v11271_v22 = vmul.f32 1.442695, %v11175_v16  ;;  %v11544_v30 = vpack.c.bf16 %v11480_v26, %v11480_v26  ;;  %v11116_v47 = vsel %vm7558_vm2, %v23340_v55, 0.0  ;;  %v18899_v53 = vpop.eup %18898  ;;  %v7429_v25 = vshrl.u32 %v23183_v51, 16  ;;  %v25710_v16 = vld [vmem:[#allocation57_spill] sm:$0xff] }
 0x70e   :  { %v6923_v62 = vrot.slane %v25708_v61, %v25549_v11  ;;  %v6931_v41 = vrot.slane %v25709_v42, %v25549_v11  ;;  %11117 = vadd.xlane.f32.xlu1 %v11116_v47  ;;  %v7446_v61 = vpack.i.b16 %v23346_v28, %v23363_v45  ;;  %v7430_v17 = vshrl.u32 %v23162_v12, 16  ;;  %v18901_v42 = vpop.eup %18900 }
 0x70f   :  { %v6957_v48 = vcombine.low %v6948_v29, %v6956_v46  ;;  %v11261_v59 = vmul.f32 1.442695, %v11170_v40  ;;  %v25277_v32 = vmax.f32 %v23113_v49, 0.0  ;;  %v11487_v26 = vmul.f32 %v18899_v53, %v25710_v16  ;;  %18204 = vmatmul.mubr.msk.bf16.vlgmr.msra.gmra.mrb[176].mxu1 %vm7558_vm2, %v11544_v30  ;;  %v25712_v29 = vld [vmem:[#allocation111_spill] sm:$0xff]  ;;  %v25714_v53 = vld [vmem:[#allocation50_spill] sm:$0xff] }
 0x710   :  { %v12470_v55 = vsel %vm11594_vm3, %v7425_v1, 0  ;;  %v23390_v47 = vpop.f32.mrb[144].mxu1  ;;  %v11358_v36 = vadd.f32 %v18895_v14, %v11022_v27  ;;  %v11482_v18 = vmul.f32 %v18901_v42, %v25711_v37  ;;  %18910 = vrcp.f32 %v11363_v38  ;;  %18215 = vmatprep.mubr.msk.bf16.mxu1 %vm19202_vm1, %v25293_v31 }
 0x711   :  { %18214 = vmatpush3.bf16.msra.mxu1 %v12470_v55  ;;  %v6932_v12 = vcombine.low %v6923_v62, %v6931_v41  ;;  %v18109_v51 = vpop.f32.mrb[145].mxu1  ;;  %18912 = vpow2.f32 %v11271_v22  ;;  %v25713_v46 = vmax.f32 %v25712_v29, 0.0  ;;  %v11551_v30 = vpack.c.bf16 %v11487_v26, %v11487_v26  ;;  %v18903_v14 = vpop.eup %18902  ;;  %v25715_v26 = vld [vmem:[#allocation54_spill] sm:$0xff] }
 0x712   :  { %18225 = vmatprep.subr.bf16.mxu1 %v25293_v31  ;;  %v11122_v1 = vsel %vm7558_vm2, %v23376_v13, 0.0  ;;  %v11681_v27 = vpop.f32.mrb[146].mxu1  ;;  %v23402_v37 = vrot.slane %v23327_v20, %v25549_v11  ;;  %v12792_v38 = vsel %vm11594_vm3, %v7446_v61, 0  ;;  %v7431_v55 = vpack.i.b16 %v7430_v17, %v7429_v25  ;;  %v18905_v22 = vpop.eup %18904 }
 0x713   :  { %v11177_v40 = vsub.f32 0.0, %v25713_v46  ;;  %11123 = vadd.xlane.f32.xlu1 %v11122_v1  ;;  %v23406_v62 = vrot.slane %v6957_v48, %v25557_v8  ;;  %v18110_v41 = vpop.f32.mrb[147].mxu1  ;;  %v10817_v42 = vsub.f32 %v25714_v53, %v25277_v32  ;;  %v25278_v16 = vmax.f32 %v23180_v10, 0.0  ;;  %18246 = vmatmul.mubr.msk.bf16.vlgmr.msra.gmra.mrb[176].mxu0 %vm7558_vm2, %v11551_v30  ;;  %v25716_v46 = vld [vmem:[#allocation36_spill] sm:$0xff]  ;;  %v11028_v30 = vpop.xlane.xlu1 %11027 }
 0x714   :  { %v11489_v51 = vmul.f32 %v18903_v14, %v25715_v26  ;;  %v11546_v29 = vpack.c.bf16 %v11482_v18, %v11482_v18  ;;  %v25717_v61 = vmax.f32 %v25716_v46, 0.0  ;;  %18914 = vrcp.f32 %v11358_v36  ;;  %18256 = vmatpush3.bf16.msra.mxu0 %v12792_v38  ;;  %18257 = vmatprep.mubr.msk.bf16.mxu0 %vm19202_vm1, %v25293_v31  ;;  %v11049_v18 = vpop.xlane.xlu0 %11048 }
 0x715   :  { %v11365_v25 = vadd.f32 %v18905_v22, %v11043_v63  ;;  %v23419_v17 = vrot.slane %v6932_v12, %v25557_v8  ;;  %v23423_v48 = vrot.slane %v23303_v21, %v25549_v11  ;;  %18916 = vpow2.f32 %v11261_v59  ;;  %18267 = vmatprep.subr.bf16.mxu0 %v25293_v31  ;;  %v18907_v63 = vpop.eup %18906 }
 0x716   :  { %v11172_v1 = vsub.f32 0.0, %v25717_v61  ;;  %v11275_v27 = vmul.f32 1.442695, %v11177_v40  ;;  %v7436_v36 = vshrl.u32 %v23245_v3, 16  ;;  %v25718_v14 = vshrl.u32 %v25690_v34, 16  ;;  %v18909_v40 = vpop.eup %18908  ;;  %v25720_v3 = vld [vmem:[#allocation56_spill] sm:$0xff] }
 0x717   :  { %v25719_v38 = vshrl.u32 %v25694_v15, 16  ;;  %v12562_v12 = vsel %vm11594_vm3, %v7431_v55, 0  ;;  %v7452_v22 = vpack.i.b16 %v23406_v62, %v23419_v17  ;;  %v7435_v59 = vshrl.u32 %v23269_v4, 16  ;;  %18216 = vmatmul.mubr.msk.bf16.vlgmr.msra.gmra.mrb[180].mxu1 %vm7558_vm2, %v11546_v29  ;;  %v25721_v4 = vld [vmem:[#allocation114_spill] sm:$0xff] }
 0x718   :  { %v10939_v53 = vmul.f32 1.442695, %v10817_v42  ;;  %v25279_v26 = vmax.f32 %v23292_v57, 0.0  ;;  %v10819_v46 = vsub.f32 %v25720_v3, %v25278_v16  ;;  %v11553_v34 = vpack.c.bf16 %v11489_v51, %v11489_v51  ;;  %18226 = vmatpush3.bf16.msra.mxu1 %v12562_v12  ;;  %18227 = vmatprep.mubr.msk.bf16.mxu1 %vm19202_vm1, %v25293_v31 }
 0x719   :  { %v23431_v41 = vpack.i.b16 %v25719_v38, %v25718_v14  ;;  %v6200_v15 = vcombine.low %v23309_v33, %v23402_v37  ;;  %v11265_v55 = vmul.f32 1.442695, %v11172_v1  ;;  %v11360_v61 = vadd.f32 %v18909_v40, %v11028_v30  ;;  %v25723_v38 = vld [vmem:[#allocation52_spill] sm:$0xff]  ;;  %18237 = vmatprep.subr.bf16.mxu1 %v25293_v31 }
 0x71a   :  { %18918 = vrcp.f32 %v11365_v25  ;;  %v25722_v42 = vmax.f32 %v25721_v4, 0.0  ;;  %v11484_v32 = vmul.f32 %v18907_v63, %v25723_v38  ;;  %v7437_v29 = vpack.i.b16 %v7436_v36, %v7435_v59  ;;  %v18911_v51 = vpop.eup %18910  ;;  %v25726_v36 = vld [vmem:[#allocation44_spill] sm:$0xff]  ;;  %v11034_v4 = vpop.xlane.xlu0 %11033 }
 0x71b   :  { %18920 = vpow2.f32 %v11275_v27  ;;  %v12884_v3 = vsel %vm11594_vm3, %v7452_v22, 0  ;;  %v23453_v1 = vcombine.high %v23406_v62, %v25659_v43  ;;  %v25724_v25 = vcombine.low %v23212_v50, %v23215_v23  ;;  %v18913_v12 = vpop.eup %18912  ;;  %18258 = vmatmul.mubr.msk.bf16.vlgmr.msra.gmra.mrb[180].mxu0 %vm7558_vm2, %v11553_v34 }
 0x71c   :  { %v11179_v14 = vsub.f32 0.0, %v25722_v42  ;;  %v25725_v30 = vcombine.high %v23212_v50, %v23215_v23  ;;  %18922 = vpow2.f32 %v10939_v53  ;;  %v10820_v22 = vsub.f32 %v25726_v36, %v25279_v26  ;;  %v25727_v42 = vld [vmem:[#allocation37_spill] sm:$0xff]  ;;  %18268 = vmatpush3.bf16.msra.mxu0 %v12884_v3  ;;  %18269 = vmatprep.mubr.msk.bf16.mxu0 %vm19202_vm1, %v25293_v31 }
 0x71d   :  { %v6998_v27 = vrot.slane %v25724_v25, %v25549_v11  ;;  %v10943_v59 = vmul.f32 1.442695, %v10819_v46  ;;  %v10757_v40 = vmax.f32 %v23236_v0, 0.0  ;;  %v25728_v38 = vmax.f32 %v25727_v42, 0.0  ;;  %v25729_v53 = vld [vmem:[#allocation125_spill] sm:$0xff]  ;;  %18279 = vmatprep.subr.bf16.mxu0 %v25293_v31 }
 0x71e   :  { %v7006_v63 = vrot.slane %v25725_v30, %v25549_v11  ;;  %18924 = vrcp.f32 %v11360_v61  ;;  %v11367_v16 = vadd.f32 %v18913_v12, %v11049_v18  ;;  %v23474_v50 = vcombine.high %v23419_v17, %v25659_v43  ;;  %v18915_v34 = vpop.eup %18914 }
 0x71f   :  { %v11174_v25 = vsub.f32 0.0, %v25728_v38  ;;  %18926 = vpow2.f32 %v11265_v55  ;;  %v11279_v23 = vmul.f32 1.442695, %v11179_v14  ;;  %v11491_v46 = vmul.f32 %v18911_v51, %v25729_v53  ;;  %v18917_v12 = vpop.eup %18916  ;;  %v25730_v55 = vld [vmem:[#allocation55_spill] sm:$0xff]  ;;  %v25733_v38 = vld [vmem:[#allocation58_spill] sm:$0xff] }
 0x720   :  { %v11548_v30 = vpack.c.bf16 %v11484_v32, %v11484_v32  ;;  %v12654_v36 = vsel %vm11594_vm3, %v7437_v29, 0  ;;  %v7458_v18 = vpack.i.b16 %v23453_v1, %v23474_v50  ;;  %v7441_v61 = vshrl.u32 %v23314_v24, 16  ;;  %v25731_v24 = vld [vmem:[#allocation39_spill] sm:$0xff] }
 0x721   :  { %v7442_v3 = vshrl.u32 %v23297_v39, 16  ;;  %v10945_v42 = vmul.f32 1.442695, %v10820_v22  ;;  %18928 = vpow2.f32 %v10943_v59  ;;  %v10821_v14 = vsub.f32 %v25730_v55, %v10757_v40  ;;  %v11055_v55 = vpop.xlane.xlu0 %11054 }
 0x722   :  { %18228 = vmatmul.mubr.msk.bf16.vlgmr.msra.gmra.mrb[184].mxu1 %vm7558_vm2, %v11548_v30  ;;  %v7007_v32 = vcombine.low %v6998_v27, %v7006_v63  ;;  %v11269_v51 = vmul.f32 1.442695, %v11174_v25  ;;  %18930 = vrcp.f32 %v11367_v16  ;;  %v11362_v29 = vadd.f32 %v18917_v12, %v11034_v4  ;;  %v23506_v30 = vpop.f32.mrb[128].mxu0 }
 0x723   :  { %18238 = vmatpush3.bf16.msra.mxu1 %v12654_v36  ;;  %18239 = vmatprep.mubr.msk.bf16.mxu1 %vm19202_vm1, %v25293_v31  ;;  %v6982_v39 = vcombine.low %v23186_v6, %v23189_v44  ;;  %18932 = vpow2.f32 %v11279_v23  ;;  %v25732_v22 = vmax.f32 %v25731_v24, 0.0  ;;  %v11486_v53 = vmul.f32 %v18915_v34, %v25733_v38  ;;  %v11040_v23 = vpop.xlane.xlu1 %11039 }
 0x724   :  { %v11555_v26 = vpack.c.bf16 %v11491_v46, %v11491_v46  ;;  %18249 = vmatprep.subr.bf16.mxu1 %v25293_v31  ;;  %v18919_v27 = vpop.eup %18918  ;;  %v6201_v16 = vcombine.high %v23309_v33, %v23402_v37  ;;  %v23498_v63 = vrot.slane %v6200_v15, %v25557_v8  ;;  %v23502_v6 = vrot.slane %v23431_v41, %v25549_v11  ;;  %v25734_v33 = vld [vmem:[#allocation33_spill] sm:$0xff]  ;;  %v25735_v15 = vld [vmem:[#allocation106_spill] sm:$0xff] }
 0x725   :  { %v11181_v59 = vsub.f32 0.0, %v25732_v22  ;;  %v7443_v44 = vpack.i.b16 %v7442_v3, %v7441_v61  ;;  %v18921_v4 = vpop.eup %18920  ;;  %18934 = vpow2.f32 %v10945_v42  ;;  %v10947_v25 = vmul.f32 1.442695, %v10821_v14  ;;  %5380 = vrot.lane.b32.xlu1 %v25734_v33, %s19193_s0  ;;  %v18103_v3 = vpop.f32.mrb[129].mxu0  ;;  %v25737_v42 = vld [vmem:[#allocation86_spill] sm:$0xff] }
 0x726   :  { %18270 = vmatmul.mubr.msk.bf16.vlgmr.msra.gmra.mrb[184].mxu0 %vm7558_vm2, %v11555_v26  ;;  %v12976_v46 = vsel %vm11594_vm3, %v7458_v18, 0  ;;  %v23511_v37 = vrot.slane %v7007_v32, %v25557_v8  ;;  %v25736_v34 = vmax.f32 %v25735_v15, 0.0  ;;  %18936 = vrcp.f32 %v11362_v29  ;;  %v23520_v18 = vpop.eup %18922  ;;  %v11635_v24 = vpop.f32.mrb[130].mxu0 }
 0x727   :  { %v11369_v61 = vadd.f32 %v18921_v4, %v11055_v55  ;;  %18280 = vmatpush3.bf16.msra.mxu0 %v12976_v46  ;;  %18281 = vmatprep.mubr.msk.bf16.mxu0 %vm19202_vm1, %v25293_v31  ;;  %v23518_v26 = vrot.slane %v6982_v39, %v25557_v8  ;;  %18938 = vpow2.f32 %v11269_v51  ;;  %v11283_v12 = vmul.f32 1.442695, %v11181_v59  ;;  %v18104_v55 = vpop.f32.mrb[131].mxu0  ;;  %v25738_v59 = vld [vmem:[#allocation117_spill] sm:$0xff]  ;;  %v11046_v3 = vpop.xlane.xlu1 %11045 }
 0x728   :  { %v11176_v36 = vsub.f32 0.0, %v25736_v34  ;;  %v11493_v14 = vmul.f32 %v18919_v27, %v25737_v42  ;;  %v11550_v32 = vpack.c.bf16 %v11486_v53, %v11486_v53  ;;  %18291 = vmatprep.subr.bf16.mxu0 %v25293_v31  ;;  %v18925_v29 = vpop.eup %18924  ;;  %v23525_v22 = vrot.slane %v6201_v16, %v25557_v8  ;;  %v11061_v42 = vpop.xlane.xlu0 %11060  ;;  %v25743_v55 = vld [vmem:[#allocation25_spill] sm:$0xff] }
 0x729   :  { %v6266_v38 = vcombine.low %v23423_v48, %v23502_v6  ;;  %v12746_v39 = vsel %vm11594_vm3, %v7443_v44, 0  ;;  %v7448_v4 = vshrl.u32 %v23346_v28, 16  ;;  %v18927_v51 = vpop.eup %18926  ;;  %v25739_v46 = vmax.f32 %v25738_v59, 0.0 }
 0x72a   :  { %18940 = vpow2.f32 %v10947_v25  ;;  %18240 = vmatmul.mubr.msk.bf16.vlgmr.msra.gmra.mrb[188].mxu1 %vm7558_vm2, %v11550_v32  ;;  %v7464_v53 = vpack.i.b16 %v23511_v37, %v23518_v26  ;;  %v7447_v16 = vshrl.u32 %v23363_v45, 16  ;;  %v11273_v33 = vmul.f32 1.442695, %v11176_v36  ;;  %v25740_v25 = vld [vmem:[#allocation120_spill] sm:$0xff] }
 0x72b   :  { %v11183_v27 = vsub.f32 0.0, %v25739_v46  ;;  %v11364_v15 = vadd.f32 %v18927_v51, %v11040_v23  ;;  %18942 = vrcp.f32 %v11369_v61  ;;  %18250 = vmatpush3.bf16.msra.mxu1 %v12746_v39  ;;  %18251 = vmatprep.mubr.msk.bf16.mxu1 %vm19202_vm1, %v25293_v31  ;;  %v23541_v28 = vcombine.high %v23518_v26, %v25659_v43  ;;  %v23543_v44 = vpop.eup %18928 }
 0x72c   :  { %18944 = vpow2.f32 %v11283_v12  ;;  %v11488_v34 = vmul.f32 %v18925_v29, %v25740_v25  ;;  %v11557_v32 = vpack.c.bf16 %v11493_v14, %v11493_v14  ;;  %v11125_v45 = vsel %vm7558_vm2, %v23520_v18, 0.0  ;;  %18261 = vmatprep.subr.bf16.mxu1 %v25293_v31  ;;  %v18931_v23 = vpop.eup %18930 }
 0x72d   :  { %11126 = vadd.xlane.f32.xlu0 %v11125_v45  ;;  %v7449_v36 = vpack.i.b16 %v7448_v4, %v7447_v16  ;;  %v23551_v61 = vcombine.high %v23511_v37, %v25659_v43  ;;  %v25741_v12 = vcombine.low %v23148_v7, %v23155_v9  ;;  %v25742_v14 = vcombine.low %v23263_v56, %v23277_v19  ;;  %v18933_v39 = vpop.eup %18932 }
 0x72e   :  { %v25744_v51 = vmax.f32 %v25743_v55, 0.0  ;;  %v11287_v4 = vmul.f32 1.442695, %v11183_v27  ;;  %18282 = vmatmul.mubr.msk.bf16.vlgmr.msra.gmra.mrb[188].mxu0 %vm7558_vm2, %v11557_v32  ;;  %v13068_v46 = vsel %vm11594_vm3, %v7464_v53, 0  ;;  %v25745_v16 = vcombine.high %v23263_v56, %v23277_v19  ;;  %v25747_v53 = vld [vmem:[#allocation85_spill] sm:$0xff] }
 0x72f   :  { %v23557_v24 = vrot.slane %v25741_v12, %v25549_v11  ;;  %v7048_v29 = vrot.slane %v25742_v14, %v25549_v11  ;;  %v10754_v45 = vmax.f32 %v23217_v54, 0.0  ;;  %18946 = vrcp.f32 %v11364_v15  ;;  %18292 = vmatpush3.bf16.msra.mxu0 %v13068_v46  ;;  %18293 = vmatprep.mubr.msk.bf16.mxu0 %vm19202_vm1, %v25293_v31  ;;  %v23578_v14 = vpop.eup %18934 }
 0x730   :  { %v11178_v59 = vsub.f32 0.0, %v25744_v51  ;;  %v7056_v25 = vrot.slane %v25745_v16, %v25549_v11  ;;  %v11371_v12 = vadd.f32 %v18933_v39, %v11061_v42  ;;  %v25746_v27 = vcombine.high %v23148_v7, %v23155_v9  ;;  %18303 = vmatprep.subr.bf16.mxu0 %v25293_v31  ;;  %v18937_v15 = vpop.eup %18936  ;;  %v25748_v16 = vld [vmem:[#allocation48_spill] sm:$0xff] }
 0x731   :  { %18948 = vpow2.f32 %v11273_v33  ;;  %v11495_v55 = vmul.f32 %v18931_v23, %v25747_v53  ;;  %v11552_v56 = vpack.c.bf16 %v11488_v34, %v11488_v34  ;;  %v11131_v19 = vsel %vm7558_vm2, %v23543_v44, 0.0  ;;  %v18939_v33 = vpop.eup %18938  ;;  %v11052_v34 = vpop.xlane.xlu1 %11051 }
 0x732   :  { %v7031_v32 = vrot.slane %v25746_v27, %v25549_v11  ;;  %v6267_v42 = vcombine.high %v23423_v48, %v23502_v6  ;;  %v12838_v39 = vsel %vm11594_vm3, %v7449_v36, 0  ;;  %11132 = vadd.xlane.f32.xlu0 %v11131_v19  ;;  %v7453_v7 = vshrl.u32 %v23419_v17, 16 }
 0x733   :  { %v7454_v9 = vshrl.u32 %v23406_v62, 16  ;;  %v11277_v51 = vmul.f32 1.442695, %v11178_v59  ;;  %18950 = vpow2.f32 %v11287_v4  ;;  %18252 = vmatmul.mubr.msk.bf16.vlgmr.msra.gmra.mrb[192].mxu1 %vm7558_vm2, %v11552_v56  ;;  %v7470_v23 = vpack.i.b16 %v23551_v61, %v23541_v28  ;;  %v25749_v4 = vld [vmem:[#allocation75_spill] sm:$0xff]  ;;  %v11067_v56 = vpop.xlane.xlu0 %11066 }
 0x734   :  { %v7057_v46 = vcombine.low %v7048_v29, %v7056_v25  ;;  %v10818_v27 = vsub.f32 %v25748_v16, %v10754_v45  ;;  %v11366_v36 = vadd.f32 %v18939_v33, %v11046_v3  ;;  %18952 = vrcp.f32 %v11371_v12  ;;  %18262 = vmatpush3.bf16.msra.mxu1 %v12838_v39  ;;  %18263 = vmatprep.mubr.msk.bf16.mxu1 %vm19202_vm1, %v25293_v31  ;;  %v23598_v17 = vpop.eup %18940 }
 0x735   :  { %v7032_v62 = vcombine.low %v23557_v24, %v7031_v32  ;;  %v25280_v59 = vmax.f32 %v23380_v58, 0.0  ;;  %v11490_v53 = vmul.f32 %v18937_v15, %v25749_v4  ;;  %v11559_v29 = vpack.c.bf16 %v11495_v55, %v11495_v55  ;;  %18273 = vmatprep.subr.bf16.mxu1 %v25293_v31  ;;  %v18943_v3 = vpop.eup %18942  ;;  %v25750_v55 = vld [vmem:[#allocation110_spill] sm:$0xff] }
 0x736   :  { %v11134_v25 = vsel %vm7558_vm2, %v23578_v14, 0.0  ;;  %v6274_v12 = vrot.slane %v6266_v38, %v25557_v8  ;;  %v6281_v24 = vrot.slane %v6267_v42, %v25557_v8  ;;  %v7066_v32 = vcombine.low %v23498_v63, %v23525_v22  ;;  %v18945_v15 = vpop.eup %18944  ;;  %v25752_v42 = vld [vmem:[#allocation119_spill] sm:$0xff] }
 0x737   :  { %11135 = vadd.xlane.f32.xlu0 %v11134_v25  ;;  %v7455_v19 = vpack.i.b16 %v7454_v9, %v7453_v7  ;;  %18954 = vpow2.f32 %v11277_v51  ;;  %v25751_v39 = vmax.f32 %v25750_v55, 0.0  ;;  %18294 = vmatmul.mubr.msk.bf16.vlgmr.msra.gmra.mrb[192].mxu0 %vm7558_vm2, %v11559_v29  ;;  %v13160_v16 = vsel %vm11594_vm3, %v7470_v23, 0  ;;  %v23625_v9 = vpop.permute.xlu1 %5346  ;;  %v25753_v51 = vld [vmem:[#allocation35_spill] sm:$0xff] }
 0x738   :  { %v23617_v4 = vrot.slane %v7057_v46, %v25557_v8  ;;  %v10941_v48 = vmul.f32 1.442695, %v10818_v27  ;;  %18956 = vrcp.f32 %v11366_v36  ;;  %v11373_v6 = vadd.f32 %v18945_v15, %v11067_v56  ;;  %18304 = vmatpush3.bf16.msra.mxu0 %v13160_v16  ;;  %18305 = vmatprep.mubr.msk.bf16.mxu0 %vm19202_vm1, %v25293_v31 }
 0x739   :  { %v11180_v33 = vsub.f32 0.0, %v25751_v39  ;;  %v23620_v38 = vrot.slane %v7032_v62, %v25557_v8  ;;  %v10822_v7 = vsub.f32 %v25752_v42, %v25280_v59  ;;  %v11497_v29 = vmul.f32 %v18943_v3, %v25753_v51  ;;  %18315 = vmatprep.subr.bf16.mxu0 %v25293_v31  ;;  %v18947_v46 = vpop.eup %18946 }
 0x73a   :  { %v11554_v25 = vpack.c.bf16 %v11490_v53, %v11490_v53  ;;  %v11137_v23 = vsel %vm7558_vm2, %v23598_v17, 0.0  ;;  %v17236_v27 = vcombine.high %v23498_v63, %v23525_v22  ;;  %v7091_v36 = vcombine.low %v6274_v12, %v6281_v24  ;;  %v11073_v53 = vpop.xlane.xlu0 %11072 }
 0x73b   :  { %11138 = vadd.xlane.f32.xlu0 %v11137_v23  ;;  %v7460_v62 = vshrl.u32 %v23453_v1, 16  ;;  %v18949_v56 = vpop.eup %18948  ;;  %v17237_v15 = vcombine.high %v6274_v12, %v6281_v24  ;;  %v11281_v3 = vmul.f32 1.442695, %v11180_v33  ;;  %v12930_v55 = vsel %vm11594_vm3, %v7455_v19, 0  ;;  %v25754_v12 = vld [vmem:[#allocation121_spill] sm:$0xff]  ;;  %v23645_v33 = vpop.f32.mrb[132].mxu0 }
 0x73c   :  { %18264 = vmatmul.mubr.msk.bf16.vlgmr.msra.gmra.mrb[196].mxu1 %vm7558_vm2, %v11554_v25  ;;  %v7476_v39 = vpack.i.b16 %v23617_v4, %v23620_v38  ;;  %v23641_v16 = vrot.slane %v7066_v32, %v25549_v11  ;;  %v11368_v42 = vadd.f32 %v18949_v56, %v11052_v34  ;;  %18958 = vrcp.f32 %v11373_v6  ;;  %v18115_v6 = vpop.f32.mrb[133].mxu0 }
 0x73d   :  { %18274 = vmatpush3.bf16.msra.mxu1 %v12930_v55  ;;  %v7459_v63 = vshrl.u32 %v23474_v50, 16  ;;  %v18951_v1 = vpop.eup %18950  ;;  %18960 = vpow2.f32 %v10941_v48  ;;  %v10949_v22 = vmul.f32 1.442695, %v10822_v7  ;;  %v11492_v24 = vmul.f32 %v18947_v46, %v25754_v12  ;;  %18275 = vmatprep.mubr.msk.bf16.mxu1 %vm19202_vm1, %v25293_v31  ;;  %v23655_v7 = vpop.permute.xlu1 %5362 }
 0x73e   :  { %v11561_v51 = vpack.c.bf16 %v11497_v29, %v11497_v29  ;;  %v18953_v19 = vpop.eup %18952  ;;  %v14536_v32 = vcombine.low %v23506_v30, %v23645_v33  ;;  %18285 = vmatprep.subr.bf16.mxu1 %v25293_v31  ;;  %v7098_v48 = vrot.slane %v7091_v36, %v25549_v11  ;;  %18962 = vpow2.f32 %v11281_v3  ;;  %v11727_v25 = vpop.f32.mrb[134].mxu0 }
 0x73f   :  { %v7461_v50 = vpack.i.b16 %v7460_v62, %v7459_v63  ;;  %v13252_v29 = vsel %vm11594_vm3, %v7476_v39, 0  ;;  %v23661_v23 = vcombine.high %v23617_v4, %v25659_v43  ;;  %v7106_v46 = vrot.slane %v17237_v15, %v25549_v11  ;;  %v18116_v36 = vpop.f32.mrb[135].mxu0  ;;  %v25755_v63 = vld [vmem:[#allocation34_spill] sm:$0xff]  ;;  %v11058_v25 = vpop.xlane.xlu0 %11057 }
 0x740   :  { %18306 = vmatmul.mubr.msk.bf16.vlgmr.msra.gmra.mrb[196].mxu0 %vm7558_vm2, %v11561_v51  ;;  %v7081_v56 = vrot.slane %v17236_v27, %v25549_v11  ;;  %18964 = vrcp.f32 %v11368_v42  ;;  %v11375_v62 = vadd.f32 %v18951_v1, %v11073_v53  ;;  %v23667_v3 = vcombine.high %v23620_v38, %v25659_v43  ;;  %v25757_v51 = vld [vmem:[#allocation74_spill] sm:$0xff] }
 0x741   :  { %18316 = vmatpush3.bf16.msra.mxu0 %v13252_v29  ;;  %v18955_v55 = vpop.eup %18954  ;;  %v25756_v39 = vmax.f32 %v25755_v63, 0.0  ;;  %18966 = vpow2.f32 %v10949_v22  ;;  %v11499_v6 = vmul.f32 %v18953_v19, %v25757_v51  ;;  %v11556_v59 = vpack.c.bf16 %v11492_v24, %v11492_v24  ;;  %18317 = vmatprep.mubr.msk.bf16.mxu0 %vm19202_vm1, %v25293_v31  ;;  %v25758_v29 = vld [vmem:[#allocation123_spill] sm:$0xff] }
 0x742   :  { %18327 = vmatprep.subr.bf16.mxu0 %v25293_v31  ;;  %v18957_v27 = vpop.eup %18956  ;;  %v13022_v15 = vsel %vm11594_vm3, %v7461_v50, 0  ;;  %v7482_v53 = vpack.i.b16 %v23661_v23, %v23667_v3  ;;  %v7466_v42 = vshrl.u32 %v23511_v37, 16  ;;  %v7107_v1 = vcombine.low %v7098_v48, %v7106_v46  ;;  %v23686_v50 = vpop.f32.mrb[136].mxu0 }
 0x743   :  { %v11182_v12 = vsub.f32 0.0, %v25756_v39  ;;  %18968 = vrcp.f32 %v11375_v62  ;;  %v11370_v22 = vadd.f32 %v18955_v55, %v11058_v25  ;;  %v7082_v24 = vcombine.low %v23641_v16, %v7081_v56  ;;  %v18127_v46 = vpop.f32.mrb[137].mxu0 }
 0x744   :  { %18276 = vmatmul.mubr.msk.bf16.vlgmr.msra.gmra.mrb[200].mxu1 %vm7558_vm2, %v11556_v59  ;;  %v11494_v36 = vmul.f32 %v18957_v27, %v25758_v29  ;;  %v23684_v59 = vpop.permute.xlu1 %5378  ;;  %v11563_v63 = vpack.c.bf16 %v11499_v6, %v11499_v6  ;;  %v7465_v37 = vshrl.u32 %v23518_v26, 16  ;;  %v6170_v55 = vcombine.high %v23169_v60, %v25551_v52  ;;  %v11819_v56 = vpop.f32.mrb[138].mxu0  ;;  %v25759_v27 = vld [vmem:[#allocation28_spill] sm:$0xff] }
 0x745   :  { %18286 = vmatpush3.bf16.msra.mxu1 %v13022_v15  ;;  %18287 = vmatprep.mubr.msk.bf16.mxu1 %vm19202_vm1, %v25293_v31  ;;  %v11285_v19 = vmul.f32 1.442695, %v11182_v12  ;;  %v13344_v16 = vsel %vm11594_vm3, %v7482_v53, 0  ;;  %v23697_v12 = vrot.slane %v7107_v1, %v25557_v8  ;;  %v6236_v51 = vcombine.high %v23303_v21, %v25551_v52  ;;  %v18128_v6 = vpop.f32.mrb[139].mxu0  ;;  %v25762_v56 = vld [vmem:[#allocation124_spill] sm:$0xff] }
 0x746   :  { %18297 = vmatprep.subr.bf16.mxu1 %v25293_v31  ;;  %v18959_v48 = vpop.eup %18958  ;;  %v7467_v39 = vpack.i.b16 %v7466_v42, %v7465_v37  ;;  %v6185_v26 = vcombine.high %v23327_v20, %v25551_v52  ;;  %18970 = vrcp.f32 %v11370_v22  ;;  %v23706_v60 = vrot.slane %v7082_v24, %v25557_v8  ;;  %v25761_v42 = vld [vmem:[#allocation30_spill] sm:$0xff] }
 0x747   :  { %v23690_v62 = vpop.eup %18960  ;;  %18972 = vpow2.f32 %v11285_v19  ;;  %v25760_v15 = vmax.f32 %v25759_v27, 0.0  ;;  %v11501_v1 = vmul.f32 %v18959_v48, %v25761_v42  ;;  %v11558_v29 = vpack.c.bf16 %v11494_v36, %v11494_v36  ;;  %v23729_v27 = vpop.f32.mrb[140].mxu0 }
 0x748   :  { %18318 = vmatmul.mubr.msk.bf16.vlgmr.msra.gmra.mrb[200].mxu0 %vm7558_vm2, %v11563_v63  ;;  %v18963_v25 = vpop.eup %18962  ;;  %v11064_v21 = vpop.xlane.xlu1 %11063  ;;  %v6251_v22 = vcombine.high %v23431_v41, %v25551_v52  ;;  %v11128_v63 = vsel %vm7558_vm2, %v23690_v62, 0.0  ;;  %v6184_v19 = vrot.slane %v6170_v55, %v25549_v11  ;;  %v13114_v37 = vsel %vm11594_vm3, %v7467_v39, 0 }
 0x749   :  { %18328 = vmatpush3.bf16.msra.mxu0 %v13344_v16  ;;  %18329 = vmatprep.mubr.msk.bf16.mxu0 %vm19202_vm1, %v25293_v31  ;;  %v11184_v53 = vsub.f32 0.0, %v25760_v15  ;;  %v7488_v36 = vpack.i.b16 %v23697_v12, %v23706_v60  ;;  %v7472_v48 = vshrl.u32 %v23551_v61, 16  ;;  %v6250_v46 = vrot.slane %v6236_v51, %v25549_v11  ;;  %v18139_v42 = vpop.f32.mrb[141].mxu0 }
 0x74a   :  { %18339 = vmatprep.subr.bf16.mxu0 %v25293_v31  ;;  %v18965_v20 = vpop.eup %18964  ;;  %11129 = vadd.xlane.f32.xlu1 %v11128_v63  ;;  %v6199_v41 = vrot.slane %v6185_v26, %v25549_v11  ;;  %v11372_v16 = vadd.f32 %v18963_v25, %v11064_v21  ;;  %v11565_v39 = vpack.c.bf16 %v11501_v1, %v11501_v1  ;;  %v7471_v15 = vshrl.u32 %v23541_v28, 16  ;;  %v25763_v21 = vld [vmem:[#allocation19_spill] sm:$0xff] }
 0x74b   :  { %v23716_v24 = vpop.eup %18966  ;;  %v11289_v55 = vmul.f32 1.442695, %v11184_v53  ;;  %v11496_v6 = vmul.f32 %v18965_v20, %v25762_v56  ;;  %v6265_v51 = vrot.slane %v6251_v22, %v25549_v11  ;;  %v13436_v28 = vsel %vm11594_vm3, %v7488_v36, 0  ;;  %v11911_v20 = vpop.f32.mrb[142].mxu0  ;;  %v25765_v36 = vld [vmem:[#allocation126_spill] sm:$0xff] }
 0x74c   :  { %18288 = vmatmul.mubr.msk.bf16.vlgmr.msra.gmra.mrb[204].mxu1 %vm7558_vm2, %v11558_v29  ;;  %v11140_v53 = vsel %vm7558_vm2, %v23716_v24, 0.0  ;;  %v25764_v29 = vmax.f32 %v25763_v21, 0.0  ;;  %v7473_v63 = vpack.i.b16 %v7472_v48, %v7471_v15  ;;  %v23746_v22 = vcombine.high %v23697_v12, %v25659_v43  ;;  %v18140_v42 = vpop.f32.mrb[143].mxu0 }
 0x74d   :  { %18298 = vmatpush3.bf16.msra.mxu1 %v13114_v37  ;;  %18299 = vmatprep.mubr.msk.bf16.mxu1 %vm19202_vm1, %v25293_v31  ;;  %v18969_v61 = vpop.eup %18968  ;;  %v6216_v37 = vcombine.low %v6184_v19, %v6199_v41  ;;  %v6217_v56 = vcombine.high %v6184_v19, %v6199_v41  ;;  %18974 = vrcp.f32 %v11372_v16  ;;  %v25766_v48 = vmax.f32 %v25765_v36, 0.0 }
 0x74e   :  { %18309 = vmatprep.subr.bf16.mxu1 %v25293_v31  ;;  %v11185_v1 = vsub.f32 0.0, %v25764_v29  ;;  %11141 = vadd.xlane.f32.xlu1 %v11140_v53  ;;  %18976 = vpow2.f32 %v11289_v55  ;;  %v25767_v53 = vld [vmem:[#allocation29_spill] sm:$0xff]  ;;  %v11070_v29 = vpop.xlane.xlu1 %11069  ;;  %v11560_v20 = vpack.c.bf16 %v11496_v6, %v11496_v6  ;;  %v6282_v41 = vcombine.low %v6250_v46, %v6265_v51 }
 0x74f   :  { %v11186_v15 = vsub.f32 0.0, %v25766_v48  ;;  %v11503_v21 = vmul.f32 %v18969_v61, %v25767_v53  ;;  %v6283_v16 = vcombine.high %v6250_v46, %v6265_v51  ;;  %v13206_v25 = vsel %vm11594_vm3, %v7473_v63, 0  ;;  %v25769_v51 = vld [vmem:[#allocation127_spill] sm:$0xff]  ;;  %v23770_v63 = vpop.f32.mrb[144].mxu0 }
 0x750   :  { %18330 = vmatmul.mubr.msk.bf16.vlgmr.msra.gmra.mrb[204].mxu0 %vm7558_vm2, %v11565_v39  ;;  %v23752_v39 = vcombine.high %v23706_v60, %v25659_v43  ;;  %v18971_v19 = vpop.eup %18970  ;;  %v11291_v42 = vmul.f32 1.442695, %v11185_v1  ;;  %v7478_v36 = vshrl.u32 %v23617_v4, 16  ;;  %v6224_v61 = vrot.slane %v6216_v37, %v25557_v8 }
 0x751   :  { %18340 = vmatpush3.bf16.msra.mxu0 %v13436_v28  ;;  %18341 = vmatprep.mubr.msk.bf16.mxu0 %vm19202_vm1, %v25293_v31  ;;  %v18973_v28 = vpop.eup %18972  ;;  %v6231_v6 = vrot.slane %v6217_v56, %v25557_v8  ;;  %v25768_v48 = vmax.f32 %v22368_v2, 0.0  ;;  %v11293_v46 = vmul.f32 1.442695, %v11186_v15  ;;  %v11498_v1 = vmul.f32 %v18971_v19, %v25769_v51  ;;  %v18151_v56 = vpop.f32.mrb[145].mxu0 }
 0x752   :  { %18351 = vmatprep.subr.bf16.mxu0 %v25293_v31  ;;  %v7494_v55 = vpack.i.b16 %v23746_v22, %v23752_v39  ;;  %v11374_v26 = vadd.f32 %v18973_v28, %v11070_v29  ;;  %v7477_v4 = vshrl.u32 %v23620_v38, 16  ;;  %v6290_v37 = vrot.slane %v6282_v41, %v25557_v8  ;;  %v12003_v15 = vpop.f32.mrb[146].mxu0  ;;  %v5331_v41 = vpop.permute.xlu0 %5330 }
 0x753   :  { %v11187_v53 = vsub.f32 0.0, %v25768_v48  ;;  %v6297_v2 = vrot.slane %v6283_v16, %v25557_v8  ;;  %18978 = vpow2.f32 %v11291_v42  ;;  %v7116_v38 = vcombine.low %v6224_v61, %v6231_v6  ;;  %v11076_v28 = vpop.xlane.xlu1 %11075 }
 0x754   :  { %18300 = vmatmul.mubr.msk.bf16.vlgmr.msra.gmra.mrb[208].mxu1 %vm7558_vm2, %v11560_v20  ;;  %v11567_v20 = vpack.c.bf16 %v11503_v21, %v11503_v21  ;;  %v7479_v29 = vpack.i.b16 %v7478_v36, %v7477_v4  ;;  %18980 = vrcp.f32 %v11374_v26  ;;  %v18152_v21 = vpop.f32.mrb[147].mxu0  ;;  %v11562_v48 = vpack.c.bf16 %v11498_v1, %v11498_v1 }
 0x755   :  { %18310 = vmatpush3.bf16.msra.mxu1 %v13206_v25  ;;  %18311 = vmatprep.mubr.msk.bf16.mxu1 %vm19202_vm1, %v25293_v31  ;;  %v13528_v25 = vsel %vm11594_vm3, %v7494_v55, 0  ;;  %v11295_v19 = vmul.f32 1.442695, %v11187_v53  ;;  %18982 = vpow2.f32 %v11293_v46  ;;  %v17238_v42 = vcombine.high %v6224_v61, %v6231_v6  ;;  %v25771_v61 = vld [vmem:[#allocation24_spill] sm:$0xff] }
 0x756   :  { %18321 = vmatprep.subr.bf16.mxu1 %v25293_v31  ;;  %v25770_v55 = vmax.f32 %v22402_v5, 0.0  ;;  %v7141_v53 = vcombine.low %v6290_v37, %v6297_v2  ;;  %v13298_v26 = vsel %vm11594_vm3, %v7479_v29, 0  ;;  %v17239_v4 = vcombine.high %v6290_v37, %v6297_v2 }
 0x757   :  { %v18975_v16 = vpop.eup %18974  ;;  %18984 = vpow2.f32 %v11295_v19  ;;  %v5482_v46 = vshrl.u32 %v5331_v41, 16  ;;  %v7483_v5 = vshrl.u32 %v23667_v3, 16  ;;  %v7490_v1 = vshrl.u32 %v23697_v12, 16 }
 0x758   :  { %18342 = vmatmul.mubr.msk.bf16.vlgmr.msra.gmra.mrb[208].mxu0 %vm7558_vm2, %v11567_v20  ;;  %v11189_v51 = vsub.f32 0.0, %v25770_v55  ;;  %v18977_v36 = vpop.eup %18976  ;;  %v7484_v20 = vshrl.u32 %v23661_v23, 16  ;;  %v11500_v6 = vmul.f32 %v18975_v16, %v25771_v61  ;;  %v5483_v23 = vshrl.u32 %v23625_v9, 16  ;;  %v11082_v55 = vpop.xlane.xlu1 %11081  ;;  %v25773_v61 = vld [vmem:[#allocation60_spill] sm:$0xff] }
 0x759   :  { %18352 = vmatpush3.bf16.msra.mxu0 %v13528_v25  ;;  %18353 = vmatprep.mubr.msk.bf16.mxu0 %vm19202_vm1, %v25293_v31  ;;  %v11376_v56 = vadd.f32 %v18977_v36, %v11076_v28  ;;  %v7123_v25 = vrot.slane %v7116_v38, %v25549_v11  ;;  %v5491_v37 = vshrl.u32 %v23684_v59, 16  ;;  %v7131_v2 = vrot.slane %v17238_v42, %v25549_v11 }
 0x75a   :  { %18363 = vmatprep.subr.bf16.mxu0 %v25293_v31  ;;  %v11299_v15 = vmul.f32 1.442695, %v11189_v51  ;;  %v25772_v29 = vmax.f32 %v22752_v35, 0.0  ;;  %v7485_v21 = vpack.i.b16 %v7484_v20, %v7483_v5  ;;  %v7489_v28 = vshrl.u32 %v23706_v60, 16 }
 0x75b   :  { %v5490_v3 = vshrl.u32 %v23655_v7, 16  ;;  %v23801_v12 = vpack.i.b16 %v5483_v23, %v5482_v46  ;;  %18986 = vrcp.f32 %v11376_v56  ;;  %v7148_v38 = vrot.slane %v7141_v53, %v25549_v11 }
 0x75c   :  { %18312 = vmatmul.mubr.msk.bf16.vlgmr.msra.gmra.mrb[212].mxu1 %vm7558_vm2, %v11562_v48  ;;  %v11191_v19 = vsub.f32 0.0, %v25772_v29  ;;  %v7495_v48 = vshrl.u32 %v23752_v39, 16  ;;  %v11564_v51 = vpack.c.bf16 %v11500_v6, %v11500_v6  ;;  %v7491_v36 = vpack.i.b16 %v7490_v1, %v7489_v28  ;;  %v25775_v1 = vld [vmem:[#allocation23_spill] sm:$0xff]  ;;  %v25776_v29 = vld [vmem:[#allocation46_spill] sm:$0xff] }
 0x75d   :  { %18322 = vmatpush3.bf16.msra.mxu1 %v13298_v26  ;;  %18323 = vmatprep.mubr.msk.bf16.mxu1 %vm19202_vm1, %v25293_v31  ;;  %v18979_v16 = vpop.eup %18978  ;;  %v7496_v42 = vshrl.u32 %v23746_v22, 16  ;;  %v7156_v35 = vrot.slane %v17239_v4, %v25549_v11  ;;  %18988 = vpow2.f32 %v11299_v15  ;;  %v23806_v60 = vpack.i.b16 %v5491_v37, %v5490_v3  ;;  %v11079_v20 = vpop.xlane.xlu0 %11078 }
 0x75e   :  { %18333 = vmatprep.subr.bf16.mxu1 %v25293_v31  ;;  %v18981_v26 = vpop.eup %18980  ;;  %v23809_v39 = vpack.i.b16 %v23625_v9, %v5331_v41  ;;  %v7132_v46 = vcombine.low %v7123_v25, %v7131_v2  ;;  %v25774_v53 = vmax.f32 %v25773_v61, 0.0  ;;  %v11303_v23 = vmul.f32 1.442695, %v11191_v19 }
 0x75f   :  { %v18983_v56 = vpop.eup %18982  ;;  %v13390_v22 = vsel %vm11594_vm3, %v7485_v21, 0  ;;  %v11377_v6 = vadd.f32 %v18979_v16, %v11079_v20  ;;  %v23817_v4 = vpack.i.b16 %v23684_v59, %v23655_v7  ;;  %v6375_v9 = vrot.slane %v23801_v12, %v25549_v11 }
 0x760   :  { %v11188_v5 = vsub.f32 0.0, %v25774_v53  ;;  %v11378_v41 = vadd.f32 %v18983_v56, %v11082_v55  ;;  %v11502_v25 = vmul.f32 %v18981_v26, %v25775_v1  ;;  %v7497_v15 = vpack.i.b16 %v7496_v42, %v7495_v48  ;;  %v25778_v55 = vld [vmem:[#allocation17_spill] sm:$0xff] }
 0x761   :  { %18990 = vrcp.f32 %v11377_v6  ;;  %v7157_v37 = vcombine.low %v7148_v38, %v7156_v35  ;;  %v18985_v2 = vpop.eup %18984  ;;  %v25777_v19 = vmax.f32 %v25776_v29, 0.0  ;;  %v6390_v59 = vrot.slane %v23806_v60, %v25549_v11  ;;  %v11085_v28 = vpop.xlane.xlu0 %11084 }
 0x762   :  { %v6309_v21 = vrot.slane %v23809_v39, %v25549_v11  ;;  %v23832_v3 = vrot.slane %v7132_v46, %v25557_v8  ;;  %v11297_v16 = vmul.f32 1.442695, %v11188_v5  ;;  %18992 = vpow2.f32 %v11303_v23  ;;  %v25780_v23 = vld [vmem:[#allocation76_spill] sm:$0xff] }
 0x763   :  { %v11190_v7 = vsub.f32 0.0, %v25777_v19  ;;  %v11379_v38 = vadd.f32 %v18985_v2, %v11085_v28  ;;  %v6324_v42 = vrot.slane %v23817_v4, %v25549_v11  ;;  %v6398_v35 = vcombine.low %v6375_v9, %v6390_v59 }
 0x764   :  { %18324 = vmatmul.mubr.msk.bf16.vlgmr.msra.gmra.mrb[216].mxu1 %vm7558_vm2, %v11564_v51  ;;  %v25779_v51 = vmax.f32 %v25778_v55, 0.0  ;;  %v6399_v26 = vcombine.high %v6375_v9, %v6390_v59  ;;  %18994 = vrcp.f32 %v11378_v41  ;;  %v11566_v20 = vpack.c.bf16 %v11502_v25, %v11502_v25 }
 0x765   :  { %18334 = vmatpush3.bf16.msra.mxu1 %v13390_v22  ;;  %18335 = vmatprep.mubr.msk.bf16.mxu1 %vm19202_vm1, %v25293_v31  ;;  %18996 = vrcp.f32 %v11379_v38  ;;  %v7164_v56 = vrot.slane %v7157_v37, %v25557_v8  ;;  %v18987_v61 = vpop.eup %18986  ;;  %v11301_v53 = vmul.f32 1.442695, %v11190_v7  ;;  %v6332_v46 = vcombine.low %v6309_v21, %v6324_v42  ;;  %v11091_v5 = vpop.xlane.xlu0 %11090  ;;  %v25782_v7 = vld [vmem:[#allocation87_spill] sm:$0xff] }
 0x766   :  { %18345 = vmatprep.subr.bf16.mxu1 %v25293_v31  ;;  %v11193_v48 = vsub.f32 0.0, %v25779_v51  ;;  %v6333_v22 = vcombine.high %v6309_v21, %v6324_v42  ;;  %v25781_v6 = vmax.f32 %v25780_v23, 0.0  ;;  %v13482_v2 = vsel %vm11594_vm3, %v7491_v36, 0 }
 0x767   :  { %v13574_v29 = vsel %vm11594_vm3, %v7497_v15, 0  ;;  %v7501_v9 = vshrl.u32 %v23832_v3, 16  ;;  %v18989_v41 = vpop.eup %18988  ;;  %18998 = vpow2.f32 %v11297_v16  ;;  %v6406_v37 = vrot.slane %v6398_v35, %v25557_v8 }
 0x768   :  { %v11192_v1 = vsub.f32 0.0, %v25781_v6  ;;  %v11307_v25 = vmul.f32 1.442695, %v11193_v48  ;;  %v6413_v19 = vrot.slane %v6399_v26, %v25557_v8  ;;  %v11504_v59 = vmul.f32 %v18987_v61, %v25782_v7  ;;  %v25783_v61 = vld [vmem:[#allocation27_spill] sm:$0xff]  ;;  %v25784_v6 = vld [vmem:[#allocation94_spill] sm:$0xff] }
 0x769   :  { %v11381_v21 = vadd.f32 %v18989_v41, %v11091_v5  ;;  %v7500_v36 = vpack.i.b16 %v7164_v56, %v23832_v3  ;;  %v23854_v15 = vcombine.high %v23832_v3, %v25659_v43  ;;  %19000 = vpow2.f32 %v11301_v53  ;;  %v11097_v55 = vpop.xlane.xlu0 %11096 }
 0x76a   :  { %v6340_v28 = vrot.slane %v6332_v46, %v25557_v8  ;;  %v6347_v16 = vrot.slane %v6333_v22, %v25557_v8  ;;  %v7502_v51 = vshrl.u32 %v7164_v56, 16  ;;  %v11305_v38 = vmul.f32 1.442695, %v11192_v1 }
 0x76b   :  { %v18991_v48 = vpop.eup %18990  ;;  %v6302_v42 = vcombine.high %v23809_v39, %v25551_v52  ;;  %v6368_v35 = vcombine.high %v23801_v12, %v25551_v52  ;;  %v23863_v26 = vcombine.high %v7164_v56, %v25659_v43  ;;  %19002 = vpow2.f32 %v11307_v25 }
 0x76c   :  { %18336 = vmatmul.mubr.msk.bf16.vlgmr.msra.gmra.mrb[220].mxu1 %vm7558_vm2, %v11566_v20  ;;  %v7191_v3 = vcombine.low %v6406_v37, %v6413_v19  ;;  %v17241_v20 = vcombine.high %v6406_v37, %v6413_v19  ;;  %v11505_v53 = vmul.f32 %v18991_v48, %v25783_v61  ;;  %v18993_v46 = vpop.eup %18992  ;;  %v6317_v22 = vcombine.high %v23817_v4, %v25551_v52 }
 0x76d   :  { %18346 = vmatpush3.bf16.msra.mxu1 %v13482_v2  ;;  %18347 = vmatprep.mubr.msk.bf16.mxu1 %vm19202_vm1, %v25293_v31  ;;  %v6383_v5 = vcombine.high %v23806_v60, %v25551_v52  ;;  %19004 = vrcp.f32 %v11381_v21  ;;  %v11568_v39 = vpack.c.bf16 %v11504_v59, %v11504_v59  ;;  %v25785_v12 = vmax.f32 %v25784_v6, 0.0  ;;  %v11103_v41 = vpop.xlane.xlu0 %11102  ;;  %v25786_v21 = vld [vmem:[#allocation71_spill] sm:$0xff] }
 0x76e   :  { %18357 = vmatprep.subr.bf16.mxu1 %v25293_v31  ;;  %v18995_v23 = vpop.eup %18994  ;;  %v7166_v56 = vcombine.low %v6340_v28, %v6347_v16  ;;  %v17240_v2 = vcombine.high %v6340_v28, %v6347_v16  ;;  %v11569_v25 = vpack.c.bf16 %v11505_v53, %v11505_v53  ;;  %v6316_v19 = vrot.slane %v6302_v42, %v25549_v11 }
 0x76f   :  { %v11195_v1 = vsub.f32 0.0, %v25785_v12  ;;  %v18997_v37 = vpop.eup %18996  ;;  %v6382_v7 = vrot.slane %v6368_v35, %v25549_v11  ;;  %v13620_v4 = vsel %vm11594_vm3, %v7500_v36, 0  ;;  %v7503_v60 = vpack.i.b16 %v7502_v51, %v7501_v9  ;;  %v25788_v35 = vld [vmem:[#allocation67_spill] sm:$0xff] }
 0x770   :  { %v25787_v59 = vmax.f32 %v25786_v21, 0.0  ;;  %v7198_v61 = vrot.slane %v7191_v3, %v25549_v11  ;;  %v7206_v6 = vrot.slane %v17241_v20, %v25549_v11  ;;  %v11383_v28 = vadd.f32 %v18993_v46, %v11097_v55  ;;  %18354 = vmatmul.mubr.msk.bf16.vlgmr.msra.gmra.mrb[212].mxu0 %vm7558_vm2, %v11569_v25  ;;  %v25789_v3 = vld [vmem:[#allocation62_spill] sm:$0xff] }
 0x771   :  { %19006 = vpow2.f32 %v11305_v38  ;;  %v6331_v16 = vrot.slane %v6317_v22, %v25549_v11  ;;  %v6397_v42 = vrot.slane %v6383_v5, %v25549_v11  ;;  %v11506_v53 = vmul.f32 %v18995_v23, %v25788_v35  ;;  %18364 = vmatpush3.bf16.msra.mxu0 %v13620_v4  ;;  %v18999_v9 = vpop.eup %18998  ;;  %v11088_v38 = vpop.xlane.xlu0 %11087  ;;  %18365 = vmatprep.mubr.msk.bf16.mxu0 %vm19202_vm1, %v25293_v31  ;;  %v25790_v21 = vld [vmem:[#allocation38_spill] sm:$0xff] }
 0x772   :  { %v11194_v48 = vsub.f32 0.0, %v25787_v59  ;;  %v11311_v36 = vmul.f32 1.442695, %v11195_v1  ;;  %v7173_v51 = vrot.slane %v7166_v56, %v25549_v11  ;;  %v7181_v55 = vrot.slane %v17240_v2, %v25549_v11  ;;  %18375 = vmatprep.subr.bf16.mxu0 %v25293_v31 }
 0x773   :  { %v11507_v20 = vmul.f32 %v18997_v37, %v25789_v3  ;;  %v6414_v46 = vcombine.low %v6382_v7, %v6397_v42  ;;  %v6415_v22 = vcombine.high %v6382_v7, %v6397_v42  ;;  %v11380_v5 = vadd.f32 %v18999_v9, %v11088_v38  ;;  %v19001_v23 = vpop.eup %19000  ;;  %v25792_v3 = vld [vmem:[#allocation68_spill] sm:$0xff] }
 0x774   :  { %18348 = vmatmul.mubr.msk.bf16.vlgmr.msra.gmra.mrb[224].mxu1 %vm7558_vm2, %v11568_v39  ;;  %v7506_v39 = vpack.i.b16 %v23863_v26, %v23854_v15  ;;  %v11309_v12 = vmul.f32 1.442695, %v11194_v48  ;;  %v6348_v1 = vcombine.low %v6316_v19, %v6331_v16  ;;  %19008 = vrcp.f32 %v11383_v28 }
 0x775   :  { %18358 = vmatpush3.bf16.msra.mxu1 %v13574_v29  ;;  %18359 = vmatprep.mubr.msk.bf16.mxu1 %vm19202_vm1, %v25293_v31  ;;  %v11094_v29 = vpop.xlane.xlu1 %11093  ;;  %v7207_v56 = vcombine.low %v7198_v61, %v7206_v6  ;;  %v6349_v2 = vcombine.high %v6316_v19, %v6331_v16  ;;  %19010 = vrcp.f32 %v11380_v5  ;;  %v11570_v37 = vpack.c.bf16 %v11506_v53, %v11506_v53  ;;  %v19003_v4 = vpop.eup %19002 }
 0x776   :  { %18369 = vmatprep.subr.bf16.mxu1 %v25293_v31  ;;  %v11382_v25 = vadd.f32 %v19001_v23, %v11094_v29  ;;  %19012 = vpow2.f32 %v11311_v36  ;;  %v25791_v59 = vmax.f32 %v25790_v21, 0.0  ;;  %v11571_v42 = vpack.c.bf16 %v11507_v20, %v11507_v20  ;;  %v11109_v61 = vpop.xlane.xlu0 %11108  ;;  %v25794_v29 = vld [vmem:[#allocation101_spill] sm:$0xff] }
 0x777   :  { %v7182_v35 = vcombine.low %v7173_v51, %v7181_v55  ;;  %v19005_v9 = vpop.eup %19004  ;;  %v25793_v38 = vmax.f32 %v25792_v3, 0.0  ;;  %v6422_v48 = vrot.slane %v6414_v46, %v25557_v8  ;;  %v6429_v28 = vrot.slane %v6415_v22, %v25557_v8 }
 0x778   :  { %v11197_v7 = vsub.f32 0.0, %v25791_v59  ;;  %v13666_v19 = vsel %vm11594_vm3, %v7503_v60, 0  ;;  %18366 = vmatmul.mubr.msk.bf16.vlgmr.msra.gmra.mrb[216].mxu0 %vm7558_vm2, %v11571_v42  ;;  %v13712_v6 = vsel %vm11594_vm3, %v7506_v39, 0  ;;  %v23906_v16 = vrot.slane %v7207_v56, %v25557_v8  ;;  %v25795_v42 = vld [vmem:[#allocation113_spill] sm:$0xff] }
 0x779   :  { %v11196_v34 = vsub.f32 0.0, %v25793_v38  ;;  %v6356_v53 = vrot.slane %v6348_v1, %v25557_v8  ;;  %v6363_v36 = vrot.slane %v6349_v2, %v25557_v8  ;;  %19014 = vrcp.f32 %v11382_v25  ;;  %18376 = vmatpush3.bf16.msra.mxu0 %v13712_v6  ;;  %18377 = vmatprep.mubr.msk.bf16.mxu0 %vm19202_vm1, %v25293_v31  ;;  %v11100_v55 = vpop.xlane.xlu1 %11099  ;;  %v25796_v6 = vld [vmem:[#allocation70_spill] sm:$0xff] }
 0x77a   :  { %v11385_v51 = vadd.f32 %v19003_v4, %v11103_v41  ;;  %19016 = vpow2.f32 %v11309_v12  ;;  %v11315_v60 = vmul.f32 1.442695, %v11197_v7  ;;  %v11509_v20 = vmul.f32 %v19005_v9, %v25794_v29  ;;  %18387 = vmatprep.subr.bf16.mxu0 %v25293_v31  ;;  %v11115_v4 = vpop.xlane.xlu0 %11114 }
 0x77b   :  { %v23915_v46 = vrot.slane %v7182_v35, %v25557_v8  ;;  %v19007_v22 = vpop.eup %19006  ;;  %v11313_v5 = vmul.f32 1.442695, %v11196_v34  ;;  %v7241_v41 = vcombine.low %v6422_v48, %v6429_v28  ;;  %v7508_v39 = vshrl.u32 %v23863_v26, 16 }
 0x77c   :  { %18360 = vmatmul.mubr.msk.bf16.vlgmr.msra.gmra.mrb[228].mxu1 %vm7558_vm2, %v11570_v37  ;;  %v17243_v23 = vcombine.high %v6422_v48, %v6429_v28  ;;  %v7216_v1 = vcombine.low %v6356_v53, %v6363_v36  ;;  %v11384_v56 = vadd.f32 %v19007_v22, %v11100_v55  ;;  %19018 = vrcp.f32 %v11385_v51 }
 0x77d   :  { %18370 = vmatpush3.bf16.msra.mxu1 %v13666_v19  ;;  %18371 = vmatprep.mubr.msk.bf16.mxu1 %vm19202_vm1, %v25293_v31  ;;  %v7512_v12 = vpack.i.b16 %v23906_v16, %v23915_v46  ;;  %v7507_v2 = vshrl.u32 %v23854_v15, 16  ;;  %19020 = vpow2.f32 %v11315_v60  ;;  %v17242_v37 = vcombine.high %v6356_v53, %v6363_v36  ;;  %v11106_v19 = vpop.xlane.xlu1 %11105 }
 0x77e   :  { %18381 = vmatprep.subr.bf16.mxu1 %v25293_v31  ;;  %v19009_v25 = vpop.eup %19008  ;;  %v11573_v21 = vpack.c.bf16 %v11509_v20, %v11509_v20  ;;  %19022 = vpow2.f32 %v11313_v5  ;;  %v7248_v7 = vrot.slane %v7241_v41, %v25549_v11  ;;  %v23930_v15 = vcombine.high %v23906_v16, %v25659_v43  ;;  %v23944_v5 = vpop.xlane.xlu0 %11120 }
 0x77f   :  { %v19011_v34 = vpop.eup %19010  ;;  %v7509_v59 = vpack.i.b16 %v7508_v39, %v7507_v2  ;;  %v13804_v9 = vsel %vm11594_vm3, %v7512_v12, 0  ;;  %v7256_v3 = vrot.slane %v17243_v23, %v25549_v11  ;;  %v7223_v38 = vrot.slane %v7216_v1, %v25549_v11  ;;  %v25799_v1 = vld [vmem:[#allocation61_spill] sm:$0xff] }
 0x780   :  { %v19013_v26 = vpop.eup %19012  ;;  %v11508_v35 = vmul.f32 %v19011_v34, %v25795_v42  ;;  %18378 = vmatmul.mubr.msk.bf16.vlgmr.msra.gmra.mrb[220].mxu0 %vm7558_vm2, %v11573_v21  ;;  %19024 = vrcp.f32 %v11384_v56  ;;  %v7231_v28 = vrot.slane %v17242_v37, %v25549_v11  ;;  %v11511_v53 = vmul.f32 %v19009_v25, %v25796_v6  ;;  %v25800_v34 = vld [vmem:[#allocation93_spill] sm:$0xff] }
 0x781   :  { %v11387_v48 = vadd.f32 %v19013_v26, %v11109_v61  ;;  %18388 = vmatpush3.bf16.msra.mxu0 %v13804_v9  ;;  %18389 = vmatprep.mubr.msk.bf16.mxu0 %vm19202_vm1, %v25293_v31  ;;  %v7190_v51 = vcombine.high %v23915_v46, %v25659_v43  ;;  %v13758_v55 = vsel %vm11594_vm3, %v7509_v59, 0  ;;  %v25797_v61 = vld [vmem:[#allocation15_spill] sm:$0xff]  ;;  %v7514_v39 = vshrl.u32 %v23906_v16, 16 }
 0x782   :  { %v11572_v36 = vpack.c.bf16 %v11508_v35, %v11508_v35  ;;  %18399 = vmatprep.subr.bf16.mxu0 %v25293_v31  ;;  %v25798_v20 = vmax.f32 %v25797_v61, 0.0  ;;  %v7257_v23 = vcombine.low %v7248_v7, %v7256_v3  ;;  %v11575_v2 = vpack.c.bf16 %v11511_v53, %v11511_v53 }
 0x783   :  { %v19015_v60 = vpop.eup %19014  ;;  %v7518_v41 = vpack.i.b16 %v23930_v15, %v7190_v51  ;;  %19026 = vrcp.f32 %v11387_v48  ;;  %v7513_v25 = vshrl.u32 %v23915_v46, 16  ;;  %v7232_v37 = vcombine.low %v7223_v38, %v7231_v28  ;;  %v25802_v46 = vld [vmem:[#allocation72_spill] sm:$0xff]  ;;  %v11112_v28 = vpop.xlane.xlu0 %11111 }
 0x784   :  { %v19017_v29 = vpop.eup %19016  ;;  %v11199_v22 = vsub.f32 0.0, %v25798_v20  ;;  %18372 = vmatmul.mubr.msk.bf16.vlgmr.msra.gmra.mrb[232].mxu1 %vm7558_vm2, %v11572_v36  ;;  %v11510_v56 = vmul.f32 %v19015_v60, %v25799_v1  ;;  %v25801_v59 = vmax.f32 %v25800_v34, 0.0  ;;  %v23959_v9 = vrot.slane %v7257_v23, %v25557_v8 }
 0x785   :  { %v11386_v12 = vadd.f32 %v19017_v29, %v11106_v19  ;;  %18382 = vmatpush3.bf16.msra.mxu1 %v13758_v55  ;;  %18383 = vmatprep.mubr.msk.bf16.mxu1 %vm19202_vm1, %v25293_v31  ;;  %v13896_v42 = vsel %vm11594_vm3, %v7518_v41, 0  ;;  %v7515_v35 = vpack.i.b16 %v7514_v39, %v7513_v25  ;;  %v7239_v6 = vrot.slane %v7232_v37, %v25557_v8  ;;  %v25803_v29 = vld [vmem:[#allocation112_spill] sm:$0xff]  ;;  %v25805_v41 = vld [vmem:[#allocation81_spill] sm:$0xff]  ;;  %v23980_v37 = vpop.permute.xlu1 %5348 }
 0x786   :  { %18393 = vmatprep.subr.bf16.mxu1 %v25293_v31  ;;  %v19019_v21 = vpop.eup %19018  ;;  %v11198_v26 = vsub.f32 0.0, %v25801_v59  ;;  %v11319_v7 = vmul.f32 1.442695, %v11199_v22  ;;  %v11574_v19 = vpack.c.bf16 %v11510_v56, %v11510_v56  ;;  %v7520_v55 = vshrl.u32 %v23930_v15, 16 }
 0x787   :  { %v19021_v16 = vpop.eup %19020  ;;  %19028 = vrcp.f32 %v11386_v12  ;;  %v11513_v38 = vmul.f32 %v19019_v21, %v25802_v46  ;;  %v13850_v60 = vsel %vm11594_vm3, %v7515_v35, 0  ;;  %v25804_v61 = vmax.f32 %v25803_v29, 0.0  ;;  %v25806_v21 = vld [vmem:[#allocation16_spill] sm:$0xff] }
 0x788   :  { %18390 = vmatmul.mubr.msk.bf16.vlgmr.msra.gmra.mrb[224].mxu0 %vm7558_vm2, %v11575_v2  ;;  %v19023_v3 = vpop.eup %19022  ;;  %v11389_v48 = vadd.f32 %v19021_v16, %v11115_v4  ;;  %v11317_v36 = vmul.f32 1.442695, %v11198_v26  ;;  %19030 = vpow2.f32 %v11319_v7  ;;  %v7524_v4 = vpack.i.b16 %v23959_v9, %v7239_v6 }
 0x789   :  { %18400 = vmatpush3.bf16.msra.mxu0 %v13896_v42  ;;  %18401 = vmatprep.mubr.msk.bf16.mxu0 %vm19202_vm1, %v25293_v31  ;;  %v11200_v20 = vsub.f32 0.0, %v25804_v61  ;;  %v11388_v22 = vadd.f32 %v19023_v3, %v11112_v28  ;;  %v11577_v23 = vpack.c.bf16 %v11513_v38, %v11513_v38  ;;  %v7519_v12 = vshrl.u32 %v7190_v51, 16  ;;  %v25809_v28 = vld [vmem:[#allocation63_spill] sm:$0xff] }
 0x78a   :  { %18411 = vmatprep.subr.bf16.mxu0 %v25293_v31  ;;  %v19025_v53 = vpop.eup %19024  ;;  %19032 = vrcp.f32 %v11389_v48  ;;  %v13988_v15 = vsel %vm11594_vm3, %v7524_v4, 0  ;;  %v7265_v2 = vcombine.high %v23959_v9, %v25659_v43  ;;  %v7240_v59 = vcombine.high %v7239_v6, %v25659_v43  ;;  %v23998_v4 = vpop.permute.xlu1 %5364 }
 0x78b   :  { %v11512_v39 = vmul.f32 %v19025_v53, %v25805_v41  ;;  %19034 = vpow2.f32 %v11317_v36  ;;  %v7521_v56 = vpack.i.b16 %v7520_v55, %v7519_v12  ;;  %v11321_v25 = vmul.f32 1.442695, %v11200_v20 }
 0x78c   :  { %18384 = vmatmul.mubr.msk.bf16.vlgmr.msra.gmra.mrb[236].mxu1 %vm7558_vm2, %v11574_v19  ;;  %19036 = vrcp.f32 %v11388_v22  ;;  %v25807_v16 = vmax.f32 %v23113_v49, 0.0  ;;  %v7530_v35 = vpack.i.b16 %v7265_v2, %v7240_v59  ;;  %v7526_v3 = vshrl.u32 %v23959_v9, 16  ;;  %v5333_v9 = vpop.permute.xlu0 %5332 }
 0x78d   :  { %18394 = vmatpush3.bf16.msra.mxu1 %v13850_v60  ;;  %18395 = vmatprep.mubr.msk.bf16.mxu1 %vm19202_vm1, %v25293_v31  ;;  %v19027_v1 = vpop.eup %19026  ;;  %v11576_v34 = vpack.c.bf16 %v11512_v39, %v11512_v39  ;;  %v13942_v42 = vsel %vm11594_vm3, %v7521_v56, 0  ;;  %19038 = vpow2.f32 %v11321_v25  ;;  %v25808_v48 = vmax.f32 %v23180_v10, 0.0  ;;  %v25810_v39 = vld [vmem:[#allocation108_spill] sm:$0xff] }
 0x78e   :  { %18405 = vmatprep.subr.bf16.mxu1 %v25293_v31  ;;  %v11515_v51 = vmul.f32 %v19027_v1, %v25806_v21  ;;  %v11201_v7 = vsub.f32 0.0, %v25807_v16  ;;  %v7525_v53 = vshrl.u32 %v7239_v6, 16  ;;  %v7532_v55 = vshrl.u32 %v7265_v2, 16 }
 0x78f   :  { %v11203_v46 = vsub.f32 0.0, %v25808_v48  ;;  %v14080_v29 = vsel %vm11594_vm3, %v7530_v35, 0  ;;  %v11205_v22 = vsub.f32 0.0, %v10757_v40  ;;  %v7531_v6 = vshrl.u32 %v7240_v59, 16 }
 0x790   :  { %18402 = vmatmul.mubr.msk.bf16.vlgmr.msra.gmra.mrb[228].mxu0 %vm7558_vm2, %v11577_v23  ;;  %v11579_v49 = vpack.c.bf16 %v11515_v51, %v11515_v51  ;;  %v11323_v60 = vmul.f32 1.442695, %v11201_v7  ;;  %v7527_v61 = vpack.i.b16 %v7526_v3, %v7525_v53  ;;  %v5496_v12 = vpack.i.b16 %v23980_v37, %v5333_v9 }
 0x791   :  { %18412 = vmatpush3.bf16.msra.mxu0 %v13988_v15  ;;  %18413 = vmatprep.mubr.msk.bf16.mxu0 %vm19202_vm1, %v25293_v31  ;;  %v19029_v26 = vpop.eup %19028  ;;  %v11327_v20 = vmul.f32 1.442695, %v11203_v46  ;;  %v24012_v15 = vsub.f32 0.0, %v10754_v45  ;;  %v25811_v0 = vmax.f32 %v23292_v57, 0.0  ;;  %v7533_v2 = vpack.i.b16 %v7532_v55, %v7531_v6  ;;  %v25812_v45 = vld [vmem:[#allocation77_spill] sm:$0xff] }
 0x792   :  { %18423 = vmatprep.subr.bf16.mxu0 %v25293_v31  ;;  %v19031_v38 = vpop.eup %19030  ;;  %v11514_v19 = vmul.f32 %v19029_v26, %v25809_v28  ;;  %19040 = vpow2.f32 %v11323_v60  ;;  %v5498_v25 = vshrl.u32 %v5333_v9, 16  ;;  %v14034_v51 = vsel %vm11594_vm3, %v7527_v61, 0 }
 0x793   :  { %v11391_v10 = vadd.f32 %v19031_v38, %v23944_v5  ;;  %v24016_v40 = vsub.f32 0.0, %v25811_v0  ;;  %v14544_v54 = vrot.slane %v14536_v32, %v25549_v11  ;;  %v5499_v57 = vshrl.u32 %v23980_v37, 16 }
 0x794   :  { %18396 = vmatmul.mubr.msk.bf16.vlgmr.msra.gmra.mrb[240].mxu1 %vm7558_vm2, %v11576_v34  ;;  %v19033_v36 = vpop.eup %19032  ;;  %v11578_v5 = vpack.c.bf16 %v11514_v19, %v11514_v19  ;;  %v11331_v34 = vmul.f32 1.442695, %v11205_v22  ;;  %v6434_v26 = vcombine.high %v5496_v12, %v25551_v52  ;;  %v25813_v32 = vcombine.high %v23506_v30, %v23645_v33 }
 0x795   :  { %18406 = vmatpush3.bf16.msra.mxu1 %v13942_v42  ;;  %18407 = vmatprep.mubr.msk.bf16.mxu1 %vm19202_vm1, %v25293_v31  ;;  %v19035_v41 = vpop.eup %19034  ;;  %v11517_v23 = vmul.f32 %v19033_v36, %v25810_v39  ;;  %19042 = vrcp.f32 %v11391_v10  ;;  %v14126_v38 = vsel %vm11594_vm3, %v7533_v2, 0  ;;  %v25814_v28 = vcombine.low %v23686_v50, %v23729_v27 }
 0x796   :  { %18417 = vmatprep.subr.bf16.mxu1 %v25293_v31  ;;  %v19037_v1 = vpop.eup %19036  ;;  %19044 = vpow2.f32 %v11327_v20  ;;  %v14551_v35 = vrot.slane %v25813_v32, %v25549_v11  ;;  %v5500_v53 = vpack.i.b16 %v5499_v57, %v5498_v25  ;;  %v6441_v61 = vrot.slane %v5496_v12, %v25549_v11 }
 0x797   :  { %v11516_v59 = vmul.f32 %v19037_v1, %v25812_v45  ;;  %v11581_v16 = vpack.c.bf16 %v11517_v23, %v11517_v23  ;;  %v11770_v7 = vpop.f32.mrb[148].mxu1  ;;  %v19039_v42 = vpop.eup %19038  ;;  %v24041_v19 = vrot.slane %v25814_v28, %v25549_v11  ;;  %v6448_v20 = vrot.slane %v6434_v26, %v25549_v11 }
 0x798   :  { %18414 = vmatmul.mubr.msk.bf16.vlgmr.msra.gmra.mrb[232].mxu0 %vm7558_vm2, %v11579_v49  ;;  %v14552_v3 = vcombine.low %v23390_v47, %v11770_v7  ;;  %v14553_v48 = vcombine.high %v23390_v47, %v11770_v7  ;;  %v18121_v46 = vpop.f32.mrb[149].mxu1  ;;  %v5506_v49 = vshrl.u32 %v23998_v4, 16  ;;  %v6507_v2 = vrot.slane %v5500_v53, %v25549_v11 }
 0x799   :  { %18424 = vmatpush3.bf16.msra.mxu0 %v14080_v29  ;;  %18425 = vmatprep.mubr.msk.bf16.mxu0 %vm19202_vm1, %v25293_v31  ;;  %v11773_v30 = vpop.f32.mrb[150].mxu1  ;;  %v11580_v22 = vpack.c.bf16 %v11516_v59, %v11516_v59 }
 0x79a   :  { %18435 = vmatprep.subr.bf16.mxu0 %v25293_v31  ;;  %v14560_v47 = vrot.slane %v14552_v3, %v25549_v11  ;;  %v14567_v60 = vrot.slane %v14553_v48, %v25549_v11  ;;  %v18122_v9 = vpop.f32.mrb[151].mxu1 }
 0x79b   :  { %v11118_v56 = vpop.xlane.xlu1 %11117 }
 0x79c   :  { %v11390_v21 = vadd.f32 %v19035_v41, %v11118_v56  ;;  %18408 = vmatmul.mubr.msk.bf16.vlgmr.msra.gmra.mrb[244].mxu1 %vm7558_vm2, %v11578_v5  ;;  %v24045_v33 = vpop.f32.mrb[148].mxu0  ;;  %v14568_v41 = vcombine.low %v14544_v54, %v14560_v47  ;;  %v14569_v39 = vcombine.high %v14544_v54, %v14560_v47  ;;  %v14584_v23 = vcombine.low %v14551_v35, %v14567_v60  ;;  %v24061_v12 = vpop.eup %19040  ;;  %v25816_v47 = vld [vmem:[#allocation103_spill] sm:$0xff] }
 0x79d   :  { %18418 = vmatpush3.bf16.msra.mxu1 %v14034_v51  ;;  %18419 = vmatprep.mubr.msk.bf16.mxu1 %vm19202_vm1, %v25293_v31  ;;  %v14672_v55 = vcombine.low %v23770_v63, %v24045_v33  ;;  %v14673_v10 = vcombine.high %v23770_v63, %v24045_v33  ;;  %v18163_v29 = vpop.f32.mrb[149].mxu0  ;;  %v14585_v5 = vcombine.high %v14551_v35, %v14567_v60 }
 0x79e   :  { %19046 = vrcp.f32 %v11390_v21  ;;  %18429 = vmatprep.subr.bf16.mxu1 %v25293_v31  ;;  %v12095_v6 = vpop.f32.mrb[150].mxu0  ;;  %v6500_v56 = vcombine.high %v5500_v53, %v25551_v52  ;;  %v14576_v51 = vrot.slane %v14568_v41, %v25557_v8  ;;  %v14583_v57 = vrot.slane %v14569_v39, %v25557_v8 }
 0x79f   :  { %v18164_v0 = vpop.f32.mrb[151].mxu0  ;;  %v24066_v54 = vrot.slane %v14584_v23, %v25557_v8  ;;  %v14599_v45 = vrot.slane %v14585_v5, %v25557_v8  ;;  %v19043_v59 = vpop.eup %19042 }
 0x7a0   :  { %v11124_v37 = vpop.xlane.xlu1 %11123  ;;  %18426 = vmatmul.mubr.msk.bf16.vlgmr.msra.gmra.mrb[236].mxu0 %vm7558_vm2, %v11581_v16  ;;  %v24071_v7 = vpop.f32.mrb[152].mxu1  ;;  %v15624_v32 = vcombine.low %v14576_v51, %v14583_v57  ;;  %v17376_v35 = vcombine.high %v14576_v51, %v14583_v57  ;;  %v6514_v6 = vrot.slane %v6500_v56, %v25549_v11 }
 0x7a1   :  { %v11392_v36 = vadd.f32 %v19039_v42, %v11124_v37  ;;  %18437 = vmatprep.mubr.msk.bf16.mxu0 %vm19202_vm1, %v25293_v31  ;;  %v24076_v42 = vpop.eup %19044  ;;  %v15640_v37 = vcombine.low %v24066_v54, %v14599_v45  ;;  %v18133_v3 = vpop.f32.mrb[153].mxu1 }
 0x7a2   :  { %v11865_v53 = vpop.f32.mrb[154].mxu1  ;;  %v24087_v9 = vrot.slane %v15624_v32, %v25549_v11  ;;  %v24090_v29 = vrot.slane %v17376_v35, %v25549_v11 }
 0x7a3   :  { %19048 = vrcp.f32 %v11392_v36  ;;  %v25815_v36 = vld [vmem:[#allocation109_spill] sm:$0xff] }
 0x7a4   :  { %v5381_v1 = vpop.permute.xlu1 %5380  ;;  %18420 = vmatmul.mubr.msk.bf16.vlgmr.msra.gmra.mrb[248].mxu1 %vm7558_vm2, %v11580_v22  ;;  %19050 = vpow2.f32 %v11331_v34  ;;  %v17377_v34 = vcombine.high %v24066_v54, %v14599_v45  ;;  %v24083_v30 = vmul.f32 %v19043_v59, %v25815_v36  ;;  %v18134_v22 = vpop.f32.mrb[155].mxu1  ;;  %v15657_v56 = vcombine.high %v24087_v9, %v24090_v29 }
 0x7a5   :  { %v5504_v25 = vpack.i.b16 %v5381_v1, %v23998_v4  ;;  %v5507_v21 = vshrl.u32 %v5381_v1, 16  ;;  %18430 = vmatpush3.bf16.msra.mxu1 %v14126_v38  ;;  %18431 = vmatprep.mubr.msk.bf16.mxu1 %vm19202_vm1, %v25293_v31  ;;  %v25817_v59 = vcombine.high %v23686_v50, %v23729_v27 }
 0x7a6   :  { %18441 = vmatprep.subr.bf16.mxu1 %v25293_v31  ;;  %v24131_v53 = vrot.slane %v17377_v34, %v25549_v11 }
 0x7a7   :  { %v5508_v26 = vpack.i.b16 %v5507_v21, %v5506_v49  ;;  %v6449_v4 = vcombine.high %v5504_v25, %v25551_v52  ;;  %v6456_v16 = vrot.slane %v5504_v25, %v25549_v11 }
 0x7a8   :  { %v19047_v48 = vpop.eup %19046 }
 0x7a9   :  { %v6463_v46 = vrot.slane %v6449_v4, %v25549_v11  ;;  %v6464_v38 = vcombine.low %v6441_v61, %v6456_v16  ;;  %v6465_v28 = vcombine.high %v6441_v61, %v6456_v16  ;;  %v6515_v49 = vcombine.high %v5508_v26, %v25551_v52  ;;  %v24113_v32 = vpop.f32.mrb[152].mxu0 }
 0x7aa   :  { %v11518_v60 = vmul.f32 %v19047_v48, %v25816_v47  ;;  %v6522_v23 = vrot.slane %v5508_v26, %v25549_v11  ;;  %v14619_v26 = vrot.slane %v25817_v59, %v25549_v11  ;;  %v11954_v35 = vpop.f32.mrb[156].mxu1  ;;  %v18175_v27 = vpop.f32.mrb[153].mxu0 }
 0x7ab   :  { %v6472_v41 = vrot.slane %v6464_v38, %v25557_v8  ;;  %v6479_v61 = vrot.slane %v6465_v28, %v25557_v8  ;;  %v6480_v52 = vcombine.low %v6448_v20, %v6463_v46  ;;  %v6481_v39 = vcombine.high %v6448_v20, %v6463_v46  ;;  %v18145_v46 = vpop.f32.mrb[157].mxu1  ;;  %v12187_v36 = vpop.f32.mrb[154].mxu0 }
 0x7ac   :  { %v6529_v5 = vrot.slane %v6515_v49, %v25549_v11  ;;  %v11582_v1 = vpack.c.bf16 %v11518_v60, %v11518_v60  ;;  %v6530_v20 = vcombine.low %v6507_v2, %v6522_v23  ;;  %v6531_v45 = vcombine.high %v6507_v2, %v6522_v23  ;;  %v11957_v60 = vpop.f32.mrb[158].mxu1 }
 0x7ad   :  { %v19049_v0 = vpop.eup %19048  ;;  %v24098_v25 = vrot.slane %v6480_v52, %v25557_v8  ;;  %v7266_v21 = vcombine.low %v6472_v41, %v6479_v61  ;;  %v17244_v51 = vcombine.high %v6472_v41, %v6479_v61  ;;  %v24106_v54 = vrot.slane %v6481_v39, %v25557_v8  ;;  %v18176_v61 = vpop.f32.mrb[155].mxu0 }
 0x7ae   :  { %v24103_v57 = vmul.f32 %v19049_v0, %v23376_v13  ;;  %18432 = vmatmul.mubr.msk.bf16.vlgmr.msra.gmra.mrb[252].mxu1 %vm7558_vm2, %v11582_v1  ;;  %v6546_v4 = vcombine.low %v6514_v6, %v6529_v5  ;;  %v6547_v16 = vcombine.high %v6514_v6, %v6529_v5  ;;  %v11583_v13 = vpack.c.bf16 %v24083_v30, %v24083_v30  ;;  %v24123_v38 = vpop.eup %19050  ;;  %v18146_v39 = vpop.f32.mrb[159].mxu1 }
 0x7af   :  { %18443 = vmatprep.mubr.msk.bf16.mxu1 %vm19202_vm1, %v25293_v31  ;;  %v6538_v2 = vrot.slane %v6530_v20, %v25557_v8  ;;  %v6545_v3 = vrot.slane %v6531_v45, %v25557_v8  ;;  %v7273_v48 = vrot.slane %v7266_v21, %v25549_v11  ;;  %v7281_v50 = vrot.slane %v17244_v51, %v25549_v11 }
 0x7b0   :  { %v11584_v28 = vpack.c.bf16 %v24103_v57, %v24103_v57  ;;  %v24128_v49 = vrot.slane %v15640_v37, %v25549_v11  ;;  %v14620_v47 = vcombine.low %v24071_v7, %v11954_v35  ;;  %v7316_v41 = vcombine.low %v24098_v25, %v24106_v54 }
 0x7b1   :  { %v7291_v22 = vcombine.low %v6538_v2, %v6545_v3  ;;  %v17245_v6 = vcombine.high %v6538_v2, %v6545_v3  ;;  %v14621_v52 = vcombine.high %v24071_v7, %v11954_v35  ;;  %v24138_v23 = vrot.slane %v6546_v4, %v25557_v8 }
 0x7b2   :  { %v24141_v37 = vrot.slane %v6547_v16, %v25557_v8  ;;  %v17246_v34 = vcombine.high %v24098_v25, %v24106_v54  ;;  %v14628_v5 = vrot.slane %v14620_v47, %v25549_v11  ;;  %v7282_v51 = vcombine.low %v7273_v48, %v7281_v50  ;;  %v24159_v3 = vpop.f32.mrb[160].mxu1 }
 0x7b3   :  { %v7298_v1 = vrot.slane %v7291_v22, %v25549_v11  ;;  %v7306_v0 = vrot.slane %v17245_v6, %v25549_v11  ;;  %v14635_v21 = vrot.slane %v14621_v52, %v25549_v11  ;;  %v24152_v45 = vrot.slane %v15657_v56, %v25557_v8  ;;  %v18157_v46 = vpop.f32.mrb[161].mxu1 }
 0x7b4   :  { %v14636_v7 = vcombine.low %v24041_v19, %v14628_v5  ;;  %v14637_v20 = vcombine.high %v24041_v19, %v14628_v5  ;;  %v15673_v59 = vcombine.high %v24128_v49, %v24131_v53  ;;  %v7289_v4 = vrot.slane %v7282_v51, %v25557_v8  ;;  %v12049_v6 = vpop.f32.mrb[162].mxu1 }
 0x7b5   :  { %v14652_v25 = vcombine.low %v14619_v26, %v14635_v21  ;;  %v14653_v54 = vcombine.high %v14619_v26, %v14635_v21  ;;  %v7307_v16 = vcombine.low %v7298_v1, %v7306_v0  ;;  %v15656_v19 = vcombine.low %v24087_v9, %v24090_v29  ;;  %v18158_v29 = vpop.f32.mrb[163].mxu1 }
 0x7b6   :  { %v14644_v35 = vrot.slane %v14636_v7, %v25557_v8  ;;  %v14651_v2 = vrot.slane %v14637_v20, %v25557_v8  ;;  %v24162_v48 = vrot.slane %v15673_v59, %v25557_v8  ;;  %v7537_v36 = vshrl.u32 %v7289_v4, 16 }
 0x7b7   :  { %v14660_v56 = vrot.slane %v14652_v25, %v25557_v8  ;;  %v14667_v50 = vrot.slane %v14653_v54, %v25557_v8  ;;  %v7314_v27 = vrot.slane %v7307_v16, %v25557_v8  ;;  %v7290_v61 = vcombine.high %v7289_v4, %v25659_v43 }
 0x7b8   :  { %v15692_v47 = vcombine.low %v14644_v35, %v14651_v2  ;;  %v17378_v60 = vcombine.high %v14644_v35, %v14651_v2  ;;  %v24173_v21 = vpop.f32.mrb[156].mxu0 }
 0x7b9   :  { %v15708_v52 = vcombine.low %v14660_v56, %v14667_v50  ;;  %v17379_v39 = vcombine.high %v14660_v56, %v14667_v50  ;;  %v7536_v5 = vpack.i.b16 %v7314_v27, %v7289_v4  ;;  %v7538_v9 = vshrl.u32 %v7314_v27, 16  ;;  %v18187_v25 = vpop.f32.mrb[157].mxu0 }
 0x7ba   :  { %v11127_v26 = vpop.xlane.xlu0 %11126  ;;  %v15699_v1 = vrot.slane %v15692_v47, %v25549_v11  ;;  %v15707_v0 = vrot.slane %v17378_v60, %v25549_v11  ;;  %v7315_v51 = vcombine.high %v7314_v27, %v25659_v43  ;;  %v14740_v20 = vcombine.low %v24113_v32, %v24173_v21  ;;  %v12279_v4 = vpop.f32.mrb[158].mxu0 }
 0x7bb   :  { %v11393_v22 = vadd.f32 %v24061_v12, %v11127_v26  ;;  %v15715_v7 = vrot.slane %v15708_v52, %v25549_v11  ;;  %v15723_v12 = vrot.slane %v17379_v39, %v25549_v11  ;;  %v14741_v59 = vcombine.high %v24113_v32, %v24173_v21  ;;  %v18188_v27 = vpop.f32.mrb[159].mxu0 }
 0x7bc   :  { %v14172_v16 = vsel %vm11594_vm3, %v7536_v5, 0  ;;  %v7539_v2 = vpack.i.b16 %v7538_v9, %v7537_v36  ;;  %v7542_v56 = vpack.i.b16 %v7315_v51, %v7290_v61  ;;  %v24185_v50 = vrot.slane %v7316_v41, %v25549_v11 }
 0x7bd   :  { %19052 = vrcp.f32 %v11393_v22  ;;  %v24188_v26 = vrot.slane %v17246_v34, %v25549_v11  ;;  %18436 = vmatpush3.bf16.msra.mxu0 %v14172_v16  ;;  %v7543_v46 = vshrl.u32 %v7290_v61, 16  ;;  %v7544_v47 = vshrl.u32 %v7315_v51, 16 }
 0x7be   :  { %v7341_v60 = vcombine.low %v24138_v23, %v24141_v37  ;;  %v14218_v22 = vsel %vm11594_vm3, %v7539_v2, 0  ;;  %18447 = vmatprep.subr.bf16.mxu0 %v25293_v31  ;;  %v17247_v41 = vcombine.high %v24138_v23, %v24141_v37  ;;  %v15725_v6 = vcombine.high %v15699_v1, %v15707_v0 }
 0x7bf   :  { %v11133_v54 = vpop.xlane.xlu0 %11132  ;;  %18442 = vmatpush3.bf16.msra.mxu1 %v14218_v22  ;;  %v7545_v36 = vpack.i.b16 %v7544_v47, %v7543_v46  ;;  %v15741_v61 = vcombine.high %v15715_v7, %v15723_v12  ;;  %v14264_v52 = vsel %vm11594_vm3, %v7542_v56, 0  ;;  %v24207_v39 = vrot.slane %v15656_v19, %v25557_v8 }
 0x7c0   :  { %v11395_v35 = vadd.f32 %v24076_v42, %v11133_v54  ;;  %v15690_v42 = vcombine.low %v24152_v45, %v24162_v48  ;;  %18438 = vmatmul.mubr.msk.bf16.vlgmr.msra.gmra.mrb[240].mxu0 %vm7558_vm2, %v11583_v13  ;;  %18453 = vmatprep.subr.bf16.mxu1 %v25293_v31  ;;  %v15672_v23 = vcombine.low %v24128_v49, %v24131_v53  ;;  %v11325_v5 = vmul.f32 1.442695, %v24012_v15 }
 0x7c1   :  { %v15724_v37 = vcombine.low %v15699_v1, %v15707_v0  ;;  %18448 = vmatpush3.bf16.msra.mxu0 %v14264_v52  ;;  %v15739_v9 = vrot.slane %v15725_v6, %v25557_v8  ;;  %v15755_v30 = vrot.slane %v15741_v61, %v25557_v8  ;;  %v15740_v29 = vcombine.low %v15715_v7, %v15723_v12  ;;  %v24230_v19 = vpop.f32.mrb[160].mxu0 }
 0x7c2   :  { %19054 = vrcp.f32 %v11395_v35  ;;  %18449 = vmatprep.mubr.msk.bf16.mxu0 %vm19202_vm1, %v25293_v31  ;;  %18444 = vmatmul.mubr.msk.bf16.vlgmr.msra.gmra.mrb[0].mxu1 %vm7558_vm2, %v11584_v28  ;;  %v14310_v13 = vsel %vm11594_vm3, %v7545_v36, 0  ;;  %v24222_v49 = vrot.slane %v15672_v23, %v25557_v8  ;;  %v7332_v53 = vcombine.low %v24185_v50, %v24188_v26  ;;  %v18199_v25 = vpop.f32.mrb[161].mxu0 }
 0x7c3   :  { %v24225_v15 = vrot.slane %v15724_v37, %v25557_v8  ;;  %18459 = vmatprep.subr.bf16.mxu0 %v25293_v31  ;;  %18454 = vmatpush3.bf16.msra.mxu1 %v14310_v13  ;;  %v15758_v57 = vcombine.low %v15739_v9, %v15755_v30  ;;  %v24233_v28 = vrot.slane %v15740_v29, %v25557_v8  ;;  %v11329_v12 = vmul.f32 1.442695, %v24016_v40  ;;  %v12371_v2 = vpop.f32.mrb[162].mxu0 }
 0x7c4   :  { %v24198_v34 = vpop.xlane.xlu0 %11135  ;;  %v7348_v0 = vrot.slane %v7341_v60, %v25549_v11  ;;  %v7356_v51 = vrot.slane %v17247_v41, %v25549_v11  ;;  %v15688_v4 = vcombine.low %v24207_v39, %v24222_v49  ;;  %v15689_v16 = vcombine.high %v24207_v39, %v24222_v49  ;;  %18455 = vmatprep.mubr.msk.bf16.mxu1 %vm19202_vm1, %v25293_v31 }
 0x7c5   :  { %v18533_v56 = vpack.i.bf16 %v15758_v57, %v15690_v42  ;;  %v15757_v50 = vcombine.high %v24225_v15, %v24233_v28  ;;  %v15756_v40 = vcombine.low %v24225_v15, %v24233_v28  ;;  %18465 = vmatprep.subr.bf16.mxu1 %v25293_v31  ;;  %v15691_v27 = vcombine.high %v24152_v45, %v24162_v48 }
 0x7c6   :  { %v7357_v26 = vcombine.low %v7348_v0, %v7356_v51  ;;  %v15759_v46 = vcombine.high %v15739_v9, %v15755_v30  ;;  %v24255_v60 = vrot.slane %v7332_v53, %v25557_v8  ;;  %v25818_v45 = vmax.f32 %v23380_v58, 0.0 }
 0x7c7   :  { %v19053_v7 = vpop.eup %19052  ;;  %18534 = vrot.lane.b32.xlu1 %v18533_v56, %s19206_s28  ;;  %v14680_v36 = vrot.slane %v14672_v55, %v25549_v11  ;;  %v14687_v30 = vrot.slane %v14673_v10, %v25549_v11 }
 0x7c8   :  { %v11139_v1 = vpop.xlane.xlu0 %11138  ;;  %v11521_v35 = vmul.f32 %v19053_v7, %v23520_v18  ;;  %v18528_v18 = vpack.i.bf16 %v15757_v50, %v15689_v16  ;;  %v24258_v42 = vrot.slane %v7357_v26, %v25557_v8  ;;  %v18538_v41 = vpack.i.bf16 %v15759_v46, %v15691_v27  ;;  %v12138_v6 = vpop.f32.mrb[164].mxu1 }
 0x7c9   :  { %v11397_v54 = vadd.f32 %v24123_v38, %v11139_v1  ;;  %v18200_v38 = vpop.f32.mrb[163].mxu0  ;;  %v11206_v48 = vsub.f32 0.0, %v25818_v45  ;;  %v14688_v58 = vcombine.low %v24159_v3, %v12138_v6  ;;  %v14689_v37 = vcombine.high %v24159_v3, %v12138_v6 }
 0x7ca   :  { %v11585_v47 = vpack.c.bf16 %v11521_v35, %v11521_v35  ;;  %18529 = vrot.lane.b32.xlu0 %v18528_v18, %s19191_s10  ;;  %v7548_v61 = vpack.i.b16 %v24258_v42, %v24255_v60  ;;  %v24274_v52 = vcombine.high %v24258_v42, %v25659_v43  ;;  %v24279_v9 = vpop.f32.mrb[164].mxu0  ;;  %v24283_v55 = vcombine.high %v24255_v60, %v25659_v43 }
 0x7cb   :  { %19056 = vrcp.f32 %v11397_v54  ;;  %v14809_v3 = vcombine.high %v24230_v19, %v24279_v9  ;;  %v18211_v53 = vpop.f32.mrb[165].mxu0  ;;  %v14696_v1 = vrot.slane %v14688_v58, %v25549_v11  ;;  %v14703_v43 = vrot.slane %v14689_v37, %v25549_v11 }
 0x7cc   :  { %v19055_v22 = vpop.eup %19054  ;;  %19058 = vpow2.f32 %v11325_v5  ;;  %18450 = vmatmul.mubr.msk.bf16.vlgmr.msra.gmra.mrb[244].mxu0 %vm7558_vm2, %v11585_v47  ;;  %v18169_v5 = vpop.f32.mrb[165].mxu1  ;;  %v14356_v13 = vsel %vm11594_vm3, %v7548_v61, 0  ;;  %v7554_v33 = vpack.i.b16 %v24274_v52, %v24283_v55  ;;  %v11333_v10 = vmul.f32 1.442695, %v11206_v48 }
 0x7cd   :  { %19060 = vpow2.f32 %v11329_v12  ;;  %18461 = vmatprep.mubr.msk.bf16.mxu0 %vm19202_vm1, %v25293_v31  ;;  %v11523_v23 = vmul.f32 %v19055_v22, %v23543_v44  ;;  %v12141_v29 = vpop.f32.mrb[166].mxu1  ;;  %v14808_v44 = vcombine.low %v24230_v19, %v24279_v9  ;;  %18460 = vmatpush3.bf16.msra.mxu0 %v14356_v13  ;;  %v12463_v63 = vpop.f32.mrb[166].mxu0  ;;  %v14704_v51 = vcombine.low %v14680_v36, %v14696_v1 }
 0x7ce   :  { %v18170_v57 = vpop.f32.mrb[167].mxu1  ;;  %18539 = vrot.lane.b32.xlu0 %v18538_v41, %s19207_s29  ;;  %v18212_v0 = vpop.f32.mrb[167].mxu0  ;;  %18471 = vmatprep.subr.bf16.mxu0 %v25293_v31  ;;  %v14705_v7 = vcombine.high %v14680_v36, %v14696_v1  ;;  %v14720_v12 = vcombine.low %v14687_v30, %v14703_v43  ;;  %v14721_v16 = vcombine.high %v14687_v30, %v14703_v43  ;;  %v14448_v50 = vsel %vm11594_vm3, %v7554_v33, 0 }
 0x7cf   :  { %v11587_v25 = vpack.c.bf16 %v11523_v23, %v11523_v23  ;;  %v14712_v35 = vrot.slane %v14704_v51, %v25557_v8  ;;  %19062 = vpow2.f32 %v11333_v10 }
 0x7d0   :  { %v14719_v2 = vrot.slane %v14705_v7, %v25557_v8  ;;  %v14728_v56 = vrot.slane %v14720_v12, %v25557_v8  ;;  %v14735_v26 = vrot.slane %v14721_v16, %v25557_v8 }
 0x7d2   :  { %v12230_v27 = vpop.f32.mrb[168].mxu1  ;;  %v15760_v47 = vcombine.low %v14712_v35, %v14719_v2  ;;  %v17380_v22 = vcombine.high %v14712_v35, %v14719_v2  ;;  %v15776_v45 = vcombine.low %v14728_v56, %v14735_v26  ;;  %v17381_v48 = vcombine.high %v14728_v56, %v14735_v26 }
 0x7d3   :  { %v18181_v41 = vpop.f32.mrb[169].mxu1 }
 0x7d4   :  { %18462 = vmatmul.mubr.msk.bf16.vlgmr.msra.gmra.mrb[248].mxu0 %vm7558_vm2, %v11587_v25  ;;  %v12233_v36 = vpop.f32.mrb[170].mxu1  ;;  %v15767_v61 = vrot.slane %v15760_v47, %v25549_v11  ;;  %v15775_v23 = vrot.slane %v17380_v22, %v25549_v11  ;;  %v24311_v37 = vpop.f32.mrb[168].mxu0  ;;  %v15783_v29 = vrot.slane %v15776_v45, %v25549_v11 }
 0x7d5   :  { %v19057_v54 = vpop.eup %19056  ;;  %18472 = vmatpush3.bf16.msra.mxu0 %v14448_v50  ;;  %18473 = vmatprep.mubr.msk.bf16.mxu0 %vm19202_vm1, %v25293_v31  ;;  %v18182_v58 = vpop.f32.mrb[171].mxu1 }
 0x7d6   :  { %v19059_v38 = vpop.eup %19058  ;;  %v11525_v18 = vmul.f32 %v19057_v54, %v23598_v17  ;;  %v15791_v17 = vrot.slane %v17381_v48, %v25549_v11  ;;  %v18223_v13 = vpop.f32.mrb[169].mxu0  ;;  %v15792_v43 = vcombine.low %v15767_v61, %v15775_v23  ;;  %v15793_v57 = vcombine.high %v15767_v61, %v15775_v23 }
 0x7d7   :  { %v19061_v46 = vpop.eup %19060  ;;  %v11130_v6 = vpop.xlane.xlu1 %11129  ;;  %v7550_v61 = vshrl.u32 %v24258_v42, 16 }
 0x7d8   :  { %v11394_v5 = vadd.f32 %v19059_v38, %v11130_v6  ;;  %v11396_v30 = vadd.f32 %v19061_v46, %v24198_v34  ;;  %v12555_v53 = vpop.f32.mrb[170].mxu0  ;;  %v11589_v1 = vpack.c.bf16 %v11525_v18, %v11525_v18  ;;  %v15808_v33 = vcombine.low %v15783_v29, %v15791_v17 }
 0x7d9   :  { %v18224_v63 = vpop.f32.mrb[171].mxu0  ;;  %v15809_v10 = vcombine.high %v15783_v29, %v15791_v17  ;;  %v24318_v0 = vrot.slane %v15792_v43, %v25557_v8  ;;  %v24321_v34 = vrot.slane %v15793_v57, %v25557_v8  ;;  %v19063_v46 = vpop.eup %19062  ;;  %v14755_v18 = vrot.slane %v14741_v59, %v25549_v11 }
 0x7da   :  { %19064 = vrcp.f32 %v11394_v5  ;;  %v12322_v51 = vpop.f32.mrb[172].mxu1  ;;  %v24324_v7 = vrot.slane %v15808_v33, %v25557_v8 }
 0x7db   :  { %v24327_v12 = vrot.slane %v15809_v10, %v25557_v8  ;;  %19066 = vrcp.f32 %v11396_v30  ;;  %v14756_v25 = vcombine.low %v12230_v27, %v12322_v51  ;;  %v14757_v54 = vcombine.high %v12230_v27, %v12322_v51  ;;  %v18193_v16 = vpop.f32.mrb[173].mxu1  ;;  %v11142_v35 = vpop.xlane.xlu1 %11141 }
 0x7dc   :  { %18474 = vmatmul.mubr.msk.bf16.vlgmr.msra.gmra.mrb[252].mxu0 %vm7558_vm2, %v11589_v1  ;;  %v12325_v2 = vpop.f32.mrb[174].mxu1  ;;  %v15824_v56 = vcombine.low %v24318_v0, %v24324_v7  ;;  %v15825_v50 = vcombine.high %v24318_v0, %v24324_v7  ;;  %v14748_v27 = vrot.slane %v14740_v20, %v25549_v11  ;;  %v24347_v45 = vpop.f32.mrb[172].mxu0  ;;  %v11398_v48 = vadd.f32 %v19063_v46, %v11142_v35 }
 0x7dd   :  { %v15826_v38 = vcombine.low %v24321_v34, %v24327_v12  ;;  %v15827_v26 = vcombine.high %v24321_v34, %v24327_v12  ;;  %v14764_v47 = vrot.slane %v14756_v25, %v25549_v11  ;;  %v14771_v22 = vrot.slane %v14757_v54, %v25549_v11  ;;  %v18194_v41 = vpop.f32.mrb[175].mxu1  ;;  %v18235_v20 = vpop.f32.mrb[173].mxu0 }
 0x7de   :  { %v14876_v36 = vcombine.low %v24311_v37, %v24347_v45  ;;  %v14877_v6 = vcombine.high %v24311_v37, %v24347_v45  ;;  %v12647_v58 = vpop.f32.mrb[174].mxu0  ;;  %v7549_v30 = vshrl.u32 %v24255_v60, 16  ;;  %19068 = vrcp.f32 %v11398_v48 }
 0x7df   :  { %v14772_v23 = vcombine.low %v14748_v27, %v14764_v47  ;;  %v14773_v32 = vcombine.high %v14748_v27, %v14764_v47  ;;  %v14788_v21 = vcombine.low %v14755_v18, %v14771_v22  ;;  %v14789_v59 = vcombine.high %v14755_v18, %v14771_v22  ;;  %v18236_v5 = vpop.f32.mrb[175].mxu0 }
 0x7e0   :  { %v7551_v57 = vpack.i.b16 %v7550_v61, %v7549_v30  ;;  %v7556_v22 = vshrl.u32 %v24274_v52, 16 }
 0x7e1   :  { %v14780_v17 = vrot.slane %v14772_v23, %v25557_v8  ;;  %v14787_v13 = vrot.slane %v14773_v32, %v25557_v8  ;;  %v14796_v53 = vrot.slane %v14788_v21, %v25557_v8  ;;  %v14803_v1 = vrot.slane %v14789_v59, %v25557_v8 }
 0x7e2   :  { %v12414_v42 = vpop.f32.mrb[176].mxu1  ;;  %v14402_v47 = vsel %vm11594_vm3, %v7551_v57, 0  ;;  %v7555_v59 = vshrl.u32 %v24283_v55, 16  ;;  %v18652_v57 = vld [vmem:[#allocation8] sm:$0xff]  }
 0x7e3   :  { %v15828_v63 = vcombine.low %v14780_v17, %v14787_v13  ;;  %v17382_v33 = vcombine.high %v14780_v17, %v14787_v13  ;;  %v15844_v10 = vcombine.low %v14796_v53, %v14803_v1  ;;  %v17383_v51 = vcombine.high %v14796_v53, %v14803_v1  ;;  %v18205_v25 = vpop.f32.mrb[177].mxu1  ;;  %18483 = vmatprep.subr.bf16.mxu0 %v18652_v57 }
 0x7e4   :  { %v19065_v29 = vpop.eup %19064  ;;  %v12417_v54 = vpop.f32.mrb[178].mxu1  ;;  %v7557_v13 = vpack.i.b16 %v7556_v22, %v7555_v59  ;;  %18484 = vmatpush3.bf16.msra.mxu0 %v18652_v57 }
 0x7e5   :  { %v11522_v43 = vmul.f32 %v19065_v29, %v23690_v62  ;;  %v19067_v16 = vpop.eup %19066  ;;  %v15835_v35 = vrot.slane %v15828_v63, %v25549_v11  ;;  %v15843_v2 = vrot.slane %v17382_v33, %v25549_v11  ;;  %v15851_v46 = vrot.slane %v15844_v10, %v25549_v11  ;;  %v18206_v62 = vpop.f32.mrb[179].mxu1 }
 0x7e6   :  { %v15859_v27 = vrot.slane %v17383_v51, %v25549_v11  ;;  %v24364_v18 = vpop.f32.mrb[176].mxu0  ;;  %v11524_v23 = vmul.f32 %v19067_v16, %v23578_v14  ;;  %v14816_v10 = vrot.slane %v14808_v44, %v25549_v11  ;;  %v14494_v19 = vsel %vm11594_vm3, %v7557_v13, 0 }
 0x7e7   :  { %v11586_v60 = vpack.c.bf16 %v11522_v43, %v11522_v43  ;;  %v18247_v41 = vpop.f32.mrb[177].mxu0  ;;  %v15860_v48 = vcombine.low %v15835_v35, %v15843_v2  ;;  %v15861_v61 = vcombine.high %v15835_v35, %v15843_v2 }
 0x7e8   :  { %v15876_v20 = vcombine.low %v15851_v46, %v15859_v27  ;;  %v12739_v32 = vpop.f32.mrb[178].mxu0  ;;  %v15877_v21 = vcombine.high %v15851_v46, %v15859_v27  ;;  %v19069_v63 = vpop.eup %19068  ;;  %v11588_v33 = vpack.c.bf16 %v11524_v23, %v11524_v23  ;;  %v18653_v46 = vld [vmem:[#allocation8 + $0x8] sm:$0xff]  }
 0x7e9   :  { %18456 = vmatmul.mubr.msk.bf16.vlgmr.msra.gmra.mrb[4].mxu1 %vm7558_vm2, %v11586_v60  ;;  %v18248_v58 = vpop.f32.mrb[179].mxu0  ;;  %v24375_v5 = vrot.slane %v15860_v48, %v25557_v8  ;;  %v15875_v30 = vrot.slane %v15861_v61, %v25557_v8  ;;  %v11526_v41 = vmul.f32 %v19069_v63, %v23716_v24  ;;  %18485 = vmatprep.subr.bf16.mxu0 %v18653_v46 }
 0x7ea   :  { %18466 = vmatpush3.bf16.msra.mxu1 %v14402_v47  ;;  %18467 = vmatprep.mubr.msk.bf16.mxu1 %vm19202_vm1, %v25293_v31  ;;  %v24378_v52 = vrot.slane %v15876_v20, %v25557_v8  ;;  %v12506_v29 = vpop.f32.mrb[180].mxu1  ;;  %v15891_v17 = vrot.slane %v15877_v21, %v25557_v8 }
 0x7eb   :  { %18477 = vmatprep.subr.bf16.mxu1 %v25293_v31  ;;  %v14824_v14 = vcombine.low %v12414_v42, %v12506_v29  ;;  %v14825_v53 = vcombine.high %v12414_v42, %v12506_v29  ;;  %v18217_v1 = vpop.f32.mrb[181].mxu1  ;;  %v14823_v42 = vrot.slane %v14809_v3, %v25549_v11  ;;  %18486 = vmatpush3.bf16.msra.mxu0 %v18653_v46 }
 0x7ec   :  { %v15893_v43 = vcombine.high %v24375_v5, %v24378_v52  ;;  %v15892_v55 = vcombine.low %v24375_v5, %v24378_v52  ;;  %v12509_v51 = vpop.f32.mrb[182].mxu1  ;;  %v15894_v25 = vcombine.low %v15875_v30, %v15891_v17  ;;  %v15895_v60 = vcombine.high %v15875_v30, %v15891_v17 }
 0x7ed   :  { %v14832_v54 = vrot.slane %v14824_v14, %v25549_v11  ;;  %v14839_v16 = vrot.slane %v14825_v53, %v25549_v11  ;;  %v18218_v35 = vpop.f32.mrb[183].mxu1 }
 0x7ee   :  { %v18543_v2 = vpack.i.bf16 %v15893_v43, %v15825_v50  ;;  %v24399_v44 = vpop.f32.mrb[180].mxu0  ;;  %v18548_v27 = vpack.i.bf16 %v15894_v25, %v15826_v38  ;;  %v18553_v9 = vpack.i.bf16 %v15895_v60, %v15827_v26 }
 0x7ef   :  { %v14840_v3 = vcombine.low %v14816_v10, %v14832_v54  ;;  %v14841_v62 = vcombine.high %v14816_v10, %v14832_v54  ;;  %v14856_v50 = vcombine.low %v14823_v42, %v14839_v16  ;;  %v14857_v47 = vcombine.high %v14823_v42, %v14839_v16  ;;  %v18259_v22 = vpop.f32.mrb[181].mxu0 }
 0x7f0   :  { %18544 = vrot.lane.b32.xlu1 %v18543_v2, %s19191_s10  ;;  %v14944_v38 = vcombine.low %v24364_v18, %v24399_v44  ;;  %v14945_v48 = vcombine.high %v24364_v18, %v24399_v44  ;;  %v12831_v20 = vpop.f32.mrb[182].mxu0  ;;  %v14884_v22 = vrot.slane %v14876_v36, %v25549_v11 }
 0x7f1   :  { %18468 = vmatmul.mubr.msk.bf16.vlgmr.msra.gmra.mrb[8].mxu1 %vm7558_vm2, %v11588_v33  ;;  %v14848_v34 = vrot.slane %v14840_v3, %v25557_v8  ;;  %v14855_v12 = vrot.slane %v14841_v62, %v25557_v8  ;;  %v14864_v26 = vrot.slane %v14856_v50, %v25557_v8  ;;  %v14871_v61 = vrot.slane %v14857_v47, %v25557_v8  ;;  %v18260_v24 = vpop.f32.mrb[183].mxu0 }
 0x7f2   :  { %18478 = vmatpush3.bf16.msra.mxu1 %v14494_v19  ;;  %18479 = vmatprep.mubr.msk.bf16.mxu1 %vm19202_vm1, %v25293_v31  ;;  %v11590_v31 = vpack.c.bf16 %v11526_v41, %v11526_v41  ;;  %v14891_v41 = vrot.slane %v14877_v6, %v25549_v11 }
 0x7f3   :  { %v15896_v32 = vcombine.low %v14848_v34, %v14855_v12  ;;  %v17384_v21 = vcombine.high %v14848_v34, %v14855_v12  ;;  %v15912_v59 = vcombine.low %v14864_v26, %v14871_v61  ;;  %v17385_v58 = vcombine.high %v14864_v26, %v14871_v61 }
 0x7f4   :  { %18549 = vrot.lane.b32.xlu1 %v18548_v27, %s19206_s28 }
 0x7f5   :  { %v12598_v23 = vpop.f32.mrb[184].mxu1  ;;  %v15903_v17 = vrot.slane %v15896_v32, %v25549_v11  ;;  %v15911_v13 = vrot.slane %v17384_v21, %v25549_v11  ;;  %v15919_v14 = vrot.slane %v15912_v59, %v25549_v11  ;;  %v15927_v53 = vrot.slane %v17385_v58, %v25549_v11 }
 0x7f6   :  { %v18229_v30 = vpop.f32.mrb[185].mxu1 }
 0x7f7   :  { %v12601_v29 = vpop.f32.mrb[186].mxu1  ;;  %v15928_v63 = vcombine.low %v15903_v17, %v15911_v13  ;;  %v15944_v33 = vcombine.low %v15919_v14, %v15927_v53  ;;  %v15929_v10 = vcombine.high %v15903_v17, %v15911_v13  ;;  %v15945_v51 = vcombine.high %v15919_v14, %v15927_v53 }
 0x7f8   :  { %v18230_v1 = vpop.f32.mrb[187].mxu1  ;;  %18554 = vrot.lane.b32.xlu1 %v18553_v9, %s19207_s29 }
 0x7f9   :  { %v24426_v43 = vpop.f32.mrb[184].mxu0  ;;  %18480 = vmatmul.mubr.msk.bf16.vlgmr.msra.gmra.mrb[12].mxu1 %vm7558_vm2, %v11590_v31  ;;  %v24431_v42 = vrot.slane %v15928_v63, %v25557_v8  ;;  %v24434_v54 = vrot.slane %v15944_v33, %v25557_v8  ;;  %v24437_v16 = vrot.slane %v15929_v10, %v25557_v8  ;;  %v24440_v35 = vrot.slane %v15945_v51, %v25557_v8 }
 0x7fa   :  { %v18271_v57 = vpop.f32.mrb[185].mxu0 }
 0x7fb   :  { %v12923_v25 = vpop.f32.mrb[186].mxu0  ;;  %v15960_v9 = vcombine.low %v24431_v42, %v24434_v54  ;;  %v15961_v3 = vcombine.high %v24431_v42, %v24434_v54  ;;  %v15962_v50 = vcombine.low %v24437_v16, %v24440_v35  ;;  %v15963_v47 = vcombine.high %v24437_v16, %v24440_v35 }
 0x7fc   :  { %v18272_v60 = vpop.f32.mrb[187].mxu0 }
 0x7fd   :  { %v12690_v2 = vpop.f32.mrb[188].mxu1 }
 0x7fe   :  { %v14892_v46 = vcombine.low %v12598_v23, %v12690_v2  ;;  %v14893_v27 = vcombine.high %v12598_v23, %v12690_v2  ;;  %v18241_v19 = vpop.f32.mrb[189].mxu1 }
 0x7ff   :  { %v12693_v62 = vpop.f32.mrb[190].mxu1 }
 0x800   :  { %v14900_v20 = vrot.slane %v14892_v46, %v25549_v11  ;;  %v14907_v34 = vrot.slane %v14893_v27, %v25549_v11  ;;  %v18242_v12 = vpop.f32.mrb[191].mxu1 }
 0x801   :  { %v24460_v26 = vpop.f32.mrb[188].mxu0 }
 0x802   :  { %v14908_v61 = vcombine.low %v14884_v22, %v14900_v20  ;;  %v14909_v24 = vcombine.high %v14884_v22, %v14900_v20  ;;  %v14924_v23 = vcombine.low %v14891_v41, %v14907_v34  ;;  %v14925_v32 = vcombine.high %v14891_v41, %v14907_v34  ;;  %v18283_v21 = vpop.f32.mrb[189].mxu0 }
 0x803   :  { %v15012_v36 = vcombine.low %v24426_v43, %v24460_v26  ;;  %v15013_v59 = vcombine.high %v24426_v43, %v24460_v26  ;;  %v13015_v37 = vpop.f32.mrb[190].mxu0 }
 0x804   :  { %v14916_v45 = vrot.slane %v14908_v61, %v25557_v8  ;;  %v14923_v6 = vrot.slane %v14909_v24, %v25557_v8  ;;  %v14932_v58 = vrot.slane %v14924_v23, %v25557_v8  ;;  %v14939_v30 = vrot.slane %v14925_v32, %v25557_v8  ;;  %v18284_v31 = vpop.f32.mrb[191].mxu0 }
 0x805   :  { %v14952_v37 = vrot.slane %v14944_v38, %v25549_v11 }
 0x806   :  { %v12782_v29 = vpop.f32.mrb[192].mxu1  ;;  %v15964_v17 = vcombine.low %v14916_v45, %v14923_v6  ;;  %v17386_v13 = vcombine.high %v14916_v45, %v14923_v6  ;;  %v15980_v14 = vcombine.low %v14932_v58, %v14939_v30  ;;  %v17387_v53 = vcombine.high %v14932_v58, %v14939_v30 }
 0x807   :  { %v18253_v1 = vpop.f32.mrb[193].mxu1  ;;  %v14959_v30 = vrot.slane %v14945_v48, %v25549_v11 }
 0x808   :  { %v12785_v57 = vpop.f32.mrb[194].mxu1  ;;  %v15971_v63 = vrot.slane %v15964_v17, %v25549_v11  ;;  %v15979_v33 = vrot.slane %v17386_v13, %v25549_v11  ;;  %v15987_v10 = vrot.slane %v15980_v14, %v25549_v11  ;;  %v15995_v51 = vrot.slane %v17387_v53, %v25549_v11 }
 0x809   :  { %v18254_v25 = vpop.f32.mrb[195].mxu1 }
 0x80a   :  { %v24474_v60 = vpop.f32.mrb[192].mxu0  ;;  %v15996_v35 = vcombine.low %v15971_v63, %v15979_v33  ;;  %v16012_v2 = vcombine.low %v15987_v10, %v15995_v51  ;;  %v15997_v46 = vcombine.high %v15971_v63, %v15979_v33  ;;  %v16013_v27 = vcombine.high %v15987_v10, %v15995_v51 }
 0x80b   :  { %v18295_v16 = vpop.f32.mrb[193].mxu0 }
 0x80c   :  { %v13107_v19 = vpop.f32.mrb[194].mxu0  ;;  %v24477_v22 = vrot.slane %v15996_v35, %v25557_v8  ;;  %v24480_v41 = vrot.slane %v16012_v2, %v25557_v8  ;;  %v16011_v20 = vrot.slane %v15997_v46, %v25557_v8  ;;  %v16027_v34 = vrot.slane %v16013_v27, %v25557_v8 }
 0x80d   :  { %v18296_v62 = vpop.f32.mrb[195].mxu0 }
 0x80e   :  { %v16029_v32 = vcombine.high %v24477_v22, %v24480_v41  ;;  %v16028_v21 = vcombine.low %v24477_v22, %v24480_v41  ;;  %v16030_v6 = vcombine.low %v16011_v20, %v16027_v34  ;;  %v16031_v58 = vcombine.high %v16011_v20, %v16027_v34 }
 0x80f   :  { %v12874_v12 = vpop.f32.mrb[196].mxu1 }
 0x810   :  { %v14960_v61 = vcombine.low %v12782_v29, %v12874_v12  ;;  %v14961_v24 = vcombine.high %v12782_v29, %v12874_v12  ;;  %v18265_v23 = vpop.f32.mrb[197].mxu1  ;;  %v18558_v13 = vpack.i.bf16 %v16029_v32, %v15961_v3  ;;  %v18563_v53 = vpack.i.bf16 %v16030_v6, %v15962_v50 }
 0x811   :  { %v12877_v45 = vpop.f32.mrb[198].mxu1  ;;  %v18568_v1 = vpack.i.bf16 %v16031_v58, %v15963_v47 }
 0x812   :  { %v14968_v31 = vrot.slane %v14960_v61, %v25549_v11  ;;  %v14975_v29 = vrot.slane %v14961_v24, %v25549_v11  ;;  %v18266_v17 = vpop.f32.mrb[199].mxu1  ;;  %18559 = vrot.lane.b32.xlu0 %v18558_v13, %s19191_s10 }
 0x813   :  { %v24498_v14 = vpop.f32.mrb[196].mxu0 }
 0x814   :  { %v14976_v57 = vcombine.low %v14952_v37, %v14968_v31  ;;  %v14977_v38 = vcombine.high %v14952_v37, %v14968_v31  ;;  %v14992_v63 = vcombine.low %v14959_v30, %v14975_v29  ;;  %v14993_v33 = vcombine.high %v14959_v30, %v14975_v29  ;;  %v18307_v10 = vpop.f32.mrb[197].mxu0 }
 0x815   :  { %v15080_v18 = vcombine.low %v24474_v60, %v24498_v14  ;;  %v15081_v44 = vcombine.high %v24474_v60, %v24498_v14  ;;  %v13199_v48 = vpop.f32.mrb[198].mxu0 }
 0x816   :  { %v14984_v3 = vrot.slane %v14976_v57, %v25557_v8  ;;  %v14991_v51 = vrot.slane %v14977_v38, %v25557_v8  ;;  %v15000_v50 = vrot.slane %v14992_v63, %v25557_v8  ;;  %v15007_v47 = vrot.slane %v14993_v33, %v25557_v8  ;;  %v18308_v25 = vpop.f32.mrb[199].mxu0  ;;  %18564 = vrot.lane.b32.xlu0 %v18563_v53, %s19206_s28 }
 0x817   :  { %v12966_v16 = vpop.f32.mrb[200].mxu1 }
 0x818   :  { %v16032_v35 = vcombine.low %v14984_v3, %v14991_v51  ;;  %v17388_v2 = vcombine.high %v14984_v3, %v14991_v51  ;;  %v16048_v46 = vcombine.low %v15000_v50, %v15007_v47  ;;  %v17389_v27 = vcombine.high %v15000_v50, %v15007_v47  ;;  %v18277_v19 = vpop.f32.mrb[201].mxu1 }
 0x819   :  { %v12969_v62 = vpop.f32.mrb[202].mxu1  ;;  %v15020_v50 = vrot.slane %v15012_v36, %v25549_v11  ;;  %v15027_v47 = vrot.slane %v15013_v59, %v25549_v11 }
 0x81a   :  { %v16039_v20 = vrot.slane %v16032_v35, %v25549_v11  ;;  %v16047_v34 = vrot.slane %v17388_v2, %v25549_v11  ;;  %v16055_v12 = vrot.slane %v16048_v46, %v25549_v11  ;;  %v16063_v61 = vrot.slane %v17389_v27, %v25549_v11  ;;  %v18278_v24 = vpop.f32.mrb[203].mxu1  ;;  %18569 = vrot.lane.b32.xlu0 %v18568_v1, %s19207_s29 }
 0x81b   :  { %v24514_v23 = vpop.f32.mrb[200].mxu0 }
 0x81c   :  { %v18319_v32 = vpop.f32.mrb[201].mxu0  ;;  %v16064_v37 = vcombine.low %v16039_v20, %v16047_v34  ;;  %v16080_v45 = vcombine.low %v16055_v12, %v16063_v61  ;;  %v16065_v6 = vcombine.high %v16039_v20, %v16047_v34  ;;  %v16081_v58 = vcombine.high %v16055_v12, %v16063_v61 }
 0x81d   :  { %v13291_v30 = vpop.f32.mrb[202].mxu0 }
 0x81e   :  { %v18320_v31 = vpop.f32.mrb[203].mxu0  ;;  %v24518_v29 = vrot.slane %v16064_v37, %v25557_v8  ;;  %v24521_v17 = vrot.slane %v16080_v45, %v25557_v8  ;;  %v24524_v13 = vrot.slane %v16065_v6, %v25557_v8  ;;  %v24527_v53 = vrot.slane %v16081_v58, %v25557_v8 }
 0x81f   :  { %v13058_v1 = vpop.f32.mrb[204].mxu1 }
 0x820   :  { %v15028_v57 = vcombine.low %v12966_v16, %v13058_v1  ;;  %v15029_v38 = vcombine.high %v12966_v16, %v13058_v1  ;;  %v18289_v63 = vpop.f32.mrb[205].mxu1  ;;  %v16096_v33 = vcombine.low %v24518_v29, %v24521_v17  ;;  %v16097_v10 = vcombine.high %v24518_v29, %v24521_v17 }
 0x821   :  { %v13061_v48 = vpop.f32.mrb[206].mxu1  ;;  %v16098_v3 = vcombine.low %v24524_v13, %v24527_v53  ;;  %v16099_v51 = vcombine.high %v24524_v13, %v24527_v53 }
 0x822   :  { %v15036_v25 = vrot.slane %v15028_v57, %v25549_v11  ;;  %v15043_v16 = vrot.slane %v15029_v38, %v25549_v11  ;;  %v18290_v35 = vpop.f32.mrb[207].mxu1 }
 0x823   :  { %v24547_v2 = vpop.f32.mrb[204].mxu0 }
 0x824   :  { %v15044_v46 = vcombine.low %v15020_v50, %v15036_v25  ;;  %v15045_v27 = vcombine.high %v15020_v50, %v15036_v25  ;;  %v15060_v19 = vcombine.low %v15027_v47, %v15043_v16  ;;  %v15061_v62 = vcombine.high %v15027_v47, %v15043_v16  ;;  %v18331_v20 = vpop.f32.mrb[205].mxu0 }
 0x825   :  { %v15148_v36 = vcombine.low %v24514_v23, %v24547_v2  ;;  %v15149_v34 = vcombine.high %v24514_v23, %v24547_v2  ;;  %v13383_v43 = vpop.f32.mrb[206].mxu0 }
 0x826   :  { %v15052_v26 = vrot.slane %v15044_v46, %v25557_v8  ;;  %v15059_v59 = vrot.slane %v15045_v27, %v25557_v8  ;;  %v15068_v12 = vrot.slane %v15060_v19, %v25557_v8  ;;  %v15075_v61 = vrot.slane %v15061_v62, %v25557_v8  ;;  %v18332_v24 = vpop.f32.mrb[207].mxu0 }
 0x827   :  { %v13150_v32 = vpop.f32.mrb[208].mxu1 }
 0x828   :  { %v16100_v37 = vcombine.low %v15052_v26, %v15059_v59  ;;  %v17390_v45 = vcombine.high %v15052_v26, %v15059_v59  ;;  %v16116_v6 = vcombine.low %v15068_v12, %v15075_v61  ;;  %v17391_v58 = vcombine.high %v15068_v12, %v15075_v61  ;;  %v18301_v30 = vpop.f32.mrb[209].mxu1 }
 0x829   :  { %v13153_v31 = vpop.f32.mrb[210].mxu1 }
 0x82a   :  { %v16107_v13 = vrot.slane %v16100_v37, %v25549_v11  ;;  %v16115_v53 = vrot.slane %v17390_v45, %v25549_v11  ;;  %v16123_v1 = vrot.slane %v16116_v6, %v25549_v11  ;;  %v16131_v57 = vrot.slane %v17391_v58, %v25549_v11  ;;  %v18302_v38 = vpop.f32.mrb[211].mxu1 }
 0x82b   :  { %v24561_v63 = vpop.f32.mrb[208].mxu0  ;;  %v15088_v37 = vrot.slane %v15080_v18, %v25549_v11 }
 0x82c   :  { %v18343_v48 = vpop.f32.mrb[209].mxu0  ;;  %v16132_v50 = vcombine.low %v16107_v13, %v16115_v53  ;;  %v16148_v47 = vcombine.low %v16123_v1, %v16131_v57  ;;  %v16133_v25 = vcombine.high %v16107_v13, %v16115_v53  ;;  %v16149_v16 = vcombine.high %v16123_v1, %v16131_v57 }
 0x82d   :  { %v13475_v35 = vpop.f32.mrb[210].mxu0 }
 0x82e   :  { %v18344_v46 = vpop.f32.mrb[211].mxu0  ;;  %v24564_v27 = vrot.slane %v16132_v50, %v25557_v8  ;;  %v24567_v19 = vrot.slane %v16148_v47, %v25557_v8  ;;  %v16147_v62 = vrot.slane %v16133_v25, %v25557_v8  ;;  %v16163_v20 = vrot.slane %v16149_v16, %v25557_v8 }
 0x82f   :  { %v13242_v43 = vpop.f32.mrb[212].mxu1 }
 0x830   :  { %v15096_v26 = vcombine.low %v13150_v32, %v13242_v43  ;;  %v15097_v59 = vcombine.high %v13150_v32, %v13242_v43  ;;  %v18313_v12 = vpop.f32.mrb[213].mxu1  ;;  %v16165_v61 = vcombine.high %v24564_v27, %v24567_v19  ;;  %v16164_v24 = vcombine.low %v24564_v27, %v24567_v19 }
 0x831   :  { %v13245_v45 = vpop.f32.mrb[214].mxu1  ;;  %v16166_v6 = vcombine.low %v16147_v62, %v16163_v20  ;;  %v16167_v58 = vcombine.high %v16147_v62, %v16163_v20  ;;  %v15095_v32 = vrot.slane %v15081_v44, %v25549_v11 }
 0x832   :  { %v15104_v30 = vrot.slane %v15096_v26, %v25549_v11  ;;  %v15111_v31 = vrot.slane %v15097_v59, %v25549_v11  ;;  %v18314_v13 = vpop.f32.mrb[215].mxu1  ;;  %v18573_v53 = vpack.i.bf16 %v16165_v61, %v16097_v10 }
 0x833   :  { %v18578_v1 = vpack.i.bf16 %v16166_v6, %v16098_v3  ;;  %v18583_v57 = vpack.i.bf16 %v16167_v58, %v16099_v51 }
 0x834   :  { %v15112_v38 = vcombine.low %v15088_v37, %v15104_v30  ;;  %v15113_v48 = vcombine.high %v15088_v37, %v15104_v30  ;;  %v15128_v50 = vcombine.low %v15095_v32, %v15111_v31  ;;  %v15129_v18 = vcombine.high %v15095_v32, %v15111_v31  ;;  %18574 = vrot.lane.b32.xlu1 %v18573_v53, %s19191_s10 }
 0x836   :  { %v15120_v47 = vrot.slane %v15112_v38, %v25557_v8  ;;  %v15127_v25 = vrot.slane %v15113_v48, %v25557_v8  ;;  %v15136_v60 = vrot.slane %v15128_v50, %v25557_v8  ;;  %v15143_v14 = vrot.slane %v15129_v18, %v25557_v8 }
 0x837   :  { %v13334_v44 = vpop.f32.mrb[216].mxu1 }
 0x838   :  { %v16168_v16 = vcombine.low %v15120_v47, %v15127_v25  ;;  %v17392_v35 = vcombine.high %v15120_v47, %v15127_v25  ;;  %v16184_v10 = vcombine.low %v15136_v60, %v15143_v14  ;;  %v17393_v3 = vcombine.high %v15136_v60, %v15143_v14  ;;  %18579 = vrot.lane.b32.xlu1 %v18578_v1, %s19206_s28  ;;  %v18325_v51 = vpop.f32.mrb[217].mxu1 }
 0x839   :  { %v13337_v46 = vpop.f32.mrb[218].mxu1  ;;  %v18535_v6 = vpop.permute.xlu1 %18534 }
 0x83a   :  { %v16175_v62 = vrot.slane %v16168_v16, %v25549_v11  ;;  %v16183_v20 = vrot.slane %v17392_v35, %v25549_v11  ;;  %v16191_v43 = vrot.slane %v16184_v10, %v25549_v11  ;;  %v16199_v26 = vrot.slane %v17393_v3, %v25549_v11  ;;  %v18326_v59 = vpop.f32.mrb[219].mxu1 }
 0x83b   :  { %v18537_v53 = vunpack.i.h.bf16 %v18535_v6  ;;  %v18536_v1 = vunpack.i.l.bf16 %v18535_v6  ;;  %v15163_v10 = vrot.slane %v15149_v34, %v25549_v11 }
 0x83c   :  { %18584 = vrot.lane.b32.xlu1 %v18583_v57, %s19207_s29  ;;  %v16200_v12 = vcombine.low %v16175_v62, %v16183_v20  ;;  %v16216_v61 = vcombine.low %v16191_v43, %v16199_v26  ;;  %v16201_v37 = vcombine.high %v16175_v62, %v16183_v20  ;;  %v16217_v45 = vcombine.high %v16191_v43, %v16199_v26  ;;  %v18530_v50 = vpop.permute.xlu0 %18529 }
 0x83d   :  { %v18532_v60 = vunpack.i.h.bf16 %v18530_v50  ;;  %v18531_v14 = vunpack.i.l.bf16 %v18530_v50 }
 0x83e   :  { %v24597_v58 = vrot.slane %v16200_v12, %v25557_v8  ;;  %v24600_v32 = vrot.slane %v16216_v61, %v25557_v8  ;;  %v24603_v30 = vrot.slane %v16201_v37, %v25557_v8  ;;  %v24606_v31 = vrot.slane %v16217_v45, %v25557_v8 }
 0x83f   :  { %v13426_v13 = vpop.f32.mrb[220].mxu1  ;;  %v16905_v62 = vsel %vm7558_vm2, %v15756_v40, %v18532_v60 }
 0x840   :  { %v15164_v57 = vcombine.low %v13334_v44, %v13426_v13  ;;  %v15165_v38 = vcombine.high %v13334_v44, %v13426_v13  ;;  %v18337_v48 = vpop.f32.mrb[221].mxu1  ;;  %v16232_v18 = vcombine.low %v24597_v58, %v24600_v32  ;;  %v16233_v47 = vcombine.high %v24597_v58, %v24600_v32  ;;  %v18540_v34 = vpop.permute.xlu0 %18539 }
 0x841   :  { %v13429_v25 = vpop.f32.mrb[222].mxu1  ;;  %v16234_v16 = vcombine.low %v24603_v30, %v24606_v31  ;;  %v16235_v35 = vcombine.high %v24603_v30, %v24606_v31  ;;  %v15156_v44 = vrot.slane %v15148_v36, %v25549_v11  ;;  %v16904_v36 = vsel %vm7558_vm2, %v15688_v4, %v18531_v14 }
 0x842   :  { %v15172_v3 = vrot.slane %v15164_v57, %v25549_v11  ;;  %v15179_v51 = vrot.slane %v15165_v38, %v25549_v11  ;;  %v18338_v46 = vpop.f32.mrb[223].mxu1  ;;  %v18542_v26 = vunpack.i.h.bf16 %v18540_v34  ;;  %v18541_v59 = vunpack.i.l.bf16 %v18540_v34 }
 0x843   :  { %v16921_v12 = vsel %vm16920_vm4, %v16904_v36, %v18536_v1  ;;  %v16922_v61 = vsel %vm16920_vm4, %v16905_v62, %v18537_v53  ;;  %v13564_v38 = vpop.f32.mrb[212].mxu0 }
 0x844   :  { %v15180_v20 = vcombine.low %v15156_v44, %v15172_v3  ;;  %v15181_v43 = vcombine.high %v15156_v44, %v15172_v3  ;;  %v15196_v23 = vcombine.low %v15163_v10, %v15179_v51  ;;  %v15197_v2 = vcombine.high %v15163_v10, %v15179_v51  ;;  %v18355_v60 = vpop.f32.mrb[213].mxu0 }
 0x845   :  { %v16938_v4 = vsel %vm16937_vm5, %v16921_v12, %v18541_v59  ;;  %v16939_v40 = vsel %vm16937_vm5, %v16922_v61, %v18542_v26  ;;  %v15216_v50 = vcombine.low %v24561_v63, %v13564_v38  ;;  %v15217_v25 = vcombine.high %v24561_v63, %v13564_v38  ;;  %v13567_v46 = vpop.f32.mrb[214].mxu0 }
 0x846   :  { %v15188_v15 = vrot.slane %v15180_v20, %v25557_v8  ;;  %v15195_v28 = vrot.slane %v15181_v43, %v25557_v8  ;;  %v15204_v39 = vrot.slane %v15196_v23, %v25557_v8  ;;  %v15211_v49 = vrot.slane %v15197_v2, %v25557_v8  ;;  %v18356_v62 = vpop.f32.mrb[215].mxu0 }
 0x847   :  { %v13518_v37 = vpop.f32.mrb[224].mxu1  ;;  %v16954_v53 = vpack.c.bf16 %v16939_v40, %v16938_v4  ;;  %v15224_v4 = vrot.slane %v15216_v50, %v25549_v11 }
 0x848   :  { %v16236_v45 = vcombine.low %v15188_v15, %v15195_v28  ;;  %v17394_v6 = vcombine.high %v15188_v15, %v15195_v28  ;;  %v16252_v13 = vcombine.low %v15204_v39, %v15211_v49  ;;  %v17395_v57 = vcombine.high %v15204_v39, %v15211_v49  ;;  %v18349_v1 = vpop.f32.mrb[225].mxu1 }
 0x849   :  { %v13521_v48 = vpop.f32.mrb[226].mxu1  ;;  %18487 = vmatprep.mubr.msk.bf16.mxu0 %vm214_vm0, %v16954_v53 }
 0x84a   :  { %v16243_v14 = vrot.slane %v16236_v45, %v25549_v11  ;;  %v16251_v44 = vrot.slane %v17394_v6, %v25549_v11  ;;  %v16259_v10 = vrot.slane %v16252_v13, %v25549_v11  ;;  %v16267_v3 = vrot.slane %v17395_v57, %v25549_v11  ;;  %v18350_v51 = vpop.f32.mrb[227].mxu1 }
 0x84b   :  { %v24661_v49 = vpop.f32.mrb[216].mxu0  ;;  %v15231_v57 = vrot.slane %v15217_v25, %v25549_v11 }
 0x84c   :  { %v16268_v36 = vcombine.low %v16243_v14, %v16251_v44  ;;  %v16284_v20 = vcombine.low %v16259_v10, %v16267_v3  ;;  %v16269_v43 = vcombine.high %v16243_v14, %v16251_v44  ;;  %v16285_v23 = vcombine.high %v16259_v10, %v16267_v3  ;;  %v18367_v45 = vpop.f32.mrb[217].mxu0 }
 0x84d   :  { %v13659_v48 = vpop.f32.mrb[218].mxu0 }
 0x84e   :  { %v24650_v63 = vrot.slane %v16268_v36, %v25557_v8  ;;  %v24653_v2 = vrot.slane %v16284_v20, %v25557_v8  ;;  %v16283_v34 = vrot.slane %v16269_v43, %v25557_v8  ;;  %v16299_v26 = vrot.slane %v16285_v23, %v25557_v8  ;;  %v18368_v60 = vpop.f32.mrb[219].mxu0 }
 0x84f   :  { %v13610_v59 = vpop.f32.mrb[228].mxu1 }
 0x850   :  { %v15232_v12 = vcombine.low %v13518_v37, %v13610_v59  ;;  %v15233_v61 = vcombine.high %v13518_v37, %v13610_v59  ;;  %v18361_v15 = vpop.f32.mrb[229].mxu1  ;;  %v16301_v28 = vcombine.high %v24650_v63, %v24653_v2  ;;  %v16300_v39 = vcombine.low %v24650_v63, %v24653_v2 }
 0x851   :  { %v13613_v40 = vpop.f32.mrb[230].mxu1  ;;  %v16302_v6 = vcombine.low %v16283_v34, %v16299_v26  ;;  %v16303_v13 = vcombine.high %v16283_v34, %v16299_v26 }
 0x852   :  { %v15240_v1 = vrot.slane %v15232_v12, %v25549_v11  ;;  %v15247_v37 = vrot.slane %v15233_v61, %v25549_v11  ;;  %v18362_v38 = vpop.f32.mrb[231].mxu1  ;;  %v18588_v53 = vpack.i.bf16 %v16301_v28, %v16233_v47 }
 0x853   :  { %v18593_v50 = vpack.i.bf16 %v16302_v6, %v16234_v16  ;;  %v18598_v14 = vpack.i.bf16 %v16303_v13, %v16235_v35  ;;  %v13748_v30 = vpop.f32.mrb[220].mxu0 }
 0x854   :  { %v15248_v25 = vcombine.low %v15224_v4, %v15240_v1  ;;  %v15249_v44 = vcombine.high %v15224_v4, %v15240_v1  ;;  %v15264_v10 = vcombine.low %v15231_v57, %v15247_v37  ;;  %v15265_v3 = vcombine.high %v15231_v57, %v15247_v37  ;;  %18589 = vrot.lane.b32.xlu0 %v18588_v53, %s19191_s10  ;;  %v18379_v23 = vpop.f32.mrb[221].mxu0 }
 0x855   :  { %v15284_v31 = vcombine.low %v24661_v49, %v13748_v30  ;;  %v15285_v35 = vcombine.high %v24661_v49, %v13748_v30  ;;  %v13751_v61 = vpop.f32.mrb[222].mxu0 }
 0x856   :  { %v15256_v51 = vrot.slane %v15248_v25, %v25557_v8  ;;  %v15263_v47 = vrot.slane %v15249_v44, %v25557_v8  ;;  %v15272_v46 = vrot.slane %v15264_v10, %v25557_v8  ;;  %v15279_v62 = vrot.slane %v15265_v3, %v25557_v8  ;;  %v18380_v15 = vpop.f32.mrb[223].mxu0 }
 0x857   :  { %v13702_v28 = vpop.f32.mrb[232].mxu1 }
 0x858   :  { %v16304_v36 = vcombine.low %v15256_v51, %v15263_v47  ;;  %v17396_v16 = vcombine.high %v15256_v51, %v15263_v47  ;;  %v16320_v20 = vcombine.low %v15272_v46, %v15279_v62  ;;  %v17397_v43 = vcombine.high %v15272_v46, %v15279_v62  ;;  %18594 = vrot.lane.b32.xlu0 %v18593_v50, %s19206_s28  ;;  %v18373_v13 = vpop.f32.mrb[233].mxu1 }
 0x859   :  { %v13705_v49 = vpop.f32.mrb[234].mxu1 }
 0x85a   :  { %v16311_v34 = vrot.slane %v16304_v36, %v25549_v11  ;;  %v16319_v26 = vrot.slane %v17396_v16, %v25549_v11  ;;  %v16327_v59 = vrot.slane %v16320_v20, %v25549_v11  ;;  %v16335_v12 = vrot.slane %v17397_v43, %v25549_v11  ;;  %v18374_v53 = vpop.f32.mrb[235].mxu1 }
 0x85b   :  { %v24701_v48 = vpop.f32.mrb[224].mxu0  ;;  %v15292_v20 = vrot.slane %v15284_v31, %v25549_v11 }
 0x85c   :  { %18599 = vrot.lane.b32.xlu0 %v18598_v14, %s19207_s29  ;;  %v16336_v4 = vcombine.low %v16311_v34, %v16319_v26  ;;  %v16352_v40 = vcombine.low %v16327_v59, %v16335_v12  ;;  %v16337_v45 = vcombine.high %v16311_v34, %v16319_v26  ;;  %v16353_v6 = vcombine.high %v16327_v59, %v16335_v12  ;;  %v18391_v44 = vpop.f32.mrb[225].mxu0 }
 0x85d   :  { %v13843_v10 = vpop.f32.mrb[226].mxu0  ;;  %v15299_v34 = vrot.slane %v15285_v35, %v25549_v11 }
 0x85e   :  { %v24690_v57 = vrot.slane %v16336_v4, %v25557_v8  ;;  %v24693_v1 = vrot.slane %v16352_v40, %v25557_v8  ;;  %v24696_v37 = vrot.slane %v16337_v45, %v25557_v8  ;;  %v24699_v38 = vrot.slane %v16353_v6, %v25557_v8  ;;  %v18392_v3 = vpop.f32.mrb[227].mxu0 }
 0x85f   :  { %v13794_v51 = vpop.f32.mrb[236].mxu1 }
 0x860   :  { %v16368_v60 = vcombine.low %v24690_v57, %v24693_v1  ;;  %v16369_v50 = vcombine.high %v24690_v57, %v24693_v1  ;;  %v16370_v14 = vcombine.low %v24696_v37, %v24699_v38  ;;  %v16371_v25 = vcombine.high %v24696_v37, %v24699_v38  ;;  %v18385_v62 = vpop.f32.mrb[237].mxu1 }
 0x861   :  { %v15300_v47 = vcombine.low %v13702_v28, %v13794_v51  ;;  %v15301_v46 = vcombine.high %v13702_v28, %v13794_v51  ;;  %v13797_v16 = vpop.f32.mrb[238].mxu1 }
 0x862   :  { %v18545_v36 = vpop.permute.xlu1 %18544  ;;  %v18386_v23 = vpop.f32.mrb[239].mxu1 }
 0x863   :  { %v15308_v43 = vrot.slane %v15300_v47, %v25549_v11  ;;  %v15315_v30 = vrot.slane %v15301_v46, %v25549_v11  ;;  %v24715_v26 = vpop.f32.mrb[228].mxu0  ;;  %v18547_v59 = vunpack.i.h.bf16 %v18545_v36  ;;  %v18546_v12 = vunpack.i.l.bf16 %v18545_v36 }
 0x864   :  { %v18403_v4 = vpop.f32.mrb[229].mxu0  ;;  %v15352_v31 = vcombine.low %v24701_v48, %v24715_v26  ;;  %v15353_v6 = vcombine.high %v24701_v48, %v24715_v26 }
 0x865   :  { %v15316_v61 = vcombine.low %v15292_v20, %v15308_v43  ;;  %v15317_v15 = vcombine.high %v15292_v20, %v15308_v43  ;;  %v15332_v28 = vcombine.low %v15299_v34, %v15315_v30  ;;  %v15333_v40 = vcombine.high %v15299_v34, %v15315_v30  ;;  %v13935_v13 = vpop.f32.mrb[230].mxu0 }
 0x866   :  { %v18550_v45 = vpop.permute.xlu1 %18549  ;;  %v18404_v53 = vpop.f32.mrb[231].mxu0  ;;  %v16906_v48 = vsel %vm7558_vm2, %v15824_v56, %v18546_v12  ;;  %v16907_v16 = vsel %vm7558_vm2, %v15892_v55, %v18547_v59 }
 0x867   :  { %v15324_v49 = vrot.slane %v15316_v61, %v25557_v8  ;;  %v15331_v35 = vrot.slane %v15317_v15, %v25557_v8  ;;  %v15340_v44 = vrot.slane %v15332_v28, %v25557_v8  ;;  %v15347_v10 = vrot.slane %v15333_v40, %v25557_v8  ;;  %v13886_v47 = vpop.f32.mrb[240].mxu1 }
 0x868   :  { %v18552_v3 = vunpack.i.h.bf16 %v18550_v45  ;;  %v18551_v51 = vunpack.i.l.bf16 %v18550_v45  ;;  %v18397_v36 = vpop.f32.mrb[241].mxu1 }
 0x869   :  { %v16372_v46 = vcombine.low %v15324_v49, %v15331_v35  ;;  %v17398_v62 = vcombine.high %v15324_v49, %v15331_v35  ;;  %v16388_v20 = vcombine.low %v15340_v44, %v15347_v10  ;;  %v17399_v43 = vcombine.high %v15340_v44, %v15347_v10  ;;  %v13889_v23 = vpop.f32.mrb[242].mxu1 }
 0x86a   :  { %v18555_v30 = vpop.permute.xlu1 %18554  ;;  %v18398_v4 = vpop.f32.mrb[243].mxu1  ;;  %v16923_v56 = vsel %vm16920_vm4, %v16906_v48, %v18551_v51  ;;  %v16924_v5 = vsel %vm16920_vm4, %v16907_v16, %v18552_v3 }
 0x86b   :  { %v16379_v34 = vrot.slane %v16372_v46, %v25549_v11  ;;  %v16387_v26 = vrot.slane %v17398_v62, %v25549_v11  ;;  %v18557_v61 = vunpack.i.h.bf16 %v18555_v30  ;;  %v18556_v15 = vunpack.i.l.bf16 %v18555_v30  ;;  %v24739_v52 = vpop.f32.mrb[232].mxu0 }
 0x86c   :  { %v16395_v0 = vrot.slane %v16388_v20, %v25549_v11  ;;  %v16403_v7 = vrot.slane %v17399_v43, %v25549_v11  ;;  %v18415_v12 = vpop.f32.mrb[233].mxu0 }
 0x86d   :  { %v16940_v55 = vsel %vm16937_vm5, %v16923_v56, %v18556_v15  ;;  %v16941_v59 = vsel %vm16937_vm5, %v16924_v5, %v18557_v61  ;;  %v16404_v28 = vcombine.low %v16379_v34, %v16387_v26  ;;  %v16405_v40 = vcombine.high %v16379_v34, %v16387_v26  ;;  %v14027_v13 = vpop.f32.mrb[234].mxu0 }
 0x86e   :  { %v16955_v45 = vpack.c.bf16 %v16941_v59, %v16940_v55  ;;  %v16420_v49 = vcombine.low %v16395_v0, %v16403_v7  ;;  %v16421_v35 = vcombine.high %v16395_v0, %v16403_v7  ;;  %v18416_v53 = vpop.f32.mrb[235].mxu0  ;;  %v15360_v34 = vrot.slane %v15352_v31, %v25549_v11 }
 0x86f   :  { %v24744_v44 = vrot.slane %v16404_v28, %v25557_v8  ;;  %v16419_v10 = vrot.slane %v16405_v40, %v25557_v8  ;;  %v13978_v3 = vpop.f32.mrb[244].mxu1  ;;  %v15367_v26 = vrot.slane %v15353_v6, %v25549_v11 }
 0x870   :  { %18488 = vmatmul.mubr.msk.bf16.vlgmr.msra.gmra.mrb[0].mxu0 %vm214_vm0, %v16955_v45  ;;  %v24749_v51 = vrot.slane %v16420_v49, %v25557_v8  ;;  %v16435_v46 = vrot.slane %v16421_v35, %v25557_v8  ;;  %v15368_v62 = vcombine.low %v13886_v47, %v13978_v3  ;;  %v15369_v36 = vcombine.high %v13886_v47, %v13978_v3  ;;  %v18409_v48 = vpop.f32.mrb[245].mxu1 }
 0x871   :  { %v13981_v16 = vpop.f32.mrb[246].mxu1 }
 0x872   :  { %v16437_v20 = vcombine.high %v24744_v44, %v24749_v51  ;;  %v16436_v43 = vcombine.low %v24744_v44, %v24749_v51  ;;  %v16438_v30 = vcombine.low %v16419_v10, %v16435_v46  ;;  %v16439_v23 = vcombine.high %v16419_v10, %v16435_v46  ;;  %v18410_v4 = vpop.f32.mrb[247].mxu1 }
 0x873   :  { %v15376_v61 = vrot.slane %v15368_v62, %v25549_v11  ;;  %v15383_v15 = vrot.slane %v15369_v36, %v25549_v11  ;;  %v14116_v47 = vpop.f32.mrb[236].mxu0 }
 0x874   :  { %v18603_v0 = vpack.i.bf16 %v16437_v20, %v16369_v50  ;;  %v18608_v7 = vpack.i.bf16 %v16438_v30, %v16370_v14  ;;  %v18613_v31 = vpack.i.bf16 %v16439_v23, %v16371_v25  ;;  %v18427_v59 = vpop.f32.mrb[237].mxu0  ;;  %v15420_v12 = vcombine.low %v24739_v52, %v14116_v47 }
 0x875   :  { %v15384_v56 = vcombine.low %v15360_v34, %v15376_v61  ;;  %v15385_v6 = vcombine.high %v15360_v34, %v15376_v61  ;;  %v15400_v5 = vcombine.low %v15367_v26, %v15383_v15  ;;  %v15401_v55 = vcombine.high %v15367_v26, %v15383_v15  ;;  %v14119_v50 = vpop.f32.mrb[238].mxu0 }
 0x876   :  { %v15421_v28 = vcombine.high %v24739_v52, %v14116_v47  ;;  %18604 = vrot.lane.b32.xlu1 %v18603_v0, %s19191_s10  ;;  %v18428_v38 = vpop.f32.mrb[239].mxu0  ;;  %v15428_v50 = vrot.slane %v15420_v12, %v25549_v11 }
 0x877   :  { %v15392_v40 = vrot.slane %v15384_v56, %v25557_v8  ;;  %v15399_v14 = vrot.slane %v15385_v6, %v25557_v8  ;;  %v15408_v45 = vrot.slane %v15400_v5, %v25557_v8  ;;  %v15415_v37 = vrot.slane %v15401_v55, %v25557_v8  ;;  %v14070_v25 = vpop.f32.mrb[248].mxu1 }
 0x878   :  { %v18421_v10 = vpop.f32.mrb[249].mxu1 }
 0x879   :  { %v16440_v13 = vcombine.low %v15392_v40, %v15399_v14  ;;  %v17400_v49 = vcombine.high %v15392_v40, %v15399_v14  ;;  %v16456_v35 = vcombine.low %v15408_v45, %v15415_v37  ;;  %v17401_v53 = vcombine.high %v15408_v45, %v15415_v37  ;;  %v14073_v52 = vpop.f32.mrb[250].mxu1 }
 0x87a   :  { %18609 = vrot.lane.b32.xlu1 %v18608_v7, %s19206_s28  ;;  %v18422_v48 = vpop.f32.mrb[251].mxu1  ;;  %v15435_v40 = vrot.slane %v15421_v28, %v25549_v11 }
 0x87b   :  { %v16447_v3 = vrot.slane %v16440_v13, %v25549_v11  ;;  %v16455_v46 = vrot.slane %v17400_v49, %v25549_v11  ;;  %v16463_v62 = vrot.slane %v16456_v35, %v25549_v11  ;;  %v16471_v36 = vrot.slane %v17401_v53, %v25549_v11 }
 0x87d   :  { %v16472_v16 = vcombine.low %v16447_v3, %v16455_v46  ;;  %v16488_v20 = vcombine.low %v16463_v62, %v16471_v36  ;;  %v16473_v30 = vcombine.high %v16447_v3, %v16455_v46  ;;  %v16489_v23 = vcombine.high %v16463_v62, %v16471_v36 }
 0x87e   :  { %18614 = vrot.lane.b32.xlu1 %v18613_v31, %s19207_s29 }
 0x87f   :  { %v24783_v34 = vrot.slane %v16472_v16, %v25557_v8  ;;  %v24786_v26 = vrot.slane %v16488_v20, %v25557_v8  ;;  %v24789_v61 = vrot.slane %v16473_v30, %v25557_v8  ;;  %v24792_v15 = vrot.slane %v16489_v23, %v25557_v8 }
 0x881   :  { %v14162_v4 = vpop.f32.mrb[252].mxu1  ;;  %v16504_v47 = vcombine.low %v24783_v34, %v24786_v26  ;;  %v16505_v0 = vcombine.high %v24783_v34, %v24786_v26  ;;  %v16506_v7 = vcombine.low %v24789_v61, %v24792_v15  ;;  %v16507_v31 = vcombine.high %v24789_v61, %v24792_v15 }
 0x882   :  { %v15436_v6 = vcombine.low %v14070_v25, %v14162_v4  ;;  %v15437_v5 = vcombine.high %v14070_v25, %v14162_v4  ;;  %v18433_v55 = vpop.f32.mrb[253].mxu1 }
 0x883   :  { %v14165_v59 = vpop.f32.mrb[254].mxu1 }
 0x884   :  { %v18560_v56 = vpop.permute.xlu0 %18559  ;;  %v15444_v14 = vrot.slane %v15436_v6, %v25549_v11  ;;  %v15451_v45 = vrot.slane %v15437_v5, %v25549_v11  ;;  %v18434_v37 = vpop.f32.mrb[255].mxu1 }
 0x885   :  { %v18562_v38 = vunpack.i.h.bf16 %v18560_v56  ;;  %v18561_v13 = vunpack.i.l.bf16 %v18560_v56 }
 0x886   :  { %v15452_v49 = vcombine.low %v15428_v50, %v15444_v14  ;;  %v15453_v35 = vcombine.high %v15428_v50, %v15444_v14  ;;  %v15468_v53 = vcombine.low %v15435_v40, %v15451_v45  ;;  %v15469_v10 = vcombine.high %v15435_v40, %v15451_v45 }
 0x887   :  { %v16909_v36 = vsel %vm7558_vm2, %v16028_v21, %v18562_v38  ;;  %v16908_v48 = vsel %vm7558_vm2, %v15960_v9, %v18561_v13 }
 0x888   :  { %v18565_v52 = vpop.permute.xlu0 %18564  ;;  %v15460_v46 = vrot.slane %v15452_v49, %v25557_v8  ;;  %v15467_v12 = vrot.slane %v15453_v35, %v25557_v8  ;;  %v15476_v28 = vrot.slane %v15468_v53, %v25557_v8  ;;  %v15483_v62 = vrot.slane %v15469_v10, %v25557_v8 }
 0x889   :  { %v18567_v3 = vunpack.i.h.bf16 %v18565_v52  ;;  %v18566_v25 = vunpack.i.l.bf16 %v18565_v52 }
 0x88a   :  { %v16508_v16 = vcombine.low %v15460_v46, %v15467_v12  ;;  %v17402_v20 = vcombine.high %v15460_v46, %v15467_v12  ;;  %v16524_v30 = vcombine.low %v15476_v28, %v15483_v62  ;;  %v17403_v23 = vcombine.high %v15476_v28, %v15483_v62 }
 0x88b   :  { %v16925_v15 = vsel %vm16920_vm4, %v16908_v48, %v18566_v25  ;;  %v16926_v4 = vsel %vm16920_vm4, %v16909_v36, %v18567_v3 }
 0x88c   :  { %v18570_v61 = vpop.permute.xlu0 %18569  ;;  %v16515_v22 = vrot.slane %v16508_v16, %v25549_v11  ;;  %v16523_v41 = vrot.slane %v17402_v20, %v25549_v11  ;;  %v16531_v21 = vrot.slane %v16524_v30, %v25549_v11  ;;  %v16539_v42 = vrot.slane %v17403_v23, %v25549_v11 }
 0x88d   :  { %v18572_v56 = vunpack.i.h.bf16 %v18570_v61  ;;  %v18571_v6 = vunpack.i.l.bf16 %v18570_v61 }
 0x88e   :  { %v16540_v55 = vcombine.low %v16515_v22, %v16523_v41  ;;  %v16556_v59 = vcombine.low %v16531_v21, %v16539_v42  ;;  %v16541_v50 = vcombine.high %v16515_v22, %v16523_v41  ;;  %v16557_v40 = vcombine.high %v16531_v21, %v16539_v42 }
 0x88f   :  { %v16942_v54 = vsel %vm16937_vm5, %v16925_v15, %v18571_v6  ;;  %v16943_v9 = vsel %vm16937_vm5, %v16926_v4, %v18572_v56 }
 0x890   :  { %v16956_v5 = vpack.c.bf16 %v16943_v9, %v16942_v54  ;;  %v24828_v14 = vrot.slane %v16540_v55, %v25557_v8  ;;  %v24831_v45 = vrot.slane %v16556_v59, %v25557_v8  ;;  %v16555_v37 = vrot.slane %v16541_v50, %v25557_v8 }
 0x891   :  { %v16571_v38 = vrot.slane %v16557_v40, %v25557_v8 }
 0x892   :  { %18491 = vmatprep.mubr.msk.bf16.mxu0 %vm214_vm0, %v16956_v5  ;;  %v16573_v13 = vcombine.high %v24828_v14, %v24831_v45  ;;  %v16572_v49 = vcombine.low %v24828_v14, %v24831_v45  ;;  %v24952_v14 = vld [vmem:[%s25019_s5] ss:$0 sm:$0xff]  ;;  %s19208_s5 = smov [#allocation10]  }
 0x893   :  { %v16574_v35 = vcombine.low %v16555_v37, %v16571_v38  ;;  %v16575_v53 = vcombine.high %v16555_v37, %v16571_v38  ;;  %v14208_v10 = vpop.f32.mrb[240].mxu0  ;;  %s17127_s8 = sshll.u32 %s19208_s5, 4  ;;  %s17128_s8 = int_to_ptr.vmem [resolvable:$true] %s17127_s8 }
 0x894   :  { %v18618_v52 = vpack.i.bf16 %v16573_v13, %v16505_v0  ;;  %v18439_v3 = vpop.f32.mrb[241].mxu0  ;;  %s19158_s0 = scalar_lea.vmem %s17128_s8, 2048  ;;  %p19163_p5 = scmp.lt.s32.totalorder %s17128_s8, %s17128_s8 }
 0x895   :  { %v18623_v25 = vpack.i.bf16 %v16574_v35, %v16506_v7  ;;  %v18638_v46 = vpack.i.bf16 %v16575_v53, %v16507_v31  ;;  %v14211_v12 = vpop.f32.mrb[242].mxu0  ;;  %v14254_v28 = vpop.f32.mrb[0].mxu1  ;;  %p19159_p4 = scmp.ne.s32.totalorder %s17128_s8, %s19158_s0  ;;  %p19164_p6 = scmp.lt.s32.totalorder %s19158_s0, %s19158_s0 }
 0x896   :  { %18619 = vrot.lane.b32.xlu0 %v18618_v52, %s19191_s10  ;;  %v18440_v62 = vpop.f32.mrb[243].mxu0  ;;  %v18445_v36 = vpop.f32.mrb[1].mxu1 }
 0x897   :  { %v14257_v48 = vpop.f32.mrb[2].mxu1  ;;  %p19165_p7 = por %p19164_p6, %p19163_p5 }
 0x898   :  { %v18446_v16 = vpop.f32.mrb[3].mxu1 }
 0x899   :  { %p19166_p8 = pnand %p19165_p7, %p19159_p4 }
 0x89a   :  { %18624 = vrot.lane.b32.xlu0 %v18623_v25, %s19206_s28 }
 0x89e   :  { %18639 = vrot.lane.b32.xlu0 %v18638_v46, %s19207_s29 }
 0x89f   :  { %v14300_v20 = vpop.f32.mrb[244].mxu0 }
 0x8a0   :  { %v15488_v30 = vcombine.low %v14208_v10, %v14300_v20  ;;  %v15489_v23 = vcombine.high %v14208_v10, %v14300_v20  ;;  %v18451_v61 = vpop.f32.mrb[245].mxu0 }
 0x8a1   :  { %v14303_v0 = vpop.f32.mrb[246].mxu0 }
 0x8a2   :  { %v18452_v15 = vpop.f32.mrb[247].mxu0  ;;  %v15496_v46 = vrot.slane %v15488_v30, %v25549_v11  ;;  %v15503_v12 = vrot.slane %v15489_v23, %v25549_v11 }
 0x8a6   :  { %v18575_v7 = vpop.permute.xlu1 %18574 }
 0x8a7   :  { %v24842_v31 = vpop.f32.mrb[248].mxu0  ;;  %v18577_v6 = vunpack.i.h.bf16 %v18575_v7  ;;  %v18576_v22 = vunpack.i.l.bf16 %v18575_v7 }
 0x8a8   :  { %v18463_v56 = vpop.f32.mrb[249].mxu0 }
 0x8a9   :  { %v14395_v41 = vpop.f32.mrb[250].mxu0  ;;  %v16910_v5 = vsel %vm7558_vm2, %v16096_v33, %v18576_v22  ;;  %v16911_v55 = vsel %vm7558_vm2, %v16164_v24, %v18577_v6 }
 0x8aa   :  { %v18580_v4 = vpop.permute.xlu1 %18579  ;;  %v18464_v54 = vpop.f32.mrb[251].mxu0 }
 0x8ab   :  { %v18582_v21 = vunpack.i.h.bf16 %v18580_v4  ;;  %v18581_v42 = vunpack.i.l.bf16 %v18580_v4 }
 0x8ad   :  { %v16927_v40 = vsel %vm16920_vm4, %v16910_v5, %v18581_v42  ;;  %v16928_v37 = vsel %vm16920_vm4, %v16911_v55, %v18582_v21 }
 0x8ae   :  { %v18585_v9 = vpop.permute.xlu1 %18584 }
 0x8af   :  { %v18587_v59 = vunpack.i.h.bf16 %v18585_v9  ;;  %v18586_v50 = vunpack.i.l.bf16 %v18585_v9  ;;  %v14484_v35 = vpop.f32.mrb[252].mxu0 }
 0x8b0   :  { %v15556_v29 = vcombine.low %v24842_v31, %v14484_v35  ;;  %v15557_v17 = vcombine.high %v24842_v31, %v14484_v35  ;;  %v18475_v33 = vpop.f32.mrb[253].mxu0 }
 0x8b1   :  { %v16944_v38 = vsel %vm16937_vm5, %v16927_v40, %v18586_v50  ;;  %v16945_v13 = vsel %vm16937_vm5, %v16928_v37, %v18587_v59  ;;  %v14487_v27 = vpop.f32.mrb[254].mxu0 }
 0x8b2   :  { %v16957_v53 = vpack.c.bf16 %v16945_v13, %v16944_v38  ;;  %v18476_v19 = vpop.f32.mrb[255].mxu0  ;;  %v15571_v33 = vrot.slane %v15557_v17, %v25549_v11 }
 0x8b4   :  { %18492 = vmatmul.mubr.msk.bf16.gmra.mrb[4].mxu0 %vm214_vm0, %v16957_v53  ;;  %v15564_v53 = vrot.slane %v15556_v29, %v25549_v11 }
 0x8bc   :  { %v14346_v24 = vpop.f32.mrb[4].mxu1 }
 0x8bd   :  { %v15504_v10 = vcombine.low %v14254_v28, %v14346_v24  ;;  %v15505_v52 = vcombine.high %v14254_v28, %v14346_v24  ;;  %v18457_v3 = vpop.f32.mrb[5].mxu1 }
 0x8be   :  { %v14349_v25 = vpop.f32.mrb[6].mxu1 }
 0x8bf   :  { %v15512_v62 = vrot.slane %v15504_v10, %v25549_v11  ;;  %v15519_v36 = vrot.slane %v15505_v52, %v25549_v11  ;;  %v18458_v48 = vpop.f32.mrb[7].mxu1 }
 0x8c1   :  { %v15520_v16 = vcombine.low %v15496_v46, %v15512_v62  ;;  %v15521_v20 = vcombine.high %v15496_v46, %v15512_v62  ;;  %v15536_v61 = vcombine.low %v15503_v12, %v15519_v36  ;;  %v15537_v0 = vcombine.high %v15503_v12, %v15519_v36 }
 0x8c3   :  { %v15528_v15 = vrot.slane %v15520_v16, %v25557_v8  ;;  %v15535_v7 = vrot.slane %v15521_v20, %v25557_v8  ;;  %v15544_v28 = vrot.slane %v15536_v61, %v25557_v8  ;;  %v15551_v31 = vrot.slane %v15537_v0, %v25557_v8 }
 0x8c4   :  { %v14438_v4 = vpop.f32.mrb[8].mxu1 }
 0x8c5   :  { %v16576_v23 = vcombine.low %v15528_v15, %v15535_v7  ;;  %v17404_v56 = vcombine.high %v15528_v15, %v15535_v7  ;;  %v16592_v6 = vcombine.low %v15544_v28, %v15551_v31  ;;  %v17405_v22 = vcombine.high %v15544_v28, %v15551_v31  ;;  %v18469_v41 = vpop.f32.mrb[9].mxu1 }
 0x8c6   :  { %v18590_v30 = vpop.permute.xlu0 %18589  ;;  %v14441_v54 = vpop.f32.mrb[10].mxu1 }
 0x8c7   :  { %v18592_v21 = vunpack.i.h.bf16 %v18590_v30  ;;  %v18591_v42 = vunpack.i.l.bf16 %v18590_v30  ;;  %v16583_v9 = vrot.slane %v16576_v23, %v25549_v11  ;;  %v16591_v5 = vrot.slane %v17404_v56, %v25549_v11  ;;  %v18470_v50 = vpop.f32.mrb[11].mxu1 }
 0x8c8   :  { %v16599_v55 = vrot.slane %v16592_v6, %v25549_v11  ;;  %v16607_v59 = vrot.slane %v17405_v22, %v25549_v11 }
 0x8c9   :  { %v16608_v13 = vcombine.low %v16583_v9, %v16591_v5  ;;  %v16609_v27 = vcombine.high %v16583_v9, %v16591_v5  ;;  %v16913_v24 = vsel %vm7558_vm2, %v16300_v39, %v18592_v21  ;;  %v16912_v10 = vsel %vm7558_vm2, %v16232_v18, %v18591_v42 }
 0x8ca   :  { %v18595_v40 = vpop.permute.xlu0 %18594  ;;  %v16624_v35 = vcombine.low %v16599_v55, %v16607_v59  ;;  %v16625_v19 = vcombine.high %v16599_v55, %v16607_v59 }
 0x8cb   :  { %v18597_v37 = vunpack.i.h.bf16 %v18595_v40  ;;  %v18596_v38 = vunpack.i.l.bf16 %v18595_v40  ;;  %v24882_v52 = vrot.slane %v16608_v13, %v25557_v8  ;;  %v16623_v63 = vrot.slane %v16609_v27, %v25557_v8 }
 0x8cc   :  { %v24885_v3 = vrot.slane %v16624_v35, %v25557_v8  ;;  %v14530_v46 = vpop.f32.mrb[12].mxu1  ;;  %v16639_v2 = vrot.slane %v16625_v19, %v25557_v8 }
 0x8cd   :  { %v16929_v29 = vsel %vm16920_vm4, %v16912_v10, %v18596_v38  ;;  %v16930_v17 = vsel %vm16920_vm4, %v16913_v24, %v18597_v37  ;;  %v15572_v32 = vcombine.low %v14438_v4, %v14530_v46  ;;  %v15573_v18 = vcombine.high %v14438_v4, %v14530_v46  ;;  %v18481_v12 = vpop.f32.mrb[13].mxu1 }
 0x8ce   :  { %v18600_v25 = vpop.permute.xlu0 %18599  ;;  %v14533_v62 = vpop.f32.mrb[14].mxu1  ;;  %v16640_v36 = vcombine.low %v24882_v52, %v24885_v3  ;;  %v16641_v48 = vcombine.high %v24882_v52, %v24885_v3  ;;  %v16642_v16 = vcombine.low %v16623_v63, %v16639_v2  ;;  %v16643_v20 = vcombine.high %v16623_v63, %v16639_v2 }
 0x8cf   :  { %v18602_v39 = vunpack.i.h.bf16 %v18600_v25  ;;  %v18601_v58 = vunpack.i.l.bf16 %v18600_v25  ;;  %v15580_v15 = vrot.slane %v15572_v32, %v25549_v11  ;;  %v15587_v7 = vrot.slane %v15573_v18, %v25549_v11  ;;  %v18482_v28 = vpop.f32.mrb[15].mxu1 }
 0x8d1   :  { %v16946_v61 = vsel %vm16937_vm5, %v16929_v29, %v18601_v58  ;;  %v16947_v0 = vsel %vm16937_vm5, %v16930_v17, %v18602_v39  ;;  %v15588_v30 = vcombine.low %v15564_v53, %v15580_v15  ;;  %v15589_v4 = vcombine.high %v15564_v53, %v15580_v15 }
 0x8d2   :  { %v16958_v31 = vpack.c.bf16 %v16947_v0, %v16946_v61  ;;  %v15604_v23 = vcombine.low %v15571_v33, %v15587_v7  ;;  %v15605_v56 = vcombine.high %v15571_v33, %v15587_v7 }
 0x8d3   :  { %v15596_v6 = vrot.slane %v15588_v30, %v25557_v8  ;;  %v15603_v22 = vrot.slane %v15589_v4, %v25557_v8 }
 0x8d4   :  { %18495 = vmatprep.mubr.msk.bf16.mxu0 %vm214_vm0, %v16958_v31  ;;  %v15612_v41 = vrot.slane %v15604_v23, %v25557_v8  ;;  %v15619_v21 = vrot.slane %v15605_v56, %v25557_v8 }
 0x8d5   :  { %v16644_v42 = vcombine.low %v15596_v6, %v15603_v22  ;;  %v17406_v54 = vcombine.high %v15596_v6, %v15603_v22 }
 0x8d6   :  { %v16660_v9 = vcombine.low %v15612_v41, %v15619_v21  ;;  %v17407_v5 = vcombine.high %v15612_v41, %v15619_v21 }
 0x8d7   :  { %v16651_v55 = vrot.slane %v16644_v42, %v25549_v11  ;;  %v16659_v59 = vrot.slane %v17406_v54, %v25549_v11 }
 0x8d8   :  { %v16667_v50 = vrot.slane %v16660_v9, %v25549_v11  ;;  %v16675_v40 = vrot.slane %v17407_v5, %v25549_v11 }
 0x8d9   :  { %v16676_v37 = vcombine.low %v16651_v55, %v16659_v59  ;;  %v16677_v13 = vcombine.high %v16651_v55, %v16659_v59 }
 0x8da   :  { %v16692_v38 = vcombine.low %v16667_v50, %v16675_v40  ;;  %v16693_v35 = vcombine.high %v16667_v50, %v16675_v40 }
 0x8db   :  { %v24909_v53 = vrot.slane %v16676_v37, %v25557_v8  ;;  %v16691_v27 = vrot.slane %v16677_v13, %v25557_v8 }
 0x8dc   :  { %v24912_v33 = vrot.slane %v16692_v38, %v25557_v8  ;;  %v16707_v19 = vrot.slane %v16693_v35, %v25557_v8 }
 0x8de   :  { %v16709_v24 = vcombine.high %v24909_v53, %v24912_v33  ;;  %v16708_v11 = vcombine.low %v24909_v53, %v24912_v33  ;;  %v16710_v10 = vcombine.low %v16691_v27, %v16707_v19  ;;  %v16711_v29 = vcombine.high %v16691_v27, %v16707_v19 }
 0x8e0   :  { %v18628_v17 = vpack.i.bf16 %v16709_v24, %v16641_v48  ;;  %v18633_v25 = vpack.i.bf16 %v16710_v10, %v16642_v16  ;;  %v18643_v46 = vpack.i.bf16 %v16711_v29, %v16643_v20 }
 0x8e2   :  { %18629 = vrot.lane.b32.xlu1 %v18628_v17, %s19191_s10 }
 0x8e6   :  { %18634 = vrot.lane.b32.xlu1 %v18633_v25, %s19206_s28 }
 0x8e8   :  { %v18605_v63 = vpop.permute.xlu1 %18604 }
 0x8e9   :  { %v18607_v8 = vunpack.i.h.bf16 %v18605_v63  ;;  %v18606_v39 = vunpack.i.l.bf16 %v18605_v63 }
 0x8ea   :  { %18644 = vrot.lane.b32.xlu1 %v18643_v46, %s19207_s29 }
 0x8eb   :  { %v16914_v12 = vsel %vm7558_vm2, %v16368_v60, %v18606_v39  ;;  %v16915_v62 = vsel %vm7558_vm2, %v16436_v43, %v18607_v8 }
 0x8ec   :  { %v18610_v2 = vpop.permute.xlu1 %18609 }
 0x8ed   :  { %v18612_v58 = vunpack.i.h.bf16 %v18610_v2  ;;  %v18611_v32 = vunpack.i.l.bf16 %v18610_v2 }
 0x8ef   :  { %v16931_v20 = vsel %vm16920_vm4, %v16914_v12, %v18611_v32  ;;  %v16932_v61 = vsel %vm16920_vm4, %v16915_v62, %v18612_v58 }
 0x8f0   :  { %v18615_v18 = vpop.permute.xlu1 %18614 }
 0x8f1   :  { %v18617_v48 = vunpack.i.h.bf16 %v18615_v18  ;;  %v18616_v16 = vunpack.i.l.bf16 %v18615_v18 }
 0x8f3   :  { %v16948_v0 = vsel %vm16937_vm5, %v16931_v20, %v18616_v16  ;;  %v16949_v15 = vsel %vm16937_vm5, %v16932_v61, %v18617_v48 }
 0x8f4   :  { %v16959_v7 = vpack.c.bf16 %v16949_v15, %v16948_v0 }
 0x8f6   :  { %18496 = vmatmul.mubr.msk.bf16.gmra.mrb[8].mxu0 %vm214_vm0, %v16959_v7 }
 0x908   :  { %v18620_v57 = vpop.permute.xlu0 %18619 }
 0x909   :  { %v18622_v60 = vunpack.i.h.bf16 %v18620_v57  ;;  %v18621_v28 = vunpack.i.l.bf16 %v18620_v57 }
 0x90b   :  { %v16917_v31 = vsel %vm7558_vm2, %v16572_v49, %v18622_v60  ;;  %v16916_v30 = vsel %vm7558_vm2, %v16504_v47, %v18621_v28 }
 0x90c   :  { %v18625_v1 = vpop.permute.xlu0 %18624 }
 0x90d   :  { %v18627_v44 = vunpack.i.h.bf16 %v18625_v1  ;;  %v18626_v51 = vunpack.i.l.bf16 %v18625_v1 }
 0x90f   :  { %v16933_v56 = vsel %vm16920_vm4, %v16916_v30, %v18626_v51  ;;  %v16934_v6 = vsel %vm16920_vm4, %v16917_v31, %v18627_v44 }
 0x910   :  { %v18640_v43 = vpop.permute.xlu0 %18639 }
 0x911   :  { %v18642_v4 = vunpack.i.h.bf16 %v18640_v43  ;;  %v18641_v23 = vunpack.i.l.bf16 %v18640_v43 }
 0x913   :  { %v16950_v22 = vsel %vm16937_vm5, %v16933_v56, %v18641_v23  ;;  %v16951_v41 = vsel %vm16937_vm5, %v16934_v6, %v18642_v4 }
 0x914   :  { %v16960_v21 = vpack.c.bf16 %v16951_v41, %v16950_v22 }
 0x916   :  { %18499 = vmatprep.mubr.msk.bf16.mxu0 %vm214_vm0, %v16960_v21 }
 0x943   :  { %v18489_v34 = vpop.f32.mrb[0].mxu0 }
 0x944   :  { %v17052_v26 = vadd.f32 %v18489_v34, %v24952_v14  ;;  %v17043_v47 = vpop.f32.mrb[1].mxu0 }
 0x945   :  { %v17044_v45 = vadd.f32 %v24952_v14, %v17043_v47  ;;  %v18490_v49 = vpop.f32.mrb[2].mxu0 }
 0x946   :  { %17108 = vst.msk [vmem:[#allocation10 + $0x10] sm:$0xff] %vm214_vm0, %v17052_v26  ;;  %v17055_v42 = vadd.f32 %v18490_v49, %v24952_v14  ;;  %v17046_v54 = vpop.f32.mrb[3].mxu0 }
 0x947   :  { %17106 = vst.msk [vmem:[#allocation10] sm:$0xff] %vm214_vm0, %v17044_v45  ;;  %v17047_v9 = vadd.f32 %v24952_v14, %v17046_v54 }
 0x948   :  { %17109 = vst.msk [vmem:[#allocation10 + $0x18] sm:$0xff] %vm214_vm0, %v17055_v42 }
 0x949   :  { %17107 = vst.msk [vmem:[#allocation10 + $0x8] sm:$0xff] %vm214_vm0, %v17047_v9 }
 0x954   :  { %v18630_v5 = vpop.permute.xlu1 %18629 }
 0x955   :  { %v18632_v59 = vunpack.i.h.bf16 %v18630_v5  ;;  %v18631_v50 = vunpack.i.l.bf16 %v18630_v5 }
 0x957   :  { %v16918_v13 = vsel %vm7558_vm2, %v16640_v36, %v18631_v50  ;;  %v16919_v35 = vsel %vm7558_vm2, %v16708_v11, %v18632_v59 }
 0x958   :  { %v18635_v55 = vpop.permute.xlu1 %18634 }
 0x959   :  { %v18637_v40 = vunpack.i.h.bf16 %v18635_v55  ;;  %v18636_v37 = vunpack.i.l.bf16 %v18635_v55 }
 0x95b   :  { %v16935_v24 = vsel %vm16920_vm4, %v16918_v13, %v18636_v37  ;;  %v16936_v10 = vsel %vm16920_vm4, %v16919_v35, %v18637_v40 }
 0x95c   :  { %v18645_v38 = vpop.permute.xlu1 %18644 }
 0x95d   :  { %v18647_v27 = vunpack.i.h.bf16 %v18645_v38  ;;  %v18646_v19 = vunpack.i.l.bf16 %v18645_v38 }
 0x95f   :  { %v16952_v29 = vsel %vm16937_vm5, %v16935_v24, %v18646_v19  ;;  %v16953_v17 = vsel %vm16937_vm5, %v16936_v10, %v18647_v27 }
 0x960   :  { %v16961_v25 = vpack.c.bf16 %v16953_v17, %v16952_v29 }
 0x962   :  { %18500 = vmatmul.mubr.msk.bf16.gmra.mrb[12].mxu0 %vm214_vm0, %v16961_v25 }
 0x987   :  { %v18493_v52 = vpop.f32.mrb[4].mxu0 }
 0x988   :  { %v17068_v3 = vadd.f32 %v18493_v52, %v24952_v14  ;;  %v17059_v36 = vpop.f32.mrb[5].mxu0 }
 0x989   :  { %v17060_v53 = vadd.f32 %v24952_v14, %v17059_v36  ;;  %v18494_v33 = vpop.f32.mrb[6].mxu0 }
 0x98a   :  { %17112 = vst.msk [vmem:[#allocation10 + $0x30] sm:$0xff] %vm214_vm0, %v17068_v3  ;;  %v17071_v11 = vadd.f32 %v18494_v33, %v24952_v14  ;;  %v17062_v46 = vpop.f32.mrb[7].mxu0 }
 0x98b   :  { %17110 = vst.msk [vmem:[#allocation10 + $0x20] sm:$0xff] %vm214_vm0, %v17060_v53  ;;  %v17063_v63 = vadd.f32 %v24952_v14, %v17062_v46 }
 0x98c   :  { %17113 = vst.msk [vmem:[#allocation10 + $0x38] sm:$0xff] %vm214_vm0, %v17071_v11 }
 0x98d   :  { %17111 = vst.msk [vmem:[#allocation10 + $0x28] sm:$0xff] %vm214_vm0, %v17063_v63 }
 0x9c9   :  { %v18497_v2 = vpop.f32.mrb[8].mxu0 }
 0x9ca   :  { %v17084_v8 = vadd.f32 %v18497_v2, %v24952_v14  ;;  %v17075_v39 = vpop.f32.mrb[9].mxu0 }
 0x9cb   :  { %v17076_v58 = vadd.f32 %v24952_v14, %v17075_v39  ;;  %v18498_v32 = vpop.f32.mrb[10].mxu0 }
 0x9cc   :  { %17116 = vst.msk [vmem:[#allocation10 + $0x50] sm:$0xff] %vm214_vm0, %v17084_v8  ;;  %v17087_v18 = vadd.f32 %v18498_v32, %v24952_v14  ;;  %v17078_v12 = vpop.f32.mrb[11].mxu0 }
 0x9cd   :  { %17114 = vst.msk [vmem:[#allocation10 + $0x40] sm:$0xff] %vm214_vm0, %v17076_v58  ;;  %v17079_v62 = vadd.f32 %v24952_v14, %v17078_v12 }
 0x9ce   :  { %17117 = vst.msk [vmem:[#allocation10 + $0x58] sm:$0xff] %vm214_vm0, %v17087_v18 }
 0x9cf   :  { %17115 = vst.msk [vmem:[#allocation10 + $0x48] sm:$0xff] %vm214_vm0, %v17079_v62 }
 0xa35   :  { %v18501_v48 = vpop.f32.mrb[12].mxu0 }
 0xa36   :  { %v17100_v16 = vadd.f32 %v18501_v48, %v24952_v14  ;;  %v17091_v20 = vpop.f32.mrb[13].mxu0 }
 0xa37   :  { %v17092_v61 = vadd.f32 %v24952_v14, %v17091_v20  ;;  %v18502_v0 = vpop.f32.mrb[14].mxu0 }
 0xa38   :  { %17120 = vst.msk [vmem:[#allocation10 + $0x70] sm:$0xff] %vm214_vm0, %v17100_v16  ;;  %v17103_v15 = vadd.f32 %v18502_v0, %v24952_v14  ;;  %v17094_v7 = vpop.f32.mrb[15].mxu0 }
 0xa39   :  { %17118 = vst.msk [vmem:[#allocation10 + $0x60] sm:$0xff] %vm214_vm0, %v17092_v61  ;;  %v17095_v57 = vadd.f32 %v24952_v14, %v17094_v7 }
 0xa3a   :  { %17121 = vst.msk [vmem:[#allocation10 + $0x78] sm:$0xff] %vm214_vm0, %v17103_v15 }
 0xa3b   :  { %17119 = vst.msk [vmem:[#allocation10 + $0x68] sm:$0xff] %vm214_vm0, %v17095_v57 }
 0xa3c   :  { %19169 = shalt.err (!%p19166_p8)
}
 0xa3d   :  { %s19170_s12 = scalar_lea.hbm %s25020_s6, 2048 }
 0xa3e   :  { %p19171_p9 = scmp.ne.s32.totalorder %s25020_s6, %s19170_s12  ;;  %p19174_p10 = scmp.lt.u32.totalorder %s19170_s12, %s25020_s6 }
 0xa40   :  { %p19176_p11 = pnand %p19174_p10, %p19171_p9 }
 0xa42   :  { %19179 = shalt.err (!%p19176_p11)
}
 0xa43   :  { %17133 = dma.vmem_to_hbm [thread:$0]  %s17128_s8, 2048, %s25020_s6, [#allocation4], %s19190_s9, %s19190_s9, %s19191_s10  }
 0xa44   :  { %19186 = dma.done.wait [#allocation4], 2048  }
 0xa45   :  { %19187 = vsyncadd [#allocation4], 4294965248 }
 0xa46   :  { %17137 = vsyncpa [#allocation3], 1 }
 0xa47   :  { %17138 = vsyncpa [#allocation6], 1 }
 0xa48   :  { %17139 = vsyncpa [#allocation9], 1 }
 0xa49   :  { %17140 = vsyncpa [#allocation4], 1 }

</bundles_post_ra>
